<compile_context>
chip_gen: v7x
topology: tpu7x:2x2x1
jax: 0.10.0
libtpu: 0.0.40
codegen_flags: <defaults>
</compile_context>

<pallas_src>
import jax
import jax.numpy as jnp
from jax import lax
from jax.experimental import pallas as pl
from jax.experimental.pallas import tpu as pltpu

ALPHA = 10.0
C_SAME = 10.0
C_DIFF = 80.0
DELTA_V = 0.5
DELTA_D = 1.5
PARAM_VAR = 1.0
PARAM_DIST = 1.0
PARAM_REG = 0.001

SIM_STREAM_DTYPE = jnp.float32   # flip to jnp.bfloat16 on v5e/v6e if tolerance allows


# --------------------------------------------------------------------------
# Kernel 1: similarity-matrix loss + semantic cross-entropy.
# Grid: (B, N // tq);  b is "parallel" (megacore), reduction axis t "arbitrary".
# --------------------------------------------------------------------------
def _simmat_ce_kernel(g_blk_ref, s_blk_ref, psem_ref, mcol_ref,
                      gT_ref, sT_ref, mrow_ref, sim_ref,
                      sim_out_ref, ce_out_ref,
                      sim_acc, ce_acc):
    t = pl.program_id(1)
    nt = pl.num_programs(1)

    @pl.when(t == 0)
    def _():
        sim_acc[...] = jnp.zeros_like(sim_acc)
        ce_acc[...] = jnp.zeros_like(ce_acc)

    g_blk = g_blk_ref[0]                          # (tq, G)  bf16 one-hot (stream)
    s_blk = s_blk_ref[0]                          # (tq, C)  bf16 one-hot (stream)
    psem = psem_ref[0]                            # (tq, C)  f32 logits   (stream)
    m_col = mcol_ref[0]                           # (tq, 1)  f32 query-side mask
    gT = gT_ref[0]                                # (G,  N)  bf16 lane-dense RHS (resident)
    sT = sT_ref[0]                                # (C,  N)  bf16 lane-dense RHS (resident)
    m_row = mrow_ref[0]                           # (1,  N)  f32 key-side mask (resident)
    sim = sim_ref[0].astype(jnp.float32)          # (tq, N)  similarity tile (hot stream)

    # group / semantic affinity matrices (MXU, canonical (M,K)x(K,N)); bf16
    # one-hot operands give exact 0/1 results in the f32 accumulator.
    gm = jnp.dot(g_blk, gT, preferred_element_type=jnp.float32)   # (tq, N) in {0,1}
    sm = jnp.dot(s_blk, sT, preferred_element_type=jnp.float32)   # (tq, N) in {0,1}

    # Reference blend collapses to predicated selects because gm,sm in {0,1}:
    #   gm==1          -> max(C_DIFF - sim, 0)
    #   gm==0, sm==1   -> ALPHA * max(C_SAME - sim, 0)   (constant folded)
    #   gm==0, sm==0   -> sim
    # Key-side mask folded as the outer select; row reduction is an exact f32
    # VPU/XLU lane sum (no MXU bf16 truncation of the f32 loss operand).
    pos = jnp.maximum(C_DIFF - sim, 0.0)
    same = jnp.maximum(ALPHA * C_SAME - ALPHA * sim, 0.0)
    picked = jnp.where(gm > 0.5, pos, jnp.where(sm > 0.5, same, sim))
    masked = jnp.where(m_row > 0.5, picked, 0.0)
    row_red = jnp.sum(masked, axis=-1, keepdims=True)              # (tq, 1)
    sim_acc[...] += row_red * m_col

    # CrossEntropyLoss with class-probability (one-hot) targets over last dim.
    mx = jnp.max(psem, axis=-1, keepdims=True)
    lse = jnp.log(jnp.sum(jnp.exp(psem - mx), axis=-1, keepdims=True)) + mx
    logp = psem - lse
    ce = -jnp.sum(s_blk.astype(jnp.float32) * logp, axis=-1, keepdims=True)  # (tq, 1)
    ce_acc[...] += ce

    @pl.when(t == nt - 1)
    def _():
        sim_out_ref[...] = jnp.sum(sim_acc[...], axis=0, keepdims=True)[None, :, :]
        ce_out_ref[...] = jnp.sum(ce_acc[...], axis=0, keepdims=True)[None, :, :]


def _simmat_ce_sums(group_blk, sem_blk, pred_sem, mask_col,
                    group_T, sem_T, mask_row, sim, tq):
    B, N, G = group_blk.shape
    C = sem_blk.shape[-1]
    nt = N // tq

    flops = int(B * N * N * (2 * (G + C) + 12))
    bytes_accessed = int(
        sim.size * sim.dtype.itemsize
        + group_blk.size * 2 + group_T.size * 2
        + sem_blk.size * 2 + sem_T.size * 2
        + pred_sem.size * 4 + mask_col.size * 4 + mask_row.size * 4
        + 2 * B * 4)
    cost = pl.CostEstimate(flops=flops,
                           transcendentals=int(B * N * (C + 1)),
                           bytes_accessed=bytes_accessed)

    # Right-sized VMEM budget (v7x has only 64 MiB per TensorCore):
    # double-buffered sim tiles + a few (tq, N) f32 temporaries + resident
    # label/mask operands + slack.  ~36 MiB at production tq=256, N=4096, f32.
    vmem_limit = int(2 * tq * N * sim.dtype.itemsize + 4 * tq * N * 4
                     + 8 * 1024 * 1024)
    vmem_limit = max(16 * 1024 * 1024, min(vmem_limit, 64 * 1024 * 1024))

    return pl.pallas_call(
        _simmat_ce_kernel,
        out_shape=(jax.ShapeDtypeStruct((B, 1, 1), jnp.float32),
                   jax.ShapeDtypeStruct((B, 1, 1), jnp.float32)),
        grid_spec=pltpu.PrefetchScalarGridSpec(
            num_scalar_prefetch=0,
            grid=(B, nt),
            in_specs=[
                pl.BlockSpec((1, tq, G), lambda b, t: (b, t, 0)),   # g_blk (stream)
                pl.BlockSpec((1, tq, C), lambda b, t: (b, t, 0)),   # s_blk (stream)
                pl.BlockSpec((1, tq, C), lambda b, t: (b, t, 0)),   # pred_sem (stream)
                pl.BlockSpec((1, tq, 1), lambda b, t: (b, t, 0)),   # query mask (stream)
                pl.BlockSpec((1, G, N), lambda b, t: (b, 0, 0)),    # group^T (resident)
                pl.BlockSpec((1, C, N), lambda b, t: (b, 0, 0)),    # semseg^T (resident)
                pl.BlockSpec((1, 1, N), lambda b, t: (b, 0, 0)),    # key mask row (resident)
                pl.BlockSpec((1, tq, N), lambda b, t: (b, t, 0)),   # sim tile (hot stream)
            ],
            out_specs=(pl.BlockSpec((1, 1, 1), lambda b, t: (b, 0, 0)),
                       pl.BlockSpec((1, 1, 1), lambda b, t: (b, 0, 0))),
            scratch_shapes=[pltpu.VMEM((tq, 1), jnp.float32),
                            pltpu.VMEM((tq, 1), jnp.float32)],
        ),
        compiler_params=pltpu.CompilerParams(
            dimension_semantics=("parallel", "arbitrary"),
            vmem_limit_bytes=vmem_limit),
        cost_estimate=cost,
    )(group_blk, sem_blk, pred_sem, mask_col, group_T, sem_T, mask_row, sim)


# --------------------------------------------------------------------------
# Kernel 2: discriminative (instance-embedding) loss, one batch per grid step.
# Tiny relative to kernel 1; per-batch outputs + "parallel" batch axis.
# --------------------------------------------------------------------------
def _disc_sums(pred_aug, ins_label_col, num_instances):
    B, N, Ep1 = pred_aug.shape
    E = Ep1 - 1
    K = num_instances

    def kernel(lab_ref, pred_ref, var_ref, dist_ref, reg_ref):
        lab = lab_ref[0]                        # (N, 1) int32 instance ids
        pred_aug_b = pred_ref[0]                # (N, E+1) f32, last column == 1
        pred_b = pred_aug_b[:, :E]              # (N, E)

        # one-hot built in-kernel -> no (B,N,K) f32 one-hot HBM round trip
        cls = lax.broadcasted_iota(jnp.int32, (N, K), 1)
        oh = (lab == cls).astype(jnp.float32)   # (N, K)

        # one MXU pass gives cluster feature sums AND populations (ones column)
        mu_sum_aug = jnp.einsum('nk,nf->kf', oh, pred_aug_b,
                                preferred_element_type=jnp.float32,
                                precision=lax.Precision.HIGHEST)   # (K, E+1)
        mu_sum = mu_sum_aug[:, :E]                                  # (K, E)
        counts_k1 = mu_sum_aug[:, E:E + 1]                          # (K, 1)
        counts_1k = jnp.sum(oh, axis=0, keepdims=True)              # (1, K)
        present_k1 = (counts_k1 > 0.5).astype(jnp.float32)
        present_1k = (counts_1k > 0.5).astype(jnp.float32)
        n_present = jnp.maximum(jnp.sum(present_1k, axis=1, keepdims=True), 1.0)

        mu = mu_sum / jnp.maximum(counts_k1, 1.0)                   # (K, E)

        # l_var: pull points toward their own cluster mean (L1 norm)
        mu_expand = jnp.dot(oh, mu, preferred_element_type=jnp.float32,
                            precision=lax.Precision.HIGHEST)        # (N, E)
        dist = jnp.sum(jnp.abs(mu_expand - pred_b), axis=-1, keepdims=True)  # (N, 1)
        dvar = jnp.square(jnp.maximum(dist - DELTA_V, 0.0))                  # (N, 1)
        per_cluster = jnp.einsum('na,nk->ak', dvar, oh,
                                 preferred_element_type=jnp.float32,
                                 precision=lax.Precision.HIGHEST)            # (1, K)
        l_var_k = per_cluster / jnp.maximum(counts_1k, 1.0) * present_1k
        l_var = jnp.sum(l_var_k, axis=1, keepdims=True) / n_present          # (1, 1)

        # l_dist: push different cluster means apart (L1 norm)
        pd = jnp.sum(jnp.abs(mu[:, None, :] - mu[None, :, :]), axis=-1)      # (K, K)
        row = lax.broadcasted_iota(jnp.int32, (K, K), 0)
        col = lax.broadcasted_iota(jnp.int32, (K, K), 1)
        off_diag = (row != col).astype(jnp.float32)
        pair_mask = present_k1 * present_1k * off_diag                       # (K, K)
        hinge = jnp.square(jnp.maximum(2.0 * DELTA_D - pd, 0.0)) * pair_mask
        l_dist = jnp.sum(hinge, keepdims=True) / jnp.maximum(
            jnp.sum(pair_mask, keepdims=True), 1.0)                          # (1, 1)

        # l_reg: keep means small
        mu_l1 = jnp.sum(jnp.abs(mu), axis=-1, keepdims=True)                 # (K, 1)
        l_reg = jnp.sum(mu_l1 * present_k1, keepdims=True) / n_present       # (1, 1)

        var_ref[...] = l_var[None, :, :]
        dist_ref[...] = l_dist[None, :, :]
        reg_ref[...] = l_reg[None, :, :]

    return pl.pallas_call(
        kernel,
        out_shape=(jax.ShapeDtypeStruct((B, 1, 1), jnp.float32),) * 3,
        grid_spec=pltpu.PrefetchScalarGridSpec(
            num_scalar_prefetch=0,
            grid=(B,),
            in_specs=[pl.BlockSpec((1, N, 1), lambda b: (b, 0, 0)),
                      pl.BlockSpec((1, N, Ep1), lambda b: (b, 0, 0))],
            out_specs=(pl.BlockSpec((1, 1, 1), lambda b: (b, 0, 0)),) * 3,
        ),
        compiler_params=pltpu.CompilerParams(
            dimension_semantics=("parallel",)),
    )(ins_label_col, pred_aug)


# --------------------------------------------------------------------------
# Wrapper reproducing get_loss.forward
# --------------------------------------------------------------------------
def get_loss_forward(pred, ins_label, pred_sem, sem_label, sem_ins_fuse,
                     pts_semseg_label, pts_group_label, pts_group_mask,
                     num_instances, tq=256):
    # sem_label is accepted but unused, exactly like the original PyTorch module.
    del sem_label
    B, N, _ = pred.shape
    tq = min(tq, N)
    assert N % tq == 0, "N must be divisible by the query tile tq"

    # one-hot labels are exact in bf16 -> halves label DMA, doubles MXU rate
    group = pts_group_label.astype(jnp.bfloat16)                  # (B, N, G)
    semseg = pts_semseg_label.astype(jnp.bfloat16)                # (B, N, C)
    group_T = jnp.transpose(group, (0, 2, 1))                     # (B, G, N)
    semseg_T = jnp.transpose(semseg, (0, 2, 1))                   # (B, C, N)
    mask_col = pts_group_mask.astype(jnp.float32)[:, :, None]     # (B, N, 1)
    mask_row = pts_group_mask.astype(jnp.float32)[:, None, :]     # (B, 1, N) lane-dense
    sim = sem_ins_fuse.astype(SIM_STREAM_DTYPE)                   # (B, N, N)

    sim_out, ce_out = _simmat_ce_sums(
        group, semseg, pred_sem.astype(jnp.float32), mask_col,
        group_T, semseg_T, mask_row, sim, tq)
    simmat_loss = jnp.sum(sim_out[:, 0, 0]) / float(B * N * N)
    classify_loss = jnp.sum(ce_out[:, 0, 0]) / float(B * N)

    # TODO(synk): original discriminative_loss discovers instances with a
    # dynamic unique(); here instances are one-hot encoded in-kernel against a
    # static max instance count and empty clusters are masked out.
    pred_aug = jnp.concatenate(
        [pred.astype(jnp.float32), jnp.ones((B, N, 1), jnp.float32)], axis=-1)
    ins_col = ins_label.astype(jnp.int32)[:, :, None]             # (B, N, 1)
    var_o, dist_o, reg_o = _disc_sums(pred_aug, ins_col, num_instances)
    l_var = jnp.mean(var_o[:, 0, 0])
    l_dist = jnp.mean(dist_o[:, 0, 0])
    l_reg = jnp.mean(reg_o[:, 0, 0])
    disc_loss = PARAM_VAR * l_var + PARAM_DIST * l_dist + PARAM_REG * l_reg

    loss = 10.0 * classify_loss + 10.0 * disc_loss + simmat_loss
    return (loss, 10.0 * classify_loss, 10.0 * disc_loss,
            l_var, l_dist, l_reg, simmat_loss)


# --------------------------------------------------------------------------
# Pure-JAX reference (same math) for a sanity check
# --------------------------------------------------------------------------
def _reference(pred, ins_label, pred_sem, sem_ins_fuse, semseg, group, mask, K):
    hp = lax.Precision.HIGHEST
    gm = jnp.einsum('bng,bmg->bnm', group, group)
    sm = jnp.einsum('bnc,bmc->bnm', semseg, semseg)
    neg_diffsem = (1.0 - gm) * (1.0 - sm) * sem_ins_fuse
    neg_samesem = ALPHA * (1.0 - gm) * sm * jnp.maximum(C_SAME - sem_ins_fuse, 0.0)
    pos = gm * jnp.maximum(C_DIFF - sem_ins_fuse, 0.0)
    w = mask[:, :, None] * mask[:, None, :]
    simmat_loss = jnp.mean((neg_samesem + neg_diffsem + pos) * w)
    logp = jax.nn.log_softmax(pred_sem, axis=-1)
    classify = jnp.mean(-jnp.sum(semseg * logp, axis=-1))
    oh = jax.nn.one_hot(ins_label, K, dtype=jnp.float32)
    counts = jnp.sum(oh, axis=1)
    present = (counts > 0.5).astype(jnp.float32)
    nsafe = jnp.maximum(counts, 1.0)
    mu = jnp.einsum('bnk,bne->bke', oh, pred, precision=hp) / nsafe[..., None]
    mu_e = jnp.einsum('bnk,bke->bne', oh, mu, precision=hp)
    dist = jnp.sum(jnp.abs(mu_e - pred), axis=-1)
    dvar = jnp.square(jnp.maximum(dist - DELTA_V, 0.0))
    per_c = jnp.einsum('bn,bnk->bk', dvar, oh, precision=hp) / nsafe * present
    npres = jnp.maximum(jnp.sum(present, axis=1), 1.0)
    l_var = jnp.mean(jnp.sum(per_c, axis=1) / npres)
    pd = jnp.sum(jnp.abs(mu[:, :, None, :] - mu[:, None, :, :]), axis=-1)
    pm = present[:, :, None] * present[:, None, :] * (1.0 - jnp.eye(K))[None]
    hinge = jnp.square(jnp.maximum(2.0 * DELTA_D - pd, 0.0)) * pm
    l_dist = jnp.mean(jnp.sum(hinge, axis=(1, 2)) /
                      jnp.maximum(jnp.sum(pm, axis=(1, 2)), 1.0))
    l_reg = jnp.mean(jnp.sum(jnp.sum(jnp.abs(mu), -1) * present, axis=1) / npres)
    disc = PARAM_VAR * l_var + PARAM_DIST * l_dist + PARAM_REG * l_reg
    return 10.0 * classify + 10.0 * disc + simmat_loss


if __name__ == "__main__":
    # Small shapes consistent with the module (orig: B=16, N=4096, E=5, C=6, G=40)
    B, N, E, C_SEM, K_INS, TQ = 2, 256, 5, 6, 8, 256

    key = jax.random.PRNGKey(0)
    k1, k2, k3, k4, k5, k6 = jax.random.split(key, 6)

    pred = jax.random.normal(k1, (B, N, E), dtype=jnp.float32)            # BxNxE
    ins_label = jax.random.randint(k2, (B, N), 0, K_INS, dtype=jnp.int32) # BxN
    pred_sem = jax.random.normal(k3, (B, N, C_SEM), dtype=jnp.float32)    # BxNxC
    sem_cls = jax.random.randint(k4, (B, N), 0, C_SEM, dtype=jnp.int32)
    sem_label = sem_cls                                                   # BxN (unused)
    sem_ins_fuse = jax.random.uniform(k5, (B, N, N), dtype=jnp.float32) * 100.0
    pts_semseg_label = jax.nn.one_hot(sem_cls, C_SEM, dtype=jnp.float32)  # BxNxC
    pts_group_label = jax.nn.one_hot(ins_label, K_INS, dtype=jnp.float32) # BxNxG
    pts_group_mask = (jax.random.uniform(k6, (B, N)) > 0.3).astype(jnp.float32)

    fwd = jax.jit(get_loss_forward, static_argnums=(8, 9))
    out = fwd(pred, ins_label, pred_sem, sem_label, sem_ins_fuse,
              pts_semseg_label, pts_group_label, pts_group_mask, K_INS, TQ)
    out = jax.block_until_ready(out)

    ref_loss = _reference(pred, ins_label, pred_sem, sem_ins_fuse,
                          pts_semseg_label, pts_group_label, pts_group_mask,
                          K_INS)
    assert jnp.allclose(out[0], ref_loss, rtol=2e-3, atol=2e-3), (out[0], ref_loss)

    print("KERNEL_OK")
</pallas_src>

<mosaic_0001>
module attributes {stable_mosaic.version = 11 : i64} {
  func.func @_simmat_ce_kernel(%arg0: i32, %arg1: i32, %arg2: memref<1x256x8xbf16, #tpu.memory_space<vmem>>, %arg3: memref<1x256x6xbf16, #tpu.memory_space<vmem>>, %arg4: memref<1x256x6xf32, #tpu.memory_space<vmem>>, %arg5: memref<1x256x1xf32, #tpu.memory_space<vmem>>, %arg6: memref<1x8x256xbf16, #tpu.memory_space<vmem>>, %arg7: memref<1x6x256xbf16, #tpu.memory_space<vmem>>, %arg8: memref<1x1x256xf32, #tpu.memory_space<vmem>>, %arg9: memref<1x256x256xf32, #tpu.memory_space<vmem>>, %arg10: memref<1x1x1xf32, #tpu.memory_space<vmem>>, %arg11: memref<1x1x1xf32, #tpu.memory_space<vmem>>, %arg12: memref<256x1xf32, #tpu.memory_space<vmem>>, %arg13: memref<256x1xf32, #tpu.memory_space<vmem>>) attributes {dimension_semantics = [#tpu.dimension_semantics<parallel>, #tpu.dimension_semantics<arbitrary>], iteration_bounds = array<i64: 2, 1>, scalar_prefetch = 0 : i64, scratch_operands = 2 : i64, tpu.core_type = #tpu.core_type<tc>, window_params = [{transform_indices = @transform_0, window_bounds = array<i64: 1, 256, 8>}, {transform_indices = @transform_1, window_bounds = array<i64: 1, 256, 6>}, {transform_indices = @transform_2, window_bounds = array<i64: 1, 256, 6>}, {transform_indices = @transform_3, window_bounds = array<i64: 1, 256, 1>}, {transform_indices = @transform_4, window_bounds = array<i64: 1, 8, 256>}, {transform_indices = @transform_5, window_bounds = array<i64: 1, 6, 256>}, {transform_indices = @transform_6, window_bounds = array<i64: 1, 1, 256>}, {transform_indices = @transform_7, window_bounds = array<i64: 1, 256, 256>}, {transform_indices = @transform_8, window_bounds = array<i64: 1, 1, 1>}, {transform_indices = @transform_9, window_bounds = array<i64: 1, 1, 1>}]} {
    %c0_i32 = arith.constant 0 : i32
    %0 = arith.cmpi eq, %arg1, %c0_i32 : i32
    %1 = arith.extui %0 : i1 to i32
    %c0_i32_0 = arith.constant 0 : i32
    %2 = arith.cmpi ne, %1, %c0_i32_0 : i32
    scf.if %2 {
      %cst_49 = arith.constant 0.000000e+00 : f32
      %72 = vector.broadcast %cst_49 : f32 to vector<256x1xf32>
      %c0_50 = arith.constant 0 : index
      %c0_51 = arith.constant 0 : index
      %73 = vector.load %arg12[%c0_50, %c0_51] : memref<256x1xf32, #tpu.memory_space<vmem>>, vector<256x1xf32>
      tpu.vector_store %arg12[%c0_50, %c0_51], %72 {strides = array<i32>} : memref<256x1xf32, #tpu.memory_space<vmem>>, vector<256x1xf32>,
      %cst_52 = arith.constant 0.000000e+00 : f32
      %74 = vector.broadcast %cst_52 : f32 to vector<256x1xf32>
      %c0_53 = arith.constant 0 : index
      %c0_54 = arith.constant 0 : index
      %75 = vector.load %arg13[%c0_53, %c0_54] : memref<256x1xf32, #tpu.memory_space<vmem>>, vector<256x1xf32>
      tpu.vector_store %arg13[%c0_53, %c0_54], %74 {strides = array<i32>} : memref<256x1xf32, #tpu.memory_space<vmem>>, vector<256x1xf32>,
    } else {
    }
    %c0 = arith.constant 0 : index
    %c0_1 = arith.constant 0 : index
    %c0_2 = arith.constant 0 : index
    %3 = vector.load %arg2[%c0, %c0_1, %c0_2] : memref<1x256x8xbf16, #tpu.memory_space<vmem>>, vector<1x256x8xbf16>
    %4 = vector.shape_cast %3 : vector<1x256x8xbf16> to vector<256x8xbf16>
    %c0_3 = arith.constant 0 : index
    %c0_4 = arith.constant 0 : index
    %c0_5 = arith.constant 0 : index
    %5 = vector.load %arg3[%c0_3, %c0_4, %c0_5] : memref<1x256x6xbf16, #tpu.memory_space<vmem>>, vector<1x256x6xbf16>
    %6 = vector.shape_cast %5 : vector<1x256x6xbf16> to vector<256x6xbf16>
    %c0_6 = arith.constant 0 : index
    %c0_7 = arith.constant 0 : index
    %c0_8 = arith.constant 0 : index
    %7 = vector.load %arg4[%c0_6, %c0_7, %c0_8] : memref<1x256x6xf32, #tpu.memory_space<vmem>>, vector<1x256x6xf32>
    %8 = vector.shape_cast %7 : vector<1x256x6xf32> to vector<256x6xf32>
    %c0_9 = arith.constant 0 : index
    %c0_10 = arith.constant 0 : index
    %c0_11 = arith.constant 0 : index
    %9 = vector.load %arg5[%c0_9, %c0_10, %c0_11] : memref<1x256x1xf32, #tpu.memory_space<vmem>>, vector<1x256x1xf32>
    %10 = vector.shape_cast %9 : vector<1x256x1xf32> to vector<256x1xf32>
    %c0_12 = arith.constant 0 : index
    %c0_13 = arith.constant 0 : index
    %c0_14 = arith.constant 0 : index
    %11 = vector.load %arg6[%c0_12, %c0_13, %c0_14] : memref<1x8x256xbf16, #tpu.memory_space<vmem>>, vector<1x8x256xbf16>
    %12 = vector.shape_cast %11 : vector<1x8x256xbf16> to vector<8x256xbf16>
    %c0_15 = arith.constant 0 : index
    %c0_16 = arith.constant 0 : index
    %c0_17 = arith.constant 0 : index
    %13 = vector.load %arg7[%c0_15, %c0_16, %c0_17] : memref<1x6x256xbf16, #tpu.memory_space<vmem>>, vector<1x6x256xbf16>
    %14 = vector.shape_cast %13 : vector<1x6x256xbf16> to vector<6x256xbf16>
    %c0_18 = arith.constant 0 : index
    %c0_19 = arith.constant 0 : index
    %c0_20 = arith.constant 0 : index
    %15 = vector.load %arg8[%c0_18, %c0_19, %c0_20] : memref<1x1x256xf32, #tpu.memory_space<vmem>>, vector<1x1x256xf32>
    %16 = vector.shape_cast %15 : vector<1x1x256xf32> to vector<1x256xf32>
    %c0_21 = arith.constant 0 : index
    %c0_22 = arith.constant 0 : index
    %c0_23 = arith.constant 0 : index
    %17 = vector.load %arg9[%c0_21, %c0_22, %c0_23] : memref<1x256x256xf32, #tpu.memory_space<vmem>>, vector<1x256x256xf32>
    %18 = vector.shape_cast %17 : vector<1x256x256xf32> to vector<256x256xf32>
    %cst = arith.constant dense<0.000000e+00> : vector<256x256xf32>
    %19 = tpu.matmul %4, %12, %cst {dimension_numbers = #tpu.dot_dimension_numbers<[1], [0], [0], [1], [0, 0, 1, 1], [], []>} : vector<256x8xbf16>, vector<8x256xbf16>, vector<256x256xf32> -> vector<256x256xf32>
    %cst_24 = arith.constant dense<0.000000e+00> : vector<256x256xf32>
    %20 = tpu.matmul %6, %14, %cst_24 {dimension_numbers = #tpu.dot_dimension_numbers<[1], [0], [0], [1], [0, 0, 1, 1], [], []>} : vector<256x6xbf16>, vector<6x256xbf16>, vector<256x256xf32> -> vector<256x256xf32>
    %cst_25 = arith.constant 8.000000e+01 : f32
    %21 = vector.broadcast %cst_25 : f32 to vector<256x256xf32>
    %22 = arith.subf %21, %18 : vector<256x256xf32>
    %cst_26 = arith.constant 0.000000e+00 : f32
    %23 = vector.broadcast %cst_26 : f32 to vector<256x256xf32>
    %24 = arith.maximumf %22, %23 : vector<256x256xf32>
    %cst_27 = arith.constant 1.000000e+01 : f32
    %25 = vector.broadcast %cst_27 : f32 to vector<256x256xf32>
    %26 = arith.mulf %25, %18 : vector<256x256xf32>
    %cst_28 = arith.constant 1.000000e+02 : f32
    %27 = vector.broadcast %cst_28 : f32 to vector<256x256xf32>
    %28 = arith.subf %27, %26 : vector<256x256xf32>
    %cst_29 = arith.constant 0.000000e+00 : f32
    %29 = vector.broadcast %cst_29 : f32 to vector<256x256xf32>
    %30 = arith.maximumf %28, %29 : vector<256x256xf32>
    %cst_30 = arith.constant 5.000000e-01 : f32
    %31 = vector.broadcast %cst_30 : f32 to vector<256x256xf32>
    %32 = arith.cmpf ogt, %19, %31 : vector<256x256xf32>
    %cst_31 = arith.constant 5.000000e-01 : f32
    %33 = vector.broadcast %cst_31 : f32 to vector<256x256xf32>
    %34 = arith.cmpf ogt, %20, %33 : vector<256x256xf32>
    %35 = arith.select %34, %30, %18 : vector<256x256xi1>, vector<256x256xf32>
    %36 = arith.select %32, %24, %35 : vector<256x256xi1>, vector<256x256xf32>
    %cst_32 = arith.constant 5.000000e-01 : f32
    %37 = vector.broadcast %cst_32 : f32 to vector<1x256xf32>
    %38 = arith.cmpf ogt, %16, %37 : vector<1x256xf32>
    %cst_33 = arith.constant 0.000000e+00 : f32
    %39 = vector.shape_cast %38 : vector<1x256xi1> to vector<1x256xi1>
    %40 = vector.broadcast %39 : vector<1x256xi1> to vector<256x256xi1>
    %41 = vector.broadcast %cst_33 : f32 to vector<256x256xf32>
    %42 = arith.select %40, %36, %41 : vector<256x256xi1>, vector<256x256xf32>
    %cst_34 = arith.constant dense<0.000000e+00> : vector<256xf32>
    %43 = vector.multi_reduction <add>, %42, %cst_34 [1] : vector<256x256xf32> to vector<256xf32>
    %44 = vector.shape_cast %43 : vector<256xf32> to vector<256x1xf32>
    %c0_35 = arith.constant 0 : index
    %c0_36 = arith.constant 0 : index
    %45 = vector.load %arg12[%c0_35, %c0_36] : memref<256x1xf32, #tpu.memory_space<vmem>>, vector<256x1xf32>
    %46 = arith.mulf %44, %10 : vector<256x1xf32>
    %47 = arith.addf %45, %46 : vector<256x1xf32>
    %c0_37 = arith.constant 0 : index
    %c0_38 = arith.constant 0 : index
    %48 = vector.load %arg12[%c0_37, %c0_38] : memref<256x1xf32, #tpu.memory_space<vmem>>, vector<256x1xf32>
    tpu.vector_store %arg12[%c0_37, %c0_38], %47 {strides = array<i32>} : memref<256x1xf32, #tpu.memory_space<vmem>>, vector<256x1xf32>,
    %cst_39 = arith.constant dense<0xFF800000> : vector<256xf32>
    %49 = vector.multi_reduction <maximumf>, %8, %cst_39 [1] : vector<256x6xf32> to vector<256xf32>
    %50 = vector.shape_cast %49 : vector<256xf32> to vector<256x1xf32>
    %51 = vector.broadcast %50 : vector<256x1xf32> to vector<256x6xf32>
    %52 = arith.subf %8, %51 : vector<256x6xf32>
    %53 = math.exp %52 : vector<256x6xf32>
    %cst_40 = arith.constant dense<0.000000e+00> : vector<256xf32>
    %54 = vector.multi_reduction <add>, %53, %cst_40 [1] : vector<256x6xf32> to vector<256xf32>
    %55 = vector.shape_cast %54 : vector<256xf32> to vector<256x1xf32>
    %56 = math.log %55 : vector<256x1xf32>
    %57 = arith.addf %56, %50 : vector<256x1xf32>
    %58 = vector.broadcast %57 : vector<256x1xf32> to vector<256x6xf32>
    %59 = arith.subf %8, %58 : vector<256x6xf32>
    %60 = arith.extf %6 : vector<256x6xbf16> to vector<256x6xf32>
    %61 = arith.mulf %60, %59 : vector<256x6xf32>
    %cst_41 = arith.constant dense<0.000000e+00> : vector<256xf32>
    %62 = vector.multi_reduction <add>, %61, %cst_41 [1] : vector<256x6xf32> to vector<256xf32>
    %63 = vector.shape_cast %62 : vector<256xf32> to vector<256x1xf32>
    %cst_42 = arith.constant 0.000000e+00 : f32
    %64 = vector.broadcast %cst_42 : f32 to vector<256x1xf32>
    %65 = arith.subf %64, %63 : vector<256x1xf32>
    %c0_43 = arith.constant 0 : index
    %c0_44 = arith.constant 0 : index
    %66 = vector.load %arg13[%c0_43, %c0_44] : memref<256x1xf32, #tpu.memory_space<vmem>>, vector<256x1xf32>
    %67 = arith.addf %66, %65 : vector<256x1xf32>
    %c0_45 = arith.constant 0 : index
    %c0_46 = arith.constant 0 : index
    %68 = vector.load %arg13[%c0_45, %c0_46] : memref<256x1xf32, #tpu.memory_space<vmem>>, vector<256x1xf32>
    tpu.vector_store %arg13[%c0_45, %c0_46], %67 {strides = array<i32>} : memref<256x1xf32, #tpu.memory_space<vmem>>, vector<256x1xf32>,
    %c0_i32_47 = arith.constant 0 : i32
    %69 = arith.cmpi eq, %arg1, %c0_i32_47 : i32
    %70 = arith.extui %69 : i1 to i32
    %c0_i32_48 = arith.constant 0 : i32
    %71 = arith.cmpi ne, %70, %c0_i32_48 : i32
    scf.if %71 {
      %c0_49 = arith.constant 0 : index
      %c0_50 = arith.constant 0 : index
      %72 = vector.load %arg12[%c0_49, %c0_50] : memref<256x1xf32, #tpu.memory_space<vmem>>, vector<256x1xf32>
      %cst_51 = arith.constant dense<0.000000e+00> : vector<1xf32>
      %73 = vector.multi_reduction <add>, %72, %cst_51 [0] : vector<256x1xf32> to vector<1xf32>
      %74 = vector.shape_cast %73 : vector<1xf32> to vector<1x1xf32>
      %75 = vector.shape_cast %74 : vector<1x1xf32> to vector<1x1x1xf32>
      %c0_52 = arith.constant 0 : index
      %c0_53 = arith.constant 0 : index
      %c0_54 = arith.constant 0 : index
      %76 = vector.load %arg10[%c0_52, %c0_53, %c0_54] : memref<1x1x1xf32, #tpu.memory_space<vmem>>, vector<1x1x1xf32>
      tpu.vector_store %arg10[%c0_52, %c0_53, %c0_54], %75 {strides = array<i32>} : memref<1x1x1xf32, #tpu.memory_space<vmem>>, vector<1x1x1xf32>,
      %c0_55 = arith.constant 0 : index
      %c0_56 = arith.constant 0 : index
      %77 = vector.load %arg13[%c0_55, %c0_56] : memref<256x1xf32, #tpu.memory_space<vmem>>, vector<256x1xf32>
      %cst_57 = arith.constant dense<0.000000e+00> : vector<1xf32>
      %78 = vector.multi_reduction <add>, %77, %cst_57 [0] : vector<256x1xf32> to vector<1xf32>
      %79 = vector.shape_cast %78 : vector<1xf32> to vector<1x1xf32>
      %80 = vector.shape_cast %79 : vector<1x1xf32> to vector<1x1x1xf32>
      %c0_58 = arith.constant 0 : index
      %c0_59 = arith.constant 0 : index
      %c0_60 = arith.constant 0 : index
      %81 = vector.load %arg11[%c0_58, %c0_59, %c0_60] : memref<1x1x1xf32, #tpu.memory_space<vmem>>, vector<1x1x1xf32>
      tpu.vector_store %arg11[%c0_58, %c0_59, %c0_60], %80 {strides = array<i32>} : memref<1x1x1xf32, #tpu.memory_space<vmem>>, vector<1x1x1xf32>,
    } else {
    }
    return
  }
  func.func @transform_0(%arg0: i32, %arg1: i32) -> (i32, i32, i32) {
    %c0_i32 = arith.constant 0 : i32
    %c0_i32_0 = arith.constant 0 : i32
    return %arg0, %arg1, %c0_i32 : i32, i32, i32
  }
  func.func @transform_1(%arg0: i32, %arg1: i32) -> (i32, i32, i32) {
    %c0_i32 = arith.constant 0 : i32
    %c0_i32_0 = arith.constant 0 : i32
    return %arg0, %arg1, %c0_i32 : i32, i32, i32
  }
  func.func @transform_2(%arg0: i32, %arg1: i32) -> (i32, i32, i32) {
    %c0_i32 = arith.constant 0 : i32
    %c0_i32_0 = arith.constant 0 : i32
    return %arg0, %arg1, %c0_i32 : i32, i32, i32
  }
  func.func @transform_3(%arg0: i32, %arg1: i32) -> (i32, i32, i32) {
    %c0_i32 = arith.constant 0 : i32
    %c0_i32_0 = arith.constant 0 : i32
    return %arg0, %arg1, %c0_i32 : i32, i32, i32
  }
  func.func @transform_4(%arg0: i32, %arg1: i32) -> (i32, i32, i32) {
    %c0_i32 = arith.constant 0 : i32
    %c0_i32_0 = arith.constant 0 : i32
    %c0_i32_1 = arith.constant 0 : i32
    return %arg0, %c0_i32, %c0_i32_0 : i32, i32, i32
  }
  func.func @transform_5(%arg0: i32, %arg1: i32) -> (i32, i32, i32) {
    %c0_i32 = arith.constant 0 : i32
    %c0_i32_0 = arith.constant 0 : i32
    %c0_i32_1 = arith.constant 0 : i32
    return %arg0, %c0_i32, %c0_i32_0 : i32, i32, i32
  }
  func.func @transform_6(%arg0: i32, %arg1: i32) -> (i32, i32, i32) {
    %c0_i32 = arith.constant 0 : i32
    %c0_i32_0 = arith.constant 0 : i32
    %c0_i32_1 = arith.constant 0 : i32
    return %arg0, %c0_i32, %c0_i32_0 : i32, i32, i32
  }
  func.func @transform_7(%arg0: i32, %arg1: i32) -> (i32, i32, i32) {
    %c0_i32 = arith.constant 0 : i32
    %c0_i32_0 = arith.constant 0 : i32
    return %arg0, %arg1, %c0_i32 : i32, i32, i32
  }
  func.func @transform_8(%arg0: i32, %arg1: i32) -> (i32, i32, i32) {
    %c0_i32 = arith.constant 0 : i32
    %c0_i32_0 = arith.constant 0 : i32
    %c0_i32_1 = arith.constant 0 : i32
    return %arg0, %c0_i32, %c0_i32_0 : i32, i32, i32
  }
  func.func @transform_9(%arg0: i32, %arg1: i32) -> (i32, i32, i32) {
    %c0_i32 = arith.constant 0 : i32
    %c0_i32_0 = arith.constant 0 : i32
    %c0_i32_1 = arith.constant 0 : i32
    return %arg0, %c0_i32, %c0_i32_0 : i32, i32, i32
  }
}

module attributes {stable_mosaic.version = 11 : i64} {
  func.func @kernel(%arg0: i32, %arg1: memref<1x256x1xi32, #tpu.memory_space<vmem>>, %arg2: memref<1x256x6xf32, #tpu.memory_space<vmem>>, %arg3: memref<1x1x1xf32, #tpu.memory_space<vmem>>, %arg4: memref<1x1x1xf32, #tpu.memory_space<vmem>>, %arg5: memref<1x1x1xf32, #tpu.memory_space<vmem>>) attributes {dimension_semantics = [#tpu.dimension_semantics<parallel>], iteration_bounds = array<i64: 2>, scalar_prefetch = 0 : i64, scratch_operands = 0 : i64, tpu.core_type = #tpu.core_type<tc>, window_params = [{transform_indices = @transform_0, window_bounds = array<i64: 1, 256, 1>}, {transform_indices = @transform_1, window_bounds = array<i64: 1, 256, 6>}, {transform_indices = @transform_2, window_bounds = array<i64: 1, 1, 1>}, {transform_indices = @transform_3, window_bounds = array<i64: 1, 1, 1>}, {transform_indices = @transform_4, window_bounds = array<i64: 1, 1, 1>}]} {
    %c0 = arith.constant 0 : index
    %c0_0 = arith.constant 0 : index
    %c0_1 = arith.constant 0 : index
    %0 = vector.load %arg1[%c0, %c0_0, %c0_1] : memref<1x256x1xi32, #tpu.memory_space<vmem>>, vector<1x256x1xi32>
    %1 = vector.shape_cast %0 : vector<1x256x1xi32> to vector<256x1xi32>
    %c0_2 = arith.constant 0 : index
    %c0_3 = arith.constant 0 : index
    %c0_4 = arith.constant 0 : index
    %2 = vector.load %arg2[%c0_2, %c0_3, %c0_4] : memref<1x256x6xf32, #tpu.memory_space<vmem>>, vector<1x256x6xf32>
    %3 = vector.shape_cast %2 : vector<1x256x6xf32> to vector<256x6xf32>
    %4 = vector.extract_strided_slice %3 {offsets = [0, 0], sizes = [256, 5], strides = [1, 1]} : vector<256x6xf32> to vector<256x5xf32>
    %5 = tpu.iota {dimensions = array<i32: 1>} : vector<256x8xi32>
    %6 = vector.broadcast %1 : vector<256x1xi32> to vector<256x8xi32>
    %7 = arith.cmpi eq, %6, %5 : vector<256x8xi32>
    %8 = arith.extui %7 : vector<256x8xi1> to vector<256x8xi32>
    %9 = arith.sitofp %8 : vector<256x8xi32> to vector<256x8xf32>
    "tpu.trace_start"() <{level = 10 : i32, message = "nk,nf->kf"}> : () -> ()
    %cst = arith.constant dense<0.000000e+00> : vector<8x6xf32>
    %10 = tpu.matmul %9, %3, %cst {dimension_numbers = #tpu.dot_dimension_numbers<[0], [0], [1], [1], [0, 1, 1, 1], [], []>, precision = #tpu.contract_precision<fp32>} : vector<256x8xf32>, vector<256x6xf32>, vector<8x6xf32> -> vector<8x6xf32>
    "tpu.trace_stop"() : () -> ()
    %11 = vector.extract_strided_slice %10 {offsets = [0, 0], sizes = [8, 5], strides = [1, 1]} : vector<8x6xf32> to vector<8x5xf32>
    %12 = vector.extract_strided_slice %10 {offsets = [0, 5], sizes = [8, 1], strides = [1, 1]} : vector<8x6xf32> to vector<8x1xf32>
    %cst_5 = arith.constant dense<0.000000e+00> : vector<8xf32>
    %13 = vector.multi_reduction <add>, %9, %cst_5 [0] : vector<256x8xf32> to vector<8xf32>
    %14 = vector.shape_cast %13 : vector<8xf32> to vector<1x8xf32>
    %cst_6 = arith.constant 5.000000e-01 : f32
    %15 = vector.broadcast %cst_6 : f32 to vector<8x1xf32>
    %16 = arith.cmpf ogt, %12, %15 : vector<8x1xf32>
    %17 = arith.extui %16 : vector<8x1xi1> to vector<8x1xi32>
    %18 = arith.sitofp %17 : vector<8x1xi32> to vector<8x1xf32>
    %cst_7 = arith.constant 5.000000e-01 : f32
    %19 = vector.broadcast %cst_7 : f32 to vector<1x8xf32>
    %20 = arith.cmpf ogt, %14, %19 : vector<1x8xf32>
    %21 = arith.extui %20 : vector<1x8xi1> to vector<1x8xi32>
    %22 = arith.sitofp %21 : vector<1x8xi32> to vector<1x8xf32>
    %cst_8 = arith.constant dense<0.000000e+00> : vector<1xf32>
    %23 = vector.multi_reduction <add>, %22, %cst_8 [1] : vector<1x8xf32> to vector<1xf32>
    %24 = vector.shape_cast %23 : vector<1xf32> to vector<1x1xf32>
    %cst_9 = arith.constant 1.000000e+00 : f32
    %25 = vector.broadcast %cst_9 : f32 to vector<1x1xf32>
    %26 = arith.maximumf %24, %25 : vector<1x1xf32>
    %cst_10 = arith.constant 1.000000e+00 : f32
    %27 = vector.broadcast %cst_10 : f32 to vector<8x1xf32>
    %28 = arith.maximumf %12, %27 : vector<8x1xf32>
    %29 = vector.broadcast %28 : vector<8x1xf32> to vector<8x5xf32>
    %30 = arith.divf %11, %29 : vector<8x5xf32>
    %cst_11 = arith.constant dense<0.000000e+00> : vector<256x5xf32>
    %31 = tpu.matmul %9, %30, %cst_11 {dimension_numbers = #tpu.dot_dimension_numbers<[1], [0], [0], [1], [0, 0, 1, 1], [], []>, precision = #tpu.contract_precision<fp32>} : vector<256x8xf32>, vector<8x5xf32>, vector<256x5xf32> -> vector<256x5xf32>
    %32 = arith.subf %31, %4 : vector<256x5xf32>
    %33 = math.absf %32 : vector<256x5xf32>
    %cst_12 = arith.constant dense<0.000000e+00> : vector<256xf32>
    %34 = vector.multi_reduction <add>, %33, %cst_12 [1] : vector<256x5xf32> to vector<256xf32>
    %35 = vector.shape_cast %34 : vector<256xf32> to vector<256x1xf32>
    %cst_13 = arith.constant 5.000000e-01 : f32
    %36 = vector.broadcast %cst_13 : f32 to vector<256x1xf32>
    %37 = arith.subf %35, %36 : vector<256x1xf32>
    %cst_14 = arith.constant 0.000000e+00 : f32
    %38 = vector.broadcast %cst_14 : f32 to vector<256x1xf32>
    %39 = arith.maximumf %37, %38 : vector<256x1xf32>
    %40 = arith.mulf %39, %39 : vector<256x1xf32>
    "tpu.trace_start"() <{level = 10 : i32, message = "na,nk->ak"}> : () -> ()
    %cst_15 = arith.constant dense<0.000000e+00> : vector<1x8xf32>
    %41 = tpu.matmul %40, %9, %cst_15 {dimension_numbers = #tpu.dot_dimension_numbers<[0], [0], [1], [1], [0, 1, 1, 1], [], []>, precision = #tpu.contract_precision<fp32>} : vector<256x1xf32>, vector<256x8xf32>, vector<1x8xf32> -> vector<1x8xf32>
    "tpu.trace_stop"() : () -> ()
    %cst_16 = arith.constant 1.000000e+00 : f32
    %42 = vector.broadcast %cst_16 : f32 to vector<1x8xf32>
    %43 = arith.maximumf %14, %42 : vector<1x8xf32>
    %44 = arith.divf %41, %43 : vector<1x8xf32>
    %45 = arith.mulf %44, %22 : vector<1x8xf32>
    %cst_17 = arith.constant dense<0.000000e+00> : vector<1xf32>
    %46 = vector.multi_reduction <add>, %45, %cst_17 [1] : vector<1x8xf32> to vector<1xf32>
    %47 = vector.shape_cast %46 : vector<1xf32> to vector<1x1xf32>
    %48 = arith.divf %47, %26 : vector<1x1xf32>
    %49 = vector.shape_cast %30 : vector<8x5xf32> to vector<8x1x5xf32>
    %50 = vector.shape_cast %30 : vector<8x5xf32> to vector<1x8x5xf32>
    %51 = vector.broadcast %49 : vector<8x1x5xf32> to vector<8x8x5xf32>
    %52 = vector.broadcast %50 : vector<1x8x5xf32> to vector<8x8x5xf32>
    %53 = arith.subf %51, %52 : vector<8x8x5xf32>
    %54 = math.absf %53 : vector<8x8x5xf32>
    %cst_18 = arith.constant dense<0.000000e+00> : vector<8x8xf32>
    %55 = vector.multi_reduction <add>, %54, %cst_18 [2] : vector<8x8x5xf32> to vector<8x8xf32>
    %56 = tpu.iota {dimensions = array<i32: 0>} : vector<8x8xi32>
    %57 = tpu.iota {dimensions = array<i32: 1>} : vector<8x8xi32>
    %58 = arith.cmpi ne, %56, %57 : vector<8x8xi32>
    %59 = arith.extui %58 : vector<8x8xi1> to vector<8x8xi32>
    %60 = arith.sitofp %59 : vector<8x8xi32> to vector<8x8xf32>
    %61 = vector.broadcast %18 : vector<8x1xf32> to vector<8x8xf32>
    %62 = vector.broadcast %22 : vector<1x8xf32> to vector<8x8xf32>
    %63 = arith.mulf %61, %62 : vector<8x8xf32>
    %64 = arith.mulf %63, %60 : vector<8x8xf32>
    %cst_19 = arith.constant 3.000000e+00 : f32
    %65 = vector.broadcast %cst_19 : f32 to vector<8x8xf32>
    %66 = arith.subf %65, %55 : vector<8x8xf32>
    %cst_20 = arith.constant 0.000000e+00 : f32
    %67 = vector.broadcast %cst_20 : f32 to vector<8x8xf32>
    %68 = arith.maximumf %66, %67 : vector<8x8xf32>
    %69 = arith.mulf %68, %68 : vector<8x8xf32>
    %70 = arith.mulf %69, %64 : vector<8x8xf32>
    %71 = vector.shape_cast %70 : vector<8x8xf32> to vector<1x8x8xf32>
    %cst_21 = arith.constant dense<0.000000e+00> : vector<1xf32>
    %72 = vector.multi_reduction <add>, %71, %cst_21 [1, 2] : vector<1x8x8xf32> to vector<1xf32>
    %73 = vector.shape_cast %72 : vector<1xf32> to vector<1x1x1xf32>
    %74 = vector.extract %73[0, 0, 0] : f32 from vector<1x1x1xf32>
    %75 = vector.broadcast %74 : f32 to vector<1x1xf32>
    %76 = vector.shape_cast %64 : vector<8x8xf32> to vector<1x8x8xf32>
    %cst_22 = arith.constant dense<0.000000e+00> : vector<1xf32>
    %77 = vector.multi_reduction <add>, %76, %cst_22 [1, 2] : vector<1x8x8xf32> to vector<1xf32>
    %78 = vector.shape_cast %77 : vector<1xf32> to vector<1x1x1xf32>
    %79 = vector.extract %78[0, 0, 0] : f32 from vector<1x1x1xf32>
    %80 = vector.broadcast %79 : f32 to vector<1x1xf32>
    %cst_23 = arith.constant 1.000000e+00 : f32
    %81 = vector.broadcast %cst_23 : f32 to vector<1x1xf32>
    %82 = arith.maximumf %80, %81 : vector<1x1xf32>
    %83 = arith.divf %75, %82 : vector<1x1xf32>
    %84 = math.absf %30 : vector<8x5xf32>
    %cst_24 = arith.constant dense<0.000000e+00> : vector<8xf32>
    %85 = vector.multi_reduction <add>, %84, %cst_24 [1] : vector<8x5xf32> to vector<8xf32>
    %86 = vector.shape_cast %85 : vector<8xf32> to vector<8x1xf32>
    %87 = arith.mulf %86, %18 : vector<8x1xf32>
    %88 = vector.shape_cast %87 : vector<8x1xf32> to vector<1x8x1xf32>
    %cst_25 = arith.constant dense<0.000000e+00> : vector<1xf32>
    %89 = vector.multi_reduction <add>, %88, %cst_25 [1, 2] : vector<1x8x1xf32> to vector<1xf32>
    %90 = vector.shape_cast %89 : vector<1xf32> to vector<1x1x1xf32>
    %91 = vector.extract %90[0, 0, 0] : f32 from vector<1x1x1xf32>
    %92 = vector.broadcast %91 : f32 to vector<1x1xf32>
    %93 = arith.divf %92, %26 : vector<1x1xf32>
    %94 = vector.shape_cast %48 : vector<1x1xf32> to vector<1x1x1xf32>
    %c0_26 = arith.constant 0 : index
    %c0_27 = arith.constant 0 : index
    %c0_28 = arith.constant 0 : index
    %95 = vector.load %arg3[%c0_26, %c0_27, %c0_28] : memref<1x1x1xf32, #tpu.memory_space<vmem>>, vector<1x1x1xf32>
    tpu.vector_store %arg3[%c0_26, %c0_27, %c0_28], %94 {strides = array<i32>} : memref<1x1x1xf32, #tpu.memory_space<vmem>>, vector<1x1x1xf32>,
    %96 = vector.shape_cast %83 : vector<1x1xf32> to vector<1x1x1xf32>
    %c0_29 = arith.constant 0 : index
    %c0_30 = arith.constant 0 : index
    %c0_31 = arith.constant 0 : index
    %97 = vector.load %arg4[%c0_29, %c0_30, %c0_31] : memref<1x1x1xf32, #tpu.memory_space<vmem>>, vector<1x1x1xf32>
    tpu.vector_store %arg4[%c0_29, %c0_30, %c0_31], %96 {strides = array<i32>} : memref<1x1x1xf32, #tpu.memory_space<vmem>>, vector<1x1x1xf32>,
    %98 = vector.shape_cast %93 : vector<1x1xf32> to vector<1x1x1xf32>
    %c0_32 = arith.constant 0 : index
    %c0_33 = arith.constant 0 : index
    %c0_34 = arith.constant 0 : index
    %99 = vector.load %arg5[%c0_32, %c0_33, %c0_34] : memref<1x1x1xf32, #tpu.memory_space<vmem>>, vector<1x1x1xf32>
    tpu.vector_store %arg5[%c0_32, %c0_33, %c0_34], %98 {strides = array<i32>} : memref<1x1x1xf32, #tpu.memory_space<vmem>>, vector<1x1x1xf32>,
    return
  }
  func.func @transform_0(%arg0: i32) -> (i32, i32, i32) {
    %c0_i32 = arith.constant 0 : i32
    %c0_i32_0 = arith.constant 0 : i32
    %c0_i32_1 = arith.constant 0 : i32
    return %arg0, %c0_i32, %c0_i32_0 : i32, i32, i32
  }
  func.func @transform_1(%arg0: i32) -> (i32, i32, i32) {
    %c0_i32 = arith.constant 0 : i32
    %c0_i32_0 = arith.constant 0 : i32
    %c0_i32_1 = arith.constant 0 : i32
    return %arg0, %c0_i32, %c0_i32_0 : i32, i32, i32
  }
  func.func @transform_2(%arg0: i32) -> (i32, i32, i32) {
    %c0_i32 = arith.constant 0 : i32
    %c0_i32_0 = arith.constant 0 : i32
    %c0_i32_1 = arith.constant 0 : i32
    return %arg0, %c0_i32, %c0_i32_0 : i32, i32, i32
  }
  func.func @transform_3(%arg0: i32) -> (i32, i32, i32) {
    %c0_i32 = arith.constant 0 : i32
    %c0_i32_0 = arith.constant 0 : i32
    %c0_i32_1 = arith.constant 0 : i32
    return %arg0, %c0_i32, %c0_i32_0 : i32, i32, i32
  }
  func.func @transform_4(%arg0: i32) -> (i32, i32, i32) {
    %c0_i32 = arith.constant 0 : i32
    %c0_i32_0 = arith.constant 0 : i32
    %c0_i32_1 = arith.constant 0 : i32
    return %arg0, %c0_i32, %c0_i32_0 : i32, i32, i32
  }
}

</mosaic_0001>

<bundles_post_ra>
// kernel: get_loss_forward.3
= control target key start
LH: loop header
LB: loop body
LE: loop exit
PB: predicated region body
PF: predicated region fallthrough
CT: control target
= control target key end

     0   :  { %s6927_s15 = smov 0   ;;  %s9385_s0 = inlined_call_operand.vmem [shape: s32[2,256,1], index: 0, kind: input, shape index: {}]   ;;  %s9386_s1 = inlined_call_operand.vmem [shape: f32[2,256,6], index: 1, kind: input, shape index: {}]   ;;  %s9387_s2 = inlined_call_operand.vmem [shape: f32[2,1,1], index: 2, kind: output, shape index: {0}]   ;;  %s9388_s3 = inlined_call_operand.vmem [shape: f32[2,1,1], index: 3, kind: output, shape index: {1}]   ;;  %s9389_s4 = inlined_call_operand.vmem [shape: f32[2,1,1], index: 4, kind: output, shape index: {2}]  }
   0x1 LB: > { %s5049_s16 = sadd.s32 4294967295, %s6894_s15   ;;  %p5053_p0 = scmp.ge.s32.totalorder %s6894_s15, 1  ;;  %s6894_s15 = sphi %s6927_s15, %s15_s15  }
   0x2   : > { %p177_p1 = scmp.lt.s32.totalorder %s6894_s15, 3 }
   0x4   : > { %p178_p2 = pnand %p5053_p0, %p177_p1 }
   0x6   : > { %181 = sbr.rel (%p178_p2) target bundleno = 2126 (0x84e), region = 28 }
   0xd   : > { %p212_p3 = scmp.lt.s32.totalorder %s5049_s16, 1  ;;  %v9390_v0 = vmov 0   ;;  %s6901_s24 = smov 123  }
   0xe   : > { %6806 = vset.pattern.permute.xlu1 %v9390_v0  ;;  %6805 = vset.pattern.permute.xlu0 %v9390_v0 }
   0xf   : > { %s10289_s16 = smov (!%p212_p3, %s5049_s16), 1 }
  0x10   : > { %s5319_s17 = sshll.u32 %s10289_s16, 8  ;;  %s224_s27 = scalar_lea.vmem %s9387_s2, %s10289_s16 }
  0x11   : > { %s6945_s20 = scalar_lea.vmem %s9385_s0, %s5319_s17  ;;  %s6984_s23 = scalar_lea.vmem %s9386_s1, %s5319_s17 }
  0x12   : > { %v248_v1 = vld [vmem:[%s6945_s20 + $0x88] sm:$0xff]  ;;  %v247_v2 = vld [vmem:[%s6945_s20 + $0x80] sm:$0xff]  ;;  %v233_v5 = vld [vmem:[%s6945_s20 + $0x10] sm:$0xff]  ;;  %s227_s6 = scalar_lea.vmem %s9388_s3, %s10289_s16  ;;  %s230_s10 = scalar_lea.vmem %s9389_s4, %s10289_s16 }
  0x13   : > { %349 = vperm.xlu1 %6806, %v248_v1   ;;  %346 = vperm.xlu0 %6805, %v247_v2   ;;  %v232_v3 = vld [vmem:[%s6945_s20 + $0x8] sm:$0xff]  ;;  %v231_v4 = vld [vmem:[%s6945_s20] sm:$0xff]  ;;  %v249_v6 = vld [vmem:[%s6945_s20 + $0x90] sm:$0xff] }
  0x14   : > { %v234_v7 = vld [vmem:[%s6945_s20 + $0x18] sm:$0xff]  ;;  %v235_v9 = vld [vmem:[%s6945_s20 + $0x20] sm:$0xff]  ;;  %v236_v11 = vld [vmem:[%s6945_s20 + $0x28] sm:$0xff] }
  0x15   : > { %v250_v8 = vld [vmem:[%s6945_s20 + $0x98] sm:$0xff]  ;;  %v251_v10 = vld [vmem:[%s6945_s20 + $0xa0] sm:$0xff]  ;;  %v252_v12 = vld [vmem:[%s6945_s20 + $0xa8] sm:$0xff] }
  0x16   : > { %v237_v13 = vld [vmem:[%s6945_s20 + $0x30] sm:$0xff]  ;;  %v238_v15 = vld [vmem:[%s6945_s20 + $0x38] sm:$0xff]  ;;  %v239_v17 = vld [vmem:[%s6945_s20 + $0x40] sm:$0xff] }
  0x17   : > { %301 = vperm.xlu1 %6806, %v232_v3   ;;  %298 = vperm.xlu0 %6805, %v231_v4   ;;  %v253_v14 = vld [vmem:[%s6945_s20 + $0xb0] sm:$0xff]  ;;  %v254_v16 = vld [vmem:[%s6945_s20 + $0xb8] sm:$0xff]  ;;  %v255_v18 = vld [vmem:[%s6945_s20 + $0xc0] sm:$0xff] }
  0x18   : > { %v240_v19 = vld [vmem:[%s6945_s20 + $0x48] sm:$0xff]  ;;  %v241_v21 = vld [vmem:[%s6945_s20 + $0x50] sm:$0xff]  ;;  %v242_v23 = vld [vmem:[%s6945_s20 + $0x58] sm:$0xff] }
  0x19   : > { %v256_v20 = vld [vmem:[%s6945_s20 + $0xc8] sm:$0xff]  ;;  %v257_v22 = vld [vmem:[%s6945_s20 + $0xd0] sm:$0xff]  ;;  %v258_v24 = vld [vmem:[%s6945_s20 + $0xd8] sm:$0xff] }
  0x1a   : > { %v243_v25 = vld [vmem:[%s6945_s20 + $0x60] sm:$0xff]  ;;  %v244_v27 = vld [vmem:[%s6945_s20 + $0x68] sm:$0xff]  ;;  %v245_v29 = vld [vmem:[%s6945_s20 + $0x70] sm:$0xff] }
  0x1b   : > { %304 = vperm.xlu1 %6806, %v233_v5   ;;  %352 = vperm.xlu0 %6805, %v249_v6   ;;  %v259_v26 = vld [vmem:[%s6945_s20 + $0xe0] sm:$0xff]  ;;  %v260_v28 = vld [vmem:[%s6945_s20 + $0xe8] sm:$0xff]  ;;  %v261_v30 = vld [vmem:[%s6945_s20 + $0xf0] sm:$0xff] }
  0x1c   : > { %v246_v31 = vld [vmem:[%s6945_s20 + $0x78] sm:$0xff]  ;;  %v279_v33 = vld [vmem:[%s6984_s23 + $0x80] sm:$0xff]  ;;  %v280_v34 = vld [vmem:[%s6984_s23 + $0x88] sm:$0xff] }
  0x1d   : > { %v262_v32 = vld [vmem:[%s6945_s20 + $0xf8] sm:$0xff]  ;;  %v263_v35 = vld [vmem:[%s6984_s23] sm:$0xff]  ;;  %v602_v36 = vand.u32 4294901760, %v279_v33  ;;  %v605_v37 = vand.u32 4294901760, %v280_v34  ;;  %v264_v38 = vld [vmem:[%s6984_s23 + $0x8] sm:$0xff] }
  0x1e   : > { %v554_v39 = vand.u32 4294901760, %v263_v35  ;;  %v6991_v40 = vld [vmem:[%s6984_s23 + $0x90] sm:$0xff]  ;;  %v6994_v41 = vld [vmem:[%s6984_s23 + $0x98] sm:$0xff]  ;;  %v557_v42 = vand.u32 4294901760, %v264_v38 }
  0x1f   : > { %307 = vperm.xlu1 %6806, %v234_v7   ;;  %355 = vperm.xlu0 %6805, %v250_v8   ;;  %v608_v43 = vand.u32 4294901760, %v6991_v40  ;;  %v611_v44 = vand.u32 4294901760, %v6994_v41  ;;  %v6999_v45 = vld [vmem:[%s6984_s23 + $0x10] sm:$0xff]  ;;  %v7002_v46 = vld [vmem:[%s6984_s23 + $0x18] sm:$0xff]  ;;  %v7004_v47 = vsub.f32 %v279_v33, %v602_v36  ;;  %v7006_v48 = vsub.f32 %v280_v34, %v605_v37  ;;  %v7055_v8 = vld [vmem:[%s6984_s23 + $0xa0] sm:$0xff] }
  0x20   : > { %v7008_v49 = vsub.f32 %v263_v35, %v554_v39  ;;  %v560_v50 = vand.u32 4294901760, %v6999_v45  ;;  %v7011_v51 = vsub.f32 %v264_v38, %v557_v42  ;;  %v563_v54 = vand.u32 4294901760, %v7002_v46  ;;  %v7091_v34 = vld [vmem:[%s6984_s23 + $0x30] sm:$0xff] }
  0x21   : > { %9728 = vst [vmem:[#allocation2_spill] sm:$0xff] %v7004_v47  ;;  %9729 = vst [vmem:[#allocation3_spill] sm:$0xff] %v7006_v48  ;;  %v7014_v52 = vsub.f32 %v6991_v40, %v608_v43  ;;  %v7017_v53 = vsub.f32 %v6994_v41, %v611_v44  ;;  %v9415_v55 = vand.u32 4294901760, %v7004_v47  ;;  %v9414_v56 = vand.u32 4294901760, %v7006_v48 }
  0x22   : > { %v9410_v57 = vand.u32 4294901760, %v7008_v49  ;;  %v7026_v58 = vsub.f32 %v6999_v45, %v560_v50  ;;  %v9409_v59 = vand.u32 4294901760, %v7011_v51  ;;  %v7032_v62 = vsub.f32 %v7002_v46, %v563_v54  ;;  %v7109_v46 = vld [vmem:[%s6984_s23 + $0x38] sm:$0xff] }
  0x23   : > { %310 = vperm.xlu1 %6806, %v235_v9   ;;  %358 = vperm.xlu0 %6805, %v251_v10   ;;  %v9408_v60 = vand.u32 4294901760, %v7014_v52  ;;  %v9407_v61 = vand.u32 4294901760, %v7017_v53  ;;  %v781_v63 = vsub.f32 %v7004_v47, %v9415_v55  ;;  %v788_v1 = vsub.f32 %v7006_v48, %v9414_v56 }
  0x24   : > { %9730 = vst [vmem:[#allocation4_spill] sm:$0xff] %v7026_v58  ;;  %9731 = vst [vmem:[#allocation5_spill] sm:$0xff] %v7032_v62  ;;  %v669_v2 = vsub.f32 %v7008_v49, %v9410_v57  ;;  %v9406_v3 = vand.u32 4294901760, %v7026_v58  ;;  %v676_v4 = vsub.f32 %v7011_v51, %v9409_v59  ;;  %v9404_v7 = vand.u32 4294901760, %v7032_v62  ;;  %v7285_v57 = vld [vmem:[%s6984_s23 + $0x68] sm:$0xff] }
  0x25   : > { %v795_v5 = vsub.f32 %v7014_v52, %v9408_v60  ;;  %v802_v6 = vsub.f32 %v7017_v53, %v9407_v61  ;;  %v782_v9 = vand.u32 4294901760, %v781_v63  ;;  %v789_v10 = vand.u32 4294901760, %v788_v1 }
  0x26   : > { %v7120_v63 = vpack.c.bf16 %v563_v54, %v560_v50  ;;  %v572_v1 = vand.u32 4294901760, %v7091_v34  ;;  %v575_v54 = vand.u32 4294901760, %v7109_v46 }
  0x27   : > { %313 = vperm.xlu1 %6806, %v236_v11   ;;  %361 = vperm.xlu0 %6805, %v252_v12   ;;  %v670_v11 = vand.u32 4294901760, %v669_v2  ;;  %v683_v12 = vsub.f32 %v7026_v58, %v9406_v3 }
  0x2b   : > { %316 = vperm.xlu1 %6806, %v237_v13   ;;  %364 = vperm.xlu0 %6805, %v253_v14   ;;  %v7061_v13 = vld [vmem:[%s6984_s23 + $0xa8] sm:$0xff]  ;;  %v677_v14 = vand.u32 4294901760, %v676_v4 }
  0x2f   : > { %319 = vperm.xlu1 %6806, %v238_v15   ;;  %367 = vperm.xlu0 %6805, %v254_v16   ;;  %v796_v15 = vand.u32 4294901760, %v795_v5  ;;  %v803_v16 = vand.u32 4294901760, %v802_v6 }
  0x33   : > { %322 = vperm.xlu1 %6806, %v239_v17   ;;  %370 = vperm.xlu0 %6805, %v255_v18   ;;  %v690_v17 = vsub.f32 %v7032_v62, %v9404_v7  ;;  %v7067_v18 = vld [vmem:[%s6984_s23 + $0x20] sm:$0xff] }
  0x37   : > { %325 = vperm.xlu1 %6806, %v240_v19   ;;  %373 = vperm.xlu0 %6805, %v256_v20   ;;  %v7070_v19 = vld [vmem:[%s6984_s23 + $0x28] sm:$0xff]  ;;  %v6271_v20 = vpack.c.bf16 %v789_v10, %v782_v9 }
  0x38   : > { %v569_v33 = vand.u32 4294901760, %v7070_v19 }
  0x39   : > { %6272 = vmatprep.subr.bf16.mxu1 %v6271_v20 }
  0x3a   : > { %v7105_v41 = vsub.f32 %v7070_v19, %v569_v33 }
  0x3b   : > { %328 = vperm.xlu1 %6806, %v241_v21   ;;  %376 = vperm.xlu0 %6805, %v257_v22   ;;  %v684_v21 = vand.u32 4294901760, %v683_v12  ;;  %v7072_v22 = vpack.c.bf16 %v605_v37, %v602_v36  ;;  %v7096_v37 = vpack.c.bf16 %v611_v44, %v608_v43 }
  0x3c   : > { %v9398_v5 = vand.u32 4294901760, %v7105_v41 }
  0x3d   : > { %9732 = vst [vmem:[#allocation6_spill] sm:$0xff] %v7072_v22  ;;  %6240 = vmatprep.subr.bf16.mxu0 %v7072_v22 }
  0x3f   : > { %331 = vperm.xlu1 %6806, %v242_v23   ;;  %379 = vperm.xlu0 %6805, %v258_v24   ;;  %v614_v23 = vand.u32 4294901760, %v7055_v8  ;;  %v7076_v24 = vld [vmem:[%s6984_s23 + $0xb0] sm:$0xff] }
  0x40   : > { %v620_v38 = vand.u32 4294901760, %v7076_v24 }
  0x42   : > { %v7116_v44 = vsub.f32 %v7076_v24, %v620_v38 }
  0x43   : > { %334 = vperm.xlu1 %6806, %v243_v25   ;;  %382 = vperm.xlu0 %6805, %v259_v26   ;;  %v6273_v25 = vpack.c.bf16 %v677_v14, %v670_v11  ;;  %v6275_v26 = vpack.c.bf16 %v803_v16, %v796_v15  ;;  %v704_v11 = vsub.f32 %v7105_v41, %v9398_v5  ;;  %v7255_v5 = vld [vmem:[%s6984_s23 + $0xe0] sm:$0xff] }
  0x44   : > { %9735 = vst [vmem:[#allocation9_spill] sm:$0xff] %v7116_v44  ;;  %v9397_v50 = vand.u32 4294901760, %v7116_v44  ;;  %v7154_v16 = vsub.f32 %v7109_v46, %v575_v54  ;;  %v9421_v59 = vand.u32 4294901760, %v7255_v5 }
  0x45   : > { %6274 = vmatpush3.bf16.msra.mxu1 %v6273_v25  ;;  %v705_v20 = vand.u32 4294901760, %v704_v11  ;;  %v7181_v11 = vld [vmem:[%s6984_s23 + $0xd0] sm:$0xff] }
  0x46   : > { %6276 = vmatprep.subr.bf16.mxu1 %v6275_v26  ;;  %v823_v14 = vsub.f32 %v7116_v44, %v9397_v50  ;;  %9738 = vst [vmem:[#allocation12_spill] sm:$0xff] %v7154_v16  ;;  %v7168_v26 = vld [vmem:[%s6984_s23 + $0x40] sm:$0xff]  ;;  %v9393_v46 = vand.u32 4294901760, %v7154_v16 }
  0x47   : > { %337 = vperm.xlu1 %6806, %v244_v27   ;;  %385 = vperm.xlu0 %6805, %v260_v28   ;;  %v691_v27 = vand.u32 4294901760, %v690_v17  ;;  %v617_v28 = vand.u32 4294901760, %v7061_v13  ;;  %v7157_v17 = vld [vmem:[%s6984_s23 + $0xc0] sm:$0xff]  ;;  %v578_v0 = vand.u32 4294901760, %v7168_v26 }
  0x49   : > { %v6277_v35 = vpack.c.bf16 %v691_v27, %v684_v21  ;;  %v7094_v36 = vsub.f32 %v7061_v13, %v617_v28  ;;  %v7165_v25 = vpack.c.bf16 %v617_v28, %v614_v23 }
  0x4b   : > { %340 = vperm.xlu1 %6806, %v245_v29   ;;  %388 = vperm.xlu0 %6805, %v261_v30   ;;  %v7080_v29 = vld [vmem:[%s6984_s23 + $0xb8] sm:$0xff]  ;;  %v7084_v30 = vsub.f32 %v7055_v8, %v614_v23  ;;  %9734 = vst [vmem:[#allocation8_spill] sm:$0xff] %v7094_v36  ;;  %v9401_v43 = vand.u32 4294901760, %v7094_v36  ;;  %v7139_v8 = vsub.f32 %v7091_v34, %v572_v1  ;;  %v626_v23 = vand.u32 4294901760, %v7157_v17 }
  0x4c   : > { %6278 = vmatpush3.bf16.msra.mxu1 %v6277_v35 }
  0x4d   : > { %9733 = vst [vmem:[#allocation7_spill] sm:$0xff] %v7084_v30  ;;  %v9403_v40 = vand.u32 4294901760, %v7084_v30  ;;  %v816_v45 = vsub.f32 %v7094_v36, %v9401_v43  ;;  %9737 = vst [vmem:[#allocation11_spill] sm:$0xff] %v7139_v8  ;;  %v9392_v15 = vand.u32 4294901760, %v7139_v8 }
  0x4f   : > { %343 = vperm.xlu1 %6806, %v246_v31   ;;  %391 = vperm.xlu0 %6805, %v262_v32   ;;  %v7086_v31 = vpack.c.bf16 %v557_v42, %v554_v39  ;;  %v566_v32 = vand.u32 4294901760, %v7067_v18  ;;  %v623_v42 = vand.u32 4294901760, %v7080_v29  ;;  %v809_v2 = vsub.f32 %v7084_v30, %v9403_v40 }
  0x50   : > { %v817_v13 = vand.u32 4294901760, %v816_v45  ;;  %v711_v35 = vsub.f32 %v7139_v8, %v9392_v15  ;;  %v9474_v8 = vmov 0.0  }
  0x51   : > { %6242 = vmatpush3.bf16.msra.mxu0 %v7086_v31  ;;  %v7102_v39 = vsub.f32 %v7067_v18, %v566_v32  ;;  %v7129_v6 = vsub.f32 %v7080_v29, %v623_v42  ;;  %v810_v9 = vand.u32 4294901760, %v809_v2  ;;  %v7160_v18 = vld [vmem:[%s6984_s23 + $0xc8] sm:$0xff]  ;;  %v824_v29 = vand.u32 4294901760, %v823_v14 }
  0x52   : > { %6244 = vmatprep.subr.bf16.mxu0 %v7096_v37  ;;  %v7175_v2 = vld [vmem:[%s6984_s23 + $0x48] sm:$0xff]  ;;  %v629_v28 = vand.u32 4294901760, %v7160_v18  ;;  %v7186_v14 = vpack.c.bf16 %v569_v33, %v566_v32  ;;  %v7201_v32 = vsub.f32 %v7168_v26, %v578_v0  ;;  %v7205_v33 = vpack.c.bf16 %v623_v42, %v620_v38  ;;  %v7218_v26 = vld [vmem:[%s6984_s23 + $0x58] sm:$0xff] }
  0x53   : > { %v9400_v4 = vand.u32 4294901760, %v7102_v39  ;;  %9736 = vst [vmem:[#allocation10_spill] sm:$0xff] %v7129_v6  ;;  %v9396_v12 = vand.u32 4294901760, %v7129_v6  ;;  %v6279_v27 = vpack.c.bf16 %v817_v13, %v810_v9  ;;  %v712_v9 = vand.u32 4294901760, %v711_v35 }
  0x54   : > { %v718_v13 = vsub.f32 %v7154_v16, %v9393_v46  ;;  %v581_v35 = vand.u32 4294901760, %v7175_v2  ;;  %9739 = vst [vmem:[#allocation13_spill] sm:$0xff] %v7205_v33  ;;  %v9399_v24 = vand.u32 4294901760, %v7201_v32  ;;  %v7229_v42 = vpack.c.bf16 %v575_v54, %v572_v1 }
  0x55   : > { %v697_v10 = vsub.f32 %v7102_v39, %v9400_v4  ;;  %6246 = vmatpush3.bf16.msra.mxu0 %v7120_v63  ;;  %v830_v21 = vsub.f32 %v7129_v6, %v9396_v12  ;;  %6280 = vmatprep.subr.bf16.mxu1 %v6279_v27  ;;  %v7196_v27 = vsub.f32 %v7160_v18, %v629_v28 }
  0x56   : > { %6248 = vmatprep.subr.bf16.mxu0 %v7165_v25  ;;  %v719_v15 = vand.u32 4294901760, %v718_v13  ;;  %v7215_v13 = vld [vmem:[%s6984_s23 + $0x50] sm:$0xff]  ;;  %9740 = vst [vmem:[#allocation14_spill] sm:$0xff] %v7229_v42  ;;  %v725_v34 = vsub.f32 %v7201_v32, %v9399_v24  ;;  %v7276_v7 = vpack.c.bf16 %v629_v28, %v626_v23 }
  0x57   : > { %v698_v19 = vand.u32 4294901760, %v697_v10  ;;  %v831_v10 = vand.u32 4294901760, %v830_v21  ;;  %v7193_v21 = vsub.f32 %v7157_v17, %v626_v23  ;;  %v9394_v18 = vand.u32 4294901760, %v7196_v27 }
  0x58   : > { %v6285_v46 = vpack.c.bf16 %v719_v15, %v712_v9  ;;  %v9424_v54 = vand.u32 4294901760, %v7215_v13  ;;  %v726_v24 = vand.u32 4294901760, %v725_v34  ;;  %9743 = vst [vmem:[#allocation17_spill] sm:$0xff] %v7276_v7  ;;  %v7289_v23 = vpack.c.bf16 %v581_v35, %v578_v0 }
  0x59   : > { %v6281_v45 = vpack.c.bf16 %v705_v20, %v698_v19  ;;  %v7190_v19 = vld [vmem:[%s6984_s23 + $0xd8] sm:$0xff]  ;;  %v6283_v20 = vpack.c.bf16 %v831_v10, %v824_v29  ;;  %6250 = vmatpush3.bf16.msra.mxu0 %v7186_v14  ;;  %v9430_v29 = vand.u32 4294901760, %v7181_v11  ;;  %v9395_v17 = vand.u32 4294901760, %v7193_v21 }
  0x5a   : > { %v9429_v10 = vand.u32 4294901760, %v7190_v19  ;;  %6252 = vmatprep.subr.bf16.mxu0 %v7205_v33  ;;  %v844_v15 = vsub.f32 %v7196_v27, %v9394_v18  ;;  %v9422_v18 = vand.u32 4294901760, %v7218_v26  ;;  %v7263_v43 = vsub.f32 %v7215_v13, %v9424_v54  ;;  %9744 = vst [vmem:[#allocation18_spill] sm:$0xff] %v7289_v23  ;;  %v7348_v54 = vld [vmem:[%s6984_s23 + $0x70] sm:$0xff] }
  0x5b   : > { %6282 = vmatpush3.bf16.msra.mxu1 %v6281_v45  ;;  %v7211_v45 = vsub.f32 %v7175_v2, %v581_v35  ;;  %v7225_v38 = vsub.f32 %v7181_v11, %v9430_v29  ;;  %v837_v2 = vsub.f32 %v7193_v21, %v9395_v17  ;;  %v9417_v35 = vand.u32 4294901760, %v7285_v57 }
  0x5c   : > { %6284 = vmatprep.subr.bf16.mxu1 %v6283_v20  ;;  %v7241_v20 = vsub.f32 %v7190_v19, %v9429_v10  ;;  %v845_v12 = vand.u32 4294901760, %v844_v15  ;;  %9741 = vst [vmem:[#allocation15_spill] sm:$0xff] %v7263_v43  ;;  %v7271_v15 = vld [vmem:[%s6984_s23 + $0xe8] sm:$0xff]  ;;  %v9412_v61 = vand.u32 4294901760, %v7263_v43 }
  0x5d   : > { %v9402_v9 = vand.u32 4294901760, %v7211_v45  ;;  %v9405_v1 = vand.u32 4294901760, %v7225_v38  ;;  %6254 = vmatpush3.bf16.msra.mxu0 %v7229_v42  ;;  %v838_v17 = vand.u32 4294901760, %v837_v2  ;;  %v7268_v2 = vsub.f32 %v7218_v26, %v9422_v18  ;;  %v7343_v18 = vld [vmem:[%s6984_s23 + $0xf8] sm:$0xff] }
  0x5e   : > { %6256 = vmatprep.subr.bf16.mxu0 %v7276_v7 }
  0x5f   : > { %6286 = vmatpush3.bf16.msra.mxu1 %v6285_v46  ;;  %v732_v50 = vsub.f32 %v7211_v45, %v9402_v9  ;;  %v9413_v46 = vand.u32 4294901760, %v7241_v20  ;;  %v851_v4 = vsub.f32 %v7225_v38, %v9405_v1  ;;  %9742 = vst [vmem:[#allocation16_spill] sm:$0xff] %v7268_v2  ;;  %v6287_v9 = vpack.c.bf16 %v845_v12, %v838_v17  ;;  %v7279_v1 = vld [vmem:[%s6984_s23 + $0x60] sm:$0xff] }
  0x60   : > { %v9411_v60 = vand.u32 4294901760, %v7268_v2  ;;  %v9419_v17 = vand.u32 4294901760, %v7271_v15 }
  0x61   : > { %v733_v40 = vand.u32 4294901760, %v732_v50  ;;  %v858_v34 = vsub.f32 %v7241_v20, %v9413_v46  ;;  %v852_v3 = vand.u32 4294901760, %v851_v4  ;;  %6288 = vmatprep.subr.bf16.mxu1 %v6287_v9  ;;  %v739_v4 = vsub.f32 %v7263_v43, %v9412_v61  ;;  %6258 = vmatpush3.bf16.msra.mxu0 %v7289_v23 }
  0x62   : > { %v746_v28 = vsub.f32 %v7268_v2, %v9411_v60  ;;  %v7300_v9 = vsub.f32 %v7255_v5, %v9421_v59  ;;  %v7306_v0 = vsub.f32 %v7271_v15, %v9419_v17 }
  0x63   : > { %v6289_v12 = vpack.c.bf16 %v733_v40, %v726_v24  ;;  %v859_v50 = vand.u32 4294901760, %v858_v34  ;;  %v9418_v40 = vand.u32 4294901760, %v7279_v1  ;;  %v740_v34 = vand.u32 4294901760, %v739_v4 }
  0x64   : > { %9745 = vst [vmem:[#allocation19_spill] sm:$0xff] %v7300_v9  ;;  %9746 = vst [vmem:[#allocation20_spill] sm:$0xff] %v7306_v0  ;;  %v747_v60 = vand.u32 4294901760, %v746_v28  ;;  %v9416_v61 = vand.u32 4294901760, %v7300_v9 }
  0x65   : > { %6290 = vmatpush3.bf16.msra.mxu1 %v6289_v12  ;;  %v6291_v24 = vpack.c.bf16 %v859_v50, %v852_v3  ;;  %v7314_v46 = vsub.f32 %v7279_v1, %v9418_v40  ;;  %v9420_v3 = vand.u32 4294901760, %v7306_v0  ;;  %v7320_v12 = vsub.f32 %v7285_v57, %v9417_v35 }
  0x66   : > { %v6293_v50 = vpack.c.bf16 %v747_v60, %v740_v34  ;;  %v865_v4 = vsub.f32 %v7300_v9, %v9416_v61  ;;  %v9425_v40 = vlaneseq }
  0x67   : > { %9747 = vst [vmem:[#allocation21_spill] sm:$0xff] %v7314_v46  ;;  %6292 = vmatprep.subr.bf16.mxu1 %v6291_v24  ;;  %9748 = vst [vmem:[#allocation22_spill] sm:$0xff] %v7320_v12  ;;  %v9423_v28 = vand.u32 4294901760, %v7314_v46  ;;  %v872_v56 = vsub.f32 %v7306_v0, %v9420_v3  ;;  %v9426_v24 = vand.u32 4294901760, %v7320_v12 }
  0x68   : > { %v866_v55 = vand.u32 4294901760, %v865_v4  ;;  %v7340_v4 = vld [vmem:[%s6984_s23 + $0xf0] sm:$0xff] }
  0x69   : > { %6294 = vmatpush3.bf16.msra.mxu1 %v6293_v50  ;;  %v753_v60 = vsub.f32 %v7314_v46, %v9423_v28  ;;  %v873_v34 = vand.u32 4294901760, %v872_v56  ;;  %v760_v61 = vsub.f32 %v7320_v12, %v9426_v24  ;;  %v7337_v50 = vand.u32 127, %v9425_v40 }
  0x6a   : > { %v9428_v56 = vand.u32 4294901760, %v7340_v4  ;;  %v9427_v28 = vand.u32 4294901760, %v7343_v18 }
  0x6b   : > { %v754_v35 = vand.u32 4294901760, %v753_v60  ;;  %v6295_v17 = vpack.c.bf16 %v873_v34, %v866_v55  ;;  %v761_v3 = vand.u32 4294901760, %v760_v61  ;;  %9749 = vst [vmem:[#allocation23_spill] sm:$0xff] %v7337_v50  ;;  %v7351_v60 = vld [vmem:[%s6984_s23 + $0x78] sm:$0xff]  ;;  %v9752_v34 = vmov 0 }
  0x6d   : > { %6296 = vmatprep.subr.bf16.mxu1 %v6295_v17  ;;  %v6297_v59 = vpack.c.bf16 %v761_v3, %v754_v35  ;;  %v9435_v17 = vand.u32 4294901760, %v7348_v54  ;;  %v9436_v35 = vand.u32 4294901760, %v7351_v60  ;;  %v7365_v3 = vsub.f32 %v7343_v18, %v9427_v28 }
  0x6f   : > { %6298 = vmatpush3.bf16.msra.mxu1 %v6297_v59  ;;  %v7360_v59 = vsub.f32 %v7340_v4, %v9428_v56  ;;  %9751 = vst [vmem:[#allocation25_spill] sm:$0xff] %v7365_v3  ;;  %v7378_v40 = vsub.f32 %v7348_v54, %v9435_v17  ;;  %v7383_v24 = vsub.f32 %v7351_v60, %v9436_v35  ;;  %v9441_v56 = vand.u32 4294901760, %v7365_v3 }
  0x71   : > { %9750 = vst [vmem:[#allocation24_spill] sm:$0xff] %v7360_v59  ;;  %9755 = vst [vmem:[#allocation27_spill] sm:$0xff] %v7378_v40  ;;  %v9442_v28 = vand.u32 4294901760, %v7360_v59  ;;  %v9453_v16 = vand.u32 4294901760, %v7378_v40  ;;  %v886_v35 = vsub.f32 %v7365_v3, %v9441_v56 }
  0x72   : > { %9756 = vst [vmem:[#allocation28_spill] sm:$0xff] %v7383_v24 }
  0x73   : > { %v879_v17 = vsub.f32 %v7360_v59, %v9442_v28  ;;  %v9762_v28 = vand.u32 4294901760, %v7383_v24  ;;  %v887_v33 = vand.u32 4294901760, %v886_v35  ;;  %v9768_v35 = vand.u32 4294901760, %v7218_v26 }
  0x75   : > { %v880_v42 = vand.u32 4294901760, %v879_v17  ;;  %v9767_v17 = vand.u32 4294901760, %v7215_v13 }
  0x77   : > { %v6299_v62 = vpack.c.bf16 %v887_v33, %v880_v42  ;;  %v7437_v58 = vpack.c.bf16 %v9768_v35, %v9767_v17  ;;  %v9771_v42 = vand.u32 4294901760, %v7255_v5  ;;  %v9777_v5 = vand.u32 4294901760, %v7285_v57 }
  0x78   : > { %v9784_v35 = vand.u32 4294901760, %v7343_v18 }
  0x79   : > { %6300 = vmatprep.subr.bf16.mxu1 %v6299_v62  ;;  %v9776_v62 = vand.u32 4294901760, %v7279_v1 }
  0x92   : > { %v350_v55 = vpop.permute.xlu1 %349  ;;  %v347_v61 = vpop.permute.xlu0 %346 }
  0x93   : > { %vm410_vm0 = vcmp.eq.s32.totalorder %v350_v55, %v7337_v50  ;;  %vm409_vm1 = vcmp.eq.s32.totalorder %v347_v61, %v7337_v50  ;;  %v774_v61 = vsub.f32 %v7383_v24, %v9762_v28 }
  0x94   : > { %vm7371_vm2 = vmpackc.low %vm410_vm0, %vm409_vm1  ;;  %v7400_v23 = vsel %vm409_vm1, 1.0, %v9474_v8  ;;  %v7431_v28 = vsel %vm410_vm0, 1.0, %v9474_v8 }
  0x95   : > { %v9753_v34 = vsel %vm7371_vm2, 4294967295, %v9752_v34  ;;  %9757 = vst [vmem:[#allocation29_spill] sm:$0xff] %v7400_v23  ;;  %9766 = vst [vmem:[#allocation33_spill] sm:$0xff] %v7431_v28 }
  0x96   : > { %9754 = vst [vmem:[#allocation26_spill] sm:$0xff] %v9753_v34  ;;  %v302_v10 = vpop.permute.xlu1 %301  ;;  %v299_v29 = vpop.permute.xlu0 %298 }
  0x97   : > { %vm394_vm3 = vcmp.eq.s32.totalorder %v302_v10, %v7337_v50  ;;  %vm393_vm4 = vcmp.eq.s32.totalorder %v299_v29, %v7337_v50  ;;  %v9759_v10 = vmov 0  ;;  %v767_v29 = vsub.f32 %v7378_v40, %v9453_v16 }
  0x98   : > { %v7403_v34 = vsel %vm393_vm4, 1.0, %v9474_v8  ;;  %vm7405_vm5 = vmpackc.low %vm394_vm3, %vm393_vm4  ;;  %v7418_v6 = vsel %vm394_vm3, 1.0, %v9474_v8  ;;  %v9764_v16 = vand.u32 4294901760, %v7181_v11 }
  0x99   : > { %9758 = vst [vmem:[#allocation30_spill] sm:$0xff] %v7403_v34  ;;  %v9760_v10 = vsel %vm7405_vm5, 4294967295, %v9759_v10  ;;  %v6807_v56 = vpack.i.bf16 %v7403_v34, %v7400_v23  ;;  %9763 = vst [vmem:[#allocation32_spill] sm:$0xff] %v7418_v6  ;;  %v768_v30 = vand.u32 4294901760, %v767_v29  ;;  %v6809_v11 = vpack.i.bf16 %v7418_v6, %v7431_v28 }
  0x9a   : > { %9761 = vst [vmem:[#allocation31_spill] sm:$0xff] %v9760_v10  ;;  %v305_v44 = vpop.permute.xlu1 %304  ;;  %v353_v7 = vpop.permute.xlu0 %352  ;;  %v9765_v10 = vand.u32 4294901760, %v7190_v19  ;;  %v9773_v29 = vmov 0 }
  0x9b   : > { %vm395_vm6 = vcmp.eq.s32.totalorder %v305_v44, %v7337_v50  ;;  %vm411_vm7 = vcmp.eq.s32.totalorder %v353_v7, %v7337_v50  ;;  %6808 = vxpose.xlu0.b32.start [1/16] (narrow) %v6807_v56, 8  ;;  %v9772_v56 = vand.u32 4294901760, %v7271_v15  ;;  %v7472_v15 = vpack.c.bf16 %v9777_v5, %v9776_v62 }
  0x9c   : > { %v7426_v36 = vpack.c.bf16 %v9765_v10, %v9764_v16  ;;  %v775_v16 = vand.u32 4294901760, %v774_v61  ;;  %v7445_v19 = vsel %vm395_vm6, 1.0, %v9474_v8  ;;  %v7450_v33 = vsel %vm411_vm7, 1.0, %v9474_v8 }
  0x9d   : > { %9769 = vst [vmem:[#allocation34_spill] sm:$0xff] %v7445_v19  ;;  %9770 = vst [vmem:[#allocation35_spill] sm:$0xff] %v7450_v33  ;;  %v7457_v55 = vpack.c.bf16 %v9772_v56, %v9771_v42  ;;  %v9778_v61 = vmov 0  ;;  %v9783_v7 = vand.u32 4294901760, %v7340_v4  ;;  %v9794_v62 = vmov 0 }
  0x9e   : > { %6260 = vmatprep.subr.bf16.mxu0 %v7426_v36  ;;  %v308_v13 = vpop.permute.xlu1 %307  ;;  %v356_v26 = vpop.permute.xlu0 %355  ;;  %v6301_v10 = vpack.c.bf16 %v775_v16, %v768_v30  ;;  %v6811_v30 = vpack.i.bf16 %v7445_v19, %v7450_v33  ;;  %v9786_v16 = vand.u32 4294901760, %v7348_v54  ;;  %v6303_v54 = vpack.c.bf16 %v7006_v48, %v7004_v47 }
  0x9f   : > { %6262 = vmatpush3.bf16.msra.mxu0 %v7437_v58  ;;  %vm396_vm8 = vcmp.eq.s32.totalorder %v308_v13, %v7337_v50  ;;  %vm412_vm9 = vcmp.eq.s32.totalorder %v356_v26, %v7337_v50  ;;  %6810 = vxpose.xlu0.b32.cont [2/16] (narrow) %v6809_v11, 8  ;;  %v7494_v11 = vpack.c.bf16 %v9784_v35, %v9783_v7  ;;  %v9787_v13 = vand.u32 4294901760, %v7351_v60 }
  0xa0   : > { %vm7463_vm10 = vmpackc.low %vm396_vm8, %vm395_vm6  ;;  %6264 = vmatprep.subr.bf16.mxu0 %v7457_v55  ;;  %6302 = vmatpush3.bf16.msra.mxu1 %v6301_v10  ;;  %v7483_v44 = vsel %vm396_vm8, 1.0, %v9474_v8  ;;  %v7486_v17 = vsel %vm412_vm9, 1.0, %v9474_v8  ;;  %v9791_v60 = vmov 0 }
  0xa1   : > { %v9774_v29 = vsel %vm7463_vm10, 4294967295, %v9773_v29  ;;  %vm7476_vm11 = vmpackc.low %vm412_vm9, %vm411_vm7  ;;  %9781 = vst [vmem:[#allocation38_spill] sm:$0xff] %v7483_v44  ;;  %6336 = vmatprep.subr.bf16.mxu1 %v7072_v22  ;;  %v7503_v26 = vpack.c.bf16 %v9787_v13, %v9786_v16  ;;  %v6813_v4 = vpack.i.bf16 %v7483_v44, %v7486_v17 }
  0xa2   : > { %9775 = vst [vmem:[#allocation36_spill] sm:$0xff] %v9774_v29  ;;  %v9779_v61 = vsel %vm7476_vm11, 4294967295, %v9778_v61  ;;  %9782 = vst [vmem:[#allocation39_spill] sm:$0xff] %v7486_v17  ;;  %v311_v1 = vpop.permute.xlu1 %310  ;;  %v359_v57 = vpop.permute.xlu0 %358  ;;  %v9817_v29 = vmov 0.0  }
  0xa3   : > { %9780 = vst [vmem:[#allocation37_spill] sm:$0xff] %v9779_v61  ;;  %6266 = vmatpush3.bf16.msra.mxu0 %v7472_v15  ;;  %9785 = vst [vmem:[#allocation40_spill] sm:$0xff] %v7494_v11  ;;  %vm397_vm12 = vcmp.eq.s32.totalorder %v311_v1, %v7337_v50  ;;  %vm413_vm13 = vcmp.eq.s32.totalorder %v359_v57, %v7337_v50  ;;  %6812 = vxpose.xlu0.b32.cont [3/16] (narrow) %v6811_v30, 8 }
  0xa4   : > { %6268 = vmatprep.subr.bf16.mxu0 %v7494_v11  ;;  %9788 = vst [vmem:[#allocation41_spill] sm:$0xff] %v7503_v26  ;;  %v7510_v18 = vsel %vm397_vm12, 1.0, %v9474_v8  ;;  %v7515_v42 = vsel %vm413_vm13, 1.0, %v9474_v8 }
  0xa5   : > { %9789 = vst [vmem:[#allocation42_spill] sm:$0xff] %v7510_v18  ;;  %9790 = vst [vmem:[#allocation43_spill] sm:$0xff] %v7515_v42  ;;  %v6815_v5 = vpack.i.bf16 %v7510_v18, %v7515_v42 }
  0xa6   : > { %v314_v56 = vpop.permute.xlu1 %313  ;;  %v362_v10 = vpop.permute.xlu0 %361 }
  0xa7   : > { %6270 = vmatpush3.bf16.msra.mxu0 %v7503_v26  ;;  %vm398_vm14 = vcmp.eq.s32.totalorder %v314_v56, %v7337_v50  ;;  %vm414_vm15 = vcmp.eq.s32.totalorder %v362_v10, %v7337_v50  ;;  %6814 = vxpose.xlu0.b32.cont [4/16] (narrow) %v6813_v4, 8 }
  0xa8   : > { %vm7524_vm0 = vmpackc.low %vm398_vm14, %vm397_vm12  ;;  %6304 = vmatprep.subr.bf16.mxu0 %v6303_v54  ;;  %v7537_v30 = vsel %vm398_vm14, 1.0, %v9474_v8  ;;  %v7540_v7 = vsel %vm414_vm15, 1.0, %v9474_v8  ;;  %v9801_v54 = vmov 0 }
  0xa9   : > { %v9792_v60 = vsel %vm7524_vm0, 4294967295, %v9791_v60  ;;  %vm7530_vm1 = vmpackc.low %vm414_vm15, %vm413_vm13  ;;  %9797 = vst [vmem:[#allocation46_spill] sm:$0xff] %v7537_v30  ;;  %v6817_v57 = vpack.i.bf16 %v7537_v30, %v7540_v7 }
  0xaa   : > { %9793 = vst [vmem:[#allocation44_spill] sm:$0xff] %v9792_v60  ;;  %v9795_v62 = vsel %vm7530_vm1, 4294967295, %v9794_v62  ;;  %9798 = vst [vmem:[#allocation47_spill] sm:$0xff] %v7540_v7  ;;  %v317_v1 = vpop.permute.xlu1 %316  ;;  %v365_v35 = vpop.permute.xlu0 %364 }
  0xab   : > { %9796 = vst [vmem:[#allocation45_spill] sm:$0xff] %v9795_v62  ;;  %vm399_vm3 = vcmp.eq.s32.totalorder %v317_v1, %v7337_v50  ;;  %vm415_vm4 = vcmp.eq.s32.totalorder %v365_v35, %v7337_v50  ;;  %6816 = vxpose.xlu0.b32.cont [5/16] (narrow) %v6815_v5, 8  ;;  %v9804_v5 = vmov 0 }
  0xac   : > { %v7547_v16 = vsel %vm399_vm3, 1.0, %v9474_v8  ;;  %v7550_v13 = vsel %vm415_vm4, 1.0, %v9474_v8 }
  0xad   : > { %9799 = vst [vmem:[#allocation48_spill] sm:$0xff] %v7547_v16  ;;  %9800 = vst [vmem:[#allocation49_spill] sm:$0xff] %v7550_v13  ;;  %v6819_v1 = vpack.i.bf16 %v7547_v16, %v7550_v13 }
  0xae   : > { %v320_v4 = vpop.permute.xlu1 %319  ;;  %v368_v56 = vpop.permute.xlu0 %367 }
  0xaf   : > { %vm400_vm6 = vcmp.eq.s32.totalorder %v320_v4, %v7337_v50  ;;  %vm416_vm7 = vcmp.eq.s32.totalorder %v368_v56, %v7337_v50  ;;  %6818 = vxpose.xlu0.b32.cont [6/16] (narrow) %v6817_v57, 8 }
  0xb0   : > { %vm7556_vm8 = vmpackc.low %vm400_vm6, %vm399_vm3  ;;  %v7567_v35 = vsel %vm400_vm6, 1.0, %v9474_v8  ;;  %v7570_v4 = vsel %vm416_vm7, 1.0, %v9474_v8 }
  0xb1   : > { %v9802_v54 = vsel %vm7556_vm8, 4294967295, %v9801_v54  ;;  %vm7560_vm9 = vmpackc.low %vm416_vm7, %vm415_vm4  ;;  %9807 = vst [vmem:[#allocation52_spill] sm:$0xff] %v7567_v35  ;;  %v6821_v10 = vpack.i.bf16 %v7567_v35, %v7570_v4 }
  0xb2   : > { %9803 = vst [vmem:[#allocation50_spill] sm:$0xff] %v9802_v54  ;;  %v9805_v5 = vsel %vm7560_vm9, 4294967295, %v9804_v5  ;;  %9808 = vst [vmem:[#allocation53_spill] sm:$0xff] %v7570_v4  ;;  %v323_v57 = vpop.permute.xlu1 %322  ;;  %v371_v56 = vpop.permute.xlu0 %370 }
  0xb3   : > { %9806 = vst [vmem:[#allocation51_spill] sm:$0xff] %v9805_v5  ;;  %vm401_vm12 = vcmp.eq.s32.totalorder %v323_v57, %v7337_v50  ;;  %vm417_vm13 = vcmp.eq.s32.totalorder %v371_v56, %v7337_v50  ;;  %6820 = vxpose.xlu0.b32.cont [7/16] (narrow) %v6819_v1, 8  ;;  %v9811_v57 = vmov 0  ;;  %v9814_v56 = vmov 0 }
  0xb4   : > { %v7577_v54 = vsel %vm401_vm12, 1.0, %v9474_v8  ;;  %v7580_v5 = vsel %vm417_vm13, 1.0, %v9474_v8 }
  0xb5   : > { %9809 = vst [vmem:[#allocation54_spill] sm:$0xff] %v7577_v54  ;;  %9810 = vst [vmem:[#allocation55_spill] sm:$0xff] %v7580_v5  ;;  %v6823_v8 = vpack.i.bf16 %v7577_v54, %v7580_v5 }
  0xb6   : > { %v326_v60 = vpop.permute.xlu1 %325  ;;  %v374_v62 = vpop.permute.xlu0 %373 }
  0xb7   : > { %vm402_vm14 = vcmp.eq.s32.totalorder %v326_v60, %v7337_v50  ;;  %vm418_vm15 = vcmp.eq.s32.totalorder %v374_v62, %v7337_v50  ;;  %6822 = vxpose.xlu0.b32.cont [8/16] (narrow) %v6821_v10, 8 }
  0xb8   : > { %vm7588_vm3 = vmpackc.low %vm402_vm14, %vm401_vm12  ;;  %v7599_v61 = vsel %vm402_vm14, 1.0, %v9817_v29  ;;  %v7602_v60 = vsel %vm418_vm15, 1.0, %v9817_v29 }
  0xb9   : > { %v9812_v57 = vsel %vm7588_vm3, 4294967295, %v9811_v57  ;;  %vm7592_vm4 = vmpackc.low %vm418_vm15, %vm417_vm13  ;;  %9818 = vst [vmem:[#allocation58_spill] sm:$0xff] %v7599_v61 }
  0xba   : > { %9813 = vst [vmem:[#allocation56_spill] sm:$0xff] %v9812_v57  ;;  %v9815_v56 = vsel %vm7592_vm4, 4294967295, %v9814_v56  ;;  %9819 = vst [vmem:[#allocation59_spill] sm:$0xff] %v7602_v60  ;;  %v329_v62 = vpop.permute.xlu1 %328  ;;  %v377_v10 = vpop.permute.xlu0 %376  ;;  %v9825_v57 = vmov 0 }
  0xbb   : > { %9816 = vst [vmem:[#allocation57_spill] sm:$0xff] %v9815_v56  ;;  %vm403_vm6 = vcmp.eq.s32.totalorder %v329_v62, %v7337_v50  ;;  %vm419_vm7 = vcmp.eq.s32.totalorder %v377_v10, %v7337_v50  ;;  %6824 = vxpose.xlu0.b32.cont [9/16] (narrow) %v6823_v8, 8  ;;  %v6825_v56 = vpack.i.bf16 %v7599_v61, %v7602_v60  ;;  %v9822_v8 = vmov 0 }
  0xbc   : > { %v7613_v48 = vsel %vm403_vm6, 1.0, %v9817_v29  ;;  %v7616_v47 = vsel %vm419_vm7, 1.0, %v9817_v29 }
  0xbd   : > { %9820 = vst [vmem:[#allocation60_spill] sm:$0xff] %v7613_v48  ;;  %9821 = vst [vmem:[#allocation61_spill] sm:$0xff] %v7616_v47  ;;  %v6827_v1 = vpack.i.bf16 %v7613_v48, %v7616_v47  ;;  %v7801_v43 = vsub.f32 %v7616_v47, %v7616_v47 }
  0xbe   : > { %v332_v22 = vpop.permute.xlu1 %331  ;;  %v380_v26 = vpop.permute.xlu0 %379 }
  0xbf   : > { %vm404_vm12 = vcmp.eq.s32.totalorder %v332_v22, %v7337_v50  ;;  %vm420_vm13 = vcmp.eq.s32.totalorder %v380_v26, %v7337_v50  ;;  %6826 = vxpose.xlu0.b32.cont [10/16] (narrow) %v6825_v56, 8  ;;  %9870 = vst [vmem:[#allocation98_spill] sm:$0xff] %v7801_v43 }
  0xc0   : > { %vm7622_vm14 = vmpackc.low %vm404_vm12, %vm403_vm6  ;;  %v7635_v62 = vsel %vm404_vm12, 1.0, %v9817_v29  ;;  %v7638_v22 = vsel %vm420_vm13, 1.0, %v9817_v29 }
  0xc1   : > { %v9823_v8 = vsel %vm7622_vm14, 4294967295, %v9822_v8  ;;  %vm7628_vm15 = vmpackc.low %vm420_vm13, %vm419_vm7  ;;  %9828 = vst [vmem:[#allocation64_spill] sm:$0xff] %v7635_v62 }
  0xc2   : > { %9824 = vst [vmem:[#allocation62_spill] sm:$0xff] %v9823_v8  ;;  %v9826_v57 = vsel %vm7628_vm15, 4294967295, %v9825_v57  ;;  %9829 = vst [vmem:[#allocation65_spill] sm:$0xff] %v7638_v22  ;;  %v335_v26 = vpop.permute.xlu1 %334  ;;  %v383_v56 = vpop.permute.xlu0 %382 }
  0xc3   : > { %9827 = vst [vmem:[#allocation63_spill] sm:$0xff] %v9826_v57  ;;  %vm405_vm6 = vcmp.eq.s32.totalorder %v335_v26, %v7337_v50  ;;  %vm421_vm14 = vcmp.eq.s32.totalorder %v383_v56, %v7337_v50  ;;  %6828 = vxpose.xlu0.b32.cont [11/16] (narrow) %v6827_v1, 8  ;;  %v6829_v57 = vpack.i.bf16 %v7635_v62, %v7638_v22  ;;  %v9832_v1 = vmov 0 }
  0xc4   : > { %v7649_v46 = vsel %vm405_vm6, 1.0, %v9817_v29  ;;  %v7652_v12 = vsel %vm421_vm14, 1.0, %v9817_v29  ;;  %v9835_v56 = vmov 0 }
  0xc5   : > { %9830 = vst [vmem:[#allocation66_spill] sm:$0xff] %v7649_v46  ;;  %9831 = vst [vmem:[#allocation67_spill] sm:$0xff] %v7652_v12  ;;  %v6831_v8 = vpack.i.bf16 %v7649_v46, %v7652_v12 }
  0xc6   : > { %v338_v9 = vpop.permute.xlu1 %337  ;;  %v386_v26 = vpop.permute.xlu0 %385 }
  0xc7   : > { %vm406_vm7 = vcmp.eq.s32.totalorder %v338_v9, %v7337_v50  ;;  %vm422_vm12 = vcmp.eq.s32.totalorder %v386_v26, %v7337_v50  ;;  %6830 = vxpose.xlu0.b32.cont [12/16] (narrow) %v6829_v57, 8 }
  0xc8   : > { %vm7656_vm13 = vmpackc.low %vm406_vm7, %vm405_vm6  ;;  %v7667_v10 = vsel %vm406_vm7, 1.0, %v9817_v29  ;;  %v7670_v40 = vsel %vm422_vm12, 1.0, %v9817_v29 }
  0xc9   : > { %v9833_v1 = vsel %vm7656_vm13, 4294967295, %v9832_v1  ;;  %vm7660_vm15 = vmpackc.low %vm422_vm12, %vm421_vm14  ;;  %9838 = vst [vmem:[#allocation70_spill] sm:$0xff] %v7667_v10  ;;  %v6833_v57 = vpack.i.bf16 %v7667_v10, %v7670_v40  ;;  %v7822_v47 = vsub.f32 %v7670_v40, %v7670_v40 }
  0xca   : > { %9834 = vst [vmem:[#allocation68_spill] sm:$0xff] %v9833_v1  ;;  %v9836_v56 = vsel %vm7660_vm15, 4294967295, %v9835_v56  ;;  %9839 = vst [vmem:[#allocation71_spill] sm:$0xff] %v7670_v40  ;;  %v341_v9 = vpop.permute.xlu1 %340  ;;  %v389_v26 = vpop.permute.xlu0 %388 }
  0xcb   : > { %9837 = vst [vmem:[#allocation69_spill] sm:$0xff] %v9836_v56  ;;  %vm407_vm6 = vcmp.eq.s32.totalorder %v341_v9, %v7337_v50  ;;  %vm423_vm3 = vcmp.eq.s32.totalorder %v389_v26, %v7337_v50  ;;  %6832 = vxpose.xlu0.b32.cont [13/16] (narrow) %v6831_v8, 8  ;;  %v9842_v9 = vmov 0  ;;  %v9845_v8 = vmov 0  ;;  %9875 = vst [vmem:[#allocation103_spill] sm:$0xff] %v7822_v47 }
  0xcc   : > { %v7677_v1 = vsel %vm407_vm6, 1.0, %v9817_v29  ;;  %v7680_v56 = vsel %vm423_vm3, 1.0, %v9817_v29 }
  0xcd   : > { %9840 = vst [vmem:[#allocation72_spill] sm:$0xff] %v7677_v1  ;;  %9841 = vst [vmem:[#allocation73_spill] sm:$0xff] %v7680_v56  ;;  %v6835_v26 = vpack.i.bf16 %v7677_v1, %v7680_v56 }
  0xce   : > { %v344_v24 = vpop.permute.xlu1 %343  ;;  %v392_v59 = vpop.permute.xlu0 %391 }
  0xcf   : > { %vm408_vm14 = vcmp.eq.s32.totalorder %v344_v24, %v7337_v50  ;;  %vm424_vm7 = vcmp.eq.s32.totalorder %v392_v59, %v7337_v50  ;;  %6834 = vxpose.xlu0.b32.cont [14/16] (narrow) %v6833_v57, 8  ;;  %v7704_v59 = vsub.f32 %v7403_v34, %v7403_v34  ;;  %v7708_v57 = vsub.f32 %v7400_v23, %v7400_v23 }
  0xd0   : > { %vm7684_vm12 = vmpackc.low %vm408_vm14, %vm407_vm6  ;;  %v7695_v3 = vsel %vm408_vm14, 1.0, %v9817_v29  ;;  %v7698_v0 = vsel %vm424_vm7, 1.0, %v9817_v29  ;;  %v7712_v50 = vsub.f32 %v7431_v28, %v7431_v28  ;;  %v7716_v29 = vsub.f32 %v7418_v6, %v7418_v6 }
  0xd1   : > { %v9843_v9 = vsel %vm7684_vm12, 4294967295, %v9842_v9  ;;  %vm7688_vm13 = vmpackc.low %vm424_vm7, %vm423_vm3  ;;  %9848 = vst [vmem:[#allocation76_spill] sm:$0xff] %v7695_v3  ;;  %v6837_v24 = vpack.i.bf16 %v7695_v3, %v7698_v0  ;;  %v7736_v28 = vsub.f32 %v7515_v42, %v7515_v42  ;;  %v7748_v23 = vsub.f32 %v7537_v30, %v7537_v30 }
  0xd2   : > { %9844 = vst [vmem:[#allocation74_spill] sm:$0xff] %v9843_v9  ;;  %v9846_v8 = vsel %vm7688_vm13, 4294967295, %v9845_v8  ;;  %9849 = vst [vmem:[#allocation77_spill] sm:$0xff] %v7698_v0  ;;  %v7728_v9 = vsub.f32 %v7445_v19, %v7445_v19  ;;  %v7756_v42 = vsub.f32 %v7570_v4, %v7570_v4  ;;  %v7774_v6 = vsub.f32 %v7567_v35, %v7567_v35 }
  0xd3   : > { %9847 = vst [vmem:[#allocation75_spill] sm:$0xff] %v9846_v8  ;;  %6836 = vxpose.xlu0.b32.cont [15/16] (narrow) %v6835_v26, 8  ;;  %9850 = vst [vmem:[#allocation78_spill] sm:$0xff] %v7704_v59  ;;  %v7720_v26 = vsub.f32 %v7450_v33, %v7450_v33  ;;  %v7732_v8 = vsub.f32 %v7483_v44, %v7483_v44  ;;  %v7740_v33 = vsub.f32 %v7540_v7, %v7540_v7  ;;  %vm9718_vm3 = vcmask 64512  }
  0xd4   : > { %9851 = vst [vmem:[#allocation79_spill] sm:$0xff] %v7708_v57  ;;  %9852 = vst [vmem:[#allocation80_spill] sm:$0xff] %v7712_v50  ;;  %v7752_v44 = vsub.f32 %v7550_v13, %v7550_v13  ;;  %v7783_v4 = vsub.f32 %v7580_v5, %v7580_v5  ;;  %v7787_v7 = vsub.f32 %v7602_v60, %v7602_v60  ;;  %v9883_v35 = vand.u32 4294901760, %v7712_v50 }
  0xd5   : > { %9853 = vst [vmem:[#allocation81_spill] sm:$0xff] %v7716_v29  ;;  %9854 = vst [vmem:[#allocation82_spill] sm:$0xff] %v7720_v26  ;;  %v7793_v30 = vsub.f32 %v7577_v54, %v7577_v54  ;;  %v7797_v13 = vsub.f32 %v7599_v61, %v7599_v61  ;;  %v7805_v34 = vsub.f32 %v7638_v22, %v7638_v22 }
  0xd6   : > { %9856 = vst [vmem:[#allocation84_spill] sm:$0xff] %v7728_v9  ;;  %9857 = vst [vmem:[#allocation85_spill] sm:$0xff] %v7732_v8  ;;  %v7810_v19 = vsub.f32 %v7613_v48, %v7613_v48  ;;  %v7814_v60 = vsub.f32 %v7635_v62, %v7635_v62  ;;  %v7818_v5 = vsub.f32 %v7652_v12, %v7652_v12  ;;  %v9882_v12 = vand.u32 4294901760, %v7708_v57 }
  0xd7   : > { %6838 = vxpose.xlu0.b32.end [16/16] (narrow) %v6837_v24, 8  ;;  %v7724_v24 = vsub.f32 %v7486_v17, %v7486_v17  ;;  %9858 = vst [vmem:[#allocation86_spill] sm:$0xff] %v7736_v28  ;;  %9859 = vst [vmem:[#allocation87_spill] sm:$0xff] %v7740_v33  ;;  %v7744_v17 = vsub.f32 %v7510_v18, %v7510_v18  ;;  %v7763_v18 = vsub.f32 %v7547_v16, %v7547_v16 }
  0xd8   : > { %9861 = vst [vmem:[#allocation89_spill] sm:$0xff] %v7748_v23  ;;  %9862 = vst [vmem:[#allocation90_spill] sm:$0xff] %v7752_v44  ;;  %v7826_v22 = vsub.f32 %v7649_v46, %v7649_v46  ;;  %v7830_v16 = vsub.f32 %v7667_v10, %v7667_v10  ;;  %v7834_v62 = vsub.f32 %v7680_v56, %v7680_v56  ;;  %v9888_v10 = vand.u32 4294901760, %v7720_v26  ;;  %v10033_v26 = vld [vmem:[#allocation43_spill] sm:$0xff] }
  0xd9   : > { %9855 = vst [vmem:[#allocation83_spill] sm:$0xff] %v7724_v24  ;;  %9860 = vst [vmem:[#allocation88_spill] sm:$0xff] %v7744_v17  ;;  %v7840_v40 = vsub.f32 %v7698_v0, %v7698_v0  ;;  %v7844_v46 = vsub.f32 %v7695_v3, %v7695_v3  ;;  %v7855_v0 = vsub.f32 %v7677_v1, %v7677_v1  ;;  %v9885_v1 = vand.u32 4294901760, %v7704_v59 }
  0xda   : > { %9863 = vst [vmem:[#allocation91_spill] sm:$0xff] %v7756_v42  ;;  %9864 = vst [vmem:[#allocation92_spill] sm:$0xff] %v7763_v18  ;;  %v7867_v2 = vpack.c.bf16 %v9883_v35, %v9882_v12  ;;  %v9886_v3 = vand.u32 4294901760, %v7716_v29  ;;  %v9889_v54 = vand.u32 4294901760, %v7724_v24  ;;  %v9891_v48 = vand.u32 4294901760, %v7728_v9 }
  0xdb   : > { %9865 = vst [vmem:[#allocation93_spill] sm:$0xff] %v7774_v6  ;;  %9866 = vst [vmem:[#allocation94_spill] sm:$0xff] %v7783_v4  ;;  %v9892_v56 = vand.u32 4294901760, %v7732_v8  ;;  %v9894_v12 = vand.u32 4294901760, %v7736_v28  ;;  %v9895_v35 = vand.u32 4294901760, %v7740_v33  ;;  %v1564_v24 = vsel %vm9718_vm3, %v10033_v26, 0 }
  0xdc   : > { %9867 = vst [vmem:[#allocation95_spill] sm:$0xff] %v7787_v7  ;;  %9868 = vst [vmem:[#allocation96_spill] sm:$0xff] %v7793_v30  ;;  %v7873_v11 = vpack.c.bf16 %v9886_v3, %v9885_v1  ;;  %v7879_v61 = vpack.c.bf16 %v9889_v54, %v9888_v10  ;;  %v9897_v3 = vand.u32 4294901760, %v7744_v17  ;;  %v9898_v1 = vand.u32 4294901760, %v7748_v23 }
  0xdd   : > { %9869 = vst [vmem:[#allocation97_spill] sm:$0xff] %v7797_v13  ;;  %9871 = vst [vmem:[#allocation99_spill] sm:$0xff] %v7805_v34  ;;  %v7885_v57 = vpack.c.bf16 %v9892_v56, %v9891_v48  ;;  %v9900_v10 = vand.u32 4294901760, %v7752_v44  ;;  %v9903_v56 = vand.u32 4294901760, %v7763_v18  ;;  %v9910_v54 = vand.u32 4294901760, %v7797_v13  ;;  %v9956_v18 = vld [vmem:[#allocation21_spill] sm:$0xff] }
  0xde   : > { %9872 = vst [vmem:[#allocation100_spill] sm:$0xff] %v7810_v19  ;;  %9873 = vst [vmem:[#allocation101_spill] sm:$0xff] %v7814_v60  ;;  %v9961_v44 = vld [vmem:[#allocation2_spill] sm:$0xff]  ;;  %v8319_v29 = vsub.f32 %v1564_v24, %v1564_v24 }
  0xdf   : > { %9874 = vst [vmem:[#allocation102_spill] sm:$0xff] %v7818_v5  ;;  %9876 = vst [vmem:[#allocation104_spill] sm:$0xff] %v7826_v22  ;;  %v9962_v17 = vand.u32 4294901760, %v9961_v44  ;;  %v9970_v44 = vand.u32 4294901760, %v7014_v52 }
  0xe0   : > { %9877 = vst [vmem:[#allocation105_spill] sm:$0xff] %v7830_v16  ;;  %9878 = vst [vmem:[#allocation106_spill] sm:$0xff] %v7834_v62 }
  0xe1   : > { %9879 = vst [vmem:[#allocation107_spill] sm:$0xff] %v7840_v40  ;;  %9880 = vst [vmem:[#allocation108_spill] sm:$0xff] %v7844_v46 }
  0xe2   : > { %9881 = vst [vmem:[#allocation109_spill] sm:$0xff] %v7855_v0  ;;  %9884 = vst [vmem:[#allocation110_spill] sm:$0xff] %v7867_v2  ;;  %v7891_v2 = vpack.c.bf16 %v9895_v35, %v9894_v12  ;;  %v9906_v35 = vand.u32 4294901760, %v7783_v4  ;;  %v9954_v4 = vld [vmem:[#allocation6_spill] sm:$0xff] }
  0xe3   : > { %9887 = vst [vmem:[#allocation111_spill] sm:$0xff] %v7873_v11  ;;  %9890 = vst [vmem:[#allocation112_spill] sm:$0xff] %v7879_v61  ;;  %v7897_v11 = vpack.c.bf16 %v9898_v1, %v9897_v3  ;;  %v9901_v61 = vand.u32 4294901760, %v7756_v42  ;;  %v9909_v1 = vand.u32 4294901760, %v7793_v30  ;;  %v9950_v30 = vld [vmem:[#allocation41_spill] sm:$0xff]  ;;  %v9963_v42 = vld [vmem:[#allocation3_spill] sm:$0xff] }
  0xe4   : > { %9893 = vst [vmem:[#allocation113_spill] sm:$0xff] %v7885_v57  ;;  %9896 = vst [vmem:[#allocation114_spill] sm:$0xff] %v7891_v2  ;;  %v9904_v57 = vand.u32 4294901760, %v7774_v6  ;;  %v9907_v2 = vand.u32 4294901760, %v7787_v7  ;;  %v9959_v6 = vld [vmem:[#allocation24_spill] sm:$0xff]  ;;  %v9964_v23 = vand.u32 4294901760, %v9963_v42 }
  0xe5   : > { %9899 = vst [vmem:[#allocation115_spill] sm:$0xff] %v7897_v11  ;;  %v7904_v48 = vpack.c.bf16 %v9901_v61, %v9900_v10  ;;  %v7922_v11 = vpack.c.bf16 %v9910_v54, %v9909_v1  ;;  %v9912_v61 = vand.u32 4294901760, %v7801_v43  ;;  %v9913_v10 = vand.u32 4294901760, %v7805_v34  ;;  %v9952_v34 = vld [vmem:[#allocation19_spill] sm:$0xff] }
  0xe6   : > { %v7910_v12 = vpack.c.bf16 %v9904_v57, %v9903_v56  ;;  %v7916_v3 = vpack.c.bf16 %v9907_v2, %v9906_v35  ;;  %v9915_v57 = vand.u32 4294901760, %v7810_v19  ;;  %v9916_v56 = vand.u32 4294901760, %v7814_v60  ;;  %v9942_v19 = vld [vmem:[#allocation12_spill] sm:$0xff]  ;;  %v9948_v60 = vld [vmem:[#allocation15_spill] sm:$0xff] }
  0xe7   : > { %9902 = vst [vmem:[#allocation116_spill] sm:$0xff] %v7904_v48  ;;  %9911 = vst [vmem:[#allocation119_spill] sm:$0xff] %v7922_v11  ;;  %v7928_v48 = vpack.c.bf16 %v9913_v10, %v9912_v61  ;;  %v9918_v2 = vand.u32 4294901760, %v7818_v5  ;;  %v9919_v35 = vand.u32 4294901760, %v7822_v47  ;;  %v9921_v54 = vand.u32 4294901760, %v7826_v22 }
  0xe8   : > { %9905 = vst [vmem:[#allocation117_spill] sm:$0xff] %v7910_v12  ;;  %9908 = vst [vmem:[#allocation118_spill] sm:$0xff] %v7916_v3  ;;  %v7934_v12 = vpack.c.bf16 %v9916_v56, %v9915_v57  ;;  %v9922_v1 = vand.u32 4294901760, %v7830_v16  ;;  %v9924_v61 = vand.u32 4294901760, %v7834_v62  ;;  %v9925_v10 = vand.u32 4294901760, %v7840_v40  ;;  %v9935_v62 = vld [vmem:[#allocation14_spill] sm:$0xff] }
  0xe9   : > { %9914 = vst [vmem:[#allocation120_spill] sm:$0xff] %v7928_v48  ;;  %v7940_v3 = vpack.c.bf16 %v9919_v35, %v9918_v2  ;;  %v9927_v57 = vand.u32 4294901760, %v7855_v0  ;;  %v9928_v56 = vand.u32 4294901760, %v7844_v46  ;;  %v9934_v46 = vld [vmem:[#allocation13_spill] sm:$0xff]  ;;  %v9939_v5 = vpack.c.bf16 %v7105_v41, %v7102_v39 }
  0xea   : > { %9917 = vst [vmem:[#allocation121_spill] sm:$0xff] %v7934_v12  ;;  %v7946_v11 = vpack.c.bf16 %v9922_v1, %v9921_v54  ;;  %v7952_v48 = vpack.c.bf16 %v9925_v10, %v9924_v61  ;;  %v9936_v40 = vld [vmem:[#allocation17_spill] sm:$0xff] }
  0xeb   : > { %9920 = vst [vmem:[#allocation122_spill] sm:$0xff] %v7940_v3  ;;  %v7958_v12 = vpack.c.bf16 %v9928_v56, %v9927_v57 }
  0xec   : > { %9923 = vst [vmem:[#allocation123_spill] sm:$0xff] %v7946_v11  ;;  %9926 = vst [vmem:[#allocation124_spill] sm:$0xff] %v7952_v48  ;;  %v9930_v48 = vld [vmem:[#allocation4_spill] sm:$0xff] }
  0xed   : > { %9929 = vst [vmem:[#allocation125_spill] sm:$0xff] %v7958_v12 }
 0x11b   : > { %v6839_v2 = vpop.trf.xlu0 }
 0x11c   : > { %v6843_v35 = vunpack.i.h.bf16 %v6839_v2  ;;  %v6840_v3 = vunpack.i.l.bf16 %v6839_v2 }
 0x11e   : > { %v7960_v22 = vand.u32 4294901760, %v6840_v3  ;;  %v7962_v16 = vand.u32 4294901760, %v6843_v35 }
 0x120   : > { %890 = vmatprep.mubr.f32.mxu1 %v7960_v22  ;;  %v650_v54 = vsub.f32 %v6840_v3, %v7960_v22  ;;  %v656_v1 = vsub.f32 %v6843_v35, %v7962_v16  ;;  %v6305_v3 = vpack.c.bf16 %v7011_v51, %v7008_v49  ;;  %v6307_v35 = vpack.c.bf16 %v7017_v53, %v7014_v52 }
 0x121   : > { %892 = vmatmul.mubr.f32.vlgmr.msra.gmra.mrb[0].mxu1 %v7962_v16 }
 0x122   : > { %6338 = vmatpush3.bf16.msra.mxu1 %v7086_v31  ;;  %v651_v61 = vand.u32 4294901760, %v650_v54  ;;  %v657_v10 = vand.u32 4294901760, %v656_v1 }
 0x123   : > { %6340 = vmatprep.subr.bf16.mxu1 %v7096_v37 }
 0x124   : > { %1134 = vmatprep.mubr.f32.mxu1 %v651_v61  ;;  %v652_v57 = vsub.f32 %v650_v54, %v651_v61  ;;  %v658_v56 = vsub.f32 %v656_v1, %v657_v10  ;;  %v9931_v61 = vld [vmem:[#allocation5_spill] sm:$0xff] }
 0x125   : > { %v6309_v11 = vpack.c.bf16 %v9931_v61, %v9930_v48 }
 0x126   : > { %6342 = vmatpush3.bf16.msra.mxu1 %v7120_v63  ;;  %v653_v2 = vand.u32 4294901760, %v652_v57  ;;  %v659_v12 = vand.u32 4294901760, %v658_v56  ;;  %v9932_v57 = vld [vmem:[#allocation7_spill] sm:$0xff]  ;;  %v9933_v56 = vld [vmem:[#allocation8_spill] sm:$0xff] }
 0x127   : > { %6344 = vmatprep.subr.bf16.mxu1 %v7165_v25  ;;  %v6311_v0 = vpack.c.bf16 %v9933_v56, %v9932_v57 }
 0x128   : > { %654 = vmatprep.mubr.f32.mxu0 %v653_v2  ;;  %v9938_v2 = vld [vmem:[#allocation10_spill] sm:$0xff] }
 0x129   : > { %660 = vmatmul.mubr.f32.vlgmr.msra.gmra.mrb[0].mxu0 %v659_v12  ;;  %v9937_v12 = vld [vmem:[#allocation9_spill] sm:$0xff] }
 0x12a   : > { %6306 = vmatpush3.bf16.msra.mxu0 %v6305_v3  ;;  %6346 = vmatpush3.bf16.msra.mxu1 %v7186_v14  ;;  %v6315_v3 = vpack.c.bf16 %v9938_v2, %v9937_v12 }
 0x12b   : > { %1027 = vmatprep.mubr.f32.mxu0 %v650_v54  ;;  %6308 = vmatprep.subr.bf16.mxu0 %v6307_v35  ;;  %v9940_v54 = vld [vmem:[#allocation18_spill] sm:$0xff]  ;;  %v9941_v35 = vld [vmem:[#allocation11_spill] sm:$0xff] }
 0x12c   : > { %6348 = vmatprep.subr.bf16.mxu1 %v9934_v46  ;;  %v6317_v47 = vpack.c.bf16 %v9942_v19, %v9941_v35 }
 0x12e   : > { %6310 = vmatpush3.bf16.msra.mxu0 %v6309_v11  ;;  %6350 = vmatpush3.bf16.msra.mxu1 %v9935_v62  ;;  %v9944_v11 = vpack.c.bf16 %v7211_v45, %v7201_v32 }
 0x12f   : > { %6312 = vmatprep.subr.bf16.mxu0 %v6311_v0  ;;  %6352 = vmatprep.subr.bf16.mxu1 %v9936_v40  ;;  %v9943_v0 = vpack.c.bf16 %v7196_v27, %v7193_v21 }
 0x132   : > { %6314 = vmatpush3.bf16.msra.mxu0 %v9939_v5  ;;  %6354 = vmatpush3.bf16.msra.mxu1 %v9940_v54  ;;  %v9945_v5 = vpack.c.bf16 %v7241_v20, %v7225_v38 }
 0x133   : > { %6316 = vmatprep.subr.bf16.mxu0 %v6315_v3  ;;  %6356 = vmatprep.subr.bf16.mxu1 %v7426_v36  ;;  %v9946_v3 = vld [vmem:[#allocation40_spill] sm:$0xff] }
 0x136   : > { %6318 = vmatpush3.bf16.msra.mxu0 %v6317_v47  ;;  %6358 = vmatpush3.bf16.msra.mxu1 %v7437_v58  ;;  %v9947_v47 = vld [vmem:[#allocation16_spill] sm:$0xff] }
 0x137   : > { %6320 = vmatprep.subr.bf16.mxu0 %v9943_v0  ;;  %6360 = vmatprep.subr.bf16.mxu1 %v7457_v55  ;;  %v9949_v43 = vpack.c.bf16 %v9947_v47, %v9948_v60  ;;  %v9951_v0 = vld [vmem:[#allocation20_spill] sm:$0xff] }
 0x138   : > { %v9953_v13 = vpack.c.bf16 %v9951_v0, %v9952_v34 }
 0x13a   : > { %6322 = vmatpush3.bf16.msra.mxu0 %v9944_v11  ;;  %6362 = vmatpush3.bf16.msra.mxu1 %v7472_v15  ;;  %v9955_v11 = vld [vmem:[#allocation22_spill] sm:$0xff] }
 0x13b   : > { %6324 = vmatprep.subr.bf16.mxu0 %v9945_v5  ;;  %6364 = vmatprep.subr.bf16.mxu1 %v9946_v3  ;;  %v9957_v7 = vpack.c.bf16 %v9955_v11, %v9956_v18  ;;  %v9958_v5 = vld [vmem:[#allocation25_spill] sm:$0xff] }
 0x13e   : > { %6326 = vmatpush3.bf16.msra.mxu0 %v9949_v43  ;;  %6366 = vmatpush3.bf16.msra.mxu1 %v9950_v30  ;;  %v9960_v43 = vpack.c.bf16 %v9958_v5, %v9959_v6 }
 0x13f   : > { %6328 = vmatprep.subr.bf16.mxu0 %v9953_v13  ;;  %6400 = vmatprep.subr.bf16.mxu1 %v9954_v4  ;;  %v6367_v13 = vpack.c.bf16 %v9964_v23, %v9962_v17  ;;  %v9965_v4 = vld [vmem:[#allocation28_spill] sm:$0xff]  ;;  %v9971_v23 = vand.u32 4294901760, %v7017_v53  ;;  %v9976_v53 = vand.u32 4294901760, %v7102_v39 }
 0x141   : > { %1138 = vmatmul.mubr.f32.vlgmr.msra.gmra.mrb[2].mxu1 %v657_v10  ;;  %v9966_v10 = vld [vmem:[#allocation27_spill] sm:$0xff]  ;;  %v6371_v17 = vpack.c.bf16 %v9971_v23, %v9970_v44 }
 0x142   : > { %6330 = vmatpush3.bf16.msra.mxu0 %v9957_v7  ;;  %6402 = vmatpush3.bf16.msra.mxu1 %v7086_v31  ;;  %v9967_v28 = vpack.c.bf16 %v9965_v4, %v9966_v10  ;;  %v9968_v31 = vand.u32 4294901760, %v7008_v49  ;;  %v9969_v7 = vand.u32 4294901760, %v7011_v51  ;;  %v9974_v51 = vand.u32 4294901760, %v9932_v57 }
 0x143   : > { %1408 = vmatprep.mubr.f32.mxu1 %v7960_v22  ;;  %6332 = vmatprep.subr.bf16.mxu0 %v9960_v43 }
 0x144   : > { %6404 = vmatprep.subr.bf16.mxu1 %v7096_v37  ;;  %v6369_v9 = vpack.c.bf16 %v9969_v7, %v9968_v31  ;;  %v9972_v37 = vand.u32 4294901760, %v9930_v48  ;;  %v9981_v48 = vand.u32 4294901760, %v9942_v19  ;;  %v9986_v19 = vand.u32 4294901760, %v7211_v45 }
 0x145   : > { %v9992_v45 = vand.u32 4294901760, %v9951_v0 }
 0x146   : > { %6334 = vmatpush3.bf16.msra.mxu0 %v9967_v28  ;;  %6406 = vmatpush3.bf16.msra.mxu1 %v7120_v63  ;;  %v9973_v63 = vand.u32 4294901760, %v9931_v61  ;;  %v9977_v28 = vand.u32 4294901760, %v7105_v41  ;;  %v9984_v61 = vand.u32 4294901760, %v7196_v27  ;;  %v9989_v27 = vand.u32 4294901760, %v9948_v60 }
 0x147   : > { %6368 = vmatprep.subr.bf16.mxu0 %v6367_v13  ;;  %6408 = vmatprep.subr.bf16.mxu1 %v7165_v25  ;;  %v9975_v25 = vand.u32 4294901760, %v9933_v56  ;;  %v9985_v56 = vand.u32 4294901760, %v7201_v32  ;;  %v9990_v32 = vand.u32 4294901760, %v9947_v47  ;;  %v9994_v60 = vand.u32 4294901760, %v9955_v11 }
 0x148   : > { %v6373_v49 = vpack.c.bf16 %v9973_v63, %v9972_v37  ;;  %v6377_v42 = vpack.c.bf16 %v9977_v28, %v9976_v53  ;;  %v9998_v13 = vand.u32 4294901760, %v9965_v4 }
 0x149   : > { %1030 = vmatmul.mubr.f32.vlgmr.msra.gmra.mrb[2].mxu0 %v656_v1  ;;  %v6375_v52 = vpack.c.bf16 %v9975_v25, %v9974_v51  ;;  %v9982_v1 = vld [vmem:[#allocation30_spill] sm:$0xff] }
 0x14a   : > { %6370 = vmatpush3.bf16.msra.mxu0 %v6369_v9  ;;  %1304 = vmatprep.mubr.f32.mxu0 %v7960_v22  ;;  %v9978_v22 = vand.u32 4294901760, %v9937_v12  ;;  %v1504_v41 = vsel %vm9718_vm3, %v9982_v1, 0  ;;  %v6385_v12 = vpack.c.bf16 %v9986_v19, %v9985_v56 }
 0x14b   : > { %6410 = vmatpush3.bf16.msra.mxu1 %v7186_v14  ;;  %6372 = vmatprep.subr.bf16.mxu0 %v6371_v17  ;;  %v9979_v14 = vand.u32 4294901760, %v9938_v2  ;;  %v9987_v2 = vand.u32 4294901760, %v7225_v38 }
 0x14c   : > { %6412 = vmatprep.subr.bf16.mxu1 %v9934_v46  ;;  %v9980_v46 = vand.u32 4294901760, %v9941_v35  ;;  %v6389_v35 = vpack.c.bf16 %v9990_v32, %v9989_v27 }
 0x14d   : > { %v6379_v9 = vpack.c.bf16 %v9979_v14, %v9978_v22 }
 0x14e   : > { %6374 = vmatpush3.bf16.msra.mxu0 %v6373_v49  ;;  %v6381_v39 = vpack.c.bf16 %v9981_v48, %v9980_v46 }
 0x14f   : > { %6414 = vmatpush3.bf16.msra.mxu1 %v9935_v62  ;;  %6376 = vmatprep.subr.bf16.mxu0 %v6375_v52  ;;  %v9983_v62 = vand.u32 4294901760, %v7193_v21  ;;  %v9988_v21 = vand.u32 4294901760, %v7241_v20 }
 0x150   : > { %6416 = vmatprep.subr.bf16.mxu1 %v9936_v40  ;;  %v8073_v40 = vsub.f32 %v1504_v41, %v1504_v41 }
 0x151   : > { %v6383_v57 = vpack.c.bf16 %v9984_v61, %v9983_v62  ;;  %v10001_v62 = vld [vmem:[#allocation34_spill] sm:$0xff] }
 0x152   : > { %6378 = vmatpush3.bf16.msra.mxu0 %v6377_v42  ;;  %v1510_v61 = vsel %vm9718_vm3, %v10001_v62, 0 }
 0x153   : > { %6418 = vmatpush3.bf16.msra.mxu1 %v9940_v54  ;;  %6380 = vmatprep.subr.bf16.mxu0 %v6379_v9  ;;  %v6387_v54 = vpack.c.bf16 %v9988_v21, %v9987_v2  ;;  %v10002_v2 = vld [vmem:[#allocation38_spill] sm:$0xff] }
 0x154   : > { %6420 = vmatprep.subr.bf16.mxu1 %v7426_v36  ;;  %v9651_v36 = vand.u32 4294901760, %v8073_v40  ;;  %v1513_v21 = vsel %vm9718_vm3, %v10002_v2, 0 }
 0x156   : > { %6382 = vmatpush3.bf16.msra.mxu0 %v6381_v39  ;;  %v1668_v20 = vsub.f32 %v8073_v40, %v9651_v36  ;;  %v10000_v39 = vld [vmem:[#allocation32_spill] sm:$0xff] }
 0x157   : > { %6422 = vmatpush3.bf16.msra.mxu1 %v7437_v58  ;;  %6384 = vmatprep.subr.bf16.mxu0 %v6383_v57  ;;  %v9991_v58 = vand.u32 4294901760, %v9952_v34  ;;  %v9995_v34 = vand.u32 4294901760, %v9959_v6  ;;  %v9642_v6 = vmov 5   ;;  %v1507_v41 = vsel %vm9718_vm3, %v10000_v39, 0  ;;  %v10027_v36 = vld [vmem:[#allocation76_spill] sm:$0xff] }
 0x158   : > { %6424 = vmatprep.subr.bf16.mxu1 %v7457_v55  ;;  %v9993_v55 = vand.u32 4294901760, %v9956_v18  ;;  %v1669_v43 = vand.u32 4294901760, %v1668_v20  ;;  %6844 = vset.pattern.permute.xlu1 %v9642_v6  ;;  %v6899_v57 = vmov 1966171168   ;;  %v8124_v19 = vsub.f32 %v1507_v41, %v1507_v41  ;;  %v10006_v20 = vld [vmem:[#allocation46_spill] sm:$0xff] }
 0x159   : > { %v6391_v38 = vpack.c.bf16 %v9992_v45, %v9991_v58  ;;  %v4574_v56 = vunpack.c.l.s4 %v6899_v57  ;;  %v10023_v6 = vld [vmem:[#allocation70_spill] sm:$0xff] }
 0x15a   : > { %6386 = vmatpush3.bf16.msra.mxu0 %v6385_v12  ;;  %v6393_v47 = vpack.c.bf16 %v9994_v60, %v9993_v55  ;;  %v8126_v12 = vsub.f32 %v1510_v61, %v1510_v61  ;;  %v9650_v45 = vand.u32 4294901760, %v8124_v19  ;;  %v1519_v55 = vsel %vm9718_vm3, %v10006_v20, 0 }
 0x15b   : > { %6426 = vmatpush3.bf16.msra.mxu1 %v7472_v15  ;;  %6388 = vmatprep.subr.bf16.mxu0 %v6387_v54  ;;  %v9996_v15 = vand.u32 4294901760, %v9958_v5  ;;  %v10003_v54 = vld [vmem:[#allocation42_spill] sm:$0xff]  ;;  %v4575_v32 = vunpack.c.0.s8 %v4574_v56 }
 0x15c   : > { %6428 = vmatprep.subr.bf16.mxu1 %v9946_v3  ;;  %v9997_v3 = vand.u32 4294901760, %v9966_v10  ;;  %v1516_v27 = vsel %vm9718_vm3, %v10003_v54, 0  ;;  %v9649_v60 = vand.u32 4294901760, %v8126_v12 }
 0x15d   : > { %v6395_v0 = vpack.c.bf16 %v9996_v15, %v9995_v34 }
 0x15e   : > { %6390 = vmatpush3.bf16.msra.mxu0 %v6389_v35  ;;  %v6397_v18 = vpack.c.bf16 %v9998_v13, %v9997_v3  ;;  %v10004_v35 = vlaneseq  ;;  %v10009_v3 = vld [vmem:[#allocation48_spill] sm:$0xff] }
 0x15f   : > { %6430 = vmatpush3.bf16.msra.mxu1 %v9950_v30  ;;  %6392 = vmatprep.subr.bf16.mxu0 %v6391_v38  ;;  %v8136_v38 = vsub.f32 %v1513_v21, %v1513_v21  ;;  %v1522_v13 = vsel %vm9718_vm3, %v10009_v3, 0 }
 0x160   : > { %v8133_v58 = vshrl.u32 %v10004_v35, 7 }
 0x162   : > { %1410 = vmatmul.mubr.f32.vlgmr.msra.gmra.mrb[4].mxu1 %v7962_v16  ;;  %6394 = vmatpush3.bf16.msra.mxu0 %v6393_v47  ;;  %10005 = vst [vmem:[#allocation5_spill] sm:$0xff] %v8133_v58  ;;  %v8141_v47 = vsub.f32 %v1516_v27, %v1516_v27  ;;  %v8144_v34 = vsub.s32 %v4575_v32, %v8133_v58  ;;  %v8207_v27 = vsub.s32 0, %v8133_v58 }
 0x163   : > { %5941 = vmatprep.mubr.f32.mxu1 %v1669_v43  ;;  %6396 = vmatprep.subr.bf16.mxu0 %v6395_v0  ;;  %v1678_v0 = vsub.f32 %v8124_v19, %v9650_v45  ;;  %v8149_v43 = vsub.f32 %v1519_v55, %v1519_v55 }
 0x164   : > { %10007 = vst [vmem:[#allocation7_spill] sm:$0xff] %v8144_v34  ;;  %10019 = vst [vmem:[#allocation18_spill] sm:$0xff] %v8207_v27 }
 0x165   : > { %10008 = vst [vmem:[#allocation8_spill] sm:$0xff] %v8149_v43 }
 0x166   : > { %6398 = vmatpush3.bf16.msra.mxu0 %v6397_v18 }
 0x169   : > { %1306 = vmatmul.mubr.f32.vlgmr.msra.gmra.mrb[4].mxu0 %v7962_v16 }
 0x16a   : > { %5991 = vmatprep.mubr.msk.f32.mxu0 %vm9718_vm3, %v9982_v1 }
 0x1f4   : > { %v5388_v30 = vpop.f32.mrb[0].mxu1 }
 0x1f5   : > { %v5389_v11 = vpop.f32.mrb[1].mxu1 }
 0x1f6   : > { %v5390_v5 = vadd.f32 %v5389_v11, %v5388_v30  ;;  %v9648_v30 = vand.u32 4294901760, %v8136_v38  ;;  %v10011_v11 = vld [vmem:[#allocation52_spill] sm:$0xff] }
 0x1fc   : > { %v5353_v31 = vpop.f32.mrb[0].mxu0 }
 0x1fd   : > { %v5354_v7 = vpop.f32.mrb[1].mxu0 }
 0x1fe   : > { %v5355_v10 = vadd.f32 %v5354_v7, %v5353_v31  ;;  %v10012_v31 = vld [vmem:[#allocation54_spill] sm:$0xff] }
 0x1ff   : > { %v1528_v7 = vsel %vm9718_vm3, %v10012_v31, 0 }
 0x200   : > { %v894_v44 = vadd.f32 %v5390_v5, %v5355_v10  ;;  %v1525_v5 = vsel %vm9718_vm3, %v10011_v11, 0  ;;  %v1688_v10 = vsub.f32 %v8126_v12, %v9649_v60 }
 0x214   : > { %v5458_v4 = vpop.f32.mrb[2].mxu1 }
 0x215   : > { %v5459_v23 = vpop.f32.mrb[3].mxu1 }
 0x216   : > { %v5460_v17 = vadd.f32 %v5459_v23, %v5458_v4  ;;  %v8168_v23 = vsub.f32 %v1522_v13, %v1522_v13  ;;  %v10020_v13 = vld [vmem:[#allocation64_spill] sm:$0xff] }
 0x218   : > { %10013 = vst [vmem:[#allocation14_spill] sm:$0xff] %v8168_v23 }
 0x21c   : > { %v5423_v37 = vpop.f32.mrb[2].mxu0 }
 0x21d   : > { %v5424_v63 = vpop.f32.mrb[3].mxu0 }
 0x21e   : > { %v5425_v49 = vadd.f32 %v5424_v63, %v5423_v37  ;;  %v9646_v37 = vand.u32 4294901760, %v8149_v43  ;;  %v8175_v63 = vsub.f32 %v1525_v5, %v1525_v5  ;;  %v1537_v5 = vsel %vm9718_vm3, %v10020_v13, 0 }
 0x220   : > { %v1032_v16 = vadd.f32 %v5425_v49, %v894_v44  ;;  %v9647_v44 = vand.u32 4294901760, %v8141_v47  ;;  %10015 = vst [vmem:[#allocation9_spill] sm:$0xff] %v8175_v63  ;;  %v8177_v49 = vsub.f32 %v1528_v7, %v1528_v7  ;;  %v1718_v57 = vsub.f32 %v8149_v43, %v9646_v37  ;;  %v10030_v37 = vld [vmem:[#allocation35_spill] sm:$0xff] }
 0x221   : > { %v9643_v56 = vand.u32 4294901760, %v8175_v63  ;;  %v1558_v33 = vsel %vm9718_vm3, %v10030_v37, 0 }
 0x222   : > { %v1140_v51 = vadd.f32 %v5460_v17, %v1032_v16  ;;  %v1679_v16 = vand.u32 4294901760, %v1678_v0  ;;  %v9644_v21 = vand.u32 4294901760, %v8177_v49 }
 0x235   : > { %v5528_v25 = vpop.f32.mrb[4].mxu1 }
 0x236   : > { %v5529_v52 = vpop.f32.mrb[5].mxu1 }
 0x237   : > { %v5530_v53 = vadd.f32 %v5529_v52, %v5528_v25 }
 0x23c   : > { %v5493_v28 = vpop.f32.mrb[4].mxu0 }
 0x23d   : > { %v5494_v42 = vpop.f32.mrb[5].mxu0 }
 0x23e   : > { %v5495_v22 = vadd.f32 %v5494_v42, %v5493_v28  ;;  %v1708_v28 = vsub.f32 %v8141_v47, %v9647_v44  ;;  %v10016_v42 = vld [vmem:[#allocation58_spill] sm:$0xff] }
 0x240   : > { %v1308_v14 = vadd.f32 %v5495_v22, %v1140_v51  ;;  %v1698_v51 = vsub.f32 %v8136_v38, %v9648_v30  ;;  %v1531_v22 = vsel %vm9718_vm3, %v10016_v42, 0 }
 0x241   : > { %v8210_v55 = vsub.f32 %v1531_v22, %v1531_v22  ;;  %v1748_v22 = vsub.f32 %v8177_v49, %v9644_v21 }
 0x242   : > { %v8117_v9 = vadd.f32 %v5530_v53, %v1308_v14  ;;  %v1689_v53 = vand.u32 4294901760, %v1688_v10  ;;  %v1699_v32 = vand.u32 4294901760, %v1698_v51  ;;  %v10021_v51 = vld [vmem:[#allocation66_spill] sm:$0xff] }
 0x244   : > { %9999 = vst [vmem:[#allocation4_spill] sm:$0xff] %v8117_v9  ;;  %v1495_v46 = vmax.f32 %v8117_v9, 1.0 }
 0x246   : > { %1498 = vperm.xlu1 %6844, %v1495_v46   ;;  %v9645_v46 = vand.u32 4294901760, %v8168_v23 }
 0x2c5   : > { %v1499_v48 = vpop.permute.xlu1 %1498 }
 0x2c6   : > { %6848 = vrcp.f32 %v1499_v48  ;;  %v10017_v48 = vld [vmem:[#allocation60_spill] sm:$0xff] }
 0x2c7   : > { %v1534_v41 = vsel %vm9718_vm3, %v10017_v48, 0 }
 0x2c8   : > { %v8212_v0 = vsub.f32 %v1534_v41, %v1534_v41  ;;  %v9652_v41 = vand.u32 4294901760, %v8210_v55 }
 0x2d0   : > { %v6849_v15 = vpop.eup %6848 }
 0x2d1   : > { %v8154_v18 = vmul.f32 %v6849_v15, %v8117_v9  ;;  %v1709_v15 = vand.u32 4294901760, %v1708_v28  ;;  %v1738_v28 = vsub.f32 %v8175_v63, %v9643_v56  ;;  %v1543_v56 = vsel %vm9718_vm3, %v10023_v6, 0 }
 0x2d2   : > { %v8255_v60 = vsub.f32 %v1543_v56, %v1543_v56 }
 0x2d3   : > { %10010 = vst [vmem:[#allocation13_spill] sm:$0xff] %v8154_v18  ;;  %v8166_v4 = vand.u32 4294901760, %v8154_v18  ;;  %v8172_v17 = vrot.slane %v8154_v18, %v8144_v34 }
 0x2d5   : > { %10014 = vst [vmem:[#allocation17_spill] sm:$0xff] %v8172_v17  ;;  %5939 = vmatprep.subr.mxu1 %v8166_v4  ;;  %v1987_v25 = vsub.f32 %v8154_v18, %v8166_v4  ;;  %v4587_v52 = vcombine.high %v8172_v17, %v8172_v17 }
 0x2d6   : > { %5940 = vmatpush3.msra.mxu1 %v8166_v4 }
 0x2d7   : > { %5942 = vmatmul.mubr.f32.vlgmr.msra.gmra.mrb[6].mxu1 %v1679_v16  ;;  %v8193_v14 = vand.u32 4294901760, %v1987_v25  ;;  %v8199_v61 = vrot.slane %v4587_v52, %v8144_v34  ;;  %v1728_v16 = vsub.f32 %v8168_v23, %v9645_v46  ;;  %v1540_v52 = vsel %vm9718_vm3, %v10021_v51, 0  ;;  %v10024_v46 = vld [vmem:[#allocation72_spill] sm:$0xff]  ;;  %v10042_v34 = vld [vmem:[#allocation59_spill] sm:$0xff] }
 0x2d8   : > { %5944 = vmatprep.mubr.f32.mxu1 %v1689_v53  ;;  %v1719_v53 = vand.u32 4294901760, %v1718_v57  ;;  %v9653_v57 = vand.u32 4294901760, %v8212_v0 }
 0x2d9   : > { %10018 = vst [vmem:[#allocation10_spill] sm:$0xff] %v8199_v61  ;;  %v1989_v35 = vsub.f32 %v1987_v25, %v8193_v14  ;;  %v4628_v7 = vrot.slane %v8199_v61, %v8207_v27  ;;  %v1729_v21 = vand.u32 4294901760, %v1728_v16  ;;  %v1758_v16 = vsub.f32 %v8210_v55, %v9652_v41 }
 0x2db   : > { %5945 = vmatmul.mubr.f32.gmra.mrb[8].mxu1 %v1699_v32  ;;  %v1990_v10 = vand.u32 4294901760, %v1989_v35  ;;  %v8230_v32 = vsub.f32 %v1537_v5, %v1537_v5  ;;  %v8233_v35 = vsub.f32 %v4628_v7, %v8154_v18  ;;  %v1546_v5 = vsel %vm9718_vm3, %v10024_v46, 0 }
 0x2dc   : > { %5947 = vmatprep.mubr.f32.mxu1 %v1709_v15  ;;  %v8236_v15 = vsub.f32 %v1540_v52, %v1540_v52  ;;  %v9654_v7 = vmov 1.0|1.0   ;;  %v10026_v52 = vld [vmem:[#allocation29_spill] sm:$0xff] }
 0x2dd   : > { %5989 = vmatprep.subr.mxu0 %v1990_v10  ;;  %6623 = vmatprep.subr.mxu1 %v1990_v10  ;;  %10022 = vst [vmem:[#allocation11_spill] sm:$0xff] %v8233_v35  ;;  %v1552_v44 = vsel %vm9718_vm3, %v10026_v52, 0  ;;  %v9660_v30 = vand.u32 4294901760, %v8230_v32  ;;  %v10036_v35 = vld [vmem:[#allocation49_spill] sm:$0xff] }
 0x2de   : > { %5990 = vmatpush3.msra.mxu0 %v1990_v10  ;;  %6624 = vmatpush3.msra.mxu1 %v1990_v10  ;;  %v1739_v10 = vand.u32 4294901760, %v1738_v28  ;;  %v1768_v28 = vsub.f32 %v8212_v0, %v9653_v57  ;;  %v8268_v56 = vsub.f32 %v1552_v44, %v1552_v44 }
 0x2df   : > { %5948 = vmatmul.mubr.f32.gmra.mrb[10].mxu1 %v1719_v53  ;;  %5992 = vmatmul.mubr.msk.f32.vlgmr.msra.gmra.mrb[6].mxu0 %vm9718_vm3, %v10000_v39  ;;  %v1749_v53 = vand.u32 4294901760, %v1748_v22  ;;  %v1549_v22 = vsel %vm9718_vm3, %v10027_v36, 0  ;;  %v1778_v57 = vsub.f32 %v8230_v32, %v9660_v30 }
 0x2e0   : > { %6039 = vmatprep.subr.mxu0 %v1987_v25  ;;  %6432 = vmatprep.subr.msk.bf16.mxu1 %vm7371_vm2, %v9654_v7  ;;  %v9667_v7 = vand.u32 4294901760, %v8255_v60  ;;  %v1769_v45 = vand.u32 4294901760, %v1768_v28 }
 0x2e1   : > { %5950 = vmatprep.mubr.f32.mxu1 %v1729_v21  ;;  %5994 = vmatprep.mubr.msk.f32.mxu0 %vm9718_vm3, %v10001_v62  ;;  %v8261_v21 = vsub.f32 %v1546_v5, %v1546_v5  ;;  %v1759_v5 = vand.u32 4294901760, %v1758_v16  ;;  %v1779_v28 = vand.u32 4294901760, %v1778_v57  ;;  %v10035_v57 = vld [vmem:[#allocation47_spill] sm:$0xff] }
 0x2e2   : > { %6040 = vmatpush3.msra.mxu0 %v1987_v25  ;;  %v10028_v25 = vld [vmem:[#allocation33_spill] sm:$0xff] }
 0x2e3   : > { %6089 = vmatprep.subr.mxu0 %v8166_v4  ;;  %5951 = vmatmul.mubr.f32.gmra.mrb[12].mxu1 %v1739_v10  ;;  %v1555_v41 = vsel %vm9718_vm3, %v10028_v25, 0  ;;  %v8278_v10 = vsub.f32 %v1549_v22, %v1549_v22  ;;  %v1798_v22 = vsub.f32 %v8255_v60, %v9667_v7 }
 0x2e4   : > { %5995 = vmatmul.mubr.msk.f32.gmra.mrb[8].mxu0 %vm9718_vm3, %v10002_v2  ;;  %5953 = vmatprep.mubr.f32.mxu1 %v1749_v53  ;;  %v10029_v53 = vand.u32 4294901760, %v8236_v15  ;;  %v8289_v30 = vsub.f32 %v1555_v41, %v1555_v41  ;;  %v8302_v41 = vsub.f32 %v1558_v33, %v1558_v33 }
 0x2e5   : > { %5997 = vmatprep.mubr.msk.f32.mxu0 %vm9718_vm3, %v10003_v54 }
 0x2e6   : > { %v1788_v44 = vsub.f32 %v8236_v15, %v10029_v53  ;;  %v10031_v53 = vld [vmem:[#allocation39_spill] sm:$0xff]  ;;  %v10038_v61 = vand.u32 4294901760, %v8302_v41 }
 0x2e7   : > { %5954 = vmatmul.mubr.f32.gmra.mrb[14].mxu1 %v1759_v5  ;;  %v9672_v5 = vand.u32 4294901760, %v8278_v10  ;;  %v1561_v58 = vsel %vm9718_vm3, %v10031_v53, 0 }
 0x2e8   : > { %5998 = vmatmul.mubr.msk.f32.gmra.mrb[10].mxu0 %vm9718_vm3, %v10006_v20  ;;  %5956 = vmatprep.mubr.f32.mxu1 %v1769_v45  ;;  %v1789_v8 = vand.u32 4294901760, %v1788_v44  ;;  %v10032_v45 = vand.u32 4294901760, %v8261_v21  ;;  %v8309_v7 = vsub.f32 %v1561_v58, %v1561_v58  ;;  %v1799_v44 = vand.u32 4294901760, %v1798_v22 }
 0x2e9   : > { %6000 = vmatprep.mubr.msk.f32.mxu0 %vm9718_vm3, %v10009_v3  ;;  %v1818_v33 = vsub.f32 %v8278_v10, %v9672_v5  ;;  %v1567_v58 = vsel %vm9718_vm3, %v10035_v57, 0  ;;  %v1570_v22 = vsel %vm9718_vm3, %v10036_v35, 0  ;;  %v10037_v5 = vand.u32 4294901760, %v8289_v30 }
 0x2ea   : > { %v1808_v16 = vsub.f32 %v8261_v21, %v10032_v45  ;;  %v10034_v45 = vand.u32 4294901760, %v8268_v56  ;;  %v1848_v27 = vsub.f32 %v8302_v41, %v10038_v61  ;;  %v8339_v18 = vsub.f32 %v1570_v22, %v1570_v22 }
 0x2eb   : > { %5957 = vmatmul.mubr.f32.gmra.mrb[16].mxu1 %v1779_v28 }
 0x2ec   : > { %6001 = vmatmul.mubr.msk.f32.gmra.mrb[12].mxu0 %vm9718_vm3, %v10011_v11  ;;  %5959 = vmatprep.mubr.f32.mxu1 %v1789_v8  ;;  %v1828_v28 = vsub.f32 %v8268_v56, %v10034_v45  ;;  %v1809_v59 = vand.u32 4294901760, %v1808_v16  ;;  %v1838_v45 = vsub.f32 %v8289_v30, %v10037_v5  ;;  %v1819_v16 = vand.u32 4294901760, %v1818_v33  ;;  %v10040_v5 = vld [vmem:[#allocation55_spill] sm:$0xff] }
 0x2ed   : > { %6003 = vmatprep.mubr.msk.f32.mxu0 %vm9718_vm3, %v10012_v31  ;;  %v1576_v24 = vsel %vm9718_vm3, %v10040_v5, 0  ;;  %v10044_v31 = vld [vmem:[#allocation61_spill] sm:$0xff]  ;;  %v10046_v3 = vand.u32 4294901760, %v8339_v18 }
 0x2ee   : > { %v1829_v8 = vand.u32 4294901760, %v1828_v28  ;;  %v1839_v33 = vand.u32 4294901760, %v1838_v45  ;;  %v10041_v28 = vand.u32 4294901760, %v8309_v7  ;;  %v8354_v9 = vsub.f32 %v1576_v24, %v1576_v24 }
 0x2ef   : > { %5960 = vmatmul.mubr.f32.gmra.mrb[18].mxu1 %v1799_v44  ;;  %v8334_v44 = vsub.f32 %v1567_v58, %v1567_v58  ;;  %v10043_v45 = vand.u32 4294901760, %v8319_v29  ;;  %v1582_v61 = vsel %vm9718_vm3, %v10044_v31, 0  ;;  %v1888_v20 = vsub.f32 %v8339_v18, %v10046_v3 }
 0x2f0   : > { %6004 = vmatmul.mubr.msk.f32.gmra.mrb[14].mxu0 %vm9718_vm3, %v10016_v42  ;;  %5962 = vmatprep.mubr.f32.mxu1 %v1809_v59  ;;  %v10039_v59 = vld [vmem:[#allocation53_spill] sm:$0xff]  ;;  %v1858_v58 = vsub.f32 %v8309_v7, %v10041_v28  ;;  %v9694_v42 = vand.u32 4294901760, %v8354_v9  ;;  %v8377_v54 = vsub.f32 %v1582_v61, %v1582_v61 }
 0x2f1   : > { %6041 = vmatprep.mubr.f32.mxu0 %v8073_v40  ;;  %v1573_v17 = vsel %vm9718_vm3, %v10039_v59, 0  ;;  %v1868_v28 = vsub.f32 %v8319_v29, %v10043_v45  ;;  %v1889_v62 = vand.u32 4294901760, %v1888_v20 }
 0x2f2   : > { %v8352_v22 = vsub.f32 %v1573_v17, %v1573_v17  ;;  %v1859_v24 = vand.u32 4294901760, %v1858_v58  ;;  %v10048_v58 = vld [vmem:[#allocation67_spill] sm:$0xff]  ;;  %v1908_v61 = vsub.f32 %v8354_v9, %v9694_v42 }
 0x2f3   : > { %5963 = vmatmul.mubr.f32.gmra.mrb[20].mxu1 %v1819_v16  ;;  %v1579_v16 = vsel %vm9718_vm3, %v10042_v34, 0  ;;  %v1588_v2 = vsel %vm9718_vm3, %v10048_v58, 0 }
 0x2f4   : > { %6042 = vmatmul.mubr.f32.vlgmr.msra.gmra.mrb[6].mxu0 %v8124_v19  ;;  %5965 = vmatprep.mubr.f32.mxu1 %v1829_v8  ;;  %v1849_v8 = vand.u32 4294901760, %v1848_v27  ;;  %v8366_v17 = vsub.f32 %v1579_v16, %v1579_v16  ;;  %v10045_v27 = vand.u32 4294901760, %v8334_v44  ;;  %v9693_v45 = vand.u32 4294901760, %v8352_v22  ;;  %v10047_v16 = vld [vmem:[#allocation65_spill] sm:$0xff] }
 0x2f5   : > { %6090 = vmatpush3.msra.mxu0 %v8166_v4  ;;  %6044 = vmatprep.mubr.f32.mxu0 %v8126_v12  ;;  %v8395_v1 = vsub.f32 %v1588_v2, %v1588_v2  ;;  %v1909_v42 = vand.u32 4294901760, %v1908_v61 }
 0x2f6   : > { %6139 = vmatprep.subr.mxu0 %v8193_v14  ;;  %v1878_v11 = vsub.f32 %v8334_v44, %v10045_v27  ;;  %v1898_v3 = vsub.f32 %v8352_v22, %v9693_v45  ;;  %v10051_v45 = vand.u32 4294901760, %v8366_v17 }
 0x2f7   : > { %5966 = vmatmul.mubr.f32.gmra.mrb[22].mxu1 %v1839_v33  ;;  %v1869_v33 = vand.u32 4294901760, %v1868_v28 }
 0x2f8   : > { %6045 = vmatmul.mubr.f32.gmra.mrb[8].mxu0 %v8136_v38  ;;  %5968 = vmatprep.mubr.f32.mxu1 %v1849_v8  ;;  %v1585_v8 = vsel %vm9718_vm3, %v10047_v16, 0  ;;  %v1879_v28 = vand.u32 4294901760, %v1878_v11  ;;  %v10050_v11 = vld [vmem:[#allocation73_spill] sm:$0xff]  ;;  %v1899_v20 = vand.u32 4294901760, %v1898_v3 }
 0x2f9   : > { %6047 = vmatprep.mubr.f32.mxu0 %v8141_v47 }
 0x2fb   : > { %5969 = vmatmul.mubr.f32.gmra.mrb[24].mxu1 %v1859_v24  ;;  %v8392_v24 = vsub.f32 %v1585_v8, %v1585_v8  ;;  %v1918_v8 = vsub.f32 %v8366_v17, %v10051_v45 }
 0x2fc   : > { %6048 = vmatmul.mubr.f32.gmra.mrb[10].mxu0 %v8149_v43  ;;  %5971 = vmatprep.mubr.f32.mxu1 %v1869_v33  ;;  %v10049_v33 = vld [vmem:[#allocation71_spill] sm:$0xff] }
 0x2fd   : > { %6050 = vmatprep.mubr.f32.mxu0 %v8168_v23  ;;  %v1591_v27 = vsel %vm9718_vm3, %v10049_v33, 0  ;;  %v1594_v23 = vsel %vm9718_vm3, %v10050_v11, 0  ;;  %v9701_v2 = vand.u32 4294901760, %v8392_v24  ;;  %v9697_v11 = vand.u32 4294901760, %v8395_v1 }
 0x2fe   : > { %v8407_v39 = vsub.f32 %v1591_v27, %v1591_v27  ;;  %v1919_v45 = vand.u32 4294901760, %v1918_v8 }
 0x2ff   : > { %5972 = vmatmul.mubr.f32.gmra.mrb[26].mxu1 %v1879_v28  ;;  %v10052_v28 = vand.u32 4294901760, %v8377_v54  ;;  %v1938_v27 = vsub.f32 %v8392_v24, %v9701_v2  ;;  %v10067_v2 = vld [vmem:[#allocation62_spill] sm:$0xff] }
 0x300   : > { %6051 = vmatmul.mubr.f32.gmra.mrb[12].mxu0 %v8175_v63  ;;  %5974 = vmatprep.mubr.f32.mxu1 %v1889_v62  ;;  %v8413_v63 = vsub.f32 %v1594_v23, %v1594_v23  ;;  %v10053_v62 = vld [vmem:[#allocation77_spill] sm:$0xff]  ;;  %v9700_v3 = vand.u32 4294901760, %v8407_v39  ;;  %vm10068_vm7 = vnez %v10067_v2  ;;  %v10073_v2 = vld [vmem:[#allocation68_spill] sm:$0xff] }
 0x301   : > { %6053 = vmatprep.mubr.f32.mxu0 %v8177_v49  ;;  %v1928_v43 = vsub.f32 %v8377_v54, %v10052_v28  ;;  %v1597_v33 = vsel %vm9718_vm3, %v10053_v62, 0  ;;  %v1948_v28 = vsub.f32 %v8395_v1, %v9697_v11 }
 0x302   : > { %v8423_v61 = vsub.f32 %v1597_v33, %v1597_v33  ;;  %v1958_v8 = vsub.f32 %v8407_v39, %v9700_v3  ;;  %v10065_v3 = vld [vmem:[#allocation63_spill] sm:$0xff] }
 0x303   : > { %5975 = vmatmul.mubr.f32.gmra.mrb[28].mxu1 %v1899_v20  ;;  %v1929_v23 = vand.u32 4294901760, %v1928_v43  ;;  %v9699_v20 = vand.u32 4294901760, %v8413_v63  ;;  %v1949_v43 = vand.u32 4294901760, %v1948_v28  ;;  %vm10066_vm14 = vnez %v10065_v3 }
 0x304   : > { %6054 = vmatmul.mubr.f32.gmra.mrb[14].mxu0 %v8210_v55  ;;  %5977 = vmatprep.mubr.f32.mxu1 %v1909_v42  ;;  %v1939_v42 = vand.u32 4294901760, %v1938_v27  ;;  %v9698_v33 = vand.u32 4294901760, %v8423_v61  ;;  %v10071_v3 = vand.u32 4294901760, %v7712_v50 }
 0x305   : > { %6056 = vmatprep.mubr.f32.mxu0 %v8212_v0  ;;  %v1968_v11 = vsub.f32 %v8413_v63, %v9699_v20  ;;  %v10063_v20 = vld [vmem:[#allocation56_spill] sm:$0xff] }
 0x306   : > { %v1978_v27 = vsub.f32 %v8423_v61, %v9698_v33  ;;  %vm10064_vm6 = vnez %v10063_v20  ;;  %v10069_v20 = vld [vmem:[#allocation79_spill] sm:$0xff] }
 0x307   : > { %5978 = vmatmul.mubr.f32.gmra.mrb[30].mxu1 %v1919_v45  ;;  %v1959_v45 = vand.u32 4294901760, %v1958_v8  ;;  %v10070_v33 = vand.u32 4294901760, %v10069_v20 }
 0x308   : > { %6057 = vmatmul.mubr.f32.gmra.mrb[16].mxu0 %v8230_v32  ;;  %5980 = vmatprep.mubr.f32.mxu1 %v1929_v23  ;;  %v1969_v23 = vand.u32 4294901760, %v1968_v11  ;;  %v1979_v28 = vand.u32 4294901760, %v1978_v27  ;;  %v10054_v11 = vmov 1.0|1.0  }
 0x309   : > { %6059 = vmatprep.mubr.f32.mxu0 %v8236_v15 }
 0x30b   : > { %5981 = vmatmul.mubr.f32.gmra.mrb[32].mxu1 %v1939_v42 }
 0x30c   : > { %6060 = vmatmul.mubr.f32.gmra.mrb[18].mxu0 %v8255_v60  ;;  %5983 = vmatprep.mubr.f32.mxu1 %v1949_v43  ;;  %v10077_v43 = vand.u32 4294901760, %v8124_v19  ;;  %v10080_v19 = vand.u32 4294901760, %v8136_v38  ;;  %v10088_v38 = vld [vmem:[#allocation9_spill] sm:$0xff] }
 0x30d   : > { %6062 = vmatprep.mubr.f32.mxu0 %v8261_v21 }
 0x30f   : > { %5984 = vmatmul.mubr.f32.gmra.mrb[34].mxu1 %v1959_v45 }
 0x310   : > { %6063 = vmatmul.mubr.f32.gmra.mrb[20].mxu0 %v8278_v10  ;;  %5986 = vmatprep.mubr.f32.mxu1 %v1969_v23  ;;  %v3934_v23 = vsub.f32 %v7712_v50, %v10071_v3  ;;  %v6857_v50 = vld [vmem:[%s6984_s23] sm:$0xff] }
 0x311   : > { %6065 = vmatprep.mubr.f32.mxu0 %v8268_v56 }
 0x312   : > { %v3935_v45 = vand.u32 4294901760, %v3934_v23  ;;  %v10079_v23 = vand.u32 4294901760, %v8126_v12  ;;  %v10083_v12 = vld [vmem:[#allocation8_spill] sm:$0xff] }
 0x313   : > { %5987 = vmatmul.mubr.f32.gmra.mrb[36].mxu1 %v1979_v28  ;;  %v3927_v28 = vsub.f32 %v10069_v20, %v10070_v33  ;;  %v10075_v33 = vand.u32 4294901760, %v8073_v40 }
 0x314   : > { %6066 = vmatmul.mubr.f32.gmra.mrb[22].mxu0 %v8289_v30  ;;  %6006 = vmatprep.mubr.msk.f32.mxu1 %vm9718_vm3, %v10017_v48 }
 0x315   : > { %6068 = vmatprep.mubr.f32.mxu0 %v8302_v41  ;;  %v3928_v3 = vand.u32 4294901760, %v3927_v28  ;;  %v10085_v28 = vld [vmem:[#allocation73_spill] sm:$0xff] }
 0x317   : > { %6007 = vmatmul.mubr.msk.f32.vlgmr.msra.gmra.mrb[16].mxu1 %vm9718_vm3, %v10020_v13  ;;  %v6463_v40 = vpack.c.bf16 %v3935_v45, %v3928_v3  ;;  %v10084_v45 = vand.u32 4294901760, %v10083_v12  ;;  %v10094_v12 = vand.u32 4294901760, %v8236_v15  ;;  %v10101_v15 = vand.u32 4294901760, %v8309_v7 }
 0x318   : > { %6069 = vmatmul.mubr.f32.gmra.mrb[24].mxu0 %v8309_v7  ;;  %6434 = vmatpush3.bf16.msk.msra.mxu1 %vm7405_vm5, %v10054_v11  ;;  %v10108_v7 = vand.u32 4294901760, %v8377_v54 }
 0x319   : > { %6009 = vmatprep.mubr.msk.f32.mxu1 %vm9718_vm3, %v10021_v51  ;;  %6071 = vmatprep.mubr.f32.mxu0 %v8319_v29 }
 0x31a   : > { %6436 = vmatprep.subr.msk.bf16.mxu1 %vm7476_vm11, %v10054_v11 }
 0x31b   : > { %6010 = vmatmul.mubr.msk.f32.gmra.mrb[18].mxu1 %vm9718_vm3, %v10023_v6 }
 0x31c   : > { %6072 = vmatmul.mubr.f32.gmra.mrb[26].mxu0 %v8334_v44  ;;  %6438 = vmatpush3.bf16.msk.msra.mxu1 %vm7463_vm10, %v10054_v11 }
 0x31d   : > { %6012 = vmatprep.mubr.msk.f32.mxu1 %vm9718_vm3, %v10024_v46  ;;  %6074 = vmatprep.mubr.f32.mxu0 %v8339_v18 }
 0x31e   : > { %6440 = vmatprep.subr.msk.bf16.mxu1 %vm7530_vm1, %v10054_v11 }
 0x31f   : > { %6013 = vmatmul.mubr.msk.f32.gmra.mrb[20].mxu1 %vm9718_vm3, %v10027_v36 }
 0x320   : > { %6075 = vmatmul.mubr.f32.gmra.mrb[28].mxu0 %v8352_v22  ;;  %6442 = vmatpush3.bf16.msk.msra.mxu1 %vm7524_vm0, %v10054_v11 }
 0x321   : > { %6015 = vmatprep.mubr.msk.f32.mxu1 %vm9718_vm3, %v10026_v52  ;;  %6077 = vmatprep.mubr.f32.mxu0 %v8354_v9 }
 0x322   : > { %6444 = vmatprep.subr.msk.bf16.mxu1 %vm7560_vm9, %v10054_v11 }
 0x323   : > { %6016 = vmatmul.mubr.msk.f32.gmra.mrb[22].mxu1 %vm9718_vm3, %v10028_v25 }
 0x324   : > { %6078 = vmatmul.mubr.f32.gmra.mrb[30].mxu0 %v8366_v17  ;;  %6446 = vmatpush3.bf16.msk.msra.mxu1 %vm7556_vm8, %v10054_v11 }
 0x325   : > { %6018 = vmatprep.mubr.msk.f32.mxu1 %vm9718_vm3, %v10030_v37  ;;  %6080 = vmatprep.mubr.f32.mxu0 %v8377_v54  ;;  %v10115_v54 = vld [vmem:[#allocation32_spill] sm:$0xff] }
 0x326   : > { %6448 = vmatprep.subr.msk.bf16.mxu1 %vm7592_vm4, %v10054_v11 }
 0x327   : > { %6019 = vmatmul.mubr.msk.f32.gmra.mrb[24].mxu1 %vm9718_vm3, %v10031_v53 }
 0x328   : > { %6081 = vmatmul.mubr.f32.gmra.mrb[32].mxu0 %v8392_v24  ;;  %6450 = vmatpush3.bf16.msk.msra.mxu1 %vm10064_vm6, %v10054_v11 }
 0x329   : > { %6021 = vmatprep.mubr.msk.f32.mxu1 %vm9718_vm3, %v10033_v26  ;;  %6083 = vmatprep.mubr.f32.mxu0 %v8395_v1 }
 0x32a   : > { %6452 = vmatprep.subr.msk.bf16.mxu1 %vm10066_vm14, %v10054_v11 }
 0x32b   : > { %6022 = vmatmul.mubr.msk.f32.gmra.mrb[26].mxu1 %vm9718_vm3, %v10035_v57 }
 0x32c   : > { %6084 = vmatmul.mubr.f32.gmra.mrb[34].mxu0 %v8407_v39  ;;  %6454 = vmatpush3.bf16.msk.msra.mxu1 %vm10068_vm7, %v10054_v11  ;;  %vm10074_vm7 = vnez %v10073_v2 }
 0x32d   : > { %6024 = vmatprep.mubr.msk.f32.mxu1 %vm9718_vm3, %v10036_v35  ;;  %6086 = vmatprep.mubr.f32.mxu0 %v8413_v63 }
 0x32e   : > { %6456 = vmatprep.subr.msk.bf16.mxu1 %vm7660_vm15, %v10054_v11 }
 0x32f   : > { %6025 = vmatmul.mubr.msk.f32.gmra.mrb[28].mxu1 %vm9718_vm3, %v10039_v59 }
 0x330   : > { %6087 = vmatmul.mubr.f32.gmra.mrb[36].mxu0 %v8423_v61  ;;  %6458 = vmatpush3.bf16.msk.msra.mxu1 %vm10074_vm7, %v10054_v11 }
 0x331   : > { %6027 = vmatprep.mubr.msk.f32.mxu1 %vm9718_vm3, %v10040_v5  ;;  %6091 = vmatprep.mubr.f32.mxu0 %v10075_v33  ;;  %v10086_v33 = vld [vmem:[#allocation14_spill] sm:$0xff] }
 0x332   : > { %6460 = vmatprep.subr.msk.bf16.mxu1 %vm7688_vm13, %v10054_v11  ;;  %v10087_v3 = vand.u32 4294901760, %v10086_v33  ;;  %v10096_v33 = vand.u32 4294901760, %v8261_v21  ;;  %v10103_v21 = vand.u32 4294901760, %v8334_v44  ;;  %v10110_v44 = vand.u32 4294901760, %v8395_v1  ;;  %v10117_v1 = vld [vmem:[#allocation38_spill] sm:$0xff] }
 0x333   : > { %6028 = vmatmul.mubr.msk.f32.gmra.mrb[30].mxu1 %vm9718_vm3, %v10042_v34  ;;  %vm10133_vm13 = vcmask 64512  }
 0x334   : > { %6092 = vmatmul.mubr.f32.vlgmr.msra.gmra.mrb[6].mxu0 %v10077_v43  ;;  %6462 = vmatpush3.bf16.msk.msra.mxu1 %vm7684_vm12, %v10054_v11  ;;  %v10082_v43 = vld [vmem:[#allocation71_spill] sm:$0xff]  ;;  %vm10134_vm7 = vmmov %vm10133_vm13 }
 0x335   : > { %6140 = vmatpush3.msra.mxu0 %v8193_v14  ;;  %6030 = vmatprep.mubr.msk.f32.mxu1 %vm9718_vm3, %v10044_v31  ;;  %v10081_v14 = vand.u32 4294901760, %v8141_v47  ;;  %v10090_v47 = vand.u32 4294901760, %v8177_v49  ;;  %v10097_v49 = vand.u32 4294901760, %v8278_v10  ;;  %v10104_v10 = vand.u32 4294901760, %v8339_v18  ;;  %vm10135_vm15 = vmmov %vm10134_vm7 }
 0x336   : > { %6094 = vmatprep.mubr.f32.mxu0 %v10079_v23  ;;  %6189 = vmatprep.subr.mxu0 %v8166_v4  ;;  %v10091_v23 = vand.u32 4294901760, %v8210_v55  ;;  %v10098_v55 = vand.u32 4294901760, %v8268_v56  ;;  %v10105_v56 = vand.u32 4294901760, %v8352_v22  ;;  %v10111_v18 = vand.u32 4294901760, %v8407_v39  ;;  %v10118_v39 = vld [vmem:[#allocation42_spill] sm:$0xff] }
 0x337   : > { %6464 = vmatprep.subr.bf16.mxu1 %v6463_v40  ;;  %6031 = vmatmul.mubr.msk.f32.gmra.mrb[32].mxu1 %vm9718_vm3, %v10047_v16  ;;  %v10089_v40 = vand.u32 4294901760, %v10088_v38  ;;  %v10112_v22 = vand.u32 4294901760, %v8413_v63  ;;  %v10119_v63 = vld [vmem:[#allocation46_spill] sm:$0xff] }
 0x338   : > { %6095 = vmatmul.mubr.f32.gmra.mrb[8].mxu0 %v10080_v19  ;;  %6033 = vmatprep.mubr.msk.f32.mxu1 %vm9718_vm3, %v10048_v58  ;;  %v10092_v19 = vand.u32 4294901760, %v8212_v0  ;;  %v10099_v0 = vand.u32 4294901760, %v8289_v30  ;;  %v10106_v30 = vand.u32 4294901760, %v8354_v9  ;;  %v10113_v9 = vand.u32 4294901760, %v8423_v61  ;;  %v10120_v61 = vld [vmem:[#allocation48_spill] sm:$0xff]  ;;  %v10122_v38 = vld [vmem:[#allocation54_spill] sm:$0xff] }
 0x339   : > { %6097 = vmatprep.mubr.f32.mxu0 %v10081_v14  ;;  %v10093_v14 = vand.u32 4294901760, %v8230_v32  ;;  %v10100_v32 = vand.u32 4294901760, %v8302_v41  ;;  %v10107_v41 = vand.u32 4294901760, %v8366_v17  ;;  %v10114_v17 = vld [vmem:[#allocation30_spill] sm:$0xff] }
 0x33b   : > { %6034 = vmatmul.mubr.msk.f32.gmra.mrb[34].mxu1 %vm9718_vm3, %v10082_v43 }
 0x33c   : > { %6098 = vmatmul.mubr.f32.gmra.mrb[10].mxu0 %v10084_v45  ;;  %6036 = vmatprep.mubr.msk.f32.mxu1 %vm9718_vm3, %v10085_v28  ;;  %v10095_v45 = vand.u32 4294901760, %v8255_v60  ;;  %v10102_v60 = vand.u32 4294901760, %v8319_v29  ;;  %v10109_v29 = vand.u32 4294901760, %v8392_v24  ;;  %v10116_v24 = vld [vmem:[#allocation34_spill] sm:$0xff] }
 0x33d   : > { %6100 = vmatprep.mubr.f32.mxu0 %v10087_v3  ;;  %v10121_v3 = vld [vmem:[#allocation52_spill] sm:$0xff] }
 0x33f   : > { %6037 = vmatmul.mubr.msk.f32.gmra.mrb[36].mxu1 %vm9718_vm3, %v10053_v62 }
 0x340   : > { %6101 = vmatmul.mubr.f32.gmra.mrb[12].mxu0 %v10089_v40 }
 0x341   : > { %6103 = vmatprep.mubr.f32.mxu0 %v10090_v47 }
 0x344   : > { %6104 = vmatmul.mubr.f32.gmra.mrb[14].mxu0 %v10091_v23 }
 0x345   : > { %6106 = vmatprep.mubr.f32.mxu0 %v10092_v19 }
 0x348   : > { %6107 = vmatmul.mubr.f32.gmra.mrb[16].mxu0 %v10093_v14 }
 0x349   : > { %6109 = vmatprep.mubr.f32.mxu0 %v10094_v12 }
 0x34c   : > { %6110 = vmatmul.mubr.f32.gmra.mrb[18].mxu0 %v10095_v45 }
 0x34d   : > { %6112 = vmatprep.mubr.f32.mxu0 %v10096_v33 }
 0x350   : > { %6113 = vmatmul.mubr.f32.gmra.mrb[20].mxu0 %v10097_v49 }
 0x351   : > { %6115 = vmatprep.mubr.f32.mxu0 %v10098_v55 }
 0x354   : > { %6116 = vmatmul.mubr.f32.gmra.mrb[22].mxu0 %v10099_v0 }
 0x355   : > { %6118 = vmatprep.mubr.f32.mxu0 %v10100_v32 }
 0x358   : > { %6119 = vmatmul.mubr.f32.gmra.mrb[24].mxu0 %v10101_v15 }
 0x359   : > { %6121 = vmatprep.mubr.f32.mxu0 %v10102_v60 }
 0x35c   : > { %6122 = vmatmul.mubr.f32.gmra.mrb[26].mxu0 %v10103_v21 }
 0x35d   : > { %6124 = vmatprep.mubr.f32.mxu0 %v10104_v10 }
 0x360   : > { %6125 = vmatmul.mubr.f32.gmra.mrb[28].mxu0 %v10105_v56 }
 0x361   : > { %6127 = vmatprep.mubr.f32.mxu0 %v10106_v30 }
 0x364   : > { %6128 = vmatmul.mubr.f32.gmra.mrb[30].mxu0 %v10107_v41 }
 0x365   : > { %6130 = vmatprep.mubr.f32.mxu0 %v10108_v7 }
 0x368   : > { %6131 = vmatmul.mubr.f32.gmra.mrb[32].mxu0 %v10109_v29 }
 0x369   : > { %6133 = vmatprep.mubr.f32.mxu0 %v10110_v44 }
 0x36c   : > { %6134 = vmatmul.mubr.f32.gmra.mrb[34].mxu0 %v10111_v18 }
 0x36d   : > { %6136 = vmatprep.mubr.f32.mxu0 %v10112_v22 }
 0x370   : > { %6137 = vmatmul.mubr.f32.gmra.mrb[36].mxu0 %v10113_v9 }
 0x371   : > { %6141 = vmatprep.mubr.msk.f32.mxu0 %vm9718_vm3, %v10114_v17 }
 0x374   : > { %6142 = vmatmul.mubr.msk.f32.vlgmr.msra.gmra.mrb[6].mxu0 %vm9718_vm3, %v10115_v54 }
 0x375   : > { %6190 = vmatpush3.msra.mxu0 %v8166_v4  ;;  %6144 = vmatprep.mubr.msk.f32.mxu0 %vm9718_vm3, %v10116_v24  ;;  %v10123_v4 = vld [vmem:[#allocation58_spill] sm:$0xff] }
 0x378   : > { %6145 = vmatmul.mubr.msk.f32.gmra.mrb[8].mxu0 %vm9718_vm3, %v10117_v1 }
 0x379   : > { %6147 = vmatprep.mubr.msk.f32.mxu0 %vm9718_vm3, %v10118_v39 }
 0x37c   : > { %6148 = vmatmul.mubr.msk.f32.gmra.mrb[10].mxu0 %vm9718_vm3, %v10119_v63 }
 0x37d   : > { %6150 = vmatprep.mubr.msk.f32.mxu0 %vm9718_vm3, %v10120_v61 }
 0x380   : > { %6151 = vmatmul.mubr.msk.f32.gmra.mrb[12].mxu0 %vm9718_vm3, %v10121_v3 }
 0x381   : > { %6153 = vmatprep.mubr.msk.f32.mxu0 %vm9718_vm3, %v10122_v38 }
 0x384   : > { %6154 = vmatmul.mubr.msk.f32.gmra.mrb[14].mxu0 %vm9718_vm3, %v10123_v4 }
 0x385   : > { %6156 = vmatprep.mubr.msk.f32.mxu0 %vm9718_vm3, %v10017_v48 }
 0x388   : > { %6157 = vmatmul.mubr.msk.f32.gmra.mrb[16].mxu0 %vm9718_vm3, %v10020_v13 }
 0x389   : > { %6159 = vmatprep.mubr.msk.f32.mxu0 %vm9718_vm3, %v10021_v51 }
 0x38c   : > { %6160 = vmatmul.mubr.msk.f32.gmra.mrb[18].mxu0 %vm9718_vm3, %v10023_v6 }
 0x38d   : > { %6162 = vmatprep.mubr.msk.f32.mxu0 %vm9718_vm3, %v10024_v46 }
 0x390   : > { %6163 = vmatmul.mubr.msk.f32.gmra.mrb[20].mxu0 %vm9718_vm3, %v10027_v36 }
 0x391   : > { %6165 = vmatprep.mubr.msk.f32.mxu0 %vm9718_vm3, %v10026_v52 }
 0x394   : > { %6166 = vmatmul.mubr.msk.f32.gmra.mrb[22].mxu0 %vm9718_vm3, %v10028_v25 }
 0x395   : > { %6168 = vmatprep.mubr.msk.f32.mxu0 %vm9718_vm3, %v10030_v37 }
 0x398   : > { %6169 = vmatmul.mubr.msk.f32.gmra.mrb[24].mxu0 %vm9718_vm3, %v10031_v53 }
 0x399   : > { %6171 = vmatprep.mubr.msk.f32.mxu0 %vm9718_vm3, %v10033_v26 }
 0x39c   : > { %6172 = vmatmul.mubr.msk.f32.gmra.mrb[26].mxu0 %vm9718_vm3, %v10035_v57 }
 0x39d   : > { %6174 = vmatprep.mubr.msk.f32.mxu0 %vm9718_vm3, %v10036_v35 }
 0x3a0   : > { %6175 = vmatmul.mubr.msk.f32.gmra.mrb[28].mxu0 %vm9718_vm3, %v10039_v59 }
 0x3a1   : > { %6177 = vmatprep.mubr.msk.f32.mxu0 %vm9718_vm3, %v10040_v5 }
 0x3a4   : > { %6178 = vmatmul.mubr.msk.f32.gmra.mrb[30].mxu0 %vm9718_vm3, %v10042_v34 }
 0x3a5   : > { %6180 = vmatprep.mubr.msk.f32.mxu0 %vm9718_vm3, %v10044_v31 }
 0x3a8   : > { %6181 = vmatmul.mubr.msk.f32.gmra.mrb[32].mxu0 %vm9718_vm3, %v10047_v16 }
 0x3a9   : > { %6183 = vmatprep.mubr.msk.f32.mxu0 %vm9718_vm3, %v10048_v58 }
 0x3aa   : > { %v8680_v40 = vpop.f32.mrb[6].mxu1 }
 0x3ab   : > { %v8682_v47 = vpop.f32.mrb[7].mxu1 }
 0x3ac   : > { %6184 = vmatmul.mubr.msk.f32.gmra.mrb[34].mxu0 %vm9718_vm3, %v10082_v43 }
 0x3ad   : > { %6186 = vmatprep.mubr.msk.f32.mxu0 %vm9718_vm3, %v10085_v28 }
 0x3ae   : > { %v8688_v23 = vpop.f32.mrb[8].mxu1 }
 0x3af   : > { %v8690_v19 = vpop.f32.mrb[9].mxu1 }
 0x3b0   : > { %6187 = vmatmul.mubr.msk.f32.gmra.mrb[36].mxu0 %vm9718_vm3, %v10053_v62 }
 0x3b1   : > { %6191 = vmatprep.mubr.msk.f32.mxu0 %vm9718_vm3, %v10114_v17 }
 0x3b2   : > { %v8696_v14 = vpop.f32.mrb[10].mxu1 }
 0x3b3   : > { %v8698_v12 = vpop.f32.mrb[11].mxu1 }
 0x3b4   : > { %6192 = vmatmul.mubr.msk.f32.vlgmr.msra.gmra.mrb[6].mxu0 %vm9718_vm3, %v10115_v54 }
 0x3b5   : > { %6194 = vmatprep.mubr.msk.f32.mxu0 %vm9718_vm3, %v10116_v24 }
 0x3b6   : > { %v8704_v45 = vpop.f32.mrb[12].mxu1 }
 0x3b7   : > { %v8706_v33 = vpop.f32.mrb[13].mxu1 }
 0x3b8   : > { %6195 = vmatmul.mubr.msk.f32.gmra.mrb[8].mxu0 %vm9718_vm3, %v10117_v1 }
 0x3b9   : > { %6197 = vmatprep.mubr.msk.f32.mxu0 %vm9718_vm3, %v10118_v39 }
 0x3ba   : > { %v8712_v49 = vpop.f32.mrb[14].mxu1 }
 0x3bb   : > { %v8714_v55 = vpop.f32.mrb[15].mxu1 }
 0x3bc   : > { %6198 = vmatmul.mubr.msk.f32.gmra.mrb[10].mxu0 %vm9718_vm3, %v10119_v63 }
 0x3bd   : > { %6200 = vmatprep.mubr.msk.f32.mxu0 %vm9718_vm3, %v10120_v61 }
 0x3c0   : > { %6201 = vmatmul.mubr.msk.f32.gmra.mrb[12].mxu0 %vm9718_vm3, %v10121_v3 }
 0x3c1   : > { %6203 = vmatprep.mubr.msk.f32.mxu0 %vm9718_vm3, %v10122_v38 }
 0x3c4   : > { %6204 = vmatmul.mubr.msk.f32.gmra.mrb[14].mxu0 %vm9718_vm3, %v10123_v4 }
 0x3c5   : > { %6206 = vmatprep.mubr.msk.f32.mxu0 %vm9718_vm3, %v10017_v48 }
 0x3c8   : > { %6207 = vmatmul.mubr.msk.f32.gmra.mrb[16].mxu0 %vm9718_vm3, %v10020_v13 }
 0x3c9   : > { %6209 = vmatprep.mubr.msk.f32.mxu0 %vm9718_vm3, %v10021_v51 }
 0x3cc   : > { %6210 = vmatmul.mubr.msk.f32.gmra.mrb[18].mxu0 %vm9718_vm3, %v10023_v6 }
 0x3cd   : > { %6212 = vmatprep.mubr.msk.f32.mxu0 %vm9718_vm3, %v10024_v46 }
 0x3d0   : > { %6213 = vmatmul.mubr.msk.f32.gmra.mrb[20].mxu0 %vm9718_vm3, %v10027_v36 }
 0x3d1   : > { %6215 = vmatprep.mubr.msk.f32.mxu0 %vm9718_vm3, %v10026_v52 }
 0x3d4   : > { %6216 = vmatmul.mubr.msk.f32.gmra.mrb[22].mxu0 %vm9718_vm3, %v10028_v25 }
 0x3d5   : > { %6218 = vmatprep.mubr.msk.f32.mxu0 %vm9718_vm3, %v10030_v37  ;;  %v6858_v37 = vld [vmem:[%s6984_s23 + $0x18] sm:$0xff] }
 0x3d8   : > { %6219 = vmatmul.mubr.msk.f32.gmra.mrb[24].mxu0 %vm9718_vm3, %v10031_v53 }
 0x3d9   : > { %6221 = vmatprep.mubr.msk.f32.mxu0 %vm9718_vm3, %v10033_v26 }
 0x3dc   : > { %6222 = vmatmul.mubr.msk.f32.gmra.mrb[26].mxu0 %vm9718_vm3, %v10035_v57 }
 0x3dd   : > { %6224 = vmatprep.mubr.msk.f32.mxu0 %vm9718_vm3, %v10036_v35 }
 0x3e0   : > { %6225 = vmatmul.mubr.msk.f32.gmra.mrb[28].mxu0 %vm9718_vm3, %v10039_v59 }
 0x3e1   : > { %6227 = vmatprep.mubr.msk.f32.mxu0 %vm9718_vm3, %v10040_v5 }
 0x3e4   : > { %6228 = vmatmul.mubr.msk.f32.gmra.mrb[30].mxu0 %vm9718_vm3, %v10042_v34  ;;  %v6856_v34 = vld [vmem:[%s6984_s23 + $0x8] sm:$0xff] }
 0x3e5   : > { %6230 = vmatprep.mubr.msk.f32.mxu0 %vm9718_vm3, %v10044_v31 }
 0x3e8   : > { %6231 = vmatmul.mubr.msk.f32.gmra.mrb[32].mxu0 %vm9718_vm3, %v10047_v16 }
 0x3e9   : > { %6233 = vmatprep.mubr.msk.f32.mxu0 %vm9718_vm3, %v10048_v58 }
 0x3ea   : > { %v8764_v0 = vpop.f32.mrb[16].mxu1 }
 0x3eb   : > { %v8766_v32 = vpop.f32.mrb[17].mxu1 }
 0x3ec   : > { %6234 = vmatmul.mubr.msk.f32.gmra.mrb[34].mxu0 %vm9718_vm3, %v10082_v43 }
 0x3ed   : > { %6236 = vmatprep.mubr.msk.f32.mxu0 %vm9718_vm3, %v10085_v28 }
 0x3ee   : > { %v8772_v15 = vpop.f32.mrb[18].mxu1 }
 0x3ef   : > { %v8774_v60 = vpop.f32.mrb[19].mxu1 }
 0x3f0   : > { %6237 = vmatmul.mubr.msk.f32.gmra.mrb[36].mxu0 %vm9718_vm3, %v10053_v62  ;;  %vm9727_vm3 = vcmask 39936  }
 0x3f2   : > { %v8778_v21 = vpop.f32.mrb[20].mxu1 }
 0x3f3   : > { %v8780_v10 = vpop.f32.mrb[21].mxu1 }
 0x3f6   : > { %v8782_v56 = vpop.f32.mrb[22].mxu1 }
 0x3f7   : > { %v8784_v30 = vpop.f32.mrb[23].mxu1 }
 0x3fa   : > { %v8786_v41 = vpop.f32.mrb[24].mxu1 }
 0x3fb   : > { %v8788_v7 = vpop.f32.mrb[25].mxu1 }
 0x3fe   : > { %v8790_v29 = vpop.f32.mrb[26].mxu1 }
 0x3ff   : > { %v8792_v44 = vpop.f32.mrb[27].mxu1 }
 0x402   : > { %v8794_v18 = vpop.f32.mrb[28].mxu1 }
 0x403   : > { %v8796_v22 = vpop.f32.mrb[29].mxu1 }
 0x406   : > { %v8798_v9 = vpop.f32.mrb[30].mxu1 }
 0x407   : > { %v8800_v2 = vpop.f32.mrb[31].mxu1 }
 0x40a   : > { %v8802_v27 = vpop.f32.mrb[32].mxu1 }
 0x40b   : > { %v8804_v8 = vpop.f32.mrb[33].mxu1 }
 0x40e   : > { %v8806_v42 = vpop.f32.mrb[34].mxu1 }
 0x40f   : > { %v8808_v11 = vpop.f32.mrb[35].mxu1 }
 0x412   : > { %v8810_v62 = vpop.f32.mrb[36].mxu1 }
 0x413   : > { %v8812_v28 = vpop.f32.mrb[37].mxu1 }
 0x487   : > { %v6193_v43 = vpop.f32.mrb[6].mxu0 }
 0x488   : > { %v6625_v58 = vadd.f32 %v6193_v43, %v8680_v40  ;;  %v3188_v16 = vpop.f32.mrb[7].mxu0 }
 0x489   : > { %v6626_v31 = vadd.f32 %v3188_v16, %v8682_v47 }
 0x48a   : > { %v3379_v20 = vsub.f32 %v6625_v58, %v6856_v34  ;;  %v6859_v58 = vld [vmem:[%s6984_s23 + $0x10] sm:$0xff] }
 0x48b   : > { %v3378_v5 = vsub.f32 %v6626_v31, %v6857_v50  ;;  %v6196_v59 = vpop.f32.mrb[8].mxu0 }
 0x48c   : > { %v6627_v35 = vadd.f32 %v6196_v59, %v8688_v23  ;;  %v3200_v57 = vpop.f32.mrb[9].mxu0  ;;  %v3411_v26 = vand.u32 2147483647, %v3379_v20 }
 0x48d   : > { %v6628_v53 = vadd.f32 %v3200_v57, %v8690_v19  ;;  %v3410_v40 = vand.u32 2147483647, %v3378_v5  ;;  %v6860_v5 = vld [vmem:[%s6984_s23 + $0x28] sm:$0xff] }
 0x48e   : > { %v3381_v25 = vsub.f32 %v6627_v35, %v6858_v37  ;;  %v3446_v43 = vsel %vm9727_vm3, %v3411_v26, 0.0 }
 0x48f   : > { %3447 = vadd.xlane.f32.xlu1 %v3446_v43  ;;  %v6199_v16 = vpop.f32.mrb[10].mxu0  ;;  %v3380_v59 = vsub.f32 %v6628_v53, %v6859_v58  ;;  %v3443_v20 = vsel %vm9727_vm3, %v3410_v40, 0.0  ;;  %v6861_v40 = vld [vmem:[%s6984_s23 + $0x20] sm:$0xff] }
 0x490   : > { %v6629_v34 = vadd.f32 %v6199_v16, %v8696_v14  ;;  %v3212_v50 = vpop.f32.mrb[11].mxu0  ;;  %v3413_v57 = vand.u32 2147483647, %v3381_v25 }
 0x491   : > { %v6630_v31 = vadd.f32 %v3212_v50, %v8698_v12  ;;  %v3412_v14 = vand.u32 2147483647, %v3380_v59 }
 0x492   : > { %v3383_v23 = vsub.f32 %v6629_v34, %v6860_v5  ;;  %v3452_v19 = vsel %vm9727_vm3, %v3413_v57, 0.0 }
 0x493   : > { %v6202_v47 = vpop.f32.mrb[12].mxu0  ;;  %3444 = vadd.xlane.f32.xlu1 %v3443_v20  ;;  %v3382_v16 = vsub.f32 %v6630_v31, %v6861_v40  ;;  %v6862_v20 = vld [vmem:[%s6984_s23 + $0x38] sm:$0xff] }
 0x494   : > { %v6631_v37 = vadd.f32 %v6202_v47, %v8704_v45  ;;  %v3224_v26 = vpop.f32.mrb[13].mxu0  ;;  %v3449_v45 = vsel %vm9727_vm3, %v3412_v14, 0.0  ;;  %v3415_v50 = vand.u32 2147483647, %v3383_v23  ;;  %v6863_v23 = vld [vmem:[%s6984_s23 + $0x30] sm:$0xff] }
 0x495   : > { %v6632_v35 = vadd.f32 %v3224_v26, %v8706_v33  ;;  %v3414_v47 = vand.u32 2147483647, %v3382_v16 }
 0x496   : > { %v3385_v57 = vsub.f32 %v6631_v37, %v6862_v20 }
 0x497   : > { %v6205_v12 = vpop.f32.mrb[14].mxu0  ;;  %3453 = vadd.xlane.f32.xlu1 %v3452_v19  ;;  %v3455_v19 = vsel %vm9727_vm3, %v3414_v47, 0.0 }
 0x498   : > { %v6633_v53 = vadd.f32 %v6205_v12, %v8712_v49  ;;  %v3236_v43 = vpop.f32.mrb[15].mxu0  ;;  %v3458_v49 = vsel %vm9727_vm3, %v3415_v50, 0.0 }
 0x499   : > { %v6634_v25 = vadd.f32 %v3236_v43, %v8714_v55 }
 0x49b   : > { %v6208_v33 = vpop.f32.mrb[16].mxu0  ;;  %3450 = vadd.xlane.f32.xlu1 %v3449_v45 }
 0x49c   : > { %v6635_v34 = vadd.f32 %v6208_v33, %v8764_v0  ;;  %v3248_v58 = vpop.f32.mrb[17].mxu0  ;;  %v3384_v0 = vsub.f32 %v6632_v35, %v6863_v23 }
 0x49d   : > { %v6636_v59 = vadd.f32 %v3248_v58, %v8766_v32  ;;  %v3417_v32 = vand.u32 2147483647, %v3385_v57 }
 0x49e   : > { %v3416_v16 = vand.u32 2147483647, %v3384_v0 }
 0x49f   : > { %v6211_v55 = vpop.f32.mrb[18].mxu0  ;;  %3459 = vadd.xlane.f32.xlu1 %v3458_v49 }
 0x4a0   : > { %v8839_v31 = vadd.f32 %v6211_v55, %v8772_v15  ;;  %v3260_v26 = vpop.f32.mrb[19].mxu0  ;;  %v6864_v15 = vld [vmem:[%s6984_s23 + $0x48] sm:$0xff] }
 0x4a1   : > { %v8842_v5 = vadd.f32 %v3260_v26, %v8774_v60  ;;  %v3387_v40 = vsub.f32 %v6633_v53, %v6864_v15  ;;  %v3464_v60 = vsel %vm9727_vm3, %v3417_v32, 0.0 }
 0x4a3   : > { %v6214_v37 = vpop.f32.mrb[20].mxu0  ;;  %3456 = vadd.xlane.f32.xlu1 %v3455_v19  ;;  %v3419_v20 = vand.u32 2147483647, %v3387_v40  ;;  %v6867_v19 = vld [vmem:[%s6984_s23 + $0x50] sm:$0xff] }
 0x4a4   : > { %v8847_v14 = vadd.f32 %v6214_v37, %v8778_v21  ;;  %v3272_v12 = vpop.f32.mrb[21].mxu0  ;;  %v6865_v21 = vld [vmem:[%s6984_s23 + $0x40] sm:$0xff]  ;;  %v3388_v32 = vsub.f32 %v6636_v59, %v6867_v19 }
 0x4a5   : > { %v8850_v43 = vadd.f32 %v3272_v12, %v8780_v10  ;;  %v3386_v58 = vsub.f32 %v6634_v25, %v6865_v21  ;;  %v3461_v10 = vsel %vm9727_vm3, %v3416_v16, 0.0  ;;  %v6869_v16 = vld [vmem:[%s6984_s23 + $0xb8] sm:$0xff] }
 0x4a6   : > { %v3420_v59 = vand.u32 2147483647, %v3388_v32 }
 0x4a7   : > { %v6217_v35 = vpop.f32.mrb[22].mxu0  ;;  %3465 = vadd.xlane.f32.xlu1 %v3464_v60  ;;  %v3418_v26 = vand.u32 2147483647, %v3386_v58 }
 0x4a8   : > { %v8855_v45 = vadd.f32 %v6217_v35, %v8782_v56  ;;  %v3284_v50 = vpop.f32.mrb[23].mxu0  ;;  %v6866_v56 = vld [vmem:[%s6984_s23 + $0x58] sm:$0xff] }
 0x4a9   : > { %v8858_v33 = vadd.f32 %v3284_v50, %v8784_v30  ;;  %v3389_v55 = vsub.f32 %v6635_v34, %v6866_v56  ;;  %v3470_v30 = vsel %vm9727_vm3, %v3419_v20, 0.0 }
 0x4ab   : > { %v6220_v53 = vpop.f32.mrb[24].mxu0  ;;  %3462 = vadd.xlane.f32.xlu1 %v3461_v10  ;;  %v3421_v37 = vand.u32 2147483647, %v3389_v55 }
 0x4ac   : > { %v8863_v57 = vadd.f32 %v6220_v53, %v8786_v41  ;;  %v3296_v49 = vpop.f32.mrb[25].mxu0 }
 0x4ad   : > { %v8866_v47 = vadd.f32 %v3296_v49, %v8788_v7  ;;  %v3467_v7 = vsel %vm9727_vm3, %v3418_v26, 0.0  ;;  %v3476_v35 = vsel %vm9727_vm3, %v3421_v37, 0.0 }
 0x4af   : > { %v6223_v25 = vpop.f32.mrb[26].mxu0  ;;  %3471 = vadd.xlane.f32.xlu1 %v3470_v30  ;;  %v6871_v30 = vld [vmem:[%s6984_s23 + $0x78] sm:$0xff] }
 0x4b0   : > { %v8871_v23 = vadd.f32 %v6223_v25, %v8790_v29  ;;  %v3308_v0 = vpop.f32.mrb[27].mxu0  ;;  %v6868_v29 = vld [vmem:[%s6984_s23 + $0x68] sm:$0xff] }
 0x4b1   : > { %v8874_v41 = vadd.f32 %v3308_v0, %v8792_v44  ;;  %v3391_v60 = vsub.f32 %v8839_v31, %v6868_v29  ;;  %v3473_v31 = vsel %vm9727_vm3, %v3420_v59, 0.0 }
 0x4b3   : > { %v6226_v34 = vpop.f32.mrb[28].mxu0  ;;  %3468 = vadd.xlane.f32.xlu1 %v3467_v7  ;;  %v3423_v49 = vand.u32 2147483647, %v3391_v60  ;;  %v6872_v7 = vld [vmem:[%s6984_s23 + $0x70] sm:$0xff] }
 0x4b4   : > { %v6647_v12 = vadd.f32 %v6226_v34, %v8794_v18  ;;  %v3320_v15 = vpop.f32.mrb[29].mxu0 }
 0x4b5   : > { %v8880_v40 = vadd.f32 %v3320_v15, %v8796_v22  ;;  %v6870_v22 = vld [vmem:[%s6984_s23 + $0x60] sm:$0xff]  ;;  %v3482_v26 = vsel %vm9727_vm3, %v3423_v49, 0.0 }
 0x4b6   : > { %v3401_v44 = vsub.f32 %v6647_v12, %v6869_v16  ;;  %v3390_v20 = vsub.f32 %v8842_v5, %v6870_v22  ;;  %v3393_v5 = vsub.f32 %v8847_v14, %v6871_v30 }
 0x4b7   : > { %v6229_v50 = vpop.f32.mrb[30].mxu0  ;;  %3477 = vadd.xlane.f32.xlu1 %v3476_v35  ;;  %v6875_v35 = vld [vmem:[%s6984_s23 + $0xf8] sm:$0xff] }
 0x4b8   : > { %v8887_v21 = vadd.f32 %v6229_v50, %v8798_v9  ;;  %v3332_v58 = vpop.f32.mrb[31].mxu0  ;;  %v3433_v18 = vand.u32 2147483647, %v3401_v44  ;;  %v3422_v25 = vand.u32 2147483647, %v3390_v20  ;;  %v6877_v20 = vld [vmem:[%s6984_s23 + $0x80] sm:$0xff] }
 0x4b9   : > { %v8890_v10 = vadd.f32 %v3332_v58, %v8800_v2  ;;  %v3425_v12 = vand.u32 2147483647, %v3393_v5 }
 0x4ba   : > { %v3512_v53 = vsel %vm9727_vm3, %v3433_v18, 0.0  ;;  %v3479_v14 = vsel %vm9727_vm3, %v3422_v25, 0.0  ;;  %v6876_v18 = vld [vmem:[%s6984_s23 + $0xf0] sm:$0xff] }
 0x4bb   : > { %v6232_v56 = vpop.f32.mrb[32].mxu0  ;;  %3474 = vadd.xlane.f32.xlu1 %v3473_v31  ;;  %3513 = vadd.xlane.f32.xlu0 %v3512_v53  ;;  %v3488_v50 = vsel %vm9727_vm3, %v3425_v12, 0.0 }
 0x4bc   : > { %v8897_v9 = vadd.f32 %v6232_v56, %v8802_v27  ;;  %v3344_v55 = vpop.f32.mrb[33].mxu0  ;;  %v3392_v27 = vsub.f32 %v8850_v43, %v6872_v7  ;;  %v6874_v43 = vld [vmem:[%s6984_s23 + $0x88] sm:$0xff]  ;;  %v6878_v56 = vld [vmem:[%s6984_s23 + $0x98] sm:$0xff] }
 0x4bd   : > { %v8900_v2 = vadd.f32 %v3344_v55, %v8804_v8  ;;  %v6873_v8 = vld [vmem:[%s6984_s23 + $0xe8] sm:$0xff]  ;;  %v3397_v55 = vsub.f32 %v8863_v57, %v6878_v56 }
 0x4be   : > { %v3424_v44 = vand.u32 2147483647, %v3392_v27 }
 0x4bf   : > { %v6235_v0 = vpop.f32.mrb[34].mxu0  ;;  %3483 = vadd.xlane.f32.xlu1 %v3482_v26 }
 0x4c0   : > { %v6653_v19 = vadd.f32 %v6235_v0, %v8806_v42  ;;  %v3356_v32 = vpop.f32.mrb[35].mxu0  ;;  %v3485_v31 = vsel %vm9727_vm3, %v3424_v44, 0.0 }
 0x4c1   : > { %v8909_v37 = vadd.f32 %v3356_v32, %v8808_v11  ;;  %v3395_v11 = vsub.f32 %v8855_v45, %v6874_v43  ;;  %v6880_v32 = vld [vmem:[%s6984_s23 + $0xa8] sm:$0xff] }
 0x4c2   : > { %v3407_v34 = vsub.f32 %v6653_v19, %v6873_v8  ;;  %v3429_v19 = vand.u32 2147483647, %v3397_v55  ;;  %v3399_v57 = vsub.f32 %v8871_v23, %v6880_v32  ;;  %v6881_v8 = vld [vmem:[%s6984_s23 + $0xa0] sm:$0xff]  ;;  %v6883_v23 = vld [vmem:[%s6984_s23 + $0xc8] sm:$0xff] }
 0x4c3   : > { %v6238_v15 = vpop.f32.mrb[36].mxu0  ;;  %3480 = vadd.xlane.f32.xlu1 %v3479_v14  ;;  %v3427_v53 = vand.u32 2147483647, %v3395_v11 }
 0x4c4   : > { %v6655_v29 = vadd.f32 %v6238_v15, %v8810_v62  ;;  %v3368_v42 = vpop.f32.mrb[37].mxu0  ;;  %v3439_v60 = vand.u32 2147483647, %v3407_v34  ;;  %v3500_v7 = vsel %vm9727_vm3, %v3429_v19, 0.0  ;;  %v3398_v34 = vsub.f32 %v8874_v41, %v6881_v8  ;;  %v6884_v41 = vld [vmem:[%s6984_s23 + $0xc0] sm:$0xff] }
 0x4c5   : > { %v6656_v16 = vadd.f32 %v3368_v42, %v8812_v28  ;;  %v3394_v28 = vsub.f32 %v8858_v33, %v6877_v20  ;;  %v3494_v30 = vsel %vm9727_vm3, %v3427_v53, 0.0  ;;  %v6879_v33 = vld [vmem:[%s6984_s23 + $0x90] sm:$0xff]  ;;  %v3431_v12 = vand.u32 2147483647, %v3399_v57  ;;  %v6887_v20 = vld [vmem:[%s6984_s23 + $0xe0] sm:$0xff] }
 0x4c6   : > { %v3409_v59 = vsub.f32 %v6655_v29, %v6875_v35  ;;  %v3530_v58 = vsel %vm9727_vm3, %v3439_v60, 0.0  ;;  %v3396_v25 = vsub.f32 %v8866_v47, %v6879_v33  ;;  %v6882_v47 = vld [vmem:[%s6984_s23 + $0xb0] sm:$0xff]  ;;  %v3430_v42 = vand.u32 2147483647, %v3398_v34 }
 0x4c7   : > { %v3408_v22 = vsub.f32 %v6656_v16, %v6876_v18  ;;  %3489 = vadd.xlane.f32.xlu1 %v3488_v50  ;;  %3531 = vadd.xlane.f32.xlu0 %v3530_v58  ;;  %v3426_v26 = vand.u32 2147483647, %v3394_v28  ;;  %v3400_v15 = vsub.f32 %v8880_v40, %v6882_v47  ;;  %v3506_v29 = vsel %vm9727_vm3, %v3431_v12, 0.0  ;;  %v6885_v40 = vld [vmem:[%s6984_s23 + $0xd8] sm:$0xff] }
 0x4c8   : > { %v3441_v62 = vand.u32 2147483647, %v3409_v59  ;;  %v3428_v27 = vand.u32 2147483647, %v3396_v25  ;;  %v3403_v60 = vsub.f32 %v8887_v21, %v6883_v23  ;;  %v3503_v16 = vsel %vm9727_vm3, %v3430_v42, 0.0  ;;  %v6886_v21 = vld [vmem:[%s6984_s23 + $0xd0] sm:$0xff] }
 0x4c9   : > { %v3440_v49 = vand.u32 2147483647, %v3408_v22  ;;  %v3491_v0 = vsel %vm9727_vm3, %v3426_v26, 0.0  ;;  %v3432_v44 = vand.u32 2147483647, %v3400_v15  ;;  %v3402_v43 = vsub.f32 %v8890_v10, %v6884_v41 }
 0x4ca   : > { %v3536_v45 = vsel %vm9727_vm3, %v3441_v62, 0.0  ;;  %v3497_v14 = vsel %vm9727_vm3, %v3428_v27, 0.0  ;;  %v3435_v35 = vand.u32 2147483647, %v3403_v60  ;;  %v3405_v59 = vsub.f32 %v8897_v9, %v6885_v40 }
 0x4cb   : > { %3486 = vadd.xlane.f32.xlu1 %v3485_v31  ;;  %3537 = vadd.xlane.f32.xlu0 %v3536_v45  ;;  %v3533_v5 = vsel %vm9727_vm3, %v3440_v49, 0.0  ;;  %v3509_v11 = vsel %vm9727_vm3, %v3432_v44, 0.0  ;;  %v3434_v58 = vand.u32 2147483647, %v3402_v43  ;;  %v3404_v18 = vsub.f32 %v8900_v2, %v6886_v21 }
 0x4cc   : > { %v3518_v50 = vsel %vm9727_vm3, %v3435_v35, 0.0  ;;  %v3437_v62 = vand.u32 2147483647, %v3405_v59  ;;  %v3406_v10 = vsub.f32 %v8909_v37, %v6887_v20 }
 0x4cd   : > { %v3515_v22 = vsel %vm9727_vm3, %v3434_v58, 0.0  ;;  %v3436_v31 = vand.u32 2147483647, %v3404_v18 }
 0x4ce   : > { %v3524_v28 = vsel %vm9727_vm3, %v3437_v62, 0.0  ;;  %v3438_v45 = vand.u32 2147483647, %v3406_v10 }
 0x4cf   : > { %3495 = vadd.xlane.f32.xlu1 %v3494_v30  ;;  %3534 = vadd.xlane.f32.xlu0 %v3533_v5  ;;  %v3521_v9 = vsel %vm9727_vm3, %v3436_v31, 0.0 }
 0x4d0   : > { %v3527_v53 = vsel %vm9727_vm3, %v3438_v45, 0.0 }
 0x4d3   : > { %3492 = vadd.xlane.f32.xlu1 %v3491_v0 }
 0x4d7   : > { %3501 = vadd.xlane.f32.xlu1 %v3500_v7 }
 0x4db   : > { %3498 = vadd.xlane.f32.xlu1 %v3497_v14 }
 0x4df   : > { %3507 = vadd.xlane.f32.xlu1 %v3506_v29 }
 0x4e3   : > { %3504 = vadd.xlane.f32.xlu1 %v3503_v16 }
 0x4e7   : > { %3510 = vadd.xlane.f32.xlu1 %v3509_v11 }
 0x4eb   : > { %3519 = vadd.xlane.f32.xlu1 %v3518_v50 }
 0x4ef   : > { %3516 = vadd.xlane.f32.xlu1 %v3515_v22 }
 0x4f3   : > { %3525 = vadd.xlane.f32.xlu1 %v3524_v28 }
 0x4f7   : > { %3522 = vadd.xlane.f32.xlu1 %v3521_v9 }
 0x4fb   : > { %3528 = vadd.xlane.f32.xlu1 %v3527_v53 }
 0x51c   : > { %v3448_v49 = vpop.xlane.xlu1 %3447 }
 0x51d   : > { %v5189_v30 = vadd.f32 -0.5, %v3448_v49 }
 0x51f   : > { %v3572_v33 = vmax.f32 %v5189_v30, 0.0 }
 0x520   : > { %v3445_v2 = vpop.xlane.xlu1 %3444 }
 0x521   : > { %v5188_v56 = vadd.f32 -0.5, %v3445_v2  ;;  %v3604_v19 = vmul.f32 %v3572_v33, %v3572_v33 }
 0x523   : > { %v3571_v5 = vmax.f32 %v5188_v56, 0.0 }
 0x524   : > { %v3454_v55 = vpop.xlane.xlu1 %3453 }
 0x525   : > { %v3603_v37 = vmul.f32 %v3571_v5, %v3571_v5  ;;  %v5191_v32 = vadd.f32 -0.5, %v3454_v55 }
 0x527   : > { %v3574_v27 = vmax.f32 %v5191_v32, 0.0 }
 0x528   : > { %v3451_v26 = vpop.xlane.xlu1 %3450 }
 0x529   : > { %v5190_v25 = vadd.f32 -0.5, %v3451_v26  ;;  %v3606_v12 = vmul.f32 %v3574_v27, %v3574_v27 }
 0x52b   : > { %v3573_v57 = vmax.f32 %v5190_v25, 0.0 }
 0x52c   : > { %v3460_v0 = vpop.xlane.xlu1 %3459 }
 0x52d   : > { %v3605_v8 = vmul.f32 %v3573_v57, %v3573_v57  ;;  %v5193_v47 = vadd.f32 -0.5, %v3460_v0 }
 0x52e   : > { %3635 = vxpose.xlu1.b32.start [1/16] (narrow) %v3603_v37, 8 }
 0x52f   : > { %v3576_v42 = vmax.f32 %v5193_v47, 0.0 }
 0x530   : > { %v3457_v7 = vpop.xlane.xlu1 %3456 }
 0x531   : > { %v5192_v34 = vadd.f32 -0.5, %v3457_v7  ;;  %v3608_v44 = vmul.f32 %v3576_v42, %v3576_v42 }
 0x532   : > { %3636 = vxpose.xlu1.b32.cont [2/16] (narrow) %v3604_v19, 8 }
 0x533   : > { %v3575_v15 = vmax.f32 %v5192_v34, 0.0 }
 0x534   : > { %v3466_v14 = vpop.xlane.xlu1 %3465 }
 0x535   : > { %v3607_v23 = vmul.f32 %v3575_v15, %v3575_v15  ;;  %v5195_v41 = vadd.f32 -0.5, %v3466_v14 }
 0x536   : > { %3637 = vxpose.xlu1.b32.cont [3/16] (narrow) %v3605_v8, 8 }
 0x537   : > { %v3578_v35 = vmax.f32 %v5195_v41, 0.0 }
 0x538   : > { %v3463_v29 = vpop.xlane.xlu1 %3462 }
 0x539   : > { %v5194_v60 = vadd.f32 -0.5, %v3463_v29  ;;  %v3610_v58 = vmul.f32 %v3578_v35, %v3578_v35 }
 0x53a   : > { %3638 = vxpose.xlu1.b32.cont [4/16] (narrow) %v3606_v12, 8 }
 0x53b   : > { %v3577_v43 = vmax.f32 %v5194_v60, 0.0 }
 0x53c   : > { %v3472_v16 = vpop.xlane.xlu1 %3471 }
 0x53d   : > { %v3609_v40 = vmul.f32 %v3577_v43, %v3577_v43  ;;  %v5197_v21 = vadd.f32 -0.5, %v3472_v16 }
 0x53e   : > { %3639 = vxpose.xlu1.b32.cont [5/16] (narrow) %v3607_v23, 8 }
 0x53f   : > { %v3580_v62 = vmax.f32 %v5197_v21, 0.0 }
 0x540   : > { %v3469_v11 = vpop.xlane.xlu1 %3468 }
 0x541   : > { %v5196_v59 = vadd.f32 -0.5, %v3469_v11  ;;  %v3612_v31 = vmul.f32 %v3580_v62, %v3580_v62 }
 0x542   : > { %3640 = vxpose.xlu1.b32.cont [6/16] (narrow) %v3608_v44, 8 }
 0x543   : > { %v3579_v18 = vmax.f32 %v5196_v59, 0.0 }
 0x544   : > { %v3478_v50 = vpop.xlane.xlu1 %3477 }
 0x545   : > { %v3611_v20 = vmul.f32 %v3579_v18, %v3579_v18  ;;  %v5199_v9 = vadd.f32 -0.5, %v3478_v50 }
 0x546   : > { %3641 = vxpose.xlu1.b32.cont [7/16] (narrow) %v3609_v40, 8 }
 0x547   : > { %v3582_v49 = vmax.f32 %v5199_v9, 0.0 }
 0x548   : > { %v3475_v22 = vpop.xlane.xlu1 %3474 }
 0x549   : > { %v5198_v10 = vadd.f32 -0.5, %v3475_v22  ;;  %v3614_v30 = vmul.f32 %v3582_v49, %v3582_v49 }
 0x54a   : > { %3642 = vxpose.xlu1.b32.cont [8/16] (narrow) %v3610_v58, 8 }
 0x54b   : > { %v3581_v45 = vmax.f32 %v5198_v10, 0.0 }
 0x54c   : > { %v3484_v28 = vpop.xlane.xlu1 %3483 }
 0x54d   : > { %v3613_v2 = vmul.f32 %v3581_v45, %v3581_v45  ;;  %v5201_v5 = vadd.f32 -0.5, %v3484_v28  ;;  %v3514_v28 = vpop.xlane.xlu0 %3513 }
 0x54e   : > { %3643 = vxpose.xlu1.b32.cont [9/16] (narrow) %v3611_v20, 8  ;;  %v5211_v9 = vadd.f32 -0.5, %v3514_v28 }
 0x54f   : > { %v3584_v37 = vmax.f32 %v5201_v5, 0.0  ;;  %v10124_v5 = vld [vmem:[#allocation7_spill] sm:$0xff] }
 0x550   : > { %v3481_v53 = vpop.xlane.xlu1 %3480 }
 0x551   : > { %v5200_v56 = vadd.f32 -0.5, %v3481_v53  ;;  %v3616_v32 = vmul.f32 %v3584_v37, %v3584_v37 }
 0x552   : > { %3644 = vxpose.xlu1.b32.cont [10/16] (narrow) %v3612_v31, 8 }
 0x553   : > { %v3583_v26 = vmax.f32 %v5200_v56, 0.0 }
 0x554   : > { %v3490_v55 = vpop.xlane.xlu1 %3489 }
 0x555   : > { %v3615_v25 = vmul.f32 %v3583_v26, %v3583_v26  ;;  %v5203_v57 = vadd.f32 -0.5, %v3490_v55  ;;  %v10125_v26 = vld [vmem:[#allocation17_spill] sm:$0xff] }
 0x556   : > { %3645 = vxpose.xlu1.b32.cont [11/16] (narrow) %v3613_v2, 8  ;;  %v3594_v2 = vmax.f32 %v5211_v9, 0.0 }
 0x557   : > { %v3586_v12 = vmax.f32 %v5203_v57, 0.0 }
 0x558   : > { %v3487_v33 = vpop.xlane.xlu1 %3486  ;;  %v3626_v37 = vmul.f32 %v3594_v2, %v3594_v2 }
 0x559   : > { %v5202_v0 = vadd.f32 -0.5, %v3487_v33  ;;  %v3618_v23 = vmul.f32 %v3586_v12, %v3586_v12  ;;  %v4595_v33 = vrot.slane %v10125_v26, %v10124_v5 }
 0x55a   : > { %3646 = vxpose.xlu1.b32.cont [12/16] (narrow) %v3614_v30, 8 }
 0x55b   : > { %v3585_v7 = vmax.f32 %v5202_v0, 0.0 }
 0x55c   : > { %v3496_v19 = vpop.xlane.xlu1 %3495 }
 0x55d   : > { %v5205_v8 = vadd.f32 -0.5, %v3496_v19  ;;  %v3617_v47 = vmul.f32 %v3585_v7, %v3585_v7  ;;  %v10126_v19 = vld [vmem:[#allocation13_spill] sm:$0xff]  ;;  %v10127_v7 = vld [vmem:[#allocation18_spill] sm:$0xff] }
 0x55e   : > { %3647 = vxpose.xlu1.b32.cont [13/16] (narrow) %v3615_v25, 8 }
 0x55f   : > { %v3588_v29 = vmax.f32 %v5205_v8, 0.0  ;;  %v4617_v8 = vcombine.high %v4595_v33, %v4595_v33 }
 0x560   : > { %v3493_v27 = vpop.xlane.xlu1 %3492 }
 0x561   : > { %v5204_v34 = vadd.f32 -0.5, %v3493_v27  ;;  %v3620_v16 = vmul.f32 %v3588_v29, %v3588_v29  ;;  %v4624_v27 = vrot.slane %v4595_v33, %v10127_v7 }
 0x562   : > { %3648 = vxpose.xlu1.b32.cont [14/16] (narrow) %v3616_v32, 8  ;;  %v4572_v32 = vcombine.high %v10126_v19, %v10126_v19 }
 0x563   : > { %v3587_v14 = vmax.f32 %v5204_v34, 0.0  ;;  %v4661_v29 = vsub.f32 %v4624_v27, %v10126_v19 }
 0x564   : > { %v3502_v15 = vpop.xlane.xlu1 %3501 }
 0x565   : > { %v3619_v42 = vmul.f32 %v3587_v14, %v3587_v14  ;;  %v5207_v44 = vadd.f32 -0.5, %v3502_v15  ;;  %v4586_v15 = vrot.slane %v4572_v32, %v10124_v5 }
 0x566   : > { %3649 = vxpose.xlu1.b32.cont [15/16] (narrow) %v3617_v47, 8  ;;  %v3532_v47 = vpop.xlane.xlu0 %3531 }
 0x567   : > { %3667 = vxpose.xlu0.b32.start [1/16] (narrow) %v3619_v42, 8  ;;  %v3590_v35 = vmax.f32 %v5207_v44, 0.0  ;;  %v4632_v42 = vrot.slane %v4617_v8, %v10127_v7 }
 0x568   : > { %v3499_v60 = vpop.xlane.xlu1 %3498 }
 0x569   : > { %v5206_v41 = vadd.f32 -0.5, %v3499_v60  ;;  %v3622_v50 = vmul.f32 %v3590_v35, %v3590_v35  ;;  %v4602_v35 = vrot.slane %v4586_v15, %v10124_v5 }
 0x56a   : > { %3650 = vxpose.xlu1.b32.end [16/16] (narrow) %v3618_v23, 8  ;;  %v10128_v23 = vld [vmem:[#allocation10_spill] sm:$0xff] }
 0x56b   : > { %v3589_v43 = vmax.f32 %v5206_v41, 0.0  ;;  %3668 = vxpose.xlu0.b32.cont [2/16] (narrow) %v3620_v16, 8  ;;  %v4619_v60 = vcombine.high %v10128_v23, %v10128_v23  ;;  %v10129_v16 = vmov 0  }
 0x56c   : > { %v3508_v11 = vpop.xlane.xlu1 %3507 }
 0x56d   : > { %v3621_v40 = vmul.f32 %v3589_v43, %v3589_v43  ;;  %v5209_v58 = vadd.f32 -0.5, %v3508_v11 }
 0x56f   : > { %3669 = vxpose.xlu0.b32.cont [3/16] (narrow) %v3621_v40, 8  ;;  %v3592_v62 = vmax.f32 %v5209_v58, 0.0  ;;  %v3538_v40 = vpop.xlane.xlu0 %3537  ;;  %v4636_v58 = vrot.slane %v4619_v60, %v10127_v7 }
 0x570   : > { %v3505_v59 = vpop.xlane.xlu1 %3504 }
 0x571   : > { %v5208_v21 = vadd.f32 -0.5, %v3505_v59  ;;  %v3624_v45 = vmul.f32 %v3592_v62, %v3592_v62  ;;  %v4669_v59 = vand.u32 2147483647, %v4661_v29 }
 0x573   : > { %v3591_v18 = vmax.f32 %v5208_v21, 0.0  ;;  %3670 = vxpose.xlu0.b32.cont [4/16] (narrow) %v3622_v50, 8  ;;  %v4663_v50 = vsub.f32 %v4632_v42, %v10126_v19  ;;  %v4588_v21 = vcombine.high %v4586_v15, %v4586_v15  ;;  %v3535_v2 = vpop.xlane.xlu0 %3534 }
 0x574   : > { %v3511_v22 = vpop.xlane.xlu1 %3510 }
 0x575   : > { %v3623_v20 = vmul.f32 %v3591_v18, %v3591_v18  ;;  %v5210_v10 = vadd.f32 -0.5, %v3511_v22  ;;  %v4671_v28 = vand.u32 2147483647, %v4663_v50  ;;  %v4616_v9 = vrot.slane %v4588_v21, %v10124_v5  ;;  %v10130_v50 = vld [vmem:[#allocation4_spill] sm:$0xff] }
 0x576   : > { %vm1485_vm12 = vcmp.gt.f32.partialorder %v10130_v50, 0.5  ;;  %v10132_v21 = vmov 0.0  }
 0x577   : > { %3671 = vxpose.xlu0.b32.cont [5/16] (narrow) %v3623_v20, 8  ;;  %v3593_v53 = vmax.f32 %v5210_v10, 0.0  ;;  %v4640_v20 = vrot.slane %v4602_v35, %v10127_v7  ;;  %v4677_v10 = vsel %vm9727_vm3, %v4669_v59, 0.0  ;;  %v4644_v33 = vrot.slane %v4616_v9, %v10127_v7 }
 0x578   : > { %v3520_v31 = vpop.xlane.xlu1 %3519  ;;  %v4620_v8 = vcombine.high %v4616_v9, %v4616_v9 }
 0x579   : > { %v3625_v56 = vmul.f32 %v3593_v53, %v3593_v53  ;;  %v5213_v25 = vadd.f32 -0.5, %v3520_v31  ;;  %v4664_v31 = vsub.f32 %v4636_v58, %v10126_v19  ;;  %v4665_v26 = vsub.f32 %v4640_v20, %v10126_v19 }
 0x57a   : > { %v4666_v27 = vsub.f32 %v4644_v33, %v10126_v19  ;;  %v4652_v42 = vrot.slane %v4620_v8, %v10127_v7  ;;  %v10131_v58 = vmov 5   ;;  %v1419_v20 = vsel %vm10135_vm15, %v10116_v24, 0.0 }
 0x57b   : > { %3672 = vxpose.xlu0.b32.cont [6/16] (narrow) %v3624_v45, 8  ;;  %v3596_v34 = vmax.f32 %v5213_v25, 0.0  ;;  %v5217_v45 = vadd.f32 -0.5, %v3532_v47  ;;  %v5218_v25 = vadd.f32 -0.5, %v3535_v2 }
 0x57c   : > { %v3517_v49 = vpop.xlane.xlu1 %3516  ;;  %v4674_v15 = vand.u32 2147483647, %v4666_v27 }
 0x57d   : > { %v5212_v55 = vadd.f32 -0.5, %v3517_v49  ;;  %v3628_v44 = vmul.f32 %v3596_v34, %v3596_v34 }
 0x57f   : > { %3673 = vxpose.xlu0.b32.cont [7/16] (narrow) %v3625_v56, 8  ;;  %v3595_v0 = vmax.f32 %v5212_v55, 0.0  ;;  %v4618_v56 = vcombine.high %v4602_v35, %v4602_v35  ;;  %v4683_v55 = vsel %vm9727_vm3, %v4671_v28, 0.0 }
 0x580   : > { %v3526_v30 = vpop.xlane.xlu1 %3525 }
 0x581   : > { %v3627_v14 = vmul.f32 %v3595_v0, %v3595_v0  ;;  %v5215_v41 = vadd.f32 -0.5, %v3526_v30  ;;  %v4672_v30 = vand.u32 2147483647, %v4664_v31  ;;  %v4648_v5 = vrot.slane %v4618_v56, %v10127_v7 }
 0x583   : > { %3674 = vxpose.xlu0.b32.cont [8/16] (narrow) %v3626_v37, 8  ;;  %v3598_v18 = vmax.f32 %v5215_v41, 0.0  ;;  %v3600_v37 = vmax.f32 %v5217_v45, 0.0  ;;  %v4686_v32 = vsel %vm9727_vm3, %v4672_v30, 0.0  ;;  %v4667_v29 = vsub.f32 %v4648_v5, %v10126_v19 }
 0x584   : > { %v3523_v57 = vpop.xlane.xlu1 %3522 }
 0x585   : > { %v5214_v12 = vadd.f32 -0.5, %v3523_v57  ;;  %v3630_v53 = vmul.f32 %v3598_v18, %v3598_v18  ;;  %v4673_v57 = vand.u32 2147483647, %v4665_v26  ;;  %v3632_v34 = vmul.f32 %v3600_v37, %v3600_v37 }
 0x586   : > { %v4675_v41 = vand.u32 2147483647, %v4667_v29  ;;  %v8992_v18 = vsel %vm1485_vm12, 1.0, %v10132_v21 }
 0x587   : > { %3675 = vxpose.xlu0.b32.cont [9/16] (narrow) %v3627_v14, 8  ;;  %v3597_v43 = vmax.f32 %v5214_v12, 0.0  ;;  %v5219_v14 = vadd.f32 -0.5, %v3538_v40  ;;  %v3601_v12 = vmax.f32 %v5218_v25, 0.0  ;;  %v4689_v47 = vsel %vm9727_vm3, %v4673_v57, 0.0 }
 0x588   : > { %6846 = vset.pattern.permute.xlu1 %v10129_v16  ;;  %v3529_v11 = vpop.xlane.xlu1 %3528  ;;  %v4695_v35 = vsel %vm9727_vm3, %v4675_v41, 0.0 }
 0x589   : > { %v3629_v22 = vmul.f32 %v3597_v43, %v3597_v43  ;;  %v5216_v62 = vadd.f32 -0.5, %v3529_v11  ;;  %v3602_v23 = vmax.f32 %v5219_v14, 0.0  ;;  %v3633_v60 = vmul.f32 %v3601_v12, %v3601_v12  ;;  %v10150_v12 = vld [vmem:[#allocation81_spill] sm:$0xff] }
 0x58a   : > { %v4668_v43 = vsub.f32 %v4652_v42, %v10126_v19 }
 0x58b   : > { %3676 = vxpose.xlu0.b32.cont [10/16] (narrow) %v3628_v44, 8  ;;  %v3599_v49 = vmax.f32 %v5216_v62, 0.0  ;;  %v4692_v44 = vsel %vm9727_vm3, %v4674_v15, 0.0  ;;  %v3634_v11 = vmul.f32 %v3602_v23, %v3602_v23  ;;  %v1416_v62 = vsel %vm10134_vm7, %v10114_v17, 0.0  ;;  %v10153_v23 = vld [vmem:[#allocation83_spill] sm:$0xff] }
 0x58c   : > { %v4676_v40 = vand.u32 2147483647, %v4668_v43  ;;  %v10155_v43 = vld [vmem:[#allocation82_spill] sm:$0xff] }
 0x58d   : > { %v3631_v0 = vmul.f32 %v3599_v49, %v3599_v49 }
 0x58e   : > { %v4698_v59 = vsel %vm9727_vm3, %v4676_v40, 0.0  ;;  %vm10136_vm3 = vmmov %vm10134_vm7 }
 0x58f   : > { %3677 = vxpose.xlu0.b32.cont [11/16] (narrow) %v3629_v22, 8  ;;  %v1417_v22 = vsel %vm10133_vm13, %v10115_v54, 0.0  ;;  %v1421_v28 = vsel %vm10136_vm3, %v10117_v1, 0.0  ;;  %vm10137_vm12 = vmmov %vm10136_vm3  ;;  %v1445_v8 = vsel %vm10136_vm3, %v10027_v36, 0.0  ;;  %v10154_v36 = vand.u32 4294901760, %v10153_v23 }
 0x590   : > { %v1423_v9 = vsel %vm10137_vm12, %v10118_v39, 0.0  ;;  %vm10138_vm14 = vmmov %vm10136_vm3  ;;  %v1433_v39 = vsel %vm10136_vm3, %v10123_v4, 0.0 }
 0x591   : > { %4678 = vadd.xlane.f32.xlu1 %v4677_v10  ;;  %v1418_v10 = vadd.f32 %v1417_v22, %v1416_v62  ;;  %v1425_v54 = vsel %vm10138_vm14, %v10119_v63, 0.0  ;;  %vm10139_vm13 = vmmov %vm10136_vm3 }
 0x592   : > { %v1427_v17 = vsel %vm10139_vm13, %v10120_v61, 0.0  ;;  %vm10140_vm15 = vmmov %vm10136_vm3 }
 0x593   : > { %3678 = vxpose.xlu0.b32.cont [12/16] (narrow) %v3630_v53, 8  ;;  %v1420_v31 = vadd.f32 %v1419_v20, %v1418_v10  ;;  %v1429_v24 = vsel %vm10140_vm15, %v10121_v3, 0.0  ;;  %vm10141_vm7 = vmmov %vm10136_vm3 }
 0x594   : > { %v1431_v1 = vsel %vm10141_vm7, %v10122_v38, 0.0  ;;  %vm10142_vm14 = vmmov %vm10136_vm3 }
 0x595   : > { %4684 = vadd.xlane.f32.xlu1 %v4683_v55  ;;  %v1422_v45 = vadd.f32 %v1421_v28, %v1420_v31  ;;  %v1435_v63 = vsel %vm10142_vm14, %v10017_v48, 0.0  ;;  %vm10143_vm12 = vmmov %vm10136_vm3  ;;  %v10146_v48 = vld [vmem:[#allocation11_spill] sm:$0xff]  ;;  %vm10152_vm14 = vcmask 39936  }
 0x596   : > { %v1437_v26 = vsel %vm10143_vm12, %v10020_v13, 0.0  ;;  %vm10144_vm13 = vmmov %vm10136_vm3  ;;  %v10159_v28 = vld [vmem:[#allocation87_spill] sm:$0xff] }
 0x597   : > { %3679 = vxpose.xlu0.b32.cont [13/16] (narrow) %v3631_v0, 8  ;;  %v1424_v53 = vadd.f32 %v1423_v9, %v1422_v45  ;;  %v1439_v38 = vsel %vm10144_vm13, %v10021_v51, 0.0  ;;  %vm10145_vm15 = vmmov %vm10136_vm3  ;;  %v10160_v31 = vand.u32 4294901760, %v10159_v28 }
 0x598   : > { %v1441_v4 = vsel %vm10145_vm15, %v10023_v6, 0.0  ;;  %vm10147_vm7 = vmmov %vm10136_vm3 }
 0x599   : > { %4687 = vadd.xlane.f32.xlu1 %v4686_v32  ;;  %v1426_v49 = vadd.f32 %v1425_v54, %v1424_v53  ;;  %v4670_v32 = vand.u32 2147483647, %v10146_v48  ;;  %v1443_v13 = vsel %vm10147_vm7, %v10024_v46, 0.0  ;;  %v3962_v9 = vsub.f32 %v10159_v28, %v10160_v31  ;;  %vm10161_vm12 = vmmov %vm10136_vm3  ;;  %v10162_v53 = vld [vmem:[#allocation84_spill] sm:$0xff] }
 0x59a   : > { %v1447_v45 = vsel %vm10161_vm12, %v10026_v52, 0.0  ;;  %vm10171_vm13 = vmmov %vm10136_vm3 }
 0x59b   : > { %3680 = vxpose.xlu0.b32.cont [14/16] (narrow) %v3632_v34, 8  ;;  %v10148_v34 = vld [vmem:[#allocation78_spill] sm:$0xff]  ;;  %v4680_v42 = vsel %vm10152_vm14, %v4670_v32, 0.0  ;;  %v10172_v32 = vld [vmem:[#allocation88_spill] sm:$0xff]  ;;  %vm10181_vm15 = vmmov %vm10136_vm3 }
 0x59c   : > { %v10149_v6 = vand.u32 4294901760, %v10148_v34  ;;  %vm10191_vm7 = vmmov %vm10136_vm3 }
 0x59d   : > { %4690 = vadd.xlane.f32.xlu1 %v4689_v47  ;;  %v10151_v47 = vand.u32 4294901760, %v10150_v12  ;;  %vm10210_vm14 = vmmov %vm10136_vm3 }
 0x59e   : > { %v3815_v14 = vsub.f32 %v10148_v34, %v10149_v6  ;;  %vm10218_vm12 = vmmov %vm10136_vm3 }
 0x59f   : > { %3681 = vxpose.xlu0.b32.cont [15/16] (narrow) %v3633_v60, 8  ;;  %v3822_v15 = vsub.f32 %v10150_v12, %v10151_v47  ;;  %v3948_v60 = vsub.f32 %v10153_v23, %v10154_v36 }
 0x5a1   : > { %4693 = vadd.xlane.f32.xlu1 %v4692_v44  ;;  %v3823_v50 = vand.u32 4294901760, %v3822_v15  ;;  %v3949_v10 = vand.u32 4294901760, %v3948_v60 }
 0x5a3   : > { %3682 = vxpose.xlu0.b32.end [16/16] (narrow) %v3634_v11, 8  ;;  %v10156_v11 = vand.u32 4294901760, %v10155_v43 }
 0x5a5   : > { %4696 = vadd.xlane.f32.xlu1 %v4695_v35  ;;  %v3941_v35 = vsub.f32 %v10155_v43, %v10156_v11 }
 0x5a9   : > { %4699 = vadd.xlane.f32.xlu1 %v4698_v59  ;;  %v3816_v59 = vand.u32 4294901760, %v3815_v14  ;;  %v10174_v14 = vld [vmem:[#allocation90_spill] sm:$0xff] }
 0x5aa   : > { %v10175_v47 = vand.u32 4294901760, %v10174_v14 }
 0x5ac   : > { %v3969_v15 = vsub.f32 %v10174_v14, %v10175_v47 }
 0x5ae   : > { %v3651_v2 = vpop.trf.xlu1 }
 0x5af   : > { %v9016_v30 = vand.u32 4294901760, %v3651_v2 }
 0x5b1   : > { %v9023_v33 = vsub.f32 %v3651_v2, %v9016_v30 }
 0x5b3   : > { %v3803_v5 = vand.u32 4294901760, %v9023_v33 }
 0x5b5   : > { %v3804_v46 = vsub.f32 %v9023_v33, %v3803_v5 }
 0x5b7   : > { %v3805_v20 = vand.u32 4294901760, %v3804_v46 }
 0x5cc   : > { %6845 = vset.pattern.permute.xlu0 %v10131_v58  ;;  %v10157_v58 = vld [vmem:[#allocation85_spill] sm:$0xff] }
 0x5cd   : > { %4708 = vperm.xlu0 %6845, %v8992_v18   ;;  %v10158_v22 = vand.u32 4294901760, %v10157_v58 }
 0x5cf   : > { %v3836_v62 = vsub.f32 %v10157_v58, %v10158_v22 }
 0x5d1   : > { %6847 = vset.pattern.permute.xlu0 %v10129_v16  ;;  %v1428_v16 = vadd.f32 %v1427_v17, %v1426_v49  ;;  %v10163_v17 = vand.u32 4294901760, %v10162_v53 }
 0x5d3   : > { %v1430_v56 = vadd.f32 %v1429_v24, %v1428_v16  ;;  %v3829_v49 = vsub.f32 %v10162_v53, %v10163_v17  ;;  %v3942_v16 = vand.u32 4294901760, %v3941_v35  ;;  %v10178_v35 = vld [vmem:[#allocation95_spill] sm:$0xff] }
 0x5d5   : > { %v1432_v55 = vadd.f32 %v1431_v1, %v1430_v56  ;;  %v10164_v1 = vld [vmem:[#allocation86_spill] sm:$0xff]  ;;  %v6467_v52 = vpack.c.bf16 %v3949_v10, %v3942_v16  ;;  %v3830_v48 = vand.u32 4294901760, %v3829_v49 }
 0x5d6   : > { %v10165_v2 = vand.u32 4294901760, %v10164_v1 }
 0x5d7   : > { %v1434_v61 = vadd.f32 %v1433_v39, %v1432_v55  ;;  %v6465_v39 = vpack.c.bf16 %v3823_v50, %v3816_v59  ;;  %v3837_v55 = vand.u32 4294901760, %v3836_v62  ;;  %v10180_v50 = vld [vmem:[#allocation35_spill] sm:$0xff] }
 0x5d8   : > { %v3955_v56 = vsub.f32 %v10164_v1, %v10165_v2  ;;  %v1451_v22 = vsel %vm10181_vm15, %v10180_v50, 0.0  ;;  %v10186_v2 = vld [vmem:[#allocation97_spill] sm:$0xff]  ;;  %vm10224_vm15 = vmmov %vm10136_vm3 }
 0x5d9   : > { %v1436_v3 = vadd.f32 %v1435_v63, %v1434_v61  ;;  %v10166_v63 = vld [vmem:[#allocation89_spill] sm:$0xff] }
 0x5da   : > { %v10167_v61 = vand.u32 4294901760, %v10166_v63  ;;  %v3956_v6 = vand.u32 4294901760, %v3955_v56  ;;  %v10187_v56 = vand.u32 4294901760, %v10186_v2 }
 0x5db   : > { %v1438_v37 = vadd.f32 %v1437_v26, %v1436_v3  ;;  %v3963_v3 = vand.u32 4294901760, %v3962_v9 }
 0x5dc   : > { %v3850_v26 = vsub.f32 %v10166_v63, %v10167_v61 }
 0x5dd   : > { %v1440_v25 = vadd.f32 %v1439_v38, %v1438_v37  ;;  %v10168_v38 = vld [vmem:[#allocation91_spill] sm:$0xff] }
 0x5de   : > { %v10169_v37 = vand.u32 4294901760, %v10168_v38  ;;  %v3851_v46 = vand.u32 4294901760, %v3850_v26  ;;  %v10188_v26 = vld [vmem:[#allocation99_spill] sm:$0xff] }
 0x5df   : > { %v1442_v27 = vadd.f32 %v1441_v4, %v1440_v25  ;;  %v10170_v25 = vld [vmem:[#allocation33_spill] sm:$0xff] }
 0x5e0   : > { %v3976_v4 = vsub.f32 %v10168_v38, %v10169_v37  ;;  %v10190_v37 = vld [vmem:[#allocation39_spill] sm:$0xff] }
 0x5e1   : > { %v1444_v29 = vadd.f32 %v1443_v13, %v1442_v27  ;;  %v10173_v13 = vand.u32 4294901760, %v10172_v32 }
 0x5e2   : > { %v3977_v11 = vand.u32 4294901760, %v3976_v4  ;;  %v1453_v4 = vsel %vm10191_vm7, %v10190_v37, 0.0  ;;  %vm10229_vm7 = vmmov %vm10136_vm3 }
 0x5e3   : > { %v1446_v41 = vadd.f32 %v1445_v8, %v1444_v29  ;;  %v3843_v27 = vsub.f32 %v10172_v32, %v10173_v13  ;;  %v6469_v29 = vpack.c.bf16 %v3837_v55, %v3830_v48 }
 0x5e5   : > { %v1448_v24 = vadd.f32 %v1447_v45, %v1446_v41  ;;  %v6471_v41 = vpack.c.bf16 %v3963_v3, %v3956_v6  ;;  %v3844_v62 = vand.u32 4294901760, %v3843_v27  ;;  %v3970_v45 = vand.u32 4294901760, %v3969_v15  ;;  %v10194_v6 = vld [vmem:[#allocation98_spill] sm:$0xff] }
 0x5e6   : > { %v10195_v47 = vand.u32 4294901760, %v10194_v6 }
 0x5e7   : > { %v3683_v0 = vpop.trf.xlu0  ;;  %v6475_v55 = vpack.c.bf16 %v3977_v11, %v3970_v45 }
 0x5e8   : > { %v9033_v57 = vand.u32 4294901760, %v3683_v0  ;;  %v3997_v15 = vsub.f32 %v10194_v6, %v10195_v47  ;;  %v10209_v47 = vld [vmem:[#allocation47_spill] sm:$0xff] }
 0x5ea   : > { %v9038_v51 = vsub.f32 %v3683_v0, %v9033_v57  ;;  %v1449_v0 = vsel %vm10171_vm13, %v10170_v25, 0.0  ;;  %vm10222_vm13 = vmmov %vm10136_vm3 }
 0x5eb   : > { %v1450_v8 = vadd.f32 %v1449_v0, %v1448_v24  ;;  %v6473_v24 = vpack.c.bf16 %v3851_v46, %v3844_v62  ;;  %v10192_v0 = vld [vmem:[#allocation96_spill] sm:$0xff]  ;;  %v10200_v62 = vld [vmem:[#allocation43_spill] sm:$0xff] }
 0x5ec   : > { %v3797_v44 = vand.u32 4294901760, %v9038_v51  ;;  %4681 = vadd.xlane.f32.xlu0 %v4680_v42  ;;  %v10176_v42 = vld [vmem:[#allocation93_spill] sm:$0xff]  ;;  %v10193_v48 = vand.u32 4294901760, %v10192_v0 }
 0x5ed   : > { %v10177_v36 = vand.u32 4294901760, %v10176_v42  ;;  %v1452_v9 = vadd.f32 %v1451_v22, %v1450_v8 }
 0x5ee   : > { %v3798_v40 = vsub.f32 %v9038_v51, %v3797_v44  ;;  %v3871_v13 = vsub.f32 %v10192_v0, %v10193_v48  ;;  %v10207_v48 = vld [vmem:[#allocation107_spill] sm:$0xff] }
 0x5ef   : > { %v3864_v60 = vsub.f32 %v10176_v42, %v10177_v36  ;;  %v1454_v27 = vadd.f32 %v1453_v4, %v1452_v9  ;;  %v10196_v36 = vld [vmem:[#allocation101_spill] sm:$0xff]  ;;  %v10201_v9 = vld [vmem:[#allocation100_spill] sm:$0xff] }
 0x5f0   : > { %v3799_v54 = vand.u32 4294901760, %v3798_v40  ;;  %v10179_v40 = vand.u32 4294901760, %v10178_v35  ;;  %v10202_v45 = vand.u32 4294901760, %v10201_v9 }
 0x5f1   : > { %v3865_v16 = vand.u32 4294901760, %v3864_v60  ;;  %v10197_v60 = vand.u32 4294901760, %v10196_v36 }
 0x5f2   : > { %3800 = vmatprep.mubr.f32.mxu1 %v3799_v54  ;;  %v3990_v59 = vsub.f32 %v10178_v35, %v10179_v40  ;;  %v10184_v54 = vld [vmem:[#allocation94_spill] sm:$0xff] }
 0x5f3   : > { %3806 = vmatmul.mubr.f32.vlgmr.msra.gmra.mrb[38].mxu1 %v3805_v20  ;;  %v10182_v20 = vld [vmem:[#allocation92_spill] sm:$0xff]  ;;  %v10185_v17 = vand.u32 4294901760, %v10184_v54 }
 0x5f4   : > { %6466 = vmatpush3.bf16.msra.mxu1 %v6465_v39  ;;  %4036 = vmatprep.mubr.f32.mxu1 %v9033_v57  ;;  %v10183_v10 = vand.u32 4294901760, %v10182_v20  ;;  %v3878_v39 = vsub.f32 %v10186_v2, %v10187_v56  ;;  %v3991_v61 = vand.u32 4294901760, %v3990_v59  ;;  %v10198_v59 = vld [vmem:[#allocation103_spill] sm:$0xff] }
 0x5f5   : > { %6468 = vmatprep.subr.bf16.mxu1 %v6467_v52  ;;  %v3983_v49 = vsub.f32 %v10184_v54, %v10185_v17  ;;  %v10189_v52 = vand.u32 4294901760, %v10188_v26  ;;  %v10199_v50 = vand.u32 4294901760, %v10198_v59  ;;  %v3885_v17 = vsub.f32 %v10201_v9, %v10202_v45 }
 0x5f6   : > { %v3857_v31 = vsub.f32 %v10182_v20, %v10183_v10  ;;  %v3879_v46 = vand.u32 4294901760, %v3878_v39  ;;  %v1455_v10 = vsel %vm10136_vm3, %v10200_v62, 0.0 }
 0x5f7   : > { %v4004_v3 = vsub.f32 %v10188_v26, %v10189_v52  ;;  %v3984_v8 = vand.u32 4294901760, %v3983_v49  ;;  %v4018_v22 = vsub.f32 %v10198_v59, %v10199_v50  ;;  %v1456_v49 = vadd.f32 %v1455_v10, %v1454_v27  ;;  %v10205_v52 = vld [vmem:[#allocation105_spill] sm:$0xff]  ;;  %v10213_v50 = vld [vmem:[#allocation106_spill] sm:$0xff] }
 0x5f8   : > { %6470 = vmatpush3.bf16.msra.mxu1 %v6469_v29  ;;  %v3858_v25 = vand.u32 4294901760, %v3857_v31  ;;  %v3872_v31 = vand.u32 4294901760, %v3871_v13  ;;  %v10208_v13 = vand.u32 4294901760, %v10207_v48  ;;  %v1457_v27 = vsel %vm10210_vm14, %v10209_v47, 0.0  ;;  %vm10232_vm14 = vmmov %vm10136_vm3 }
 0x5f9   : > { %6472 = vmatprep.subr.bf16.mxu1 %v6471_v41  ;;  %v3892_v41 = vsub.f32 %v10196_v36, %v10197_v60  ;;  %v6479_v11 = vpack.c.bf16 %v3991_v61, %v3984_v8  ;;  %v4005_v40 = vand.u32 4294901760, %v4004_v3  ;;  %v10206_v3 = vand.u32 4294901760, %v10205_v52 }
 0x5fa   : > { %v6477_v29 = vpack.c.bf16 %v3865_v16, %v3858_v25  ;;  %v10203_v16 = vld [vmem:[#allocation102_spill] sm:$0xff]  ;;  %v4019_v25 = vand.u32 4294901760, %v4018_v22  ;;  %v4032_v8 = vsub.f32 %v10207_v48, %v10208_v13  ;;  %v10214_v62 = vand.u32 4294901760, %v10213_v50 }
 0x5fb   : > { %v10204_v56 = vand.u32 4294901760, %v10203_v16  ;;  %v3893_v61 = vand.u32 4294901760, %v3892_v41  ;;  %v3906_v37 = vsub.f32 %v10205_v52, %v10206_v3  ;;  %v1458_v41 = vadd.f32 %v1457_v27, %v1456_v49  ;;  %v10219_v49 = vld [vmem:[#allocation109_spill] sm:$0xff] }
 0x5fc   : > { %6474 = vmatpush3.bf16.msra.mxu1 %v6473_v24  ;;  %v3998_v24 = vand.u32 4294901760, %v3997_v15  ;;  %v3886_v15 = vand.u32 4294901760, %v3885_v17  ;;  %v10217_v17 = vld [vmem:[#allocation49_spill] sm:$0xff] }
 0x5fd   : > { %6476 = vmatprep.subr.bf16.mxu1 %v6475_v55  ;;  %v4011_v39 = vsub.f32 %v10203_v16, %v10204_v56  ;;  %v6481_v55 = vpack.c.bf16 %v3879_v46, %v3872_v31  ;;  %v3907_v10 = vand.u32 4294901760, %v3906_v37  ;;  %v10215_v31 = vld [vmem:[#allocation108_spill] sm:$0xff]  ;;  %v1459_v3 = vsel %vm10218_vm12, %v10217_v17, 0.0  ;;  %v10226_v17 = vld [vmem:[#allocation79_spill] sm:$0xff]  ;;  %vm10234_vm12 = vmmov %vm10136_vm3 }
 0x5fe   : > { %v6483_v4 = vpack.c.bf16 %v4005_v40, %v3998_v24  ;;  %v4025_v40 = vsub.f32 %v10213_v50, %v10214_v62  ;;  %v6485_v22 = vpack.c.bf16 %v3893_v61, %v3886_v15  ;;  %v10216_v45 = vand.u32 4294901760, %v10215_v31 }
 0x5ff   : > { %v1460_v27 = vadd.f32 %v1459_v3, %v1458_v41 }
 0x600   : > { %6478 = vmatpush3.bf16.msra.mxu1 %v6477_v29  ;;  %v10211_v29 = vld [vmem:[#allocation104_spill] sm:$0xff]  ;;  %v3920_v24 = vsub.f32 %v10215_v31, %v10216_v45  ;;  %v4026_v47 = vand.u32 4294901760, %v4025_v40  ;;  %v6497_v40 = vpack.c.bf16 %v10150_v12, %v10148_v34  ;;  %v10230_v34 = vld [vmem:[#allocation61_spill] sm:$0xff] }
 0x601   : > { %6480 = vmatprep.subr.bf16.mxu1 %v6479_v11  ;;  %v10212_v60 = vand.u32 4294901760, %v10211_v29  ;;  %v4012_v11 = vand.u32 4294901760, %v4011_v39  ;;  %v10225_v45 = vld [vmem:[#allocation80_spill] sm:$0xff]  ;;  %v1467_v12 = vsel %vm10136_vm3, %v10230_v34, 0.0 }
 0x602   : > { %v3921_v37 = vand.u32 4294901760, %v3920_v24  ;;  %v10228_v24 = vld [vmem:[#allocation59_spill] sm:$0xff] }
 0x603   : > { %v3899_v46 = vsub.f32 %v10211_v29, %v10212_v60  ;;  %v6487_v56 = vpack.c.bf16 %v4019_v25, %v4012_v11  ;;  %v10221_v60 = vld [vmem:[#allocation53_spill] sm:$0xff] }
 0x604   : > { %6482 = vmatpush3.bf16.msra.mxu1 %v6481_v55  ;;  %v4033_v55 = vand.u32 4294901760, %v4032_v8  ;;  %v1461_v62 = vsel %vm10222_vm13, %v10221_v60, 0.0  ;;  %vm10236_vm13 = vmmov %vm10136_vm3 }
 0x605   : > { %6484 = vmatprep.subr.bf16.mxu1 %v6483_v4  ;;  %v3900_v13 = vand.u32 4294901760, %v3899_v46  ;;  %v10220_v4 = vand.u32 4294901760, %v10219_v49  ;;  %v1462_v8 = vadd.f32 %v1461_v62, %v1460_v27 }
 0x606   : > { %v6491_v15 = vpack.c.bf16 %v4033_v55, %v4026_v47  ;;  %v1465_v55 = vsel %vm10229_vm7, %v10228_v24, 0.0  ;;  %v10231_v47 = vld [vmem:[#allocation65_spill] sm:$0xff]  ;;  %vm10240_vm7 = vmmov %vm10136_vm3  ;;  %v10260_v24 = vld [vmem:[#allocation68_spill] sm:$0xff] }
 0x607   : > { %v3913_v39 = vsub.f32 %v10219_v49, %v10220_v4  ;;  %v6489_v61 = vpack.c.bf16 %v3907_v10, %v3900_v13  ;;  %v6499_v10 = vpack.c.bf16 %v10153_v23, %v10155_v43  ;;  %v6501_v13 = vpack.c.bf16 %v10157_v58, %v10162_v53 }
 0x608   : > { %6486 = vmatpush3.bf16.msra.mxu1 %v6485_v22  ;;  %v10223_v22 = vld [vmem:[#allocation55_spill] sm:$0xff]  ;;  %v6503_v4 = vpack.c.bf16 %v10159_v28, %v10164_v1  ;;  %v6505_v43 = vpack.c.bf16 %v10166_v63, %v10172_v32  ;;  %v1469_v27 = vsel %vm10232_vm14, %v10231_v47, 0.0  ;;  %v6509_v28 = vpack.c.bf16 %v10176_v42, %v10182_v20 }
 0x609   : > { %6488 = vmatprep.subr.bf16.mxu1 %v6487_v56  ;;  %v3914_v25 = vand.u32 4294901760, %v3913_v39  ;;  %v1463_v46 = vsel %vm10224_vm15, %v10223_v22, 0.0  ;;  %v10227_v56 = vpack.c.bf16 %v10225_v45, %v10226_v17  ;;  %v6507_v39 = vpack.c.bf16 %v10168_v38, %v10174_v14  ;;  %v10233_v1 = vld [vmem:[#allocation67_spill] sm:$0xff]  ;;  %vm10238_vm15 = vmmov %vm10136_vm3 }
 0x60a   : > { %v1464_v41 = vadd.f32 %v1463_v46, %v1462_v8  ;;  %v6511_v53 = vpack.c.bf16 %v10178_v35, %v10184_v54  ;;  %v6513_v38 = vpack.c.bf16 %v10186_v2, %v10192_v0  ;;  %v6515_v32 = vpack.c.bf16 %v10188_v26, %v10194_v6  ;;  %v10235_v14 = vld [vmem:[#allocation71_spill] sm:$0xff]  ;;  %v10237_v54 = vld [vmem:[#allocation73_spill] sm:$0xff] }
 0x60b   : > { %v6493_v11 = vpack.c.bf16 %v3921_v37, %v3914_v25  ;;  %v1473_v37 = vsel %vm10236_vm13, %v10235_v14, 0.0  ;;  %v6517_v35 = vpack.c.bf16 %v10196_v36, %v10201_v9  ;;  %v6519_v20 = vpack.c.bf16 %v10198_v59, %v10203_v16  ;;  %v10239_v6 = vld [vmem:[#allocation77_spill] sm:$0xff]  ;;  %v10252_v45 = vld [vmem:[#allocation63_spill] sm:$0xff] }
 0x60c   : > { %6490 = vmatpush3.bf16.msra.mxu1 %v6489_v61  ;;  %v1466_v3 = vadd.f32 %v1465_v55, %v1464_v41  ;;  %v1471_v61 = vsel %vm10234_vm12, %v10233_v1, 0.0  ;;  %v6521_v26 = vpack.c.bf16 %v10205_v52, %v10211_v29  ;;  %v6523_v0 = vpack.c.bf16 %v10207_v48, %v10213_v50  ;;  %v10256_v41 = vld [vmem:[#allocation69_spill] sm:$0xff] }
 0x60d   : > { %6492 = vmatprep.subr.bf16.mxu1 %v6491_v15  ;;  %v1475_v15 = vsel %vm10238_vm15, %v10237_v54, 0.0  ;;  %v1477_v60 = vsel %vm10240_vm7, %v10239_v6, 0.0  ;;  %v6525_v59 = vpack.c.bf16 %v10215_v31, %v10219_v49  ;;  %v10241_v9 = vmov 1.0|1.0   ;;  %v10273_v54 = vld [vmem:[#allocation117_spill] sm:$0xff] }
 0x60e   : > { %v1468_v23 = vadd.f32 %v1467_v12, %v1466_v3  ;;  %vm10253_vm3 = vnez %v10252_v45  ;;  %vm10257_vm12 = vnez %v10256_v41  ;;  %vm10261_vm7 = vnez %v10260_v24  ;;  %v10277_v6 = vld [vmem:[#allocation121_spill] sm:$0xff] }
 0x610   : > { %6494 = vmatpush3.bf16.msra.mxu1 %v6493_v11  ;;  %v1470_v58 = vadd.f32 %v1469_v27, %v1468_v23 }
 0x611   : > { %6496 = vmatprep.subr.bf16.mxu1 %v10227_v56  ;;  %v10254_v56 = vld [vmem:[#allocation62_spill] sm:$0xff] }
 0x612   : > { %v1472_v63 = vadd.f32 %v1471_v61, %v1470_v58  ;;  %vm10255_vm14 = vnez %v10254_v56 }
 0x613   : > { %4038 = vmatmul.mubr.f32.vlgmr.msra.gmra.mrb[40].mxu1 %v9016_v30 }
 0x614   : > { %6498 = vmatpush3.bf16.msra.mxu1 %v6497_v40  ;;  %4173 = vmatprep.mubr.f32.mxu1 %v9038_v51  ;;  %v1474_v42 = vadd.f32 %v1473_v37, %v1472_v63  ;;  %v10258_v40 = vld [vmem:[#allocation23_spill] sm:$0xff]  ;;  %v10270_v63 = vld [vmem:[#allocation114_spill] sm:$0xff] }
 0x615   : > { %6500 = vmatprep.subr.bf16.mxu1 %v6499_v10  ;;  %v10259_v10 = vld [vmem:[#allocation5_spill] sm:$0xff]  ;;  %v10271_v37 = vld [vmem:[#allocation115_spill] sm:$0xff] }
 0x616   : > { %v1476_v2 = vadd.f32 %v1475_v15, %v1474_v42  ;;  %vm4703_vm13 = vcmp.ne.s32.totalorder %v10259_v10, %v10258_v40  ;;  %v4747_v12 = vsub.s32 1, %v10259_v10  ;;  %v4768_v27 = vsub.s32 4, %v10259_v10  ;;  %v10272_v42 = vld [vmem:[#allocation116_spill] sm:$0xff]  ;;  %v10274_v15 = vld [vmem:[#allocation118_spill] sm:$0xff] }
 0x617   : > { %v5316_v55 = vsel %vm4703_vm13, 1.0, %v10132_v21  ;;  %v4754_v58 = vsub.s32 2, %v10259_v10  ;;  %v4782_v61 = vsub.s32 6, %v10259_v10  ;;  %v4775_v14 = vsub.s32 5, %v10259_v10 }
 0x618   : > { %6502 = vmatpush3.bf16.msra.mxu1 %v6501_v13  ;;  %v1478_v36 = vadd.f32 %v1477_v60, %v1476_v2  ;;  %v10278_v60 = vld [vmem:[#allocation122_spill] sm:$0xff] }
 0x619   : > { %6504 = vmatprep.subr.bf16.mxu1 %v6503_v4  ;;  %v10262_v4 = vld [vmem:[#allocation75_spill] sm:$0xff] }
 0x61a   : > { %v1479_v62 = vrot.slane %v1478_v36, 4 }
 0x61c   : > { %6506 = vmatpush3.bf16.msra.mxu1 %v6505_v43  ;;  %v1480_v29 = vadd.f32 %v1479_v62, %v1478_v36  ;;  %v10264_v43 = vld [vmem:[#allocation74_spill] sm:$0xff]  ;;  %v10279_v36 = vld [vmem:[#allocation123_spill] sm:$0xff]  ;;  %v10281_v62 = vld [vmem:[#allocation125_spill] sm:$0xff] }
 0x61d   : > { %6508 = vmatprep.subr.bf16.mxu1 %v6507_v39  ;;  %v10266_v39 = vld [vmem:[#allocation110_spill] sm:$0xff] }
 0x61e   : > { %v1481_v49 = vrot.slane %v1480_v29, 2 }
 0x620   : > { %6510 = vmatpush3.bf16.msra.mxu1 %v6509_v28  ;;  %v10267_v28 = vld [vmem:[#allocation111_spill] sm:$0xff] }
 0x621   : > { %6512 = vmatprep.subr.bf16.mxu1 %v6511_v53  ;;  %v10268_v53 = vld [vmem:[#allocation112_spill] sm:$0xff] }
 0x624   : > { %6514 = vmatpush3.bf16.msra.mxu1 %v6513_v38 }
 0x625   : > { %6516 = vmatprep.subr.bf16.mxu1 %v6515_v32 }
 0x628   : > { %6518 = vmatpush3.bf16.msra.mxu1 %v6517_v35 }
 0x629   : > { %6520 = vmatprep.subr.bf16.mxu1 %v6519_v20  ;;  %v4789_v20 = vsub.s32 7, %v10259_v10 }
 0x62c   : > { %6522 = vmatpush3.bf16.msra.mxu1 %v6521_v26  ;;  %v10275_v26 = vld [vmem:[#allocation119_spill] sm:$0xff] }
 0x62d   : > { %6524 = vmatprep.subr.bf16.mxu1 %v6523_v0  ;;  %v10276_v0 = vld [vmem:[#allocation120_spill] sm:$0xff] }
 0x630   : > { %6526 = vmatpush3.bf16.msra.mxu1 %v6525_v59  ;;  %v10280_v59 = vld [vmem:[#allocation124_spill] sm:$0xff] }
 0x631   : > { %6528 = vmatprep.subr.msk.bf16.mxu1 %vm7371_vm2, %v10241_v9 }
 0x633   : > { %4176 = vmatmul.mubr.f32.vlgmr.msra.gmra.mrb[42].mxu1 %v9023_v33  ;;  %v4761_v33 = vsub.s32 3, %v10259_v10 }
 0x634   : > { %6530 = vmatpush3.bf16.msk.msra.mxu1 %vm7405_vm5, %v10241_v9  ;;  %4280 = vmatprep.mubr.f32.mxu1 %v3797_v44  ;;  %v1482_v44 = vadd.f32 %v1481_v49, %v1480_v29  ;;  %v4914_v29 = vand.u32 2147483647, %v10126_v19  ;;  %v4679_v19 = vpop.xlane.xlu1 %4678 }
 0x635   : > { %6532 = vmatprep.subr.msk.bf16.mxu1 %vm7476_vm11, %v10241_v9  ;;  %v4713_v49 = vsub.f32 3.0, %v4679_v19 }
 0x636   : > { %v1483_v22 = vrot.slane %v1482_v44, 1 }
 0x637   : > { %v4721_v51 = vmax.f32 %v4713_v49, 0.0 }
 0x638   : > { %6534 = vmatpush3.bf16.msk.msra.mxu1 %vm7463_vm10, %v10241_v9  ;;  %v9242_v17 = vadd.f32 %v1483_v22, %v1482_v44 }
 0x639   : > { %6536 = vmatprep.subr.msk.bf16.mxu1 %vm7530_vm1, %v10241_v9  ;;  %v4729_v11 = vmul.f32 %v4721_v51, %v4721_v51 }
 0x63a   : > { %vm1488_vm15 = vcmp.gt.f32.partialorder %v9242_v17, 0.5 }
 0x63b   : > { %v9258_v13 = vsel %vm1488_vm15, 1.0, %v10132_v21  ;;  %vm4565_vm15 = vcmask 57344  }
 0x63c   : > { %6538 = vmatpush3.bf16.msk.msra.mxu1 %vm7524_vm0, %v10241_v9 }
 0x63d   : > { %6540 = vmatprep.subr.msk.bf16.mxu1 %vm7560_vm9, %v10241_v9 }
 0x640   : > { %6542 = vmatpush3.bf16.msk.msra.mxu1 %vm7556_vm8, %v10241_v9 }
 0x641   : > { %6544 = vmatprep.subr.msk.bf16.mxu1 %vm7592_vm4, %v10241_v9 }
 0x644   : > { %6546 = vmatpush3.bf16.msk.msra.mxu1 %vm10064_vm6, %v10241_v9 }
 0x645   : > { %6548 = vmatprep.subr.msk.bf16.mxu1 %vm10253_vm3, %v10241_v9 }
 0x648   : > { %6550 = vmatpush3.bf16.msk.msra.mxu1 %vm10255_vm14, %v10241_v9  ;;  %vm10263_vm14 = vnez %v10262_v4 }
 0x649   : > { %6552 = vmatprep.subr.msk.bf16.mxu1 %vm10257_vm12, %v10241_v9  ;;  %vm10265_vm12 = vnez %v10264_v43 }
 0x64c   : > { %6554 = vmatpush3.bf16.msk.msra.mxu1 %vm10261_vm7, %v10241_v9  ;;  %v4709_v3 = vpop.permute.xlu0 %4708 }
 0x64d   : > { %6556 = vmatprep.subr.msk.bf16.mxu1 %vm10263_vm14, %v10241_v9  ;;  %v4711_v34 = vmul.f32 %v9258_v13, %v4709_v3 }
 0x64f   : > { %v9265_v23 = vmul.f32 %v5316_v55, %v4711_v34 }
 0x650   : > { %6558 = vmatpush3.bf16.msk.msra.mxu1 %vm10265_vm12, %v10241_v9 }
 0x651   : > { %6560 = vmatprep.subr.bf16.mxu1 %v10266_v39  ;;  %v4748_v47 = vrot.slane %v9265_v23, %v4747_v12  ;;  %v4741_v21 = vrot.slane %v9265_v23, %v10127_v7  ;;  %v4769_v1 = vrot.slane %v9265_v23, %v4768_v27  ;;  %v4755_v7 = vrot.slane %v9265_v23, %v4754_v58 }
 0x652   : > { %v4783_v38 = vrot.slane %v9265_v23, %v4782_v61  ;;  %v4762_v32 = vrot.slane %v9265_v23, %v4761_v33  ;;  %v4776_v35 = vrot.slane %v9265_v23, %v4775_v14  ;;  %v4790_v2 = vrot.slane %v9265_v23, %v4789_v20 }
 0x653   : > { %4284 = vmatmul.mubr.f32.vlgmr.msra.gmra.mrb[44].mxu1 %v3803_v5  ;;  %4750 = vbcast.lane.b32.xlu0 %v4748_v47, 256  ;;  %v10269_v5 = vld [vmem:[#allocation113_spill] sm:$0xff] }
 0x654   : > { %6562 = vmatpush3.bf16.msra.mxu1 %v10267_v28  ;;  %4450 = vmatprep.mubr.f32.mxu1 %v9033_v57 }
 0x655   : > { %4743 = vbcast.lane.b32.xlu1 %v4741_v21, 256  ;;  %6564 = vmatprep.subr.bf16.mxu1 %v10268_v53 }
 0x657   : > { %4771 = vbcast.lane.b32.xlu0 %v4769_v1, 256 }
 0x658   : > { %6566 = vmatpush3.bf16.msra.mxu1 %v10269_v5 }
 0x659   : > { %4757 = vbcast.lane.b32.xlu1 %v4755_v7, 256  ;;  %6568 = vmatprep.subr.bf16.mxu1 %v10270_v63 }
 0x65b   : > { %4785 = vbcast.lane.b32.xlu0 %v4783_v38, 256 }
 0x65c   : > { %6570 = vmatpush3.bf16.msra.mxu1 %v10271_v37 }
 0x65d   : > { %4764 = vbcast.lane.b32.xlu1 %v4762_v32, 256  ;;  %6572 = vmatprep.subr.bf16.mxu1 %v10272_v42 }
 0x660   : > { %6574 = vmatpush3.bf16.msra.mxu1 %v10273_v54 }
 0x661   : > { %4778 = vbcast.lane.b32.xlu1 %v4776_v35, 256  ;;  %6576 = vmatprep.subr.bf16.mxu1 %v10274_v15 }
 0x664   : > { %6578 = vmatpush3.bf16.msra.mxu1 %v10275_v26 }
 0x665   : > { %4792 = vbcast.lane.b32.xlu1 %v4790_v2, 256  ;;  %6580 = vmatprep.subr.bf16.mxu1 %v10276_v0 }
 0x668   : > { %6582 = vmatpush3.bf16.msra.mxu1 %v10277_v6 }
 0x669   : > { %6584 = vmatprep.subr.bf16.mxu1 %v10278_v60 }
 0x66c   : > { %6586 = vmatpush3.bf16.msra.mxu1 %v10279_v36 }
 0x66d   : > { %6588 = vmatprep.subr.bf16.mxu1 %v10280_v59 }
 0x670   : > { %6590 = vmatpush3.bf16.msra.mxu1 %v10281_v62 }
 0x671   : > { %6592 = vmatprep.subr.msk.bf16.mxu1 %vm7371_vm2, %v10241_v9  ;;  %vm10282_vm2 = vcmask 39936  }
 0x672   : > { %v4915_v16 = vsel %vm10282_vm2, %v4914_v29, 0.0 }
 0x673   : > { %4452 = vmatmul.mubr.f32.vlgmr.msra.gmra.mrb[46].mxu1 %v9016_v30 }
 0x674   : > { %6594 = vmatpush3.bf16.msk.msra.mxu1 %vm7405_vm5, %v10241_v9  ;;  %4554 = vmatprep.mubr.f32.mxu1 %v9033_v57  ;;  %vm10283_vm5 = vnez %v10254_v56  ;;  %v4685_v57 = vpop.xlane.xlu1 %4684 }
 0x675   : > { %6596 = vmatprep.subr.msk.bf16.mxu1 %vm7476_vm11, %v10241_v9  ;;  %v4715_v22 = vsub.f32 3.0, %v4685_v57  ;;  %vm10285_vm11 = vcmask 64512  }
 0x676   : > { %v4900_v49 = vsel %vm10285_vm11, %v9265_v23, 0.0  ;;  %vm10287_vm13 = vmmov %vm10285_vm11 }
 0x677   : > { %v4723_v55 = vmax.f32 %v4715_v22, 0.0 }
 0x678   : > { %6598 = vmatpush3.bf16.msk.msra.mxu1 %vm7463_vm10, %v10241_v9  ;;  %vm10284_vm10 = vnez %v10256_v41  ;;  %v4688_v52 = vpop.xlane.xlu1 %4687 }
 0x679   : > { %6600 = vmatprep.subr.msk.bf16.mxu1 %vm7530_vm1, %v10241_v9  ;;  %v4682_v25 = vpop.xlane.xlu0 %4681  ;;  %v4716_v3 = vsub.f32 3.0, %v4688_v52  ;;  %v4731_v43 = vmul.f32 %v4723_v55, %v4723_v55  ;;  %vm4876_vm1 = vcmask 1042434  }
 0x67a   : > { %4916 = vadd.xlane.f32.xlu0 %v4915_v16  ;;  %v4714_v44 = vsub.f32 3.0, %v4682_v25 }
 0x67b   : > { %v4724_v39 = vmax.f32 %v4716_v3, 0.0 }
 0x67c   : > { %6602 = vmatpush3.bf16.msk.msra.mxu1 %vm7524_vm0, %v10241_v9  ;;  %v4691_v48 = vpop.xlane.xlu1 %4690  ;;  %v4722_v46 = vmax.f32 %v4714_v44, 0.0  ;;  %vm4874_vm0 = vcmask 1041409  }
 0x67d   : > { %6604 = vmatprep.subr.msk.bf16.mxu1 %vm7560_vm9, %v10241_v9  ;;  %v4717_v47 = vsub.f32 3.0, %v4691_v48  ;;  %v4732_v58 = vmul.f32 %v4724_v39, %v4724_v39  ;;  %vm4880_vm9 = vcmask 1044484  }
 0x67e   : > { %v4730_v4 = vmul.f32 %v4722_v46, %v4722_v46 }
 0x67f   : > { %v4725_v28 = vmax.f32 %v4717_v47, 0.0 }
 0x680   : > { %6606 = vmatpush3.bf16.msk.msra.mxu1 %vm7556_vm8, %v10241_v9  ;;  %v4694_v50 = vpop.xlane.xlu1 %4693  ;;  %vm4878_vm8 = vcmask 1043459  }
 0x681   : > { %6608 = vmatprep.subr.msk.bf16.mxu1 %vm7592_vm4, %v10241_v9  ;;  %v4718_v53 = vsub.f32 3.0, %v4694_v50  ;;  %v4733_v7 = vmul.f32 %v4725_v28, %v4725_v28  ;;  %vm4882_vm4 = vcmask 1045509  }
 0x683   : > { %v4726_v33 = vmax.f32 %v4718_v53, 0.0 }
 0x684   : > { %6610 = vmatpush3.bf16.msk.msra.mxu1 %vm10064_vm6, %v10241_v9  ;;  %v4697_v31 = vpop.xlane.xlu1 %4696  ;;  %vm4884_vm6 = vcmask 1046534  }
 0x685   : > { %6612 = vmatprep.subr.msk.bf16.mxu1 %vm10253_vm3, %v10241_v9  ;;  %v4719_v5 = vsub.f32 3.0, %v4697_v31  ;;  %v4734_v32 = vmul.f32 %v4726_v33, %v4726_v33  ;;  %vm4886_vm3 = vcmask 1047559  }
 0x687   : > { %v4727_v14 = vmax.f32 %v4719_v5, 0.0 }
 0x688   : > { %6614 = vmatpush3.bf16.msk.msra.mxu1 %vm10283_vm5, %v10241_v9  ;;  %v4700_v8 = vpop.xlane.xlu1 %4699 }
 0x689   : > { %6616 = vmatprep.subr.msk.bf16.mxu1 %vm10284_vm10, %v10241_v9  ;;  %v4720_v37 = vsub.f32 3.0, %v4700_v8  ;;  %v4735_v20 = vmul.f32 %v4727_v14, %v4727_v14  ;;  %v1491_v14 = vsel %vm10287_vm13, %v9258_v13, 0.0 }
 0x68b   : > { %v4728_v54 = vmax.f32 %v4720_v37, 0.0 }
 0x68c   : > { %6618 = vmatpush3.bf16.msk.msra.mxu1 %vm10261_vm7, %v10241_v9  ;;  %vm4936_vm7 = vcmask 0  }
 0x68d   : > { %6620 = vmatprep.subr.msk.bf16.mxu1 %vm10263_vm14, %v10241_v9  ;;  %v4736_v26 = vmul.f32 %v4728_v54, %v4728_v54  ;;  %vm10286_vm14 = vmmov %vm10285_vm11 }
 0x690   : > { %6622 = vmatpush3.bf16.msk.msra.mxu1 %vm10265_vm12, %v10241_v9  ;;  %vm4923_vm12 = vcmask 7168  }
 0x693   : > { %4556 = vmatmul.mubr.f32.vlgmr.msra.gmra.mrb[48].mxu1 %v9016_v30 }
 0x6c5   : > { %v4751_v30 = vpop.permute.xlu0 %4750 }
 0x6c6   : > { %v5761_v45 = vpop.f32.mrb[38].mxu1  ;;  %v4803_v12 = vmul.f32 %v4751_v30, %v4730_v4 }
 0x6c7   : > { %v4744_v56 = vpop.permute.xlu1 %4743  ;;  %v5762_v41 = vpop.f32.mrb[39].mxu1 }
 0x6c8   : > { %v4802_v9 = vmul.f32 %v4744_v56, %v4729_v11  ;;  %v5763_v24 = vadd.f32 %v5762_v41, %v5761_v45  ;;  %v4844_v41 = vsub.s32 %v10258_v40, %v10259_v10 }
 0x6c9   : > { %v4772_v61 = vpop.permute.xlu0 %4771 }
 0x6ca   : > { %4819 = vperm.xlu1 %6846, %v4802_v9   ;;  %v4806_v63 = vmul.f32 %v4772_v61, %v4733_v7  ;;  %v4561_v9 = vmax.f32 %v9242_v17, 1.0 }
 0x6cb   : > { %v4758_v34 = vpop.permute.xlu1 %4757 }
 0x6cc   : > { %v4804_v21 = vmul.f32 %v4758_v34, %v4731_v43  ;;  %6850 = vrcp.f32 %v4561_v9 }
 0x6cd   : > { %v4786_v35 = vpop.permute.xlu0 %4785 }
 0x6ce   : > { %4822 = vperm.xlu1 %6846, %v4803_v12   ;;  %v4808_v15 = vmul.f32 %v4786_v35, %v4735_v20 }
 0x6cf   : > { %v4765_v27 = vpop.permute.xlu1 %4764 }
 0x6d0   : > { %v4805_v1 = vmul.f32 %v4765_v27, %v4732_v58 }
 0x6d2   : > { %4825 = vperm.xlu1 %6846, %v4804_v21  }
 0x6d3   : > { %v4779_v38 = vpop.permute.xlu1 %4778 }
 0x6d4   : > { %v4807_v42 = vmul.f32 %v4779_v38, %v4734_v32 }
 0x6d6   : > { %4828 = vperm.xlu1 %6846, %v4805_v1   ;;  %v6851_v5 = vpop.eup %6850 }
 0x6d7   : > { %v4793_v2 = vpop.permute.xlu1 %4792 }
 0x6d8   : > { %v4809_v0 = vmul.f32 %v4793_v2, %v4736_v26 }
 0x6da   : > { %4831 = vperm.xlu1 %6846, %v4806_v63  }
 0x6de   : > { %4834 = vperm.xlu1 %6846, %v4807_v42  }
 0x6e2   : > { %4837 = vperm.xlu1 %6846, %v4808_v15  }
 0x6e6   : > { %4840 = vperm.xlu1 %6846, %v4809_v0   ;;  %v5796_v6 = vpop.f32.mrb[40].mxu1 }
 0x6e7   : > { %v5797_v60 = vpop.f32.mrb[41].mxu1 }
 0x6e8   : > { %v5798_v36 = vadd.f32 %v5797_v60, %v5796_v6 }
 0x6ea   : > { %v4040_v59 = vadd.f32 %v5798_v36, %v5763_v24 }
 0x706   : > { %v5831_v62 = vpop.f32.mrb[42].mxu1 }
 0x707   : > { %v4917_v29 = vpop.xlane.xlu0 %4916  ;;  %v5832_v16 = vpop.f32.mrb[43].mxu1 }
 0x708   : > { %v4918_v19 = vmul.f32 %v8992_v18, %v4917_v29  ;;  %v5833_v57 = vadd.f32 %v5832_v16, %v5831_v62 }
 0x70a   : > { %4920 = vrot.lane.b32.xlu0 %v4918_v19, %s6901_s24  ;;  %v4178_v52 = vadd.f32 %v5833_v57, %v4040_v59 }
 0x726   : > { %v5866_v48 = vpop.f32.mrb[44].mxu1 }
 0x727   : > { %v5867_v50 = vpop.f32.mrb[45].mxu1 }
 0x728   : > { %v5868_v31 = vadd.f32 %v5867_v50, %v5866_v48 }
 0x729   : > { %4901 = vadd.xlane.f32.xlu0 %v4900_v49 }
 0x72a   : > { %v4286_v25 = vadd.f32 %v5868_v31, %v4178_v52 }
 0x746   : > { %v5901_v51 = vpop.f32.mrb[46].mxu1 }
 0x747   : > { %v5902_v44 = vpop.f32.mrb[47].mxu1 }
 0x748   : > { %v5903_v8 = vadd.f32 %v5902_v44, %v5901_v51 }
 0x749   : > { %v4820_v11 = vpop.permute.xlu1 %4819 }
 0x74a   : > { %v4454_v22 = vadd.f32 %v5903_v8, %v4286_v25  ;;  %v4845_v55 = vrot.slane %v4820_v11, %v4844_v41 }
 0x74d   : > { %v4823_v46 = vpop.permute.xlu1 %4822 }
 0x74e   : > { %v4849_v30 = vrot.slane %v4823_v46, %v4844_v41 }
 0x750   : > { %v4875_v12 = vsel %vm4874_vm0, %v4849_v30, %v4845_v55 }
 0x751   : > { %v4826_v45 = vpop.permute.xlu1 %4825 }
 0x752   : > { %v4853_v23 = vrot.slane %v4826_v45, %v4844_v41 }
 0x754   : > { %v4877_v39 = vsel %vm4876_vm1, %v4853_v23, %v4875_v12 }
 0x755   : > { %v4829_v18 = vpop.permute.xlu1 %4828 }
 0x756   : > { %v4857_v3 = vrot.slane %v4829_v18, %v4844_v41 }
 0x758   : > { %v4879_v40 = vsel %vm4878_vm8, %v4857_v3, %v4877_v39 }
 0x759   : > { %v4832_v56 = vpop.permute.xlu1 %4831 }
 0x75a   : > { %v4861_v4 = vrot.slane %v4832_v56, %v4844_v41 }
 0x75c   : > { %v4881_v17 = vsel %vm4880_vm9, %v4861_v4, %v4879_v40 }
 0x75d   : > { %v4835_v24 = vpop.permute.xlu1 %4834 }
 0x75e   : > { %v4865_v43 = vrot.slane %v4835_v24, %v4844_v41 }
 0x760   : > { %v4883_v21 = vsel %vm4882_vm4, %v4865_v43, %v4881_v17 }
 0x761   : > { %v4838_v34 = vpop.permute.xlu1 %4837 }
 0x762   : > { %v4869_v47 = vrot.slane %v4838_v34, %v4844_v41 }
 0x764   : > { %v4885_v53 = vsel %vm4884_vm6, %v4869_v47, %v4883_v21 }
 0x765   : > { %v4841_v10 = vpop.permute.xlu1 %4840 }
 0x766   : > { %v4873_v27 = vrot.slane %v4841_v10, %v4844_v41  ;;  %v5936_v58 = vpop.f32.mrb[48].mxu1 }
 0x767   : > { %v5937_v28 = vpop.f32.mrb[49].mxu1 }
 0x768   : > { %v5938_v1 = vadd.f32 %v5937_v28, %v5936_v58  ;;  %v4887_v61 = vsel %vm4886_vm3, %v4873_v27, %v4885_v53 }
 0x769   : > { %v4889_v7 = vsel %vm10286_vm14, %v4887_v61, 0.0 }
 0x76a   : > { %v4558_v33 = vadd.f32 %v5938_v1, %v4454_v22  ;;  %4890 = vadd.xlane.f32.xlu1 %v4889_v7 }
 0x76c   : > { %v4563_v63 = vmul.f32 %v6851_v5, %v4558_v33 }
 0x76e   : > { %v4564_v37 = vmul.f32 %v9258_v13, %v4563_v63 }
 0x770   : > { %v4566_v42 = vsel %vm4565_vm15, %v4564_v37, 0.0 }
 0x77c   : > { %v4921_v38 = vpop.permute.xlu0 %4920 }
 0x77d   : > { %v4924_v32 = vsel %vm4923_vm12, %v4921_v38, 0.0 }
 0x77e   : > { %4925 = vadd.xlane.f32.xlu1 %v4924_v32 }
 0x782   : > { %1492 = vadd.xlane.f32.xlu1 %v1491_v14 }
 0x786   : > { %4567 = vadd.xlane.f32.xlu1 %v4566_v42 }
 0x7b6   : > { %v4902_v35 = vpop.xlane.xlu0 %4901 }
 0x7b7   : > { %v4903_v20 = vrot.slane %v4902_v35, 4 }
 0x7b9   : > { %v4904_v54 = vadd.f32 %v4903_v20, %v4902_v35 }
 0x7bb   : > { %v4905_v15 = vrot.slane %v4904_v54, 2 }
 0x7bd   : > { %v4906_v6 = vadd.f32 %v4905_v15, %v4904_v54 }
 0x7bf   : > { %v4907_v59 = vrot.slane %v4906_v6, 1 }
 0x7c1   : > { %v4908_v16 = vadd.f32 %v4907_v59, %v4906_v6 }
 0x7f7   : > { %v4891_v2 = vpop.xlane.xlu1 %4890 }
 0x7f8   : > { %v4892_v26 = vrot.slane %v4891_v2, 4 }
 0x7fa   : > { %v4893_v0 = vadd.f32 %v4892_v26, %v4891_v2 }
 0x7fc   : > { %v4894_v60 = vrot.slane %v4893_v0, 2 }
 0x7fe   : > { %v4895_v36 = vadd.f32 %v4894_v60, %v4893_v0 }
 0x800   : > { %v4896_v62 = vrot.slane %v4895_v36, 1 }
 0x802   : > { %v4897_v29 = vadd.f32 %v4896_v62, %v4895_v36 }
 0x804   : > { %6785 = vpush %v4897_v29 }
 0x805   : > { %6787 = vpush %v4908_v16 }
 0x80b   : > { %v4926_v13 = vpop.xlane.xlu1 %4925 }
 0x80c   : > { %v4927_v19 = vrot.slane %v4926_v13, 4 }
 0x80e   : > { %v4928_v57 = vadd.f32 %v4927_v19, %v4926_v13 }
 0x80f   : > { %v1493_v52 = vpop.xlane.xlu1 %1492 }
 0x810   : > { %v4929_v48 = vrot.slane %v4928_v57, 2  ;;  %v1494_v50 = vmax.f32 %v1493_v52, 1.0 }
 0x812   : > { %6852 = vrcp.f32 %v1494_v50  ;;  %v4930_v31 = vadd.f32 %v4929_v48, %v4928_v57 }
 0x813   : > { %v4568_v44 = vpop.xlane.xlu1 %4567 }
 0x814   : > { %v4931_v49 = vrot.slane %v4930_v31, 1 }
 0x816   : > { %v4932_v25 = vadd.f32 %v4931_v49, %v4930_v31 }
 0x818   : > { %6789 = vpush %v4932_v25 }
 0x81c   : > { %v6853_v51 = vpop.eup %6852 }
 0x81d   : > { %v4570_v8 = vmul.f32 %v6853_v51, %v4568_v44 }
 0x81f   : > { %4937 = vst.msk [vmem:[%s224_s27] sm:$0x1] %vm4936_vm7, %v4570_v8 }
 0x835   : > { %s6786_s28 = spop %6785 }
 0x836   : > { %s6788_s29 = spop %6787  ;;  %v4899_v45 = vstv %s6786_s28 }
 0x837   : > { %v4910_v11 = vstv %s6788_s29 }
 0x838   : > { %v4911_v22 = vmax.f32 %v4910_v11, 1.0 }
 0x83a   : > { %6854 = vrcp.f32 %v4911_v22 }
 0x844   : > { %v6855_v46 = vpop.eup %6854 }
 0x845   : > { %v4913_v18 = vmul.f32 %v6855_v46, %v4899_v45 }
 0x847   : > { %4938 = vst.msk [vmem:[%s227_s6] sm:$0x1] %vm4936_vm7, %v4913_v18 }
 0x849   : > { %s6790_s7 = spop %6789 }
 0x84a   : > { %v4934_v56 = vstv %s6790_s7 }
 0x84b   : > { %v4935_v41 = vmul.f32 %v6853_v51, %v4934_v56 }
 0x84d   : > { %4939 = vst.msk [vmem:[%s230_s10] sm:$0x1] %vm4936_vm7, %v4935_v41 }
 0x84e PF: > { %s15_s15 = sadd.s32 1, %s6894_s15  }
 0x84f   : > { %p12_p4 = scmp.ge.s32.totalorder %s15_s15, 4  }
 0x851   :  { %14 = sbr.rel (!%p12_p4) target bundleno = 1 (0x1), region = 85 }

// kernel: get_loss_forward.2
= control target key start
LH: loop header
LB: loop body
LE: loop exit
PB: predicated region body
PF: predicated region fallthrough
CT: control target
= control target key end

     0   :  { %s3921_s30 = smov 0   ;;  %s3923_s10 = smov 0   ;;  %s6014_s0 = inlined_call_operand.vmem [shape: bf16[2,256,8], index: 0, kind: input, shape index: {}]   ;;  %s6015_s1 = inlined_call_operand.vmem [shape: bf16[2,256,6], index: 1, kind: input, shape index: {}]   ;;  %s6016_s2 = inlined_call_operand.vmem [shape: f32[2,256,6], index: 2, kind: input, shape index: {}]   ;;  %s6017_s3 = inlined_call_operand.vmem [shape: f32[2,256,1], index: 3, kind: input, shape index: {}]   ;;  %s6018_s4 = inlined_call_operand.vmem [shape: bf16[2,8,256], index: 4, kind: input, shape index: {}]   ;;  %s6019_s5 = inlined_call_operand.vmem [shape: bf16[2,6,256], index: 5, kind: input, shape index: {}]   ;;  %s6020_s6 = inlined_call_operand.vmem [shape: f32[2,1,256], index: 6, kind: input, shape index: {}]   ;;  %s6021_s7 = inlined_call_operand.vmem [shape: f32[2,256,256], index: 7, kind: input, shape index: {}]   ;;  %s6022_s8 = inlined_call_operand.vmem [shape: f32[2,1,1], index: 8, kind: output, shape index: {0}]   ;;  %s6023_s9 = inlined_call_operand.vmem [shape: f32[2,1,1], index: 9, kind: output, shape index: {1}]  }
   0x1   :  { %s3925_s11 = smov 0  }
   0x2 LB: > { %s32_s12 = sadd.s32 1, %s3863_s10  ;;  %p3493_p0 = scmp.ge.s32.totalorder %s3867_s11, 1  ;;  %s3867_s11 = sphi %s3925_s11, %s20_s11   ;;  %s3863_s10 = sphi %s3923_s10, %s6391_s10   ;;  %s3859_s30 = sphi %s3921_s30, %s6390_s30  }
   0x3   : > { %p34_p1 = scmp.ge.s32.totalorder %s32_s12, 2  ;;  %p407_p2 = scmp.lt.s32.totalorder %s3867_s11, 3 }
   0x5   : > { %s6393_s12 = smov (%p34_p1, %s32_s12), 0  ;;  %p408_p3 = pnand %p3493_p0, %p407_p2 }
   0x7   : > { %411 = sbr.rel (%p408_p3) target bundleno = 661 (0x295), region = 52 }
   0xe   : > { %p500_p4 = scmp.lt.s32.totalorder %s3859_s30, 1  ;;  %v6024_v0 = vmov 0   ;;  %vm1254_vm0 = vcmask 48128   ;;  %vm1303_vm1 = vcmask 1042432   ;;  %vm969_vm2 = vcmask 1043456  }
   0xf   : > { %1342 = vmatprep.mubr.bf16.mxu1 %v6024_v0  ;;  %1008 = vmatprep.mubr.bf16.mxu0 %v6024_v0  ;;  %vm920_vm3 = vcmask 64512  }
  0x10   : > { %s6395_s30 = smov (!%p500_p4, %s3859_s30), 1 }
  0x11   : > { %s3583_s13 = sshll.u32 %s6395_s30, 8  ;;  %s3585_s17 = sshll.u32 %s6395_s30, 3 }
  0x12   : > { %s3949_s16 = scalar_lea.vmem %s6016_s2, %s3583_s13  ;;  %s3581_s18 = sshll.u32 %s6395_s30, 7 }
  0x13   : > { %v3952_v1 = vld [vmem:[%s3949_s16] sm:$0xff]  ;;  %v3955_v2 = vld [vmem:[%s3949_s16 + $0x10] sm:$0xff]  ;;  %v3958_v3 = vld [vmem:[%s3949_s16 + $0x8] sm:$0xff]  ;;  %s548_s21 = scalar_lea.vmem %s6019_s5, %s3585_s17  ;;  %s543_s24 = scalar_lea.vmem %s6018_s4, %s3585_s17 }
  0x14   : > { %v2380_v4 = vsel %vm1254_vm0, %v3952_v1, -inf  ;;  %v2386_v5 = vsel %vm1254_vm0, %v3955_v2, -inf  ;;  %v3967_v6 = vld [vmem:[%s3949_s16 + $0x18] sm:$0xff]  ;;  %v2383_v7 = vsel %vm1254_vm0, %v3958_v3, -inf  ;;  %s3982_s27 = scalar_lea.vmem %s6015_s1, %s3581_s18  ;;  %v3985_v9 = vld [vmem:[%s3949_s16 + $0x20] sm:$0xff]  ;;  %v3988_v10 = vld [vmem:[%s3949_s16 + $0x28] sm:$0xff]  ;;  %s3994_s14 = scalar_lea.vmem %s6014_s0, %s3581_s18 }
  0x15   : > { %2381 = vmax.xlane.f32.xlu0 %v2380_v4  ;;  %2387 = vmax.xlane.f32.xlu1 %v2386_v5  ;;  %v2389_v8 = vsel %vm1254_vm0, %v3967_v6, -inf  ;;  %v769_v11 = vld [vmem:[%s548_s21] sm:$0x77]  ;;  %v2392_v17 = vsel %vm1254_vm0, %v3985_v9, -inf  ;;  %v2395_v18 = vsel %vm1254_vm0, %v3988_v10, -inf  ;;  %v4001_v20 = vld [vmem:[%s3949_s16 + $0x30] sm:$0xff]  ;;  %s5754_s26 = scalar_lea.vmem %s6017_s3, %s3583_s13 }
  0x16   : > { %v768_v12 = vld [vmem:[%s543_s24] sm:$0xff]  ;;  %v3561_v13 = vcombine.high %v769_v11, %v769_v11  ;;  %v3560_v15 = vcombine.low %v769_v11, %v769_v11  ;;  %v4004_v21 = vld [vmem:[%s3949_s16 + $0x38] sm:$0xff]  ;;  %v2398_v24 = vsel %vm1254_vm0, %v4001_v20, -inf  ;;  %v4019_v28 = vld [vmem:[%s3949_s16 + $0x48] sm:$0xff]  ;;  %s3587_s15 = sshll.u32 %s6395_s30, 9  ;;  %s3506_s20 = sshll.u32 %s6395_s30, 1 }
  0x17   : > { %v3526_v14 = vcombine.high %v768_v12, %v768_v12  ;;  %v672_v16 = vld [vmem:[%s3982_s27] sm:$0xff]   ;;  %v3525_v19 = vcombine.low %v768_v12, %v768_v12  ;;  %v2401_v25 = vsel %vm1254_vm0, %v4004_v21, -inf  ;;  %v674_v29 = vld [vmem:[%s3982_s27 + $0x8] sm:$0xff]   ;;  %v2407_v31 = vsel %vm1254_vm0, %v4019_v28, -inf  ;;  %v4029_v32 = vld [vmem:[%s3949_s16 + $0x50] sm:$0xff]  ;;  %s4228_s19 = scalar_lea.vmem %s6021_s7, %s3587_s15  ;;  %s552_s23 = scalar_lea.vmem %s6020_s6, %s3506_s20 }
  0x18   : > { %3562 = vmatprep.subr.msk.bf16.mxu1 %vm1303_vm1, %v3561_v13  ;;  %v1305_v22 = vsel %vm1303_vm1, %v3560_v15, 0  ;;  %v3619_v26 = vld [vmem:[%s3994_s14] sm:$0xff]   ;;  %v4033_v33 = vld [vmem:[%s3949_s16 + $0x58] sm:$0xff]  ;;  %v2410_v34 = vsel %vm1254_vm0, %v4029_v32, -inf  ;;  %v3621_v37 = vld [vmem:[%s3994_s14 + $0x8] sm:$0xff]  }
  0x19   : > { %2384 = vmax.xlane.f32.xlu0 %v2383_v7  ;;  %2390 = vmax.xlane.f32.xlu1 %v2389_v8  ;;  %v971_v23 = vsel %vm969_vm2, %v3525_v19, 0  ;;  %v4016_v27 = vld [vmem:[%s3949_s16 + $0x40] sm:$0xff]  ;;  %v2413_v35 = vsel %vm1254_vm0, %v4033_v33, -inf  ;;  %v4045_v38 = vld [vmem:[%s3949_s16 + $0x68] sm:$0xff]  ;;  %v676_v39 = vld [vmem:[%s3982_s27 + $0x10] sm:$0xff]  }
  0x1a   : > { %3527 = vmatprep.subr.msk.bf16.mxu0 %vm969_vm2, %v3526_v14  ;;  %1311 = vmatpush1.bf16.msra.mxu1 %v1305_v22  ;;  %v2404_v30 = vsel %vm1254_vm0, %v4016_v27, -inf  ;;  %v4041_v36 = vld [vmem:[%s3949_s16 + $0x60] sm:$0xff]  ;;  %v2419_v41 = vsel %vm1254_vm0, %v4045_v38, -inf  ;;  %v4055_v42 = vld [vmem:[%s3949_s16 + $0x70] sm:$0xff]  ;;  %v4059_v43 = vld [vmem:[%s3949_s16 + $0x78] sm:$0xff] }
  0x1b   : > { %977 = vmatpush1.bf16.msra.mxu0 %v971_v23  ;;  %v2416_v40 = vsel %vm1254_vm0, %v4041_v36, -inf  ;;  %v2422_v44 = vsel %vm1254_vm0, %v4055_v42, -inf  ;;  %v2425_v45 = vsel %vm1254_vm0, %v4059_v43, -inf  ;;  %v4067_v46 = vld [vmem:[%s3949_s16 + $0x80] sm:$0xff]  ;;  %v3623_v47 = vld [vmem:[%s3994_s14 + $0x10] sm:$0xff]   ;;  %v4071_v48 = vld [vmem:[%s3949_s16 + $0x88] sm:$0xff] }
  0x1c   : > { %v678_v49 = vld [vmem:[%s3982_s27 + $0x18] sm:$0xff]   ;;  %v2428_v50 = vsel %vm1254_vm0, %v4067_v46, -inf  ;;  %v2431_v51 = vsel %vm1254_vm0, %v4071_v48, -inf  ;;  %v4081_v52 = vld [vmem:[%s3949_s16 + $0x90] sm:$0xff]  ;;  %v4094_v57 = vld [vmem:[%s3949_s16 + $0xa0] sm:$0xff] }
  0x1d   : > { %2393 = vmax.xlane.f32.xlu0 %v2392_v17  ;;  %2396 = vmax.xlane.f32.xlu1 %v2395_v18  ;;  %v4085_v53 = vld [vmem:[%s3949_s16 + $0x98] sm:$0xff]  ;;  %v2434_v54 = vsel %vm1254_vm0, %v4081_v52, -inf  ;;  %v4097_v58 = vld [vmem:[%s3949_s16 + $0xa8] sm:$0xff]  ;;  %v680_v59 = vld [vmem:[%s3982_s27 + $0x20] sm:$0xff]   ;;  %v2440_v60 = vsel %vm1254_vm0, %v4094_v57, -inf }
  0x1e   : > { %3563 = vmatmul.mubr.msk.bf16.vlgmr.msra.gmra.mrb[0].mxu1 %vm1254_vm0, %v672_v16  ;;  %3528 = vmatmul.mubr.msk.bf16.vlgmr.msra.gmra.mrb[0].mxu0 %vm920_vm3, %v3619_v26  ;;  %v2437_v55 = vsel %vm1254_vm0, %v4085_v53, -inf  ;;  %v3625_v56 = vld [vmem:[%s3994_s14 + $0x18] sm:$0xff]   ;;  %v2443_v61 = vsel %vm1254_vm0, %v4097_v58, -inf  ;;  %v4108_v62 = vld [vmem:[%s3949_s16 + $0xb0] sm:$0xff]  ;;  %v3627_v7 = vld [vmem:[%s3994_s14 + $0x20] sm:$0xff]  }
  0x1f   : > { %1352 = vmatprep.mubr.bf16.mxu1 %v6024_v0  ;;  %1018 = vmatprep.mubr.bf16.mxu0 %v6024_v0  ;;  %v4111_v63 = vld [vmem:[%s3949_s16 + $0xb8] sm:$0xff]  ;;  %v2446_v4 = vsel %vm1254_vm0, %v4108_v62, -inf  ;;  %v4120_v8 = vld [vmem:[%s3949_s16 + $0xc0] sm:$0xff]  ;;  %v4123_v11 = vld [vmem:[%s3949_s16 + $0xc8] sm:$0xff] }
  0x20   : > { %v2449_v5 = vsel %vm1254_vm0, %v4111_v63, -inf  ;;  %v682_v12 = vld [vmem:[%s3982_s27 + $0x28] sm:$0xff]   ;;  %v2452_v13 = vsel %vm1254_vm0, %v4120_v8, -inf  ;;  %v2455_v14 = vsel %vm1254_vm0, %v4123_v11, -inf  ;;  %v4134_v15 = vld [vmem:[%s3949_s16 + $0xd0] sm:$0xff]  ;;  %v4137_v16 = vld [vmem:[%s3949_s16 + $0xd8] sm:$0xff] }
  0x21   : > { %2399 = vmax.xlane.f32.xlu0 %v2398_v24  ;;  %2402 = vmax.xlane.f32.xlu1 %v2401_v25  ;;  %v2458_v17 = vsel %vm1254_vm0, %v4134_v15, -inf  ;;  %v2461_v18 = vsel %vm1254_vm0, %v4137_v16, -inf  ;;  %v3629_v19 = vld [vmem:[%s3994_s14 + $0x28] sm:$0xff]   ;;  %v4146_v22 = vld [vmem:[%s3949_s16 + $0xe0] sm:$0xff]  ;;  %v684_v24 = vld [vmem:[%s3982_s27 + $0x30] sm:$0xff]  }
  0x22   : > { %v4149_v23 = vld [vmem:[%s3949_s16 + $0xe8] sm:$0xff]  ;;  %v2464_v25 = vsel %vm1254_vm0, %v4146_v22, -inf }
  0x23   : > { %v2467_v26 = vsel %vm1254_vm0, %v4149_v23, -inf }
  0x25   : > { %2405 = vmax.xlane.f32.xlu0 %v2404_v30  ;;  %2408 = vmax.xlane.f32.xlu1 %v2407_v31  ;;  %v4163_v30 = vld [vmem:[%s3949_s16 + $0xf8] sm:$0xff] }
  0x26   : > { %3564 = vmatmul.mubr.msk.bf16.gmra.mrb[4].mxu1 %vm1254_vm0, %v674_v29  ;;  %3529 = vmatmul.mubr.msk.bf16.gmra.mrb[4].mxu0 %vm920_vm3, %v3621_v37  ;;  %v4160_v29 = vld [vmem:[%s3949_s16 + $0xf0] sm:$0xff]  ;;  %v686_v37 = vld [vmem:[%s3982_s27 + $0x38] sm:$0xff]  }
  0x27   : > { %1362 = vmatprep.mubr.bf16.mxu1 %v6024_v0  ;;  %1028 = vmatprep.mubr.bf16.mxu0 %v6024_v0  ;;  %v2470_v31 = vsel %vm1254_vm0, %v4160_v29, -inf }
  0x29   : > { %2411 = vmax.xlane.f32.xlu0 %v2410_v34  ;;  %2414 = vmax.xlane.f32.xlu1 %v2413_v35  ;;  %v2473_v34 = vsel %vm1254_vm0, %v4163_v30, -inf  ;;  %v3631_v35 = vld [vmem:[%s3994_s14 + $0x30] sm:$0xff]  }
  0x2d   : > { %2417 = vmax.xlane.f32.xlu0 %v2416_v40  ;;  %2420 = vmax.xlane.f32.xlu1 %v2419_v41  ;;  %v688_v40 = vld [vmem:[%s3982_s27 + $0x40] sm:$0xff]  }
  0x2e   : > { %3565 = vmatmul.mubr.msk.bf16.gmra.mrb[8].mxu1 %vm1254_vm0, %v676_v39  ;;  %3530 = vmatmul.mubr.msk.bf16.gmra.mrb[8].mxu0 %vm920_vm3, %v3623_v47  ;;  %v3633_v39 = vld [vmem:[%s3994_s14 + $0x38] sm:$0xff]   ;;  %v3635_v41 = vld [vmem:[%s3994_s14 + $0x40] sm:$0xff]   ;;  %v692_v47 = vld [vmem:[%s3982_s27 + $0x50] sm:$0xff]  }
  0x2f   : > { %1372 = vmatprep.mubr.bf16.mxu1 %v6024_v0  ;;  %1038 = vmatprep.mubr.bf16.mxu0 %v6024_v0 }
  0x31   : > { %2423 = vmax.xlane.f32.xlu0 %v2422_v44  ;;  %2426 = vmax.xlane.f32.xlu1 %v2425_v45  ;;  %v690_v44 = vld [vmem:[%s3982_s27 + $0x48] sm:$0xff]  }
  0x32   : > { %v3637_v45 = vld [vmem:[%s3994_s14 + $0x48] sm:$0xff]  }
  0x35   : > { %2429 = vmax.xlane.f32.xlu0 %v2428_v50  ;;  %2432 = vmax.xlane.f32.xlu1 %v2431_v51  ;;  %v694_v50 = vld [vmem:[%s3982_s27 + $0x58] sm:$0xff]  }
  0x36   : > { %3566 = vmatmul.mubr.msk.bf16.gmra.mrb[12].mxu1 %vm1254_vm0, %v678_v49  ;;  %3531 = vmatmul.mubr.msk.bf16.gmra.mrb[12].mxu0 %vm920_vm3, %v3625_v56  ;;  %v3639_v49 = vld [vmem:[%s3994_s14 + $0x50] sm:$0xff]   ;;  %v3641_v51 = vld [vmem:[%s3994_s14 + $0x58] sm:$0xff]   ;;  %v698_v56 = vld [vmem:[%s3982_s27 + $0x68] sm:$0xff]  }
  0x37   : > { %1382 = vmatprep.mubr.bf16.mxu1 %v6024_v0  ;;  %1048 = vmatprep.mubr.bf16.mxu0 %v6024_v0 }
  0x39   : > { %2435 = vmax.xlane.f32.xlu0 %v2434_v54  ;;  %2438 = vmax.xlane.f32.xlu1 %v2437_v55  ;;  %v696_v54 = vld [vmem:[%s3982_s27 + $0x60] sm:$0xff]  }
  0x3a   : > { %v3643_v55 = vld [vmem:[%s3994_s14 + $0x60] sm:$0xff]  }
  0x3d   : > { %2441 = vmax.xlane.f32.xlu0 %v2440_v60  ;;  %2444 = vmax.xlane.f32.xlu1 %v2443_v61  ;;  %v700_v60 = vld [vmem:[%s3982_s27 + $0x70] sm:$0xff]  }
  0x3e   : > { %3567 = vmatmul.mubr.msk.bf16.gmra.mrb[16].mxu1 %vm1254_vm0, %v680_v59  ;;  %3532 = vmatmul.mubr.msk.bf16.gmra.mrb[16].mxu0 %vm920_vm3, %v3627_v7  ;;  %v3645_v59 = vld [vmem:[%s3994_s14 + $0x68] sm:$0xff]   ;;  %v3647_v61 = vld [vmem:[%s3994_s14 + $0x70] sm:$0xff]   ;;  %v4233_v7 = vld [vmem:[%s4228_s19] sm:$0xff] }
  0x3f   : > { %1392 = vmatprep.mubr.bf16.mxu1 %v6024_v0  ;;  %1058 = vmatprep.mubr.bf16.mxu0 %v6024_v0 }
  0x41   : > { %2447 = vmax.xlane.f32.xlu0 %v2446_v4  ;;  %2450 = vmax.xlane.f32.xlu1 %v2449_v5  ;;  %v702_v4 = vld [vmem:[%s3982_s27 + $0x78] sm:$0xff]  }
  0x42   : > { %v3649_v5 = vld [vmem:[%s3994_s14 + $0x78] sm:$0xff]   ;;  %s569_s14 = scalar_lea.vmem %s6023_s9, %s6395_s30 }
  0x45   : > { %2453 = vmax.xlane.f32.xlu0 %v2452_v13  ;;  %2456 = vmax.xlane.f32.xlu1 %v2455_v14  ;;  %v4239_v13 = vld [vmem:[%s4228_s19 + $0x10] sm:$0xff]  ;;  %v1631_v14 = vmul.f32 10.0, %v4233_v7 }
  0x46   : > { %3568 = vmatmul.mubr.msk.bf16.gmra.mrb[20].mxu1 %vm1254_vm0, %v682_v12  ;;  %3533 = vmatmul.mubr.msk.bf16.gmra.mrb[20].mxu0 %vm920_vm3, %v3629_v19  ;;  %v4236_v12 = vld [vmem:[%s4228_s19 + $0x8] sm:$0xff]  ;;  %v4246_v19 = vld [vmem:[%s4228_s19 + $0x18] sm:$0xff] }
  0x47   : > { %1402 = vmatprep.mubr.bf16.mxu1 %v6024_v0  ;;  %1068 = vmatprep.mubr.bf16.mxu0 %v6024_v0 }
  0x49   : > { %2459 = vmax.xlane.f32.xlu0 %v2458_v17  ;;  %2462 = vmax.xlane.f32.xlu1 %v2461_v18  ;;  %v1632_v17 = vmul.f32 10.0, %v4236_v12  ;;  %v1633_v18 = vmul.f32 10.0, %v4239_v13 }
  0x4d   : > { %2465 = vmax.xlane.f32.xlu0 %v2464_v25  ;;  %2468 = vmax.xlane.f32.xlu1 %v2467_v26  ;;  %v1695_v25 = vsub.f32 100.0, %v1631_v14  ;;  %v1504_v26 = vsub.f32 80.0, %v4236_v12 }
  0x4e   : > { %3569 = vmatmul.mubr.msk.bf16.gmra.mrb[24].mxu1 %vm1254_vm0, %v684_v24  ;;  %3534 = vmatmul.mubr.msk.bf16.gmra.mrb[24].mxu0 %vm920_vm3, %v3631_v35  ;;  %v1503_v24 = vsub.f32 80.0, %v4233_v7  ;;  %v1696_v35 = vsub.f32 100.0, %v1632_v17 }
  0x4f   : > { %1412 = vmatprep.mubr.bf16.mxu1 %v6024_v0  ;;  %1078 = vmatprep.mubr.bf16.mxu0 %v6024_v0 }
  0x51   : > { %2471 = vmax.xlane.f32.xlu0 %v2470_v31  ;;  %2474 = vmax.xlane.f32.xlu1 %v2473_v34  ;;  %v1505_v31 = vsub.f32 80.0, %v4239_v13  ;;  %v4252_v34 = vld [vmem:[%s4228_s19 + $0x20] sm:$0xff] }
  0x52   : > { %6107 = vst [vmem:[#allocation4_spill] sm:$0xff] %v4252_v34 }
  0x56   : > { %3570 = vmatmul.mubr.msk.bf16.gmra.mrb[28].mxu1 %vm1254_vm0, %v686_v37  ;;  %3535 = vmatmul.mubr.msk.bf16.gmra.mrb[28].mxu0 %vm920_vm3, %v3633_v39  ;;  %v1697_v37 = vsub.f32 100.0, %v1633_v18  ;;  %v1506_v39 = vsub.f32 80.0, %v4246_v19 }
  0x57   : > { %1422 = vmatprep.mubr.bf16.mxu1 %v6024_v0  ;;  %1088 = vmatprep.mubr.bf16.mxu0 %v6024_v0 }
  0x58   : > { %v4285_v14 = vmax.f32 %v1506_v39, 0.0 }
  0x5a   : > { %6111 = vst [vmem:[#allocation8_spill] sm:$0xff] %v4285_v14 }
  0x5e   : > { %3571 = vmatmul.mubr.msk.bf16.gmra.mrb[32].mxu1 %vm1254_vm0, %v688_v40  ;;  %3536 = vmatmul.mubr.msk.bf16.gmra.mrb[32].mxu0 %vm920_vm3, %v3635_v41  ;;  %v1634_v40 = vmul.f32 10.0, %v4246_v19 }
  0x5f   : > { %1432 = vmatprep.mubr.bf16.mxu1 %v6024_v0  ;;  %1098 = vmatprep.mubr.bf16.mxu0 %v6024_v0 }
  0x66   : > { %3572 = vmatmul.mubr.msk.bf16.gmra.mrb[36].mxu1 %vm1254_vm0, %v690_v44  ;;  %3537 = vmatmul.mubr.msk.bf16.gmra.mrb[36].mxu0 %vm920_vm3, %v3637_v45  ;;  %v4260_v45 = vmax.f32 %v1695_v25, 0.0 }
  0x67   : > { %1442 = vmatprep.mubr.bf16.mxu1 %v6024_v0  ;;  %1108 = vmatprep.mubr.bf16.mxu0 %v6024_v0 }
  0x6e   : > { %3573 = vmatmul.mubr.msk.bf16.gmra.mrb[40].mxu1 %vm1254_vm0, %v692_v47  ;;  %3538 = vmatmul.mubr.msk.bf16.gmra.mrb[40].mxu0 %vm920_vm3, %v3639_v49  ;;  %v4262_v47 = vmax.f32 %v1503_v24, 0.0  ;;  %v4264_v49 = vmax.f32 %v1504_v26, 0.0 }
  0x6f   : > { %1452 = vmatprep.mubr.bf16.mxu1 %v6024_v0  ;;  %1118 = vmatprep.mubr.bf16.mxu0 %v6024_v0 }
  0x76   : > { %3574 = vmatmul.mubr.msk.bf16.gmra.mrb[44].mxu1 %vm1254_vm0, %v694_v50  ;;  %3539 = vmatmul.mubr.msk.bf16.gmra.mrb[44].mxu0 %vm920_vm3, %v3641_v51  ;;  %v1635_v50 = vmul.f32 10.0, %v4252_v34  ;;  %v4268_v51 = vld [vmem:[%s4228_s19 + $0x28] sm:$0xff] }
  0x77   : > { %1462 = vmatprep.mubr.bf16.mxu1 %v6024_v0  ;;  %1128 = vmatprep.mubr.bf16.mxu0 %v6024_v0  ;;  %6110 = vst [vmem:[#allocation7_spill] sm:$0xff] %v4268_v51 }
  0x78   : > { %v1699_v26 = vsub.f32 100.0, %v1635_v50 }
  0x7e   : > { %3575 = vmatmul.mubr.msk.bf16.gmra.mrb[48].mxu1 %vm1254_vm0, %v696_v54  ;;  %3540 = vmatmul.mubr.msk.bf16.gmra.mrb[48].mxu0 %vm920_vm3, %v3643_v55 }
  0x7f   : > { %1472 = vmatprep.mubr.bf16.mxu1 %v6024_v0  ;;  %1138 = vmatprep.mubr.bf16.mxu0 %v6024_v0 }
  0x86   : > { %3576 = vmatmul.mubr.msk.bf16.gmra.mrb[52].mxu1 %vm1254_vm0, %v698_v56  ;;  %3541 = vmatmul.mubr.msk.bf16.gmra.mrb[52].mxu0 %vm920_vm3, %v3645_v59  ;;  %v4275_v56 = vmax.f32 %v1505_v31, 0.0  ;;  %v1507_v59 = vsub.f32 80.0, %v4252_v34  ;;  %v1508_v31 = vsub.f32 80.0, %v4268_v51 }
  0x87   : > { %1482 = vmatprep.mubr.bf16.mxu1 %v6024_v0  ;;  %1148 = vmatprep.mubr.bf16.mxu0 %v6024_v0 }
  0x8e   : > { %3577 = vmatmul.mubr.msk.bf16.gmra.mrb[56].mxu1 %vm1254_vm0, %v700_v60  ;;  %3542 = vmatmul.mubr.msk.bf16.gmra.mrb[56].mxu0 %vm920_vm3, %v3647_v61  ;;  %v4279_v60 = vld [vmem:[%s4228_s19 + $0x30] sm:$0xff]  ;;  %v4281_v61 = vmax.f32 %v1696_v35, 0.0 }
  0x8f   : > { %1492 = vmatprep.mubr.bf16.mxu1 %v6024_v0  ;;  %1158 = vmatprep.mubr.bf16.mxu0 %v6024_v0  ;;  %v1637_v35 = vmul.f32 10.0, %v4279_v60  ;;  %v1509_v50 = vsub.f32 80.0, %v4279_v60  ;;  %v770_v0 = vld [vmem:[%s552_s23] sm:$0x3] }
  0x90   : > { %vm2079_vm4 = vcmp.gt.f32.partialorder %v770_v0, 0.5 }
  0x96   : > { %3578 = vmatmul.mubr.msk.bf16.gmra.mrb[60].mxu1 %vm1254_vm0, %v702_v4  ;;  %3543 = vmatmul.mubr.msk.bf16.gmra.mrb[60].mxu0 %vm920_vm3, %v3649_v5  ;;  %v4283_v4 = vmax.f32 %v1697_v37, 0.0  ;;  %v1698_v5 = vsub.f32 100.0, %v1634_v40  ;;  %v2081_v37 = vlaneseq }
  0xa2   : > { %v4256_v41 = vpop.xlane.xlu0 %2381  ;;  %v4258_v44 = vpop.xlane.xlu1 %2387 }
  0xa3   : > { %6108 = vst [vmem:[#allocation5_spill] sm:$0xff] %v4256_v41  ;;  %6109 = vst [vmem:[#allocation6_spill] sm:$0xff] %v4258_v44  ;;  %v2476_v54 = vsub.f32 %v3952_v1, %v4256_v41  ;;  %v2478_v55 = vsub.f32 %v3955_v2, %v4258_v44  ;;  %v1636_v1 = vmul.f32 10.0, %v4268_v51  ;;  %v4292_v2 = vld [vmem:[%s4228_s19 + $0x38] sm:$0xff] }
  0xa4   : > { %6112 = vst [vmem:[#allocation9_spill] sm:$0xff] %v4292_v2  ;;  %v1638_v44 = vmul.f32 10.0, %v4292_v2 }
  0xa5   : > { %v2508_v17 = vmul.f32 1.442695, %v2476_v54  ;;  %v2512_v18 = vmul.f32 1.442695, %v2478_v55  ;;  %v4304_v54 = vmax.f32 %v1507_v59, 0.0  ;;  %v4306_v55 = vmax.f32 %v1698_v5, 0.0 }
  0xa6   : > { %v4294_v24 = vpop.xlane.xlu0 %2384  ;;  %v4296_v25 = vpop.xlane.xlu1 %2390  ;;  %v1700_v34 = vsub.f32 100.0, %v1636_v1  ;;  %v4319_v59 = vmax.f32 %v1508_v31, 0.0  ;;  %v1701_v5 = vsub.f32 100.0, %v1637_v35 }
  0xa7   : > { %6113 = vst [vmem:[#allocation10_spill] sm:$0xff] %v4294_v24  ;;  %6114 = vst [vmem:[#allocation11_spill] sm:$0xff] %v4296_v25  ;;  %3666 = vpow2.f32 %v2508_v17  ;;  %v2477_v39 = vsub.f32 %v3958_v3, %v4294_v24  ;;  %v2479_v40 = vsub.f32 %v3967_v6, %v4296_v25  ;;  %v4311_v17 = vld [vmem:[%s4228_s19 + $0x40] sm:$0xff]  ;;  %v4317_v6 = vmax.f32 %v1699_v26, 0.0 }
  0xa8   : > { %3668 = vpow2.f32 %v2512_v18  ;;  %6115 = vst [vmem:[#allocation12_spill] sm:$0xff] %v4311_v17  ;;  %6118 = vst [vmem:[#allocation15_spill] sm:$0xff] %v4319_v59  ;;  %v4321_v18 = vshrl.u32 %v2081_v37, 7  ;;  %v1639_v26 = vmul.f32 10.0, %v4311_v17  ;;  %v4329_v37 = vmax.f32 %v1700_v34, 0.0 }
  0xa9   : > { %v2510_v41 = vmul.f32 1.442695, %v2477_v39  ;;  %v2514_v51 = vmul.f32 1.442695, %v2479_v40  ;;  %v1510_v39 = vsub.f32 80.0, %v4292_v2  ;;  %v1702_v40 = vsub.f32 100.0, %v1638_v44 }
  0xaa   : > { %v4313_v14 = vpop.xlane.xlu0 %2393  ;;  %v4315_v3 = vpop.xlane.xlu1 %2396 }
  0xab   : > { %6116 = vst [vmem:[#allocation13_spill] sm:$0xff] %v4313_v14  ;;  %6117 = vst [vmem:[#allocation14_spill] sm:$0xff] %v4315_v3  ;;  %3670 = vpow2.f32 %v2510_v41  ;;  %v2480_v25 = vsub.f32 %v3985_v9, %v4313_v14  ;;  %v2481_v1 = vsub.f32 %v3988_v10, %v4315_v3  ;;  %v4331_v41 = vmax.f32 %v1509_v50, 0.0 }
  0xac   : > { %3672 = vpow2.f32 %v2514_v51  ;;  %v6122_v10 = vmov 0   ;;  %v1511_v3 = vsub.f32 80.0, %v4311_v17  ;;  %v4347_v50 = vmax.f32 %v1701_v5, 0.0 }
  0xad   : > { %v2516_v31 = vmul.f32 1.442695, %v2480_v25  ;;  %v2518_v35 = vmul.f32 1.442695, %v2481_v1  ;;  %6119 = vst [vmem:[#allocation16_spill] sm:$0xff] %v4331_v41  ;;  %v4338_v0 = vsel %vm2079_vm4, 1, %v6122_v10 }
  0xae   : > { %v4333_v24 = vpop.xlane.xlu0 %2399  ;;  %v4335_v9 = vpop.xlane.xlu1 %2402  ;;  %v4350_v1 = vld [vmem:[%s4228_s19 + $0x48] sm:$0xff]  ;;  %v4353_v10 = vld [vmem:[%s4228_s19 + $0x50] sm:$0xff]  ;;  %v4355_v51 = vmax.f32 %v1702_v40, 0.0  ;;  %v4357_v44 = vmax.f32 %v1510_v39, 0.0  ;;  %v1703_v14 = vsub.f32 100.0, %v1639_v26  ;;  %v4368_v40 = vmax.f32 %v1511_v3, 0.0 }
  0xaf   : > { %6120 = vst [vmem:[#allocation17_spill] sm:$0xff] %v4333_v24  ;;  %6121 = vst [vmem:[#allocation18_spill] sm:$0xff] %v4335_v9  ;;  %3674 = vpow2.f32 %v2516_v31  ;;  %v2482_v34 = vsub.f32 %v4001_v20, %v4333_v24  ;;  %v2483_v25 = vsub.f32 %v4004_v21, %v4335_v9  ;;  %v1512_v20 = vsub.f32 80.0, %v4350_v1  ;;  %v4361_v24 = vld [vmem:[%s4228_s19 + $0x58] sm:$0xff] }
  0xb0   : > { %6123 = vst [vmem:[#allocation19_spill] sm:$0xff] %v4350_v1  ;;  %6124 = vst [vmem:[#allocation20_spill] sm:$0xff] %v4353_v10  ;;  %3676 = vpow2.f32 %v2518_v35  ;;  %v1640_v39 = vmul.f32 10.0, %v4350_v1  ;;  %v1641_v26 = vmul.f32 10.0, %v4353_v10  ;;  %v4381_v3 = vmax.f32 %v1703_v14, 0.0 }
  0xb1   : > { %6125 = vst [vmem:[#allocation21_spill] sm:$0xff] %v4355_v51  ;;  %6126 = vst [vmem:[#allocation22_spill] sm:$0xff] %v4357_v44  ;;  %v3667_v17 = vpop.eup %3666  ;;  %v2520_v31 = vmul.f32 1.442695, %v2482_v34  ;;  %v2522_v41 = vmul.f32 1.442695, %v2483_v25 }
  0xb2   : > { %6127 = vst [vmem:[#allocation23_spill] sm:$0xff] %v4361_v24  ;;  %v3669_v21 = vpop.eup %3668  ;;  %v4363_v5 = vpop.xlane.xlu0 %2405  ;;  %v2572_v9 = vsel %vm1254_vm0, %v3667_v17, 0.0  ;;  %6130 = vst [vmem:[#allocation26_spill] sm:$0xff] %v4368_v40  ;;  %v1513_v25 = vsub.f32 80.0, %v4353_v10  ;;  %v4378_v44 = vld [vmem:[%s4228_s19 + $0x60] sm:$0xff]  ;;  %v1642_v40 = vmul.f32 10.0, %v4361_v24 }
  0xb3   : > { %6128 = vst [vmem:[#allocation24_spill] sm:$0xff] %v4363_v5  ;;  %v4366_v59 = vpop.xlane.xlu1 %2408  ;;  %3678 = vpow2.f32 %v2520_v31  ;;  %v2484_v35 = vsub.f32 %v4016_v27, %v4363_v5  ;;  %2573 = vadd.xlane.f32.xlu0 %v2572_v9  ;;  %6131 = vst [vmem:[#allocation27_spill] sm:$0xff] %v4378_v44  ;;  %v2578_v17 = vsel %vm1254_vm0, %v3669_v21, 0.0  ;;  %v4384_v2 = vmax.f32 %v1512_v20, 0.0 }
  0xb4   : > { %6129 = vst [vmem:[#allocation25_spill] sm:$0xff] %v4366_v59  ;;  %v2485_v34 = vsub.f32 %v4019_v28, %v4366_v59  ;;  %3680 = vpow2.f32 %v2522_v41  ;;  %v1514_v27 = vsub.f32 80.0, %v4361_v24  ;;  %v1704_v41 = vsub.f32 100.0, %v1640_v39 }
  0xb5   : > { %v3671_v1 = vpop.eup %3670  ;;  %v2524_v31 = vmul.f32 1.442695, %v2484_v35  ;;  %6132 = vst [vmem:[#allocation28_spill] sm:$0xff] %v4384_v2  ;;  %v1705_v21 = vsub.f32 100.0, %v1641_v26  ;;  %v1643_v14 = vmul.f32 10.0, %v4378_v44  ;;  %v4399_v2 = vmax.f32 %v1513_v25, 0.0 }
  0xb6   : > { %v2526_v51 = vmul.f32 1.442695, %v2485_v34  ;;  %v3673_v9 = vpop.eup %3672  ;;  %v4387_v28 = vpop.xlane.xlu0 %2411  ;;  %v2575_v59 = vsel %vm1254_vm0, %v3671_v1, 0.0  ;;  %v1515_v34 = vsub.f32 80.0, %v4378_v44  ;;  %v1706_v39 = vsub.f32 100.0, %v1642_v40 }
  0xb7   : > { %6133 = vst [vmem:[#allocation29_spill] sm:$0xff] %v4387_v28  ;;  %v4390_v5 = vpop.xlane.xlu1 %2414  ;;  %3682 = vpow2.f32 %v2524_v31  ;;  %v2486_v35 = vsub.f32 %v4029_v32, %v4387_v28  ;;  %2579 = vadd.xlane.f32.xlu0 %v2578_v17  ;;  %2576 = vadd.xlane.f32.xlu1 %v2575_v59  ;;  %v2581_v1 = vsel %vm1254_vm0, %v3673_v9, 0.0  ;;  %v4401_v31 = vmax.f32 %v1514_v27, 0.0  ;;  %v4404_v32 = vld [vmem:[%s4228_s19 + $0x68] sm:$0xff] }
  0xb8   : > { %6134 = vst [vmem:[#allocation30_spill] sm:$0xff] %v4390_v5  ;;  %v2487_v20 = vsub.f32 %v4033_v33, %v4390_v5  ;;  %3684 = vpow2.f32 %v2526_v51  ;;  %6135 = vst [vmem:[#allocation31_spill] sm:$0xff] %v4404_v32  ;;  %v4411_v9 = vmax.f32 %v1704_v41, 0.0  ;;  %v4413_v25 = vmax.f32 %v1705_v21, 0.0 }
  0xb9   : > { %v3675_v26 = vpop.eup %3674  ;;  %v2528_v24 = vmul.f32 1.442695, %v2486_v35  ;;  %v1707_v40 = vsub.f32 100.0, %v1643_v14  ;;  %v4425_v21 = vmax.f32 %v1706_v39, 0.0  ;;  %v4429_v14 = vld [vmem:[%s4228_s19 + $0x78] sm:$0xff] }
  0xba   : > { %v2530_v10 = vmul.f32 1.442695, %v2487_v20  ;;  %v3677_v59 = vpop.eup %3676  ;;  %v4406_v17 = vpop.xlane.xlu0 %2417  ;;  %v2584_v33 = vsel %vm1254_vm0, %v3675_v26, 0.0  ;;  %v4419_v20 = vmax.f32 %v1515_v34, 0.0  ;;  %v4422_v26 = vld [vmem:[%s4228_s19 + $0x70] sm:$0xff] }
  0xbb   : > { %6136 = vst [vmem:[#allocation32_spill] sm:$0xff] %v4406_v17  ;;  %v4409_v51 = vpop.xlane.xlu1 %2420  ;;  %3686 = vpow2.f32 %v2528_v24  ;;  %v2488_v27 = vsub.f32 %v4041_v36, %v4406_v17  ;;  %2582 = vadd.xlane.f32.xlu1 %v2581_v1  ;;  %2585 = vadd.xlane.f32.xlu0 %v2584_v33  ;;  %6139 = vst [vmem:[#allocation35_spill] sm:$0xff] %v4422_v26  ;;  %v2587_v41 = vsel %vm1254_vm0, %v3677_v59, 0.0  ;;  %v1644_v24 = vmul.f32 10.0, %v4404_v32  ;;  %v4433_v17 = vld [vmem:[%s4228_s19 + $0x80] sm:$0xff] }
  0xbc   : > { %6137 = vst [vmem:[#allocation33_spill] sm:$0xff] %v4409_v51  ;;  %v2489_v35 = vsub.f32 %v4045_v38, %v4409_v51  ;;  %6138 = vst [vmem:[#allocation34_spill] sm:$0xff] %v4419_v20  ;;  %3688 = vpow2.f32 %v2530_v10  ;;  %v1516_v33 = vsub.f32 80.0, %v4404_v32  ;;  %v4440_v39 = vmax.f32 %v1707_v40, 0.0 }
  0xbd   : > { %v3679_v5 = vpop.eup %3678  ;;  %v2532_v36 = vmul.f32 1.442695, %v2488_v27  ;;  %6140 = vst [vmem:[#allocation36_spill] sm:$0xff] %v4433_v17  ;;  %v1517_v59 = vsub.f32 80.0, %v4422_v26  ;;  %v1645_v28 = vmul.f32 10.0, %v4422_v26  ;;  %v1646_v20 = vmul.f32 10.0, %v4429_v14 }
  0xbe   : > { %v2534_v1 = vmul.f32 1.442695, %v2489_v35  ;;  %v3681_v38 = vpop.eup %3680  ;;  %v4435_v34 = vpop.xlane.xlu0 %2423  ;;  %v2590_v10 = vsel %vm1254_vm0, %v3679_v5, 0.0  ;;  %6143 = vst [vmem:[#allocation39_spill] sm:$0xff] %v4440_v39  ;;  %v1708_v40 = vsub.f32 100.0, %v1644_v24  ;;  %v1647_v32 = vmul.f32 10.0, %v4433_v17 }
  0xbf   : > { %6141 = vst [vmem:[#allocation37_spill] sm:$0xff] %v4435_v34  ;;  %v4438_v51 = vpop.xlane.xlu1 %2426  ;;  %3690 = vpow2.f32 %v2532_v36  ;;  %v2490_v27 = vsub.f32 %v4055_v42, %v4435_v34  ;;  %2588 = vadd.xlane.f32.xlu1 %v2587_v41  ;;  %2591 = vadd.xlane.f32.xlu0 %v2590_v10  ;;  %v2593_v5 = vsel %vm1254_vm0, %v3681_v38, 0.0  ;;  %v4451_v36 = vmax.f32 %v1516_v33, 0.0  ;;  %v4467_v34 = vld [vmem:[%s4228_s19 + $0x88] sm:$0xff] }
  0xc0   : > { %6142 = vst [vmem:[#allocation38_spill] sm:$0xff] %v4438_v51  ;;  %v2491_v35 = vsub.f32 %v4059_v43, %v4438_v51  ;;  %3692 = vpow2.f32 %v2534_v1  ;;  %v1518_v42 = vsub.f32 80.0, %v4429_v14  ;;  %v1709_v1 = vsub.f32 100.0, %v1645_v28  ;;  %6148 = vst [vmem:[#allocation44_spill] sm:$0xff] %v4467_v34 }
  0xc1   : > { %v3683_v39 = vpop.eup %3682  ;;  %v2536_v44 = vmul.f32 1.442695, %v2490_v27  ;;  %6144 = vst [vmem:[#allocation40_spill] sm:$0xff] %v4451_v36  ;;  %v4459_v38 = vmax.f32 %v1517_v59, 0.0  ;;  %v1519_v24 = vsub.f32 80.0, %v4433_v17  ;;  %v1711_v59 = vsub.f32 100.0, %v1647_v32 }
  0xc2   : > { %v2538_v26 = vmul.f32 1.442695, %v2491_v35  ;;  %v3685_v41 = vpop.eup %3684  ;;  %v4454_v10 = vpop.xlane.xlu0 %2429  ;;  %v2596_v43 = vsel %vm1254_vm0, %v3683_v39, 0.0  ;;  %v1710_v35 = vsub.f32 100.0, %v1646_v20  ;;  %v4470_v39 = vmax.f32 %v1708_v40, 0.0 }
  0xc3   : > { %6145 = vst [vmem:[#allocation41_spill] sm:$0xff] %v4454_v10  ;;  %v4457_v51 = vpop.xlane.xlu1 %2432  ;;  %6147 = vst [vmem:[#allocation43_spill] sm:$0xff] %v4459_v38  ;;  %3694 = vpow2.f32 %v2536_v44  ;;  %v2492_v33 = vsub.f32 %v4067_v46, %v4454_v10  ;;  %2594 = vadd.xlane.f32.xlu1 %v2593_v5  ;;  %2597 = vadd.xlane.f32.xlu0 %v2596_v43  ;;  %v2599_v28 = vsel %vm1254_vm0, %v3685_v41, 0.0  ;;  %v4472_v36 = vmax.f32 %v1518_v42, 0.0  ;;  %v4475_v46 = vld [vmem:[%s4228_s19 + $0x90] sm:$0xff] }
  0xc4   : > { %6146 = vst [vmem:[#allocation42_spill] sm:$0xff] %v4457_v51  ;;  %v2493_v27 = vsub.f32 %v4071_v48, %v4457_v51  ;;  %3696 = vpow2.f32 %v2538_v26  ;;  %6149 = vst [vmem:[#allocation45_spill] sm:$0xff] %v4475_v46  ;;  %v4482_v26 = vmax.f32 %v1709_v1, 0.0  ;;  %v4484_v40 = vmax.f32 %v1519_v24, 0.0 }
  0xc5   : > { %v3687_v17 = vpop.eup %3686  ;;  %v2540_v38 = vmul.f32 1.442695, %v2492_v33  ;;  %v1648_v32 = vmul.f32 10.0, %v4467_v34  ;;  %v4491_v33 = vmax.f32 %v1710_v35, 0.0  ;;  %v4497_v24 = vmax.f32 %v1711_v59, 0.0 }
  0xc6   : > { %v2542_v44 = vmul.f32 1.442695, %v2493_v27  ;;  %v3689_v5 = vpop.eup %3688  ;;  %v4477_v43 = vpop.xlane.xlu0 %2435  ;;  %v2602_v48 = vsel %vm1254_vm0, %v3687_v17, 0.0  ;;  %6152 = vst [vmem:[#allocation48_spill] sm:$0xff] %v4484_v40  ;;  %v4494_v17 = vld [vmem:[%s4228_s19 + $0x98] sm:$0xff]  ;;  %v1649_v27 = vmul.f32 10.0, %v4475_v46 }
  0xc7   : > { %6150 = vst [vmem:[#allocation46_spill] sm:$0xff] %v4477_v43  ;;  %v4480_v20 = vpop.xlane.xlu1 %2438  ;;  %3698 = vpow2.f32 %v2540_v38  ;;  %v2494_v42 = vsub.f32 %v4081_v52, %v4477_v43  ;;  %2600 = vadd.xlane.f32.xlu1 %v2599_v28  ;;  %2603 = vadd.xlane.f32.xlu0 %v2602_v48  ;;  %v2605_v1 = vsel %vm1254_vm0, %v3689_v5, 0.0  ;;  %6153 = vst [vmem:[#allocation49_spill] sm:$0xff] %v4497_v24  ;;  %v1520_v52 = vsub.f32 80.0, %v4467_v34  ;;  %v4502_v28 = vld [vmem:[%s4228_s19 + $0xa0] sm:$0xff] }
  0xc8   : > { %6151 = vst [vmem:[#allocation47_spill] sm:$0xff] %v4480_v20  ;;  %v2495_v41 = vsub.f32 %v4085_v53, %v4480_v20  ;;  %3700 = vpow2.f32 %v2542_v44  ;;  %6154 = vst [vmem:[#allocation50_spill] sm:$0xff] %v4502_v28  ;;  %v1712_v44 = vsub.f32 100.0, %v1648_v32  ;;  %v1521_v59 = vsub.f32 80.0, %v4475_v46 }
  0xc9   : > { %v3691_v38 = vpop.eup %3690  ;;  %v2544_v51 = vmul.f32 1.442695, %v2494_v42  ;;  %v1650_v5 = vmul.f32 10.0, %v4494_v17  ;;  %v1522_v43 = vsub.f32 80.0, %v4494_v17  ;;  %v1713_v32 = vsub.f32 100.0, %v1649_v27 }
  0xca   : > { %v2546_v10 = vmul.f32 1.442695, %v2495_v41  ;;  %v3693_v48 = vpop.eup %3692  ;;  %v4504_v53 = vpop.xlane.xlu0 %2441  ;;  %v2608_v35 = vsel %vm1254_vm0, %v3691_v38, 0.0  ;;  %v1651_v40 = vmul.f32 10.0, %v4502_v28  ;;  %v4518_v24 = vmax.f32 %v1520_v52, 0.0 }
  0xcb   : > { %6155 = vst [vmem:[#allocation51_spill] sm:$0xff] %v4504_v53  ;;  %v4507_v20 = vpop.xlane.xlu1 %2444  ;;  %3702 = vpow2.f32 %v2544_v51  ;;  %v2496_v42 = vsub.f32 %v4094_v57, %v4504_v53  ;;  %2606 = vadd.xlane.f32.xlu1 %v2605_v1  ;;  %2609 = vadd.xlane.f32.xlu0 %v2608_v35  ;;  %v2611_v38 = vsel %vm1254_vm0, %v3693_v48, 0.0  ;;  %v1523_v57 = vsub.f32 80.0, %v4502_v28  ;;  %v4540_v53 = vld [vmem:[%s4228_s19 + $0xb0] sm:$0xff] }
  0xcc   : > { %6156 = vst [vmem:[#allocation52_spill] sm:$0xff] %v4507_v20  ;;  %v2497_v41 = vsub.f32 %v4097_v58, %v4507_v20  ;;  %3704 = vpow2.f32 %v2546_v10  ;;  %6157 = vst [vmem:[#allocation53_spill] sm:$0xff] %v4518_v24  ;;  %v4526_v48 = vmax.f32 %v1712_v44, 0.0  ;;  %v4528_v27 = vmax.f32 %v1521_v59, 0.0 }
  0xcd   : > { %v3695_v46 = vpop.eup %3694  ;;  %v2548_v34 = vmul.f32 1.442695, %v2496_v42  ;;  %v1714_v20 = vsub.f32 100.0, %v1650_v5  ;;  %v4531_v42 = vld [vmem:[%s4228_s19 + $0xa8] sm:$0xff]  ;;  %6163 = vst [vmem:[#allocation59_spill] sm:$0xff] %v4540_v53  ;;  %v4543_v59 = vmax.f32 %v1713_v32, 0.0 }
  0xce   : > { %v2550_v51 = vmul.f32 1.442695, %v2497_v41  ;;  %v3697_v1 = vpop.eup %3696  ;;  %v4521_v35 = vpop.xlane.xlu0 %2447  ;;  %v2614_v58 = vsel %vm1254_vm0, %v3695_v46, 0.0  ;;  %6160 = vst [vmem:[#allocation56_spill] sm:$0xff] %v4528_v27  ;;  %6161 = vst [vmem:[#allocation57_spill] sm:$0xff] %v4531_v42  ;;  %v4537_v46 = vmax.f32 %v1522_v43, 0.0 }
  0xcf   : > { %6158 = vst [vmem:[#allocation54_spill] sm:$0xff] %v4521_v35  ;;  %v4524_v10 = vpop.xlane.xlu1 %2450  ;;  %3706 = vpow2.f32 %v2548_v34  ;;  %v2498_v52 = vsub.f32 %v4108_v62, %v4521_v35  ;;  %2612 = vadd.xlane.f32.xlu1 %v2611_v38  ;;  %2615 = vadd.xlane.f32.xlu0 %v2614_v58  ;;  %v2617_v44 = vsel %vm1254_vm0, %v3697_v1, 0.0  ;;  %v1715_v5 = vsub.f32 100.0, %v1651_v40  ;;  %v4546_v34 = vld [vmem:[%s4228_s19 + $0xb8] sm:$0xff] }
  0xd0   : > { %6159 = vst [vmem:[#allocation55_spill] sm:$0xff] %v4524_v10  ;;  %v2499_v41 = vsub.f32 %v4111_v63, %v4524_v10  ;;  %6162 = vst [vmem:[#allocation58_spill] sm:$0xff] %v4537_v46  ;;  %3708 = vpow2.f32 %v2550_v51  ;;  %v4548_v58 = vmax.f32 %v1523_v57, 0.0  ;;  %v1652_v63 = vmul.f32 10.0, %v4531_v42  ;;  %v4561_v46 = vld [vmem:[%s4228_s19 + $0xc0] sm:$0xff] }
  0xd1   : > { %6164 = vst [vmem:[#allocation60_spill] sm:$0xff] %v4546_v34  ;;  %v3699_v28 = vpop.eup %3698  ;;  %v2552_v62 = vmul.f32 1.442695, %v2498_v52  ;;  %v4556_v1 = vmax.f32 %v1714_v20, 0.0  ;;  %v1524_v40 = vsub.f32 80.0, %v4531_v42  ;;  %v1653_v32 = vmul.f32 10.0, %v4540_v53 }
  0xd2   : > { %v2554_v38 = vmul.f32 1.442695, %v2499_v41  ;;  %6165 = vst [vmem:[#allocation61_spill] sm:$0xff] %v4548_v58  ;;  %v3701_v43 = vpop.eup %3700  ;;  %v4551_v10 = vpop.xlane.xlu0 %2453  ;;  %v2620_v51 = vsel %vm1254_vm0, %v3699_v28, 0.0  ;;  %6168 = vst [vmem:[#allocation64_spill] sm:$0xff] %v4561_v46  ;;  %v1654_v28 = vmul.f32 10.0, %v4546_v34 }
  0xd3   : > { %6166 = vst [vmem:[#allocation62_spill] sm:$0xff] %v4551_v10  ;;  %v4554_v35 = vpop.xlane.xlu1 %2456  ;;  %3710 = vpow2.f32 %v2552_v62  ;;  %v2500_v57 = vsub.f32 %v4120_v8, %v4551_v10  ;;  %2618 = vadd.xlane.f32.xlu1 %v2617_v44  ;;  %2621 = vadd.xlane.f32.xlu0 %v2620_v51  ;;  %v2623_v20 = vsel %vm1254_vm0, %v3701_v43, 0.0  ;;  %v4569_v41 = vmax.f32 %v1715_v5, 0.0 }
  0xd4   : > { %6167 = vst [vmem:[#allocation63_spill] sm:$0xff] %v4554_v35  ;;  %v2501_v52 = vsub.f32 %v4123_v11, %v4554_v35  ;;  %3712 = vpow2.f32 %v2554_v38  ;;  %v1525_v58 = vsub.f32 80.0, %v4540_v53  ;;  %v1716_v24 = vsub.f32 100.0, %v1652_v63 }
  0xd5   : > { %v3703_v42 = vpop.eup %3702  ;;  %v2556_v27 = vmul.f32 1.442695, %v2500_v57  ;;  %v1655_v8 = vmul.f32 10.0, %v4561_v46  ;;  %v4578_v38 = vmax.f32 %v1524_v40, 0.0  ;;  %v1717_v43 = vsub.f32 100.0, %v1653_v32 }
  0xd6   : > { %v2558_v62 = vmul.f32 1.442695, %v2501_v52  ;;  %v3705_v44 = vpop.eup %3704  ;;  %v4573_v51 = vpop.xlane.xlu0 %2459  ;;  %v2626_v11 = vsel %vm1254_vm0, %v3703_v42, 0.0  ;;  %v1526_v5 = vsub.f32 80.0, %v4546_v34  ;;  %v1718_v52 = vsub.f32 100.0, %v1654_v28 }
  0xd7   : > { %6169 = vst [vmem:[#allocation65_spill] sm:$0xff] %v4573_v51  ;;  %v4576_v35 = vpop.xlane.xlu1 %2462  ;;  %6171 = vst [vmem:[#allocation67_spill] sm:$0xff] %v4578_v38  ;;  %3714 = vpow2.f32 %v2556_v27  ;;  %v2502_v57 = vsub.f32 %v4134_v15, %v4573_v51  ;;  %2624 = vadd.xlane.f32.xlu1 %v2623_v20  ;;  %2627 = vadd.xlane.f32.xlu0 %v2626_v11  ;;  %v2629_v42 = vsel %vm1254_vm0, %v3705_v44, 0.0  ;;  %v4586_v10 = vmax.f32 %v1525_v58, 0.0  ;;  %v4621_v51 = vld [vmem:[%s4228_s19 + $0xe0] sm:$0xff] }
  0xd8   : > { %6170 = vst [vmem:[#allocation66_spill] sm:$0xff] %v4576_v35  ;;  %v2503_v63 = vsub.f32 %v4137_v16, %v4576_v35  ;;  %3716 = vpow2.f32 %v2558_v62  ;;  %v1527_v40 = vsub.f32 80.0, %v4561_v46  ;;  %v6173_v27 = vsub.s32 0, %v4321_v18  ;;  %v4595_v16 = vld [vmem:[%s4228_s19 + $0xc8] sm:$0xff]  ;;  %6182 = vst [vmem:[#allocation77_spill] sm:$0xff] %v4621_v51 }
  0xd9   : > { %6172 = vst [vmem:[#allocation68_spill] sm:$0xff] %v4586_v10  ;;  %v3707_v32 = vpop.eup %3706  ;;  %v2560_v38 = vmul.f32 1.442695, %v2502_v57  ;;  %v1719_v20 = vsub.f32 100.0, %v1655_v8  ;;  %6174 = vst [vmem:[#allocation69_spill] sm:$0xff] %v4595_v16  ;;  %v4602_v11 = vmax.f32 %v1716_v24, 0.0 }
  0xda   : > { %v2562_v34 = vmul.f32 1.442695, %v2503_v63  ;;  %v4592_v15 = vrot.slane %v4338_v0, %v6173_v27  ;;  %v3709_v28 = vpop.eup %3708  ;;  %v4597_v62 = vpop.xlane.xlu0 %2465  ;;  %v2632_v58 = vsel %vm1254_vm0, %v3707_v32, 0.0  ;;  %v4604_v57 = vmax.f32 %v1717_v43, 0.0  ;;  %v4615_v32 = vld [vmem:[%s4228_s19 + $0xd0] sm:$0xff]  ;;  %v4618_v24 = vld [vmem:[%s4228_s19 + $0xd8] sm:$0xff] }
  0xdb   : > { %6175 = vst [vmem:[#allocation70_spill] sm:$0xff] %v4597_v62  ;;  %v4600_v44 = vpop.xlane.xlu1 %2468  ;;  %v4606_v63 = vmax.f32 %v1526_v5, 0.0  ;;  %3718 = vpow2.f32 %v2560_v38  ;;  %v2504_v8 = vsub.f32 %v4146_v22, %v4597_v62  ;;  %2630 = vadd.xlane.f32.xlu1 %v2629_v42  ;;  %2633 = vadd.xlane.f32.xlu0 %v2632_v58  ;;  %v4612_v35 = vmax.f32 %v1718_v52, 0.0  ;;  %6180 = vst [vmem:[#allocation75_spill] sm:$0xff] %v4615_v32  ;;  %v4628_v5 = vld [vmem:[%s4228_s19 + $0xe8] sm:$0xff]  ;;  %v4642_v10 = vld [vmem:[%s4228_s19 + $0xf0] sm:$0xff] }
  0xdc   : > { %6176 = vst [vmem:[#allocation71_spill] sm:$0xff] %v4600_v44  ;;  %6177 = vst [vmem:[#allocation72_spill] sm:$0xff] %v4604_v57  ;;  %v2505_v27 = vsub.f32 %v4149_v23, %v4600_v44  ;;  %3720 = vpow2.f32 %v2562_v34  ;;  %v2635_v43 = vsel %vm1254_vm0, %v3709_v28, 0.0  ;;  %v4624_v38 = vmax.f32 %v1527_v40, 0.0 }
  0xdd   : > { %6178 = vst [vmem:[#allocation73_spill] sm:$0xff] %v4606_v63  ;;  %6179 = vst [vmem:[#allocation74_spill] sm:$0xff] %v4612_v35  ;;  %v1656_v22 = vmul.f32 10.0, %v4595_v16  ;;  %v3711_v42 = vpop.eup %3710  ;;  %v2564_v23 = vmul.f32 1.442695, %v2504_v8  ;;  %v4630_v58 = vmax.f32 %v1719_v20, 0.0 }
  0xde   : > { %6181 = vst [vmem:[#allocation76_spill] sm:$0xff] %v4618_v24  ;;  %6183 = vst [vmem:[#allocation78_spill] sm:$0xff] %v4624_v38  ;;  %v2566_v52 = vmul.f32 1.442695, %v2505_v27  ;;  %v1528_v44 = vsub.f32 80.0, %v4595_v16  ;;  %v3713_v62 = vpop.eup %3712  ;;  %v4633_v46 = vpop.xlane.xlu0 %2471  ;;  %v2638_v34 = vsel %vm1254_vm0, %v3711_v42, 0.0 }
  0xdf   : > { %6184 = vst [vmem:[#allocation79_spill] sm:$0xff] %v4628_v5  ;;  %6185 = vst [vmem:[#allocation80_spill] sm:$0xff] %v4630_v58  ;;  %v4636_v28 = vpop.xlane.xlu1 %2474  ;;  %v1657_v40 = vmul.f32 10.0, %v4615_v32  ;;  %v1658_v38 = vmul.f32 10.0, %v4618_v24  ;;  %v1659_v63 = vmul.f32 10.0, %v4621_v51  ;;  %3722 = vpow2.f32 %v2564_v23  ;;  %2636 = vadd.xlane.f32.xlu1 %v2635_v43  ;;  %2639 = vadd.xlane.f32.xlu0 %v2638_v34  ;;  %v4658_v34 = vld [vmem:[%s4228_s19 + $0xf8] sm:$0xff] }
  0xe0   : > { %6186 = vst [vmem:[#allocation81_spill] sm:$0xff] %v4633_v46  ;;  %6187 = vst [vmem:[#allocation82_spill] sm:$0xff] %v4636_v28  ;;  %v2506_v20 = vsub.f32 %v4160_v29, %v4633_v46  ;;  %v2507_v8 = vsub.f32 %v4163_v30, %v4636_v28  ;;  %v1660_v27 = vmul.f32 10.0, %v4628_v5  ;;  %3724 = vpow2.f32 %v2566_v52 }
  0xe1   : > { %6188 = vst [vmem:[#allocation83_spill] sm:$0xff] %v4642_v10  ;;  %v2641_v42 = vsel %vm1254_vm0, %v3713_v62, 0.0  ;;  %v1720_v16 = vsub.f32 100.0, %v1656_v22  ;;  %v1529_v58 = vsub.f32 80.0, %v4615_v32  ;;  %v3715_v35 = vpop.eup %3714  ;;  %v6189_v23 = vsub.s32 1, %v4321_v18  ;;  %6190 = vst [vmem:[#allocation84_spill] sm:$0xff] %v4658_v34 }
  0xe2   : > { %v2568_v57 = vmul.f32 1.442695, %v2506_v20  ;;  %v2570_v53 = vmul.f32 1.442695, %v2507_v8  ;;  %v1661_v43 = vmul.f32 10.0, %v4642_v10  ;;  %v3717_v30 = vpop.eup %3716  ;;  %v2644_v52 = vsel %vm1254_vm0, %v3715_v35, 0.0 }
  0xe3   : > { %v4654_v29 = vrot.slane %v4338_v0, %v6189_v23  ;;  %v4661_v28 = vmax.f32 %v1528_v44, 0.0  ;;  %v1721_v62 = vsub.f32 100.0, %v1657_v40  ;;  %v1530_v22 = vsub.f32 80.0, %v4618_v24  ;;  %2642 = vadd.xlane.f32.xlu1 %v2641_v42  ;;  %2645 = vadd.xlane.f32.xlu0 %v2644_v52  ;;  %v4684_v52 = vld [vmem:[%s4228_s19 + $0x110] sm:$0xff] }
  0xe4   : > { %3726 = vpow2.f32 %v2568_v57  ;;  %v1722_v18 = vsub.f32 100.0, %v1658_v38  ;;  %v1723_v0 = vsub.f32 100.0, %v1659_v63  ;;  %v1724_v20 = vsub.f32 100.0, %v1660_v27  ;;  %v4673_v38 = vld [vmem:[%s4228_s19 + $0x100] sm:$0xff]  ;;  %v4676_v63 = vld [vmem:[%s4228_s19 + $0x108] sm:$0xff]  ;;  %6197 = vst [vmem:[#allocation91_spill] sm:$0xff] %v4684_v52 }
  0xe5   : > { %6191 = vst [vmem:[#allocation85_spill] sm:$0xff] %v4661_v28  ;;  %3728 = vpow2.f32 %v2570_v53  ;;  %v2647_v8 = vsel %vm1254_vm0, %v3717_v30, 0.0  ;;  %v4665_v23 = vmax.f32 %v1529_v58, 0.0  ;;  %v1662_v35 = vmul.f32 10.0, %v4658_v34  ;;  %v3719_v44 = vpop.eup %3718  ;;  %6194 = vst [vmem:[#allocation88_spill] sm:$0xff] %v4673_v38  ;;  %v809_v24 = vld [vmem:[%s4228_s19 + $0x130] sm:$0xff] }
  0xe6   : > { %v4668_v40 = vmax.f32 %v1720_v16, 0.0  ;;  %v1531_v46 = vsub.f32 80.0, %v4621_v51  ;;  %v1532_v57 = vsub.f32 80.0, %v4628_v5  ;;  %v1725_v42 = vsub.f32 100.0, %v1661_v43  ;;  %6195 = vst [vmem:[#allocation89_spill] sm:$0xff] %v4676_v63  ;;  %v3721_v53 = vpop.eup %3720 }
  0xe7   : > { %6192 = vst [vmem:[#allocation86_spill] sm:$0xff] %v4665_v23  ;;  %v2650_v27 = vsel %vm1254_vm0, %v3719_v44, 0.0  ;;  %v4679_v58 = vmax.f32 %v1721_v62, 0.0  ;;  %v1533_v16 = vsub.f32 80.0, %v4642_v10  ;;  %v1534_v30 = vsub.f32 80.0, %v4658_v34  ;;  %2648 = vadd.xlane.f32.xlu1 %v2647_v8  ;;  %v4695_v44 = vld [vmem:[%s4228_s19 + $0x118] sm:$0xff] }
  0xe8   : > { %6193 = vst [vmem:[#allocation87_spill] sm:$0xff] %v4668_v40  ;;  %2651 = vadd.xlane.f32.xlu0 %v2650_v27  ;;  %v4686_v43 = vmax.f32 %v1722_v18, 0.0  ;;  %v4688_v5 = vmax.f32 %v1530_v22, 0.0  ;;  %v4690_v51 = vmax.f32 %v1723_v0, 0.0  ;;  %v4692_v23 = vmax.f32 %v1724_v20, 0.0  ;;  %6202 = vst [vmem:[#allocation96_spill] sm:$0xff] %v4695_v44 }
  0xe9   : > { %6196 = vst [vmem:[#allocation90_spill] sm:$0xff] %v4679_v58  ;;  %v2653_v62 = vsel %vm1254_vm0, %v3721_v53, 0.0  ;;  %v1726_v10 = vsub.f32 100.0, %v1662_v35  ;;  %v1663_v34 = vmul.f32 10.0, %v4673_v38  ;;  %v1664_v28 = vmul.f32 10.0, %v4676_v63  ;;  %v807_v8 = vld [vmem:[%s4228_s19 + $0x120] sm:$0xff]  ;;  %v3723_v18 = vpop.eup %3722 }
  0xea   : > { %6198 = vst [vmem:[#allocation92_spill] sm:$0xff] %v4686_v43  ;;  %6199 = vst [vmem:[#allocation93_spill] sm:$0xff] %v4688_v5  ;;  %v808_v27 = vld [vmem:[%s4228_s19 + $0x128] sm:$0xff]  ;;  %v4702_v43 = vmax.f32 %v1531_v46, 0.0  ;;  %v4704_v22 = vmax.f32 %v1532_v57, 0.0  ;;  %v4706_v0 = vmax.f32 %v1725_v42, 0.0 }
  0xeb   : > { %6200 = vst [vmem:[#allocation94_spill] sm:$0xff] %v4690_v51  ;;  %6201 = vst [vmem:[#allocation95_spill] sm:$0xff] %v4692_v23  ;;  %v1665_v20 = vmul.f32 10.0, %v4684_v52  ;;  %v3725_v23 = vpop.eup %3724  ;;  %v2656_v53 = vsel %vm1254_vm0, %v3723_v18, 0.0  ;;  %v4710_v51 = vmax.f32 %v1533_v16, 0.0  ;;  %v4712_v35 = vmax.f32 %v1534_v30, 0.0  ;;  %2654 = vadd.xlane.f32.xlu1 %v2653_v62 }
  0xec   : > { %6203 = vst [vmem:[#allocation97_spill] sm:$0xff] %v4702_v43  ;;  %6204 = vst [vmem:[#allocation98_spill] sm:$0xff] %v4704_v22  ;;  %v1666_v5 = vmul.f32 10.0, %v4695_v44  ;;  %2657 = vadd.xlane.f32.xlu0 %v2656_v53  ;;  %v1535_v46 = vsub.f32 80.0, %v4673_v38  ;;  %v1536_v57 = vsub.f32 80.0, %v4676_v63  ;;  %v1667_v42 = vmul.f32 10.0, %v807_v8 }
  0xed   : > { %6205 = vst [vmem:[#allocation99_spill] sm:$0xff] %v4706_v0  ;;  %6206 = vst [vmem:[#allocation100_spill] sm:$0xff] %v4710_v51  ;;  %v1668_v22 = vmul.f32 10.0, %v808_v27  ;;  %v2659_v43 = vsel %vm1254_vm0, %v3725_v23, 0.0  ;;  %v4719_v0 = vmax.f32 %v1726_v10, 0.0  ;;  %v1727_v18 = vsub.f32 100.0, %v1663_v34 }
  0xee   : > { %6207 = vst [vmem:[#allocation101_spill] sm:$0xff] %v4712_v35  ;;  %v1728_v16 = vsub.f32 100.0, %v1664_v28  ;;  %v3727_v51 = vpop.eup %3726  ;;  %vm2089_vm5 = vcmp.eq.s32.totalorder %v4592_v15, 1  ;;  %v1537_v30 = vsub.f32 80.0, %v4684_v52  ;;  %v1729_v35 = vsub.f32 100.0, %v1665_v20 }
  0xef   : > { %6208 = vst [vmem:[#allocation102_spill] sm:$0xff] %v4719_v0  ;;  %v1538_v62 = vsub.f32 80.0, %v4695_v44  ;;  %v1669_v53 = vmul.f32 10.0, %v809_v24  ;;  %v3729_v38 = vpop.eup %3728  ;;  %v2662_v63 = vsel %vm1254_vm0, %v3727_v51, 0.0  ;;  %vm2090_vm6 = vcmp.eq.s32.totalorder %v4654_v29, 1  ;;  %2660 = vadd.xlane.f32.xlu1 %v2659_v43 }
  0xf0   : > { %v1730_v23 = vsub.f32 100.0, %v1666_v5  ;;  %v1539_v10 = vsub.f32 80.0, %v807_v8  ;;  %v1540_v0 = vsub.f32 80.0, %v808_v27  ;;  %2663 = vadd.xlane.f32.xlu0 %v2662_v63  ;;  %v4726_v28 = vmax.f32 %v1535_v46, 0.0  ;;  %v4740_v8 = vld [vmem:[%s3982_s27] sm:$0xff]   ;;  %v4744_v27 = vld [vmem:[%s4228_s19 + $0x138] sm:$0xff] }
  0xf1   : > { %v4728_v34 = vmax.f32 %v1536_v57, 0.0  ;;  %v1731_v20 = vsub.f32 100.0, %v1667_v42  ;;  %v1732_v52 = vsub.f32 100.0, %v1668_v22  ;;  %v2665_v44 = vsel %vm1254_vm0, %v3729_v38, 0.0  ;;  %6209 = vst [vmem:[#allocation103_spill] sm:$0xff] %v4740_v8  ;;  %v1344_v46 = vpop.f32.mrb[0].mxu1 }
  0xf2   : > { %v4731_v58 = vmax.f32 %v1727_v18, 0.0  ;;  %v4733_v51 = vmax.f32 %v1728_v16, 0.0  ;;  %v1541_v32 = vsub.f32 80.0, %v809_v24  ;;  %v4735_v40 = vmax.f32 %v1729_v35, 0.0  ;;  %v1346_v35 = vpop.f32.mrb[1].mxu1 }
  0xf3   : > { %v4737_v5 = vmax.f32 %v1537_v30, 0.0  ;;  %v1733_v43 = vsub.f32 100.0, %v1669_v53  ;;  %v4746_v22 = vmax.f32 %v1730_v23, 0.0  ;;  %v4748_v38 = vmax.f32 %v1538_v62, 0.0  ;;  %2666 = vadd.xlane.f32.xlu1 %v2665_v44  ;;  %v1348_v53 = vpop.f32.mrb[2].mxu1  ;;  %v1010_v44 = vpop.f32.mrb[0].mxu0 }
  0xf4   : > { %v4750_v57 = vmax.f32 %v1539_v10, 0.0  ;;  %v4752_v24 = vmax.f32 %v1540_v0, 0.0  ;;  %vm1887_vm7 = vcmp.gt.f32.partialorder %v1344_v46, 0.5  ;;  %v4754_v42 = vmax.f32 %v1731_v20, 0.0  ;;  %v4765_v0 = vld [vmem:[%s4228_s19 + $0x140] sm:$0xff] }
  0xf5   : > { %v4756_v18 = vmax.f32 %v1732_v52, 0.0  ;;  %v1951_v30 = vsel %vm1887_vm7, %v4260_v45, %v4233_v7  ;;  %vm1888_vm8 = vcmp.gt.f32.partialorder %v1346_v35, 0.5  ;;  %v4761_v62 = vmax.f32 %v1541_v32, 0.0  ;;  %v1350_v52 = vpop.f32.mrb[3].mxu1  ;;  %v1012_v7 = vpop.f32.mrb[1].mxu0 }
  0xf6   : > { %v1670_v23 = vmul.f32 10.0, %v4744_v27  ;;  %v1952_v10 = vsel %vm1888_vm8, %v4281_v61, %v4236_v12  ;;  %vm1889_vm9 = vcmp.gt.f32.partialorder %v1348_v53, 0.5  ;;  %v4769_v20 = vmax.f32 %v1733_v43, 0.0  ;;  %v1014_v16 = vpop.f32.mrb[2].mxu0 }
  0xf7   : > { %v1542_v46 = vsub.f32 80.0, %v4744_v27  ;;  %vm1823_vm10 = vcmp.gt.f32.partialorder %v1010_v44, 0.5  ;;  %v1953_v45 = vsel %vm1889_vm9, %v4283_v4, %v4239_v13  ;;  %vm1890_vm11 = vcmp.gt.f32.partialorder %v1350_v52, 0.5  ;;  %v1016_v53 = vpop.f32.mrb[3].mxu0 }
  0xf8   : > { %v1543_v32 = vsub.f32 80.0, %v4765_v0  ;;  %v2015_v35 = vsel %vm1823_vm10, %v4262_v47, %v1951_v30  ;;  %vm1824_vm12 = vcmp.gt.f32.partialorder %v1012_v7, 0.5  ;;  %v1954_v12 = vsel %vm1890_vm11, %v4306_v55, %v4246_v19  ;;  %v6210_v19 = vld [vmem:[#allocation8_spill] sm:$0xff] }
  0xf9   : > { %v1671_v61 = vmul.f32 10.0, %v4765_v0  ;;  %v2016_v43 = vsel %vm1824_vm12, %v4264_v49, %v1952_v10  ;;  %vm1825_vm13 = vcmp.gt.f32.partialorder %v1014_v16, 0.5  ;;  %v2091_v13 = vsel %vm2089_vm5, %v2015_v35, 0.0  ;;  %v1354_v52 = vpop.f32.mrb[4].mxu1  ;;  %v4791_v16 = vld [vmem:[%s3982_s27 + $0x8] sm:$0xff]  }
  0xfa   : > { %v1734_v4 = vsub.f32 100.0, %v1670_v23  ;;  %v2017_v44 = vsel %vm1825_vm13, %v4275_v56, %v1953_v45  ;;  %vm1826_vm14 = vcmp.gt.f32.partialorder %v1016_v53, 0.5  ;;  %v2092_v47 = vsel %vm2090_vm6, %v2016_v43, 0.0  ;;  %6211 = vst [vmem:[#allocation8_spill] sm:$0xff] %v4791_v16  ;;  %v4795_v23 = vld [vmem:[%s4228_s19 + $0x148] sm:$0xff]  ;;  %v1356_v56 = vpop.f32.mrb[5].mxu1 }
  0xfb   : > { %v4785_v30 = vmax.f32 %v1542_v46, 0.0  ;;  %v2018_v55 = vsel %vm1826_vm14, %v6210_v19, %v1954_v12  ;;  %v2155_v7 = vadd.f32 %v2092_v47, %v2091_v13  ;;  %v2093_v49 = vsel %vm2089_vm5, %v2017_v44, 0.0  ;;  %v6212_v12 = vld [vmem:[#allocation4_spill] sm:$0xff]  ;;  %v1358_v53 = vpop.f32.mrb[6].mxu1  ;;  %v1020_v47 = vpop.f32.mrb[4].mxu0  ;;  %v6213_v19 = vld [vmem:[#allocation7_spill] sm:$0xff] }
  0xfc   : > { %vm1891_vm15 = vcmp.gt.f32.partialorder %v1354_v52, 0.5  ;;  %v2094_v46 = vsel %vm2090_vm6, %v2018_v55, 0.0  ;;  %v1735_v45 = vsub.f32 100.0, %v1671_v61  ;;  %v4799_v35 = vmax.f32 %v1543_v32, 0.0  ;;  %v1360_v10 = vpop.f32.mrb[7].mxu1  ;;  %v4810_v61 = vld [vmem:[%s4228_s19 + $0x150] sm:$0xff] }
  0xfd   : > { %v1955_v43 = vsel %vm1891_vm15, %v4317_v6, %v6212_v12  ;;  %vm1892_vm1 = vcmp.gt.f32.partialorder %v1356_v56, 0.5  ;;  %2156 = vadd.xlane.f32.xlu0 %v2155_v7  ;;  %v2158_v13 = vadd.f32 %v2094_v46, %v2093_v49  ;;  %v1544_v44 = vsub.f32 80.0, %v4795_v23  ;;  %v1022_v6 = vpop.f32.mrb[5].mxu0  ;;  %v6214_v56 = vld [vmem:[#allocation9_spill] sm:$0xff] }
  0xfe   : > { %v1956_v52 = vsel %vm1892_vm1, %v4329_v37, %v6213_v19  ;;  %vm1893_vm2 = vcmp.gt.f32.partialorder %v1358_v53, 0.5  ;;  %v4806_v63 = vmax.f32 %v1734_v4, 0.0  ;;  %v1672_v32 = vmul.f32 10.0, %v4795_v23  ;;  %v1024_v37 = vpop.f32.mrb[6].mxu0  ;;  %v6215_v4 = vld [vmem:[#allocation21_spill] sm:$0xff]  ;;  %v6216_v53 = vld [vmem:[#allocation15_spill] sm:$0xff] }
  0xff   : > { %vm1827_vm3 = vcmp.gt.f32.partialorder %v1020_v47, 0.5  ;;  %v1957_v55 = vsel %vm1893_vm2, %v4347_v50, %v4279_v60  ;;  %vm1894_vm4 = vcmp.gt.f32.partialorder %v1360_v10, 0.5  ;;  %2159 = vadd.xlane.f32.xlu1 %v2158_v13  ;;  %v1545_v7 = vsub.f32 80.0, %v4810_v61  ;;  %v1026_v19 = vpop.f32.mrb[7].mxu0  ;;  %v6217_v10 = vld [vmem:[#allocation16_spill] sm:$0xff] }
 0x100   : > { %v2019_v49 = vsel %vm1827_vm3, %v4304_v54, %v1955_v43  ;;  %vm1828_vm7 = vcmp.gt.f32.partialorder %v1022_v6, 0.5  ;;  %v1958_v46 = vsel %vm1894_vm4, %v6215_v4, %v6214_v56  ;;  %v4818_v12 = vmax.f32 %v1735_v45, 0.0  ;;  %v6218_v6 = vld [vmem:[#allocation22_spill] sm:$0xff] }
 0x101   : > { %v2020_v47 = vsel %vm1828_vm7, %v6216_v53, %v1956_v52  ;;  %vm1829_vm8 = vcmp.gt.f32.partialorder %v1024_v37, 0.5  ;;  %v2095_v60 = vsel %vm2089_vm5, %v2019_v49, 0.0  ;;  %v4823_v50 = vmax.f32 %v1544_v44, 0.0  ;;  %v1364_v56 = vpop.f32.mrb[8].mxu1  ;;  %v4833_v53 = vld [vmem:[%s4228_s19 + $0x158] sm:$0xff] }
 0x102   : > { %v2021_v13 = vsel %vm1829_vm8, %v6217_v10, %v1957_v55  ;;  %vm1830_vm9 = vcmp.gt.f32.partialorder %v1026_v19, 0.5  ;;  %v2096_v54 = vsel %vm2090_vm6, %v2020_v47, 0.0  ;;  %v1673_v43 = vmul.f32 10.0, %v4810_v61  ;;  %v1366_v44 = vpop.f32.mrb[9].mxu1  ;;  %v6219_v19 = vld [vmem:[#allocation12_spill] sm:$0xff] }
 0x103   : > { %v2022_v45 = vsel %vm1830_vm9, %v6218_v6, %v1958_v46  ;;  %v2161_v4 = vadd.f32 %v2096_v54, %v2095_v60  ;;  %v2097_v52 = vsel %vm2089_vm5, %v2021_v13, 0.0  ;;  %v1736_v37 = vsub.f32 100.0, %v1672_v32  ;;  %v1368_v60 = vpop.f32.mrb[10].mxu1  ;;  %v1030_v13 = vpop.f32.mrb[8].mxu0  ;;  %v6220_v54 = vld [vmem:[#allocation19_spill] sm:$0xff] }
 0x104   : > { %vm1895_vm10 = vcmp.gt.f32.partialorder %v1364_v56, 0.5  ;;  %v2098_v55 = vsel %vm2090_vm6, %v2022_v45, 0.0  ;;  %v4838_v47 = vmax.f32 %v1545_v7, 0.0  ;;  %vm1896_vm11 = vcmp.gt.f32.partialorder %v1366_v44, 0.5  ;;  %v1370_v56 = vpop.f32.mrb[11].mxu1  ;;  %v4847_v7 = vld [vmem:[%s4228_s19 + $0x160] sm:$0xff] }
 0x105   : > { %v1959_v46 = vsel %vm1895_vm10, %v4381_v3, %v6219_v19  ;;  %2162 = vadd.xlane.f32.xlu0 %v2161_v4  ;;  %v2164_v10 = vadd.f32 %v2098_v55, %v2097_v52  ;;  %v1546_v32 = vsub.f32 80.0, %v4833_v53  ;;  %v1960_v6 = vsel %vm1896_vm11, %v4411_v9, %v6220_v54  ;;  %6221 = vst [vmem:[#allocation4_spill] sm:$0xff] %v4847_v7  ;;  %v1032_v16 = vpop.f32.mrb[9].mxu0  ;;  %v6222_v3 = vld [vmem:[#allocation20_spill] sm:$0xff]  ;;  %v6223_v44 = vld [vmem:[#allocation26_spill] sm:$0xff]  ;;  %v6224_v9 = vld [vmem:[#allocation23_spill] sm:$0xff] }
 0x106   : > { %vm1897_vm12 = vcmp.gt.f32.partialorder %v1368_v60, 0.5  ;;  %v1737_v45 = vsub.f32 100.0, %v1673_v43  ;;  %v1674_v49 = vmul.f32 10.0, %v4833_v53  ;;  %vm1831_vm13 = vcmp.gt.f32.partialorder %v1030_v13, 0.5  ;;  %v1034_v19 = vpop.f32.mrb[10].mxu0  ;;  %v6225_v54 = vld [vmem:[#allocation28_spill] sm:$0xff] }
 0x107   : > { %v1961_v4 = vsel %vm1897_vm12, %v4413_v25, %v6222_v3  ;;  %vm1898_vm14 = vcmp.gt.f32.partialorder %v1370_v56, 0.5  ;;  %v1547_v52 = vsub.f32 80.0, %v4847_v7  ;;  %v2023_v55 = vsel %vm1831_vm13, %v6223_v44, %v1959_v46  ;;  %v1036_v13 = vpop.f32.mrb[11].mxu0 }
 0x108   : > { %vm1832_vm15 = vcmp.gt.f32.partialorder %v1032_v16, 0.5  ;;  %v1962_v60 = vsel %vm1898_vm14, %v4425_v21, %v6224_v9  ;;  %v4855_v43 = vmax.f32 %v1736_v37, 0.0  ;;  %vm1833_vm1 = vcmp.gt.f32.partialorder %v1034_v19, 0.5  ;;  %v4878_v19 = vld [vmem:[%s4228_s19 + $0x168] sm:$0xff]  ;;  %v6228_v9 = vld [vmem:[#allocation39_spill] sm:$0xff] }
 0x109   : > { %v2024_v8 = vsel %vm1832_vm15, %v6225_v54, %v1960_v6  ;;  %2165 = vadd.xlane.f32.xlu0 %v2164_v10  ;;  %v2099_v25 = vsel %vm2089_vm5, %v2023_v55, 0.0  ;;  %v4860_v56 = vmax.f32 %v1546_v32, 0.0  ;;  %v2025_v16 = vsel %vm1833_vm1, %v4399_v2, %v1961_v4  ;;  %v1374_v10 = vpop.f32.mrb[12].mxu1  ;;  %v4874_v55 = vld [vmem:[%s3982_s27 + $0x10] sm:$0xff]  }
 0x10a   : > { %vm1834_vm2 = vcmp.gt.f32.partialorder %v1036_v13, 0.5  ;;  %v2100_v21 = vsel %vm2090_vm6, %v2024_v8, 0.0  ;;  %v1675_v37 = vmul.f32 10.0, %v4847_v7  ;;  %v2101_v3 = vsel %vm2089_vm5, %v2025_v16, 0.0  ;;  %v1376_v32 = vpop.f32.mrb[13].mxu1  ;;  %6226 = vst [vmem:[#allocation7_spill] sm:$0xff] %v4874_v55 }
 0x10b   : > { %v2026_v46 = vsel %vm1834_vm2, %v4401_v31, %v1962_v60  ;;  %v2167_v6 = vadd.f32 %v2100_v21, %v2099_v25  ;;  %v4869_v44 = vmax.f32 %v1737_v45, 0.0  ;;  %vm1899_vm3 = vcmp.gt.f32.partialorder %v1374_v10, 0.5  ;;  %v6227_v31 = vld [vmem:[#allocation27_spill] sm:$0xff]  ;;  %v1378_v54 = vpop.f32.mrb[14].mxu1  ;;  %v4885_v25 = vld [vmem:[%s4228_s19 + $0x170] sm:$0xff]  ;;  %v1040_v16 = vpop.f32.mrb[12].mxu0 }
 0x10c   : > { %v2102_v2 = vsel %vm2090_vm6, %v2026_v46, 0.0  ;;  %v1738_v4 = vsub.f32 100.0, %v1674_v49  ;;  %v1963_v60 = vsel %vm1899_vm3, %v6228_v9, %v6227_v31  ;;  %vm1900_vm4 = vcmp.gt.f32.partialorder %v1376_v32, 0.5  ;;  %v6229_v21 = vld [vmem:[#allocation31_spill] sm:$0xff]  ;;  %v1380_v46 = vpop.f32.mrb[15].mxu1  ;;  %v1042_v7 = vpop.f32.mrb[13].mxu0 }
 0x10d   : > { %2168 = vadd.xlane.f32.xlu0 %v2167_v6  ;;  %v2170_v45 = vadd.f32 %v2102_v2, %v2101_v3  ;;  %v4882_v13 = vmax.f32 %v1547_v52, 0.0  ;;  %v1964_v49 = vsel %vm1900_vm4, %v4470_v39, %v6229_v21  ;;  %vm1901_vm7 = vcmp.gt.f32.partialorder %v1378_v54, 0.5  ;;  %v6230_v31 = vld [vmem:[#allocation35_spill] sm:$0xff]  ;;  %v6231_v3 = vld [vmem:[#allocation34_spill] sm:$0xff]  ;;  %v1044_v2 = vpop.f32.mrb[14].mxu0  ;;  %v6249_v55 = vld [vmem:[#allocation57_spill] sm:$0xff] }
 0x10e   : > { %v1739_v10 = vsub.f32 100.0, %v1675_v37  ;;  %v1548_v8 = vsub.f32 80.0, %v4878_v19  ;;  %vm1835_vm8 = vcmp.gt.f32.partialorder %v1040_v16, 0.5  ;;  %v1965_v6 = vsel %vm1901_vm7, %v4482_v26, %v6230_v31  ;;  %v6232_v37 = vld [vmem:[#allocation40_spill] sm:$0xff]  ;;  %v1046_v16 = vpop.f32.mrb[15].mxu0 }
 0x10f   : > { %vm1902_vm9 = vcmp.gt.f32.partialorder %v1380_v46, 0.5  ;;  %v1676_v52 = vmul.f32 10.0, %v4878_v19  ;;  %v2027_v32 = vsel %vm1835_vm8, %v6231_v3, %v1963_v60  ;;  %vm1836_vm10 = vcmp.gt.f32.partialorder %v1042_v7, 0.5  ;;  %v6233_v46 = vld [vmem:[#allocation43_spill] sm:$0xff] }
 0x110   : > { %v1966_v39 = vsel %vm1902_vm9, %v4491_v33, %v4429_v14  ;;  %v4897_v9 = vmul.f32 10.0, %v4885_v25  ;;  %v2028_v54 = vsel %vm1836_vm10, %v6232_v37, %v1964_v49  ;;  %vm1837_vm11 = vcmp.gt.f32.partialorder %v1044_v2, 0.5  ;;  %v6234_v37 = vld [vmem:[#allocation36_spill] sm:$0xff] }
 0x111   : > { %2171 = vadd.xlane.f32.xlu0 %v2170_v45  ;;  %v2103_v26 = vsel %vm2089_vm5, %v2027_v32, 0.0  ;;  %v4902_v21 = vmax.f32 %v1738_v4, 0.0  ;;  %v2029_v60 = vsel %vm1837_vm11, %v6233_v46, %v1965_v6  ;;  %vm1838_vm12 = vcmp.gt.f32.partialorder %v1046_v16, 0.5  ;;  %v1384_v49 = vpop.f32.mrb[16].mxu1  ;;  %v4921_v46 = vld [vmem:[%s4228_s19 + $0x178] sm:$0xff] }
 0x112   : > { %v2104_v7 = vsel %vm2090_vm6, %v2028_v54, 0.0  ;;  %v1549_v14 = vsub.f32 80.0, %v4885_v25  ;;  %v2030_v33 = vsel %vm1838_vm12, %v4472_v36, %v1966_v39  ;;  %v2105_v31 = vsel %vm2089_vm5, %v2029_v60, 0.0  ;;  %v1386_v4 = vpop.f32.mrb[17].mxu1  ;;  %v6235_v54 = vld [vmem:[#allocation49_spill] sm:$0xff]  ;;  %6237 = vst [vmem:[#allocation21_spill] sm:$0xff] %v4921_v46 }
 0x113   : > { %v2173_v45 = vadd.f32 %v2104_v7, %v2103_v26  ;;  %vm1903_vm13 = vcmp.gt.f32.partialorder %v1384_v49, 0.5  ;;  %v2106_v6 = vsel %vm2090_vm6, %v2030_v33, 0.0  ;;  %v4914_v32 = vmax.f32 %v1739_v10, 0.0  ;;  %v1388_v36 = vpop.f32.mrb[18].mxu1  ;;  %v1050_v60 = vpop.f32.mrb[16].mxu0  ;;  %v6238_v7 = vld [vmem:[#allocation44_spill] sm:$0xff] }
 0x114   : > { %v1740_v2 = vsub.f32 100.0, %v1676_v52  ;;  %v1967_v16 = vsel %vm1903_vm13, %v6235_v54, %v6234_v37  ;;  %vm1904_vm14 = vcmp.gt.f32.partialorder %v1386_v4, 0.5  ;;  %v2176_v39 = vadd.f32 %v2106_v6, %v2105_v31  ;;  %v1390_v10 = vpop.f32.mrb[19].mxu1  ;;  %v6240_v4 = vld [vmem:[#allocation45_spill] sm:$0xff]  ;;  %v4932_v6 = vld [vmem:[%s4228_s19 + $0x180] sm:$0xff] }
 0x115   : > { %2174 = vadd.xlane.f32.xlu0 %v2173_v45  ;;  %v4918_v26 = vmax.f32 %v1548_v8, 0.0  ;;  %v1968_v49 = vsel %vm1904_vm14, %v4526_v48, %v6238_v7  ;;  %vm1905_vm15 = vcmp.gt.f32.partialorder %v1388_v36, 0.5  ;;  %v1741_v52 = vsub.f32 100.0, %v4897_v9  ;;  %v1052_v45 = vpop.f32.mrb[17].mxu0  ;;  %6241 = vst [vmem:[#allocation16_spill] sm:$0xff] %v4932_v6  ;;  %v6242_v37 = vld [vmem:[#allocation48_spill] sm:$0xff] }
 0x116   : > { %v4926_v33 = vmax.f32 %v1549_v14, 0.0  ;;  %vm1839_vm1 = vcmp.gt.f32.partialorder %v1050_v60, 0.5  ;;  %v1969_v31 = vsel %vm1905_vm15, %v4543_v59, %v6240_v4  ;;  %vm1906_vm2 = vcmp.gt.f32.partialorder %v1390_v10, 0.5  ;;  %v1054_v48 = vpop.f32.mrb[18].mxu0  ;;  %v6243_v36 = vld [vmem:[#allocation53_spill] sm:$0xff] }
 0x117   : > { %6236 = vst [vmem:[#allocation9_spill] sm:$0xff] %v4918_v26  ;;  %v1550_v8 = vsub.f32 80.0, %v4921_v46  ;;  %v2031_v54 = vsel %vm1839_vm1, %v6242_v37, %v1967_v16  ;;  %vm1840_vm3 = vcmp.gt.f32.partialorder %v1052_v45, 0.5  ;;  %v1970_v9 = vsel %vm1906_vm2, %v4556_v1, %v4494_v17  ;;  %v1056_v59 = vpop.f32.mrb[19].mxu0  ;;  %v4944_v4 = vld [vmem:[%s4228_s19 + $0x188] sm:$0xff]  ;;  %v6245_v16 = vld [vmem:[#allocation56_spill] sm:$0xff] }
 0x118   : > { %6239 = vst [vmem:[#allocation15_spill] sm:$0xff] %v4926_v33  ;;  %v1678_v14 = vmul.f32 10.0, %v4921_v46  ;;  %v2032_v60 = vsel %vm1840_vm3, %v6243_v36, %v1968_v49  ;;  %vm1841_vm4 = vcmp.gt.f32.partialorder %v1054_v48, 0.5  ;;  %v2107_v7 = vsel %vm2089_vm5, %v2031_v54, 0.0  ;;  %6244 = vst [vmem:[#allocation22_spill] sm:$0xff] %v4944_v4  ;;  %v6246_v37 = vld [vmem:[#allocation58_spill] sm:$0xff] }
 0x119   : > { %2177 = vadd.xlane.f32.xlu0 %v2176_v39  ;;  %v4941_v10 = vmax.f32 %v1740_v2, 0.0  ;;  %v2033_v45 = vsel %vm1841_vm4, %v6245_v16, %v1969_v31  ;;  %vm1842_vm7 = vcmp.gt.f32.partialorder %v1056_v59, 0.5  ;;  %v2108_v17 = vsel %vm2090_vm6, %v2032_v60, 0.0  ;;  %v1394_v39 = vpop.f32.mrb[20].mxu1  ;;  %v4954_v54 = vld [vmem:[%s3982_s27 + $0x18] sm:$0xff]   ;;  %v6248_v16 = vld [vmem:[#allocation50_spill] sm:$0xff] }
 0x11a   : > { %v1679_v1 = vmul.f32 10.0, %v4932_v6  ;;  %v2034_v49 = vsel %vm1842_vm7, %v6246_v37, %v1970_v9  ;;  %v2179_v48 = vadd.f32 %v2108_v17, %v2107_v7  ;;  %v2109_v36 = vsel %vm2089_vm5, %v2033_v45, 0.0  ;;  %6247 = vst [vmem:[#allocation12_spill] sm:$0xff] %v4954_v54  ;;  %v1396_v3 = vpop.f32.mrb[21].mxu1  ;;  %v1060_v37 = vpop.f32.mrb[20].mxu0  ;;  %v6251_v33 = vld [vmem:[#allocation59_spill] sm:$0xff] }
 0x11b   : > { %vm1907_vm8 = vcmp.gt.f32.partialorder %v1394_v39, 0.5  ;;  %v2110_v31 = vsel %vm2090_vm6, %v2034_v49, 0.0  ;;  %v4959_v59 = vmax.f32 %v1741_v52, 0.0  ;;  %v1680_v60 = vmul.f32 10.0, %v4944_v4  ;;  %v1398_v7 = vpop.f32.mrb[22].mxu1  ;;  %v1062_v46 = vpop.f32.mrb[21].mxu0 }
 0x11c   : > { %v1971_v9 = vsel %vm1907_vm8, %v4569_v41, %v6248_v16  ;;  %vm1908_vm9 = vcmp.gt.f32.partialorder %v1396_v3, 0.5  ;;  %v2182_v45 = vadd.f32 %v2110_v31, %v2109_v36  ;;  %v1742_v17 = vsub.f32 100.0, %v1678_v14  ;;  %v1400_v2 = vpop.f32.mrb[23].mxu1  ;;  %v6252_v41 = vld [vmem:[#allocation72_spill] sm:$0xff]  ;;  %v6253_v36 = vld [vmem:[#allocation61_spill] sm:$0xff]  ;;  %v1064_v31 = vpop.f32.mrb[22].mxu0 }
 0x11d   : > { %2180 = vadd.xlane.f32.xlu0 %v2179_v48  ;;  %v1972_v39 = vsel %vm1908_vm9, %v4602_v11, %v6249_v55  ;;  %vm1909_vm10 = vcmp.gt.f32.partialorder %v1398_v7, 0.5  ;;  %v4966_v49 = vmax.f32 %v1550_v8, 0.0  ;;  %v1551_v52 = vsub.f32 80.0, %v4932_v6  ;;  %v6254_v16 = vld [vmem:[#allocation60_spill] sm:$0xff]  ;;  %v6255_v26 = vld [vmem:[#allocation74_spill] sm:$0xff]  ;;  %v6257_v7 = vld [vmem:[#allocation67_spill] sm:$0xff] }
 0x11e   : > { %vm1843_vm11 = vcmp.gt.f32.partialorder %v1060_v37, 0.5  ;;  %v1973_v48 = vsel %vm1909_vm10, %v6252_v41, %v6251_v33  ;;  %vm1910_vm12 = vcmp.gt.f32.partialorder %v1400_v2, 0.5  ;;  %v1743_v3 = vsub.f32 100.0, %v1679_v1  ;;  %v4976_v8 = vld [vmem:[%s4228_s19 + $0x190] sm:$0xff]  ;;  %v1066_v6 = vpop.f32.mrb[23].mxu0  ;;  %v6259_v41 = vld [vmem:[#allocation73_spill] sm:$0xff] }
 0x11f   : > { %6250 = vst [vmem:[#allocation19_spill] sm:$0xff] %v4966_v49  ;;  %v2035_v14 = vsel %vm1843_vm11, %v6253_v36, %v1971_v9  ;;  %vm1844_vm13 = vcmp.gt.f32.partialorder %v1062_v46, 0.5  ;;  %v1974_v11 = vsel %vm1910_vm12, %v6255_v26, %v6254_v16  ;;  %v1552_v55 = vsub.f32 80.0, %v4944_v4  ;;  %6256 = vst [vmem:[#allocation20_spill] sm:$0xff] %v4976_v8  ;;  %v6258_v46 = vld [vmem:[#allocation68_spill] sm:$0xff]  ;;  %v6272_v54 = vld [vmem:[#allocation85_spill] sm:$0xff] }
 0x120   : > { %v2036_v37 = vsel %vm1844_vm13, %v6257_v7, %v1972_v39  ;;  %vm1845_vm14 = vcmp.gt.f32.partialorder %v1064_v31, 0.5  ;;  %v2111_v33 = vsel %vm2089_vm5, %v2035_v14, 0.0  ;;  %v4981_v1 = vmax.f32 %v1742_v17, 0.0  ;;  %v4991_v31 = vld [vmem:[%s4228_s19 + $0x198] sm:$0xff]  ;;  %v6260_v14 = vld [vmem:[#allocation64_spill] sm:$0xff] }
 0x121   : > { %2183 = vadd.xlane.f32.xlu0 %v2182_v45  ;;  %v2037_v2 = vsel %vm1845_vm14, %v6258_v46, %v1973_v48  ;;  %vm1846_vm15 = vcmp.gt.f32.partialorder %v1066_v6, 0.5  ;;  %v2112_v26 = vsel %vm2090_vm6, %v2036_v37, 0.0  ;;  %v1744_v9 = vsub.f32 100.0, %v1680_v60  ;;  %v1404_v16 = vpop.f32.mrb[24].mxu1 }
 0x122   : > { %v2038_v36 = vsel %vm1846_vm15, %v6259_v41, %v1974_v11  ;;  %v2185_v4 = vadd.f32 %v2112_v26, %v2111_v33  ;;  %v2113_v45 = vsel %vm2089_vm5, %v2037_v2, 0.0  ;;  %v1681_v39 = vmul.f32 10.0, %v4976_v8  ;;  %v1406_v17 = vpop.f32.mrb[25].mxu1  ;;  %v6261_v11 = vld [vmem:[#allocation80_spill] sm:$0xff]  ;;  %v1070_v2 = vpop.f32.mrb[24].mxu0  ;;  %v6263_v26 = vld [vmem:[#allocation69_spill] sm:$0xff] }
 0x123   : > { %vm1911_vm1 = vcmp.gt.f32.partialorder %v1404_v16, 0.5  ;;  %v2114_v6 = vsel %vm2090_vm6, %v2038_v36, 0.0  ;;  %v4995_v48 = vmax.f32 %v1743_v3, 0.0  ;;  %vm1912_vm2 = vcmp.gt.f32.partialorder %v1406_v17, 0.5  ;;  %v1408_v37 = vpop.f32.mrb[26].mxu1  ;;  %v6264_v41 = vld [vmem:[#allocation87_spill] sm:$0xff] }
 0x124   : > { %v1975_v7 = vsel %vm1911_vm1, %v6261_v11, %v6260_v14  ;;  %v2188_v33 = vadd.f32 %v2114_v6, %v2113_v45  ;;  %v5000_v46 = vmax.f32 %v1551_v52, 0.0  ;;  %v1976_v16 = vsel %vm1912_vm2, %v6264_v41, %v6263_v26  ;;  %v1410_v49 = vpop.f32.mrb[27].mxu1  ;;  %v1072_v60 = vpop.f32.mrb[25].mxu0  ;;  %v6266_v14 = vld [vmem:[#allocation75_spill] sm:$0xff]  ;;  %v6269_v52 = vld [vmem:[#allocation78_spill] sm:$0xff]  ;;  %v6270_v26 = vld [vmem:[#allocation76_spill] sm:$0xff] }
 0x125   : > { %2186 = vadd.xlane.f32.xlu0 %v2185_v4  ;;  %vm1913_vm3 = vcmp.gt.f32.partialorder %v1408_v37, 0.5  ;;  %v5004_v36 = vmax.f32 %v1552_v55, 0.0  ;;  %v1682_v3 = vmul.f32 10.0, %v4991_v31  ;;  %vm1847_vm4 = vcmp.gt.f32.partialorder %v1070_v2, 0.5  ;;  %v6267_v4 = vld [vmem:[#allocation90_spill] sm:$0xff]  ;;  %v1074_v11 = vpop.f32.mrb[26].mxu0 }
 0x126   : > { %6262 = vst [vmem:[#allocation26_spill] sm:$0xff] %v5000_v46  ;;  %v1977_v17 = vsel %vm1913_vm3, %v6267_v4, %v6266_v14  ;;  %vm1914_vm7 = vcmp.gt.f32.partialorder %v1410_v49, 0.5  ;;  %v5009_v45 = vmax.f32 %v1744_v9, 0.0  ;;  %v2039_v6 = vsel %vm1847_vm4, %v6269_v52, %v1975_v7  ;;  %v6271_v37 = vld [vmem:[#allocation92_spill] sm:$0xff]  ;;  %v1076_v2 = vpop.f32.mrb[27].mxu0  ;;  %v6274_v7 = vld [vmem:[#allocation86_spill] sm:$0xff] }
 0x127   : > { %6265 = vst [vmem:[#allocation23_spill] sm:$0xff] %v5004_v36  ;;  %vm1848_vm8 = vcmp.gt.f32.partialorder %v1072_v60, 0.5  ;;  %v1978_v41 = vsel %vm1914_vm7, %v6271_v37, %v6270_v26  ;;  %v1553_v55 = vsub.f32 80.0, %v4976_v8  ;;  %vm1849_vm9 = vcmp.gt.f32.partialorder %v1074_v11, 0.5  ;;  %v5019_v9 = vld [vmem:[%s4228_s19 + $0x1a0] sm:$0xff]  ;;  %v6275_v26 = vld [vmem:[#allocation93_spill] sm:$0xff] }
 0x128   : > { %6268 = vst [vmem:[#allocation28_spill] sm:$0xff] %v5009_v45  ;;  %v2040_v36 = vsel %vm1848_vm8, %v6272_v54, %v1976_v16  ;;  %v2115_v14 = vsel %vm2089_vm5, %v2039_v6, 0.0  ;;  %v1745_v49 = vsub.f32 100.0, %v1681_v39  ;;  %6273 = vst [vmem:[#allocation27_spill] sm:$0xff] %v5019_v9  ;;  %v2041_v60 = vsel %vm1849_vm9, %v6274_v7, %v1977_v17 }
 0x129   : > { %2189 = vadd.xlane.f32.xlu0 %v2188_v33  ;;  %vm1850_vm10 = vcmp.gt.f32.partialorder %v1076_v2, 0.5  ;;  %v2116_v4 = vsel %vm2090_vm6, %v2040_v36, 0.0  ;;  %v1746_v52 = vsub.f32 100.0, %v1682_v3  ;;  %v1414_v54 = vpop.f32.mrb[28].mxu1  ;;  %v2117_v16 = vsel %vm2089_vm5, %v2041_v60, 0.0  ;;  %v5034_v2 = vld [vmem:[%s3982_s27 + $0x20] sm:$0xff]  }
 0x12a   : > { %v2042_v37 = vsel %vm1850_vm10, %v6275_v26, %v1978_v41  ;;  %v2191_v33 = vadd.f32 %v2116_v4, %v2115_v14  ;;  %vm1915_vm11 = vcmp.gt.f32.partialorder %v1414_v54, 0.5  ;;  %v1416_v39 = vpop.f32.mrb[29].mxu1  ;;  %v5031_v17 = vmul.f32 10.0, %v5019_v9  ;;  %v6276_v3 = vld [vmem:[#allocation77_spill] sm:$0xff]  ;;  %v6277_v41 = vld [vmem:[#allocation94_spill] sm:$0xff]  ;;  %v1080_v26 = vpop.f32.mrb[28].mxu0 }
 0x12b   : > { %v2118_v11 = vsel %vm2090_vm6, %v2042_v37, 0.0  ;;  %v1979_v14 = vsel %vm1915_vm11, %v6277_v41, %v6276_v3  ;;  %vm1916_vm12 = vcmp.gt.f32.partialorder %v1416_v39, 0.5  ;;  %v1418_v7 = vpop.f32.mrb[30].mxu1  ;;  %v5039_v4 = vmax.f32 %v1745_v49, 0.0  ;;  %v6278_v54 = vld [vmem:[#allocation79_spill] sm:$0xff]  ;;  %v1082_v36 = vpop.f32.mrb[29].mxu0 }
 0x12c   : > { %v2194_v60 = vadd.f32 %v2118_v11, %v2117_v16  ;;  %v6279_v37 = vld [vmem:[#allocation95_spill] sm:$0xff]  ;;  %vm1917_vm13 = vcmp.gt.f32.partialorder %v1418_v7, 0.5  ;;  %v1420_v8 = vpop.f32.mrb[31].mxu1  ;;  %v5043_v45 = vmax.f32 %v1553_v55, 0.0  ;;  %v5045_v46 = vmax.f32 %v1746_v52, 0.0  ;;  %v6282_v49 = vld [vmem:[#allocation97_spill] sm:$0xff] }
 0x12d   : > { %2192 = vadd.xlane.f32.xlu0 %v2191_v33  ;;  %v1980_v6 = vsel %vm1916_vm12, %v6279_v37, %v6278_v54  ;;  %vm1851_vm14 = vcmp.gt.f32.partialorder %v1080_v26, 0.5  ;;  %v6280_v3 = vld [vmem:[#allocation83_spill] sm:$0xff]  ;;  %vm1918_vm15 = vcmp.gt.f32.partialorder %v1420_v8, 0.5  ;;  %vm575_vm1 = vcmask 7168   ;;  %v5052_v11 = vpop.f32.mrb[30].mxu0  ;;  %v6283_v41 = vld [vmem:[#allocation84_spill] sm:$0xff] }
 0x12e   : > { %v6281_v33 = vld [vmem:[#allocation99_spill] sm:$0xff]  ;;  %v2043_v16 = vsel %vm1851_vm14, %v6282_v49, %v1979_v14  ;;  %vm1852_vm2 = vcmp.gt.f32.partialorder %v1082_v36, 0.5  ;;  %v6284_v7 = vld [vmem:[#allocation102_spill] sm:$0xff]  ;;  %v5059_v55 = vld [vmem:[%s4228_s19 + $0x1a8] sm:$0xff]  ;;  %vm1853_vm3 = vcmp.gt.f32.partialorder %v5052_v11, 0.5  ;;  %v5065_v37 = vpop.f32.mrb[31].mxu0 }
 0x12f   : > { %v5049_v39 = vsel %vm1917_vm13, %v6281_v33, %v6280_v3  ;;  %v5056_v54 = vsel %vm1918_vm15, %v6284_v7, %v6283_v41  ;;  %v6285_v52 = vld [vmem:[#allocation98_spill] sm:$0xff]  ;;  %v5069_v8 = vsel %vm2089_vm5, %v2043_v16, 0.0  ;;  %v1747_v36 = vsub.f32 100.0, %v5031_v17  ;;  %v6289_v16 = vld [vmem:[#allocation101_spill] sm:$0xff]  ;;  %v6293_v17 = vld [vmem:[#allocation91_spill] sm:$0xff] }
 0x130   : > { %v5062_v26 = vsel %vm1852_vm2, %v6285_v52, %v1980_v6  ;;  %v3870_v14 = vmov 0.0   ;;  %v6286_v6 = vld [vmem:[#allocation100_spill] sm:$0xff]  ;;  %vm1854_vm4 = vcmp.gt.f32.partialorder %v5065_v37, 0.5  ;;  %v6287_v33 = vsub.f32 80.0, %v4991_v31 }
 0x131   : > { %2195 = vadd.xlane.f32.xlu0 %v2194_v60  ;;  %576 = vst.msk [vmem:[#allocation2] sm:$0xff] %vm575_vm1, %v3870_v14  ;;  %577 = vst.msk [vmem:[#allocation2 + $0x8] sm:$0xff] %vm575_vm1, %v3870_v14  ;;  %v2045_v60 = vsel %vm1853_vm3, %v6286_v6, %v5049_v39  ;;  %v2120_v3 = vsel %vm2090_vm6, %v5062_v26, 0.0  ;;  %v2046_v41 = vsel %vm1854_vm4, %v6289_v16, %v5056_v54  ;;  %v1424_v7 = vpop.f32.mrb[32].mxu1  ;;  %v1684_v39 = vmul.f32 10.0, %v5059_v55  ;;  %v6290_v54 = vld [vmem:[#allocation88_spill] sm:$0xff] }
 0x132   : > { %578 = vst.msk [vmem:[#allocation2 + $0x10] sm:$0xff] %vm575_vm1, %v3870_v14  ;;  %579 = vst.msk [vmem:[#allocation2 + $0x18] sm:$0xff] %vm575_vm1, %v3870_v14  ;;  %v5210_v49 = vmax.f32 %v6287_v33, 0.0  ;;  %v2197_v52 = vadd.f32 %v2120_v3, %v5069_v8  ;;  %v2121_v11 = vsel %vm2089_vm5, %v2045_v60, 0.0  ;;  %vm1919_vm7 = vcmp.gt.f32.partialorder %v1424_v7, 0.5  ;;  %v1426_v37 = vpop.f32.mrb[33].mxu1 }
 0x133   : > { %580 = vst.msk [vmem:[#allocation2 + $0x20] sm:$0xff] %vm575_vm1, %v3870_v14  ;;  %581 = vst.msk [vmem:[#allocation2 + $0x28] sm:$0xff] %vm575_vm1, %v3870_v14  ;;  %v2122_v26 = vsel %vm2090_vm6, %v2046_v41, 0.0  ;;  %v1983_v33 = vsel %vm1919_vm7, %v4731_v58, %v6290_v54  ;;  %vm1920_vm8 = vcmp.gt.f32.partialorder %v1426_v37, 0.5  ;;  %v1428_v60 = vpop.f32.mrb[34].mxu1  ;;  %v5226_v3 = vmax.f32 %v1747_v36, 0.0 }
 0x134   : > { %582 = vst.msk [vmem:[#allocation2 + $0x30] sm:$0xff] %vm575_vm1, %v3870_v14  ;;  %583 = vst.msk [vmem:[#allocation2 + $0x38] sm:$0xff] %vm575_vm1, %v3870_v14  ;;  %v2200_v8 = vadd.f32 %v2122_v26, %v2121_v11  ;;  %v1090_v16 = vpop.f32.mrb[32].mxu0  ;;  %v6291_v7 = vld [vmem:[#allocation89_spill] sm:$0xff]  ;;  %vm1921_vm9 = vcmp.gt.f32.partialorder %v1428_v60, 0.5  ;;  %v1430_v41 = vpop.f32.mrb[35].mxu1 }
 0x135   : > { %584 = vst.msk [vmem:[#allocation2 + $0x40] sm:$0xff] %vm575_vm1, %v3870_v14  ;;  %585 = vst.msk [vmem:[#allocation2 + $0x48] sm:$0xff] %vm575_vm1, %v3870_v14  ;;  %2198 = vadd.xlane.f32.xlu0 %v2197_v52  ;;  %v5234_v6 = vld [vmem:[%s3982_s27 + $0x28] sm:$0xff]   ;;  %vm1855_vm10 = vcmp.gt.f32.partialorder %v1090_v16, 0.5  ;;  %v1092_v11 = vpop.f32.mrb[33].mxu0  ;;  %v1985_v36 = vsel %vm1921_vm9, %v4735_v40, %v6293_v17  ;;  %vm1922_vm11 = vcmp.gt.f32.partialorder %v1430_v41, 0.5 }
 0x136   : > { %586 = vst.msk [vmem:[#allocation2 + $0x50] sm:$0xff] %vm575_vm1, %v3870_v14  ;;  %587 = vst.msk [vmem:[#allocation2 + $0x58] sm:$0xff] %vm575_vm1, %v3870_v14  ;;  %v1748_v37 = vsub.f32 100.0, %v1684_v39  ;;  %vm1856_vm12 = vcmp.gt.f32.partialorder %v1092_v11, 0.5  ;;  %v1094_v26 = vpop.f32.mrb[34].mxu0  ;;  %v6294_v54 = vld [vmem:[#allocation96_spill] sm:$0xff] }
 0x137   : > { %588 = vst.msk [vmem:[#allocation2 + $0x60] sm:$0xff] %vm575_vm1, %v3870_v14  ;;  %589 = vst.msk [vmem:[#allocation2 + $0x68] sm:$0xff] %vm575_vm1, %v3870_v14  ;;  %v1986_v60 = vsel %vm1922_vm11, %v4746_v22, %v6294_v54  ;;  %vm1857_vm13 = vcmp.gt.f32.partialorder %v1094_v26, 0.5  ;;  %v1096_v52 = vpop.f32.mrb[35].mxu0  ;;  %v5249_v39 = vld [vmem:[%s4228_s19 + $0x1b8] sm:$0xff]  ;;  %v3801_v54 = vld [vmem:[%s4228_s19 + $0x128] sm:$0xff] }
 0x138   : > { %590 = vst.msk [vmem:[#allocation2 + $0x70] sm:$0xff] %vm575_vm1, %v3870_v14  ;;  %591 = vst.msk [vmem:[#allocation2 + $0x78] sm:$0xff] %vm575_vm1, %v3870_v14  ;;  %v2049_v22 = vsel %vm1857_vm13, %v4737_v5, %v1985_v36  ;;  %vm1858_vm14 = vcmp.gt.f32.partialorder %v1096_v52, 0.5  ;;  %v5259_v11 = vmax.f32 %v1748_v37, 0.0  ;;  %v1686_v5 = vmul.f32 10.0, %v5249_v39 }
 0x139   : > { %592 = vst.msk [vmem:[#allocation2 + $0x80] sm:$0xff] %vm575_vm1, %v3870_v14  ;;  %593 = vst.msk [vmem:[#allocation2 + $0x88] sm:$0xff] %vm575_vm1, %v3870_v14  ;;  %2201 = vadd.xlane.f32.xlu0 %v2200_v8  ;;  %v2050_v8 = vsel %vm1858_vm14, %v4748_v38, %v1986_v60  ;;  %v1434_v41 = vpop.f32.mrb[36].mxu1  ;;  %v1100_v26 = vpop.f32.mrb[36].mxu0 }
 0x13a   : > { %594 = vst.msk [vmem:[#allocation2 + $0x90] sm:$0xff] %vm575_vm1, %v3870_v14  ;;  %595 = vst.msk [vmem:[#allocation2 + $0x98] sm:$0xff] %vm575_vm1, %v3870_v14  ;;  %v2126_v17 = vsel %vm2090_vm6, %v2050_v8, 0.0  ;;  %vm1923_vm15 = vcmp.gt.f32.partialorder %v1434_v41, 0.5  ;;  %vm1859_vm4 = vcmp.gt.f32.partialorder %v1100_v26, 0.5 }
 0x13b   : > { %596 = vst.msk [vmem:[#allocation2 + $0xa0] sm:$0xff] %vm575_vm1, %v3870_v14  ;;  %597 = vst.msk [vmem:[#allocation2 + $0xa8] sm:$0xff] %vm575_vm1, %v3870_v14 }
 0x13c   : > { %598 = vst.msk [vmem:[#allocation2 + $0xb0] sm:$0xff] %vm575_vm1, %v3870_v14  ;;  %599 = vst.msk [vmem:[#allocation2 + $0xb8] sm:$0xff] %vm575_vm1, %v3870_v14 }
 0x13d   : > { %600 = vst.msk [vmem:[#allocation2 + $0xc0] sm:$0xff] %vm575_vm1, %v3870_v14  ;;  %601 = vst.msk [vmem:[#allocation2 + $0xc8] sm:$0xff] %vm575_vm1, %v3870_v14 }
 0x13e   : > { %602 = vst.msk [vmem:[#allocation2 + $0xd0] sm:$0xff] %vm575_vm1, %v3870_v14  ;;  %603 = vst.msk [vmem:[#allocation2 + $0xd8] sm:$0xff] %vm575_vm1, %v3870_v14 }
 0x13f   : > { %604 = vst.msk [vmem:[#allocation2 + $0xe0] sm:$0xff] %vm575_vm1, %v3870_v14  ;;  %605 = vst.msk [vmem:[#allocation2 + $0xe8] sm:$0xff] %vm575_vm1, %v3870_v14 }
 0x140   : > { %606 = vst.msk [vmem:[#allocation2 + $0xf0] sm:$0xff] %vm575_vm1, %v3870_v14  ;;  %607 = vst.msk [vmem:[#allocation2 + $0xf8] sm:$0xff] %vm575_vm1, %v3870_v14 }
 0x141   : > { %608 = vst.msk [vmem:[#allocation3] sm:$0xff] %vm575_vm1, %v3870_v14  ;;  %609 = vst.msk [vmem:[#allocation3 + $0x8] sm:$0xff] %vm575_vm1, %v3870_v14 }
 0x142   : > { %610 = vst.msk [vmem:[#allocation3 + $0x10] sm:$0xff] %vm575_vm1, %v3870_v14  ;;  %611 = vst.msk [vmem:[#allocation3 + $0x18] sm:$0xff] %vm575_vm1, %v3870_v14 }
 0x143   : > { %612 = vst.msk [vmem:[#allocation3 + $0x20] sm:$0xff] %vm575_vm1, %v3870_v14  ;;  %613 = vst.msk [vmem:[#allocation3 + $0x28] sm:$0xff] %vm575_vm1, %v3870_v14 }
 0x144   : > { %614 = vst.msk [vmem:[#allocation3 + $0x30] sm:$0xff] %vm575_vm1, %v3870_v14  ;;  %615 = vst.msk [vmem:[#allocation3 + $0x38] sm:$0xff] %vm575_vm1, %v3870_v14 }
 0x145   : > { %616 = vst.msk [vmem:[#allocation3 + $0x40] sm:$0xff] %vm575_vm1, %v3870_v14  ;;  %617 = vst.msk [vmem:[#allocation3 + $0x48] sm:$0xff] %vm575_vm1, %v3870_v14 }
 0x146   : > { %618 = vst.msk [vmem:[#allocation3 + $0x50] sm:$0xff] %vm575_vm1, %v3870_v14  ;;  %619 = vst.msk [vmem:[#allocation3 + $0x58] sm:$0xff] %vm575_vm1, %v3870_v14 }
 0x147   : > { %620 = vst.msk [vmem:[#allocation3 + $0x60] sm:$0xff] %vm575_vm1, %v3870_v14  ;;  %621 = vst.msk [vmem:[#allocation3 + $0x68] sm:$0xff] %vm575_vm1, %v3870_v14 }
 0x148   : > { %622 = vst.msk [vmem:[#allocation3 + $0x70] sm:$0xff] %vm575_vm1, %v3870_v14  ;;  %623 = vst.msk [vmem:[#allocation3 + $0x78] sm:$0xff] %vm575_vm1, %v3870_v14 }
 0x149   : > { %624 = vst.msk [vmem:[#allocation3 + $0x80] sm:$0xff] %vm575_vm1, %v3870_v14  ;;  %625 = vst.msk [vmem:[#allocation3 + $0x88] sm:$0xff] %vm575_vm1, %v3870_v14 }
 0x14a   : > { %626 = vst.msk [vmem:[#allocation3 + $0x90] sm:$0xff] %vm575_vm1, %v3870_v14  ;;  %627 = vst.msk [vmem:[#allocation3 + $0x98] sm:$0xff] %vm575_vm1, %v3870_v14 }
 0x14b   : > { %628 = vst.msk [vmem:[#allocation3 + $0xa0] sm:$0xff] %vm575_vm1, %v3870_v14  ;;  %629 = vst.msk [vmem:[#allocation3 + $0xa8] sm:$0xff] %vm575_vm1, %v3870_v14 }
 0x14c   : > { %630 = vst.msk [vmem:[#allocation3 + $0xb0] sm:$0xff] %vm575_vm1, %v3870_v14  ;;  %631 = vst.msk [vmem:[#allocation3 + $0xb8] sm:$0xff] %vm575_vm1, %v3870_v14 }
 0x14d   : > { %632 = vst.msk [vmem:[#allocation3 + $0xc0] sm:$0xff] %vm575_vm1, %v3870_v14  ;;  %633 = vst.msk [vmem:[#allocation3 + $0xc8] sm:$0xff] %vm575_vm1, %v3870_v14 }
 0x14e   : > { %634 = vst.msk [vmem:[#allocation3 + $0xd0] sm:$0xff] %vm575_vm1, %v3870_v14  ;;  %635 = vst.msk [vmem:[#allocation3 + $0xd8] sm:$0xff] %vm575_vm1, %v3870_v14 }
 0x14f   : > { %636 = vst.msk [vmem:[#allocation3 + $0xe0] sm:$0xff] %vm575_vm1, %v3870_v14  ;;  %637 = vst.msk [vmem:[#allocation3 + $0xe8] sm:$0xff] %vm575_vm1, %v3870_v14 }
 0x150   : > { %638 = vst.msk [vmem:[#allocation3 + $0xf0] sm:$0xff] %vm575_vm1, %v3870_v14  ;;  %639 = vst.msk [vmem:[#allocation3 + $0xf8] sm:$0xff] %vm575_vm1, %v3870_v14  ;;  %v1555_v14 = vsub.f32 80.0, %v5019_v9  ;;  %v5231_v9 = vld [vmem:[%s4228_s19 + $0x1b0] sm:$0xff] }
 0x151   : > { %6288 = vst [vmem:[#allocation39_spill] sm:$0xff] %v5210_v49  ;;  %v1984_v49 = vsel %vm1920_vm8, %v4733_v51, %v6291_v7  ;;  %6292 = vst [vmem:[#allocation31_spill] sm:$0xff] %v5234_v6  ;;  %v2047_v51 = vsel %vm1855_vm10, %v4726_v28, %v1983_v33  ;;  %v1556_v7 = vsub.f32 80.0, %v5059_v55  ;;  %v1685_v40 = vmul.f32 10.0, %v5231_v9  ;;  %v6316_v6 = vld [vmem:[#allocation16_spill] sm:$0xff] }
 0x152   : > { %v2048_v58 = vsel %vm1856_vm12, %v4728_v34, %v1984_v49  ;;  %v2123_v16 = vsel %vm2089_vm5, %v2047_v51, 0.0  ;;  %v5254_v33 = vmax.f32 %v1555_v14, 0.0  ;;  %v2125_v49 = vsel %vm2089_vm5, %v2049_v22, 0.0  ;;  %v3800_v14 = vld [vmem:[%s4228_s19 + $0x120] sm:$0xff] }
 0x153   : > { %v2124_v28 = vsel %vm2090_vm6, %v2048_v58, 0.0  ;;  %v1436_v58 = vpop.f32.mrb[37].mxu1  ;;  %v5263_v51 = vmax.f32 %v1556_v7, 0.0  ;;  %v1987_v52 = vsel %vm1923_vm15, %v4754_v42, %v3800_v14  ;;  %v5268_v36 = vadd.f32 %v2126_v17, %v2125_v49  ;;  %v5275_v22 = vld [vmem:[%s4228_s19 + $0x1c0] sm:$0xff]  ;;  %v3802_v42 = vld [vmem:[%s4228_s19 + $0x130] sm:$0xff] }
 0x154   : > { %v2203_v34 = vadd.f32 %v2124_v28, %v2123_v16  ;;  %vm1924_vm2 = vcmp.gt.f32.partialorder %v1436_v58, 0.5  ;;  %v1438_v38 = vpop.f32.mrb[38].mxu1  ;;  %v1557_v37 = vsub.f32 80.0, %v5231_v9  ;;  %v1749_v16 = vsub.f32 100.0, %v1685_v40  ;;  %v2574_v58 = vpop.xlane.xlu0 %2573 }
 0x155   : > { %v1988_v60 = vsel %vm1924_vm2, %v4756_v18, %v3801_v54  ;;  %vm1925_vm3 = vcmp.gt.f32.partialorder %v1438_v38, 0.5  ;;  %v1440_v7 = vpop.f32.mrb[39].mxu1  ;;  %v1558_v28 = vsub.f32 80.0, %v5249_v39  ;;  %v1559_v49 = vsub.f32 80.0, %v5275_v22 }
 0x156   : > { %2204 = vadd.xlane.f32.xlu0 %v2203_v34  ;;  %v1102_v34 = vpop.f32.mrb[37].mxu0  ;;  %v1989_v8 = vsel %vm1925_vm3, %v4769_v20, %v3802_v42  ;;  %vm1926_vm7 = vcmp.gt.f32.partialorder %v1440_v7, 0.5  ;;  %v2051_v41 = vsel %vm1859_vm4, %v4750_v57, %v1987_v52  ;;  %v1750_v40 = vsub.f32 100.0, %v1686_v5  ;;  %v1444_v5 = vpop.f32.mrb[40].mxu1 }
 0x157   : > { %vm1860_vm8 = vcmp.gt.f32.partialorder %v1102_v34, 0.5  ;;  %v1104_v17 = vpop.f32.mrb[38].mxu0  ;;  %v1990_v18 = vsel %vm1926_vm7, %v4806_v63, %v4744_v27  ;;  %v2127_v14 = vsel %vm2089_vm5, %v2051_v41, 0.0  ;;  %v1687_v20 = vmul.f32 10.0, %v5275_v22  ;;  %v1446_v7 = vpop.f32.mrb[41].mxu1 }
 0x158   : > { %v2052_v38 = vsel %vm1860_vm8, %v4752_v24, %v1988_v60  ;;  %vm1861_vm9 = vcmp.gt.f32.partialorder %v1104_v17, 0.5  ;;  %v1106_v26 = vpop.f32.mrb[39].mxu0  ;;  %3730 = vlog2.f32 %v2574_v58  ;;  %v5295_v24 = vmax.f32 %v1557_v37, 0.0  ;;  %v2577_v42 = vpop.xlane.xlu1 %2576 }
 0x159   : > { %v2128_v57 = vsel %vm2090_vm6, %v2052_v38, 0.0  ;;  %v2053_v52 = vsel %vm1861_vm9, %v4761_v62, %v1989_v8  ;;  %vm1862_vm10 = vcmp.gt.f32.partialorder %v1106_v26, 0.5  ;;  %vm1927_vm11 = vcmp.gt.f32.partialorder %v1444_v5, 0.5  ;;  %v2580_v8 = vpop.xlane.xlu0 %2579  ;;  %v1110_v17 = vpop.f32.mrb[40].mxu0 }
 0x15a   : > { %v2129_v63 = vsel %vm2089_vm5, %v2053_v52, 0.0  ;;  %v2054_v27 = vsel %vm1862_vm10, %v4785_v30, %v1990_v18  ;;  %v5293_v54 = vadd.f32 %v2128_v57, %v2127_v14  ;;  %v5299_v34 = vmax.f32 %v1749_v16, 0.0  ;;  %v1448_v58 = vpop.f32.mrb[42].mxu1  ;;  %v1112_v38 = vpop.f32.mrb[41].mxu0 }
 0x15b   : > { %v2130_v60 = vsel %vm2090_vm6, %v2054_v27, 0.0  ;;  %v5301_v62 = vmax.f32 %v1558_v28, 0.0  ;;  %v1991_v30 = vsel %vm1927_vm11, %v4818_v12, %v4765_v0  ;;  %vm1928_vm12 = vcmp.gt.f32.partialorder %v1446_v7, 0.5  ;;  %v5314_v28 = vld [vmem:[%s4228_s19 + $0x1c8] sm:$0xff]  ;;  %v1450_v0 = vpop.f32.mrb[43].mxu1 }
 0x15c   : > { %v5305_v41 = vadd.f32 %v2130_v60, %v2129_v63  ;;  %v5307_v37 = vmax.f32 %v1750_v40, 0.0  ;;  %3732 = vlog2.f32 %v2577_v42  ;;  %v1992_v18 = vsel %vm1928_vm12, %v4855_v43, %v4795_v23  ;;  %6296 = vst [vmem:[#allocation34_spill] sm:$0xff] %v5314_v28  ;;  %v1114_v23 = vpop.f32.mrb[42].mxu0  ;;  %v2583_v43 = vpop.xlane.xlu1 %2582 }
 0x15d   : > { %v1751_v16 = vsub.f32 100.0, %v1687_v20  ;;  %v5311_v14 = vmax.f32 %v1559_v49, 0.0  ;;  %3734 = vlog2.f32 %v2580_v8  ;;  %vm1863_vm13 = vcmp.gt.f32.partialorder %v1110_v17, 0.5  ;;  %v2586_v49 = vpop.xlane.xlu0 %2585 }
 0x15e   : > { %vm1929_vm14 = vcmp.gt.f32.partialorder %v1448_v58, 0.5  ;;  %v1560_v12 = vsub.f32 80.0, %v5314_v28  ;;  %v2055_v40 = vsel %vm1863_vm13, %v4799_v35, %v1991_v30  ;;  %vm1864_vm15 = vcmp.gt.f32.partialorder %v1112_v38, 0.5 }
 0x15f   : > { %6295 = vst [vmem:[#allocation35_spill] sm:$0xff] %v5311_v14  ;;  %v1993_v26 = vsel %vm1929_vm14, %v4869_v44, %v4810_v61  ;;  %vm1930_vm2 = vcmp.gt.f32.partialorder %v1450_v0, 0.5  ;;  %v2131_v20 = vsel %vm2089_vm5, %v2055_v40, 0.0  ;;  %v2056_v57 = vsel %vm1864_vm15, %v4823_v50, %v1992_v18  ;;  %v1116_v61 = vpop.f32.mrb[43].mxu0  ;;  %v1454_v50 = vpop.f32.mrb[44].mxu1  ;;  %v6298_v18 = vld [vmem:[#allocation4_spill] sm:$0xff] }
 0x160   : > { %vm1865_vm3 = vcmp.gt.f32.partialorder %v1114_v23, 0.5  ;;  %v1994_v52 = vsel %vm1930_vm2, %v4902_v21, %v4833_v53  ;;  %3736 = vlog2.f32 %v2583_v43  ;;  %v2132_v35 = vsel %vm2090_vm6, %v2056_v57, 0.0  ;;  %v1456_v21 = vpop.f32.mrb[45].mxu1  ;;  %v2589_v8 = vpop.xlane.xlu1 %2588 }
 0x161   : > { %v2057_v63 = vsel %vm1865_vm3, %v4838_v47, %v1993_v26  ;;  %v5328_v44 = vmax.f32 %v1751_v16, 0.0  ;;  %3738 = vlog2.f32 %v2586_v49  ;;  %vm1866_vm4 = vcmp.gt.f32.partialorder %v1116_v61, 0.5  ;;  %v2592_v30 = vpop.xlane.xlu0 %2591  ;;  %v5345_v16 = vld [vmem:[%s4228_s19 + $0x1d0] sm:$0xff]  ;;  %v1458_v0 = vpop.f32.mrb[46].mxu1  ;;  %v6300_v26 = vld [vmem:[#allocation5_spill] sm:$0xff] }
 0x162   : > { %v2133_v27 = vsel %vm2089_vm5, %v2057_v63, 0.0  ;;  %v5332_v5 = vadd.f32 %v2132_v35, %v2131_v20  ;;  %v3731_v60 = vpop.eup %3730  ;;  %v2058_v53 = vsel %vm1866_vm4, %v4860_v56, %v1994_v52  ;;  %vm1931_vm7 = vcmp.gt.f32.partialorder %v1454_v50, 0.5  ;;  %6299 = vst [vmem:[#allocation43_spill] sm:$0xff] %v5345_v16  ;;  %v1120_v56 = vpop.f32.mrb[44].mxu0 }
 0x163   : > { %v5336_v7 = vmul.f32 10.0, %v5314_v28  ;;  %v5338_v47 = vmax.f32 %v1560_v12, 0.0  ;;  %v2669_v42 = vmul.f32 0.6931472, %v3731_v60  ;;  %v2134_v17 = vsel %vm2090_vm6, %v2058_v53, 0.0  ;;  %v1122_v43 = vpop.f32.mrb[45].mxu0 }
 0x164   : > { %v1995_v58 = vsel %vm1931_vm7, %v4914_v32, %v6298_v18  ;;  %vm1932_vm8 = vcmp.gt.f32.partialorder %v1456_v21, 0.5  ;;  %3740 = vlog2.f32 %v2589_v8  ;;  %v5349_v12 = vadd.f32 %v2134_v17, %v2133_v27  ;;  %v1460_v32 = vpop.f32.mrb[47].mxu1  ;;  %v2595_v63 = vpop.xlane.xlu1 %2594  ;;  %v3803_v27 = vld [vmem:[%s3949_s16] sm:$0xff]  ;;  %v6301_v60 = vld [vmem:[#allocation9_spill] sm:$0xff]  ;;  %v3806_v28 = vld [vmem:[%s3949_s16 + $0x18] sm:$0xff] }
 0x165   : > { %6297 = vst [vmem:[#allocation40_spill] sm:$0xff] %v5338_v47  ;;  %v1996_v38 = vsel %vm1932_vm8, %v4941_v10, %v4878_v19  ;;  %v2732_v23 = vadd.f32 %v2669_v42, %v6300_v26  ;;  %3742 = vlog2.f32 %v2592_v30  ;;  %vm1867_vm9 = vcmp.gt.f32.partialorder %v1120_v56, 0.5  ;;  %v1124_v10 = vpop.f32.mrb[46].mxu0  ;;  %v2598_v61 = vpop.xlane.xlu0 %2597  ;;  %v6303_v30 = vld [vmem:[#allocation103_spill] sm:$0xff] }
 0x166   : > { %vm1933_vm10 = vcmp.gt.f32.partialorder %v1458_v0, 0.5  ;;  %v3733_v49 = vpop.eup %3732  ;;  %v2059_v20 = vsel %vm1867_vm9, %v4882_v13, %v1995_v58  ;;  %vm1868_vm11 = vcmp.gt.f32.partialorder %v1122_v43, 0.5  ;;  %vm1934_vm12 = vcmp.gt.f32.partialorder %v1460_v32, 0.5  ;;  %v1126_v42 = vpop.f32.mrb[47].mxu0  ;;  %v6305_v58 = vld [vmem:[#allocation15_spill] sm:$0xff] }
 0x167   : > { %v1997_v19 = vsel %vm1933_vm10, %v4959_v59, %v4885_v25  ;;  %v3735_v52 = vpop.eup %3734  ;;  %v2671_v35 = vmul.f32 0.6931472, %v3733_v49  ;;  %v2764_v50 = vsub.f32 %v3803_v27, %v2732_v23  ;;  %v2060_v53 = vsel %vm1868_vm11, %v6301_v60, %v1996_v38  ;;  %v6302_v59 = vld [vmem:[#allocation10_spill] sm:$0xff]  ;;  %v1464_v38 = vpop.f32.mrb[48].mxu1  ;;  %v5371_v0 = vld [vmem:[%s4228_s19 + $0x1d8] sm:$0xff]  ;;  %v6308_v49 = vld [vmem:[#allocation21_spill] sm:$0xff] }
 0x168   : > { %v2673_v21 = vmul.f32 0.6931472, %v3735_v52  ;;  %v2135_v13 = vsel %vm2089_vm5, %v2059_v20, 0.0  ;;  %vm1869_vm13 = vcmp.gt.f32.partialorder %v1124_v10, 0.5  ;;  %v5362_v25 = vmul.f32 10.0, %v5345_v16  ;;  %6306 = vst [vmem:[#allocation36_spill] sm:$0xff] %v5371_v0 }
 0x169   : > { %v2733_v8 = vadd.f32 %v2671_v35, %v6302_v59  ;;  %3744 = vlog2.f32 %v2595_v63  ;;  %v6304_v17 = vunpack.c.l.bf16 %v6303_v30  ;;  %v5368_v56 = vsel %vm1869_vm13, %v6305_v58, %v1997_v19  ;;  %v6307_v23 = vld [vmem:[#allocation6_spill] sm:$0xff]  ;;  %v5378_v10 = vpop.f32.mrb[49].mxu1  ;;  %v2601_v19 = vpop.xlane.xlu1 %2600  ;;  %v6309_v59 = vld [vmem:[#allocation19_spill] sm:$0xff] }
 0x16a   : > { %v3737_v26 = vpop.eup %3736  ;;  %v2734_v43 = vadd.f32 %v2673_v21, %v6307_v23  ;;  %v2136_v32 = vsel %vm2090_vm6, %v2060_v53, 0.0  ;;  %v1998_v20 = vsel %vm1934_vm12, %v4981_v1, %v6308_v49  ;;  %vm1870_vm14 = vcmp.gt.f32.partialorder %v1126_v42, 0.5  ;;  %v2604_v63 = vpop.xlane.xlu0 %2603  ;;  %v3805_v53 = vld [vmem:[%s3949_s16 + $0x10] sm:$0xff]  ;;  %v6310_v23 = vld [vmem:[#allocation11_spill] sm:$0xff] }
 0x16b   : > { %v2828_v18 = vmul.f32 %v6304_v17, %v2764_v50  ;;  %v3739_v52 = vpop.eup %3738  ;;  %v2675_v35 = vmul.f32 0.6931472, %v3737_v26  ;;  %v3804_v50 = vld [vmem:[%s3949_s16 + $0x8] sm:$0xff]  ;;  %v5383_v21 = vsel %vm1870_vm14, %v6309_v59, %v1998_v20  ;;  %3746 = vlog2.f32 %v2598_v61  ;;  %v1130_v42 = vpop.f32.mrb[48].mxu0  ;;  %v6314_v59 = vld [vmem:[#allocation8_spill] sm:$0xff] }
 0x16c   : > { %v2765_v60 = vsub.f32 %v3804_v50, %v2733_v8  ;;  %v2677_v17 = vmul.f32 0.6931472, %v3739_v52  ;;  %v2766_v1 = vsub.f32 %v3805_v53, %v2734_v43  ;;  %v5386_v58 = vpop.f32.mrb[50].mxu1  ;;  %v1690_v26 = vmul.f32 10.0, %v5371_v0  ;;  %v1132_v8 = vpop.f32.mrb[49].mxu0  ;;  %v5396_v52 = vld [vmem:[%s4228_s19 + $0x1e0] sm:$0xff] }
 0x16d   : > { %v2860_v27 = vsel %vm1254_vm0, %v2828_v18, 0.0  ;;  %v2735_v49 = vadd.f32 %v2675_v35, %v6310_v23  ;;  %v6311_v18 = vunpack.c.h.bf16 %v6303_v30  ;;  %vm1935_vm15 = vcmp.gt.f32.partialorder %v1464_v38, 0.5  ;;  %v5392_v20 = vpop.f32.mrb[51].mxu1  ;;  %6312 = vst [vmem:[#allocation49_spill] sm:$0xff] %v5396_v52  ;;  %v5405_v38 = vpop.f32.mrb[50].mxu0 }
 0x16e   : > { %2861 = vadd.xlane.f32.xlu0 %v2860_v27  ;;  %v1753_v61 = vsub.f32 100.0, %v5362_v25  ;;  %v3741_v43 = vpop.eup %3740  ;;  %v6313_v27 = vld [vmem:[#allocation13_spill] sm:$0xff]  ;;  %v6315_v53 = vunpack.c.l.bf16 %v6314_v59  ;;  %v1999_v35 = vsel %vm1935_vm15, %v4995_v48, %v6316_v6  ;;  %v5403_v30 = vadd.f32 %v2136_v32, %v2135_v13  ;;  %v5407_v25 = vpop.xlane.xlu0 %2609 }
 0x16f   : > { %v2829_v40 = vmul.f32 %v6311_v18, %v2765_v60  ;;  %v2736_v50 = vadd.f32 %v2677_v17, %v6313_v27  ;;  %v3743_v60 = vpop.eup %3742  ;;  %v2679_v23 = vmul.f32 0.6931472, %v3741_v43  ;;  %v2607_v18 = vpop.xlane.xlu1 %2606  ;;  %v2767_v17 = vsub.f32 %v3806_v28, %v2735_v49  ;;  %v6317_v27 = vld [vmem:[#allocation26_spill] sm:$0xff] }
 0x170   : > { %v2830_v57 = vmul.f32 %v6315_v53, %v2766_v1  ;;  %vm1871_vm2 = vcmp.gt.f32.partialorder %v1130_v42, 0.5  ;;  %3748 = vlog2.f32 %v2601_v19  ;;  %v5412_v48 = vpop.f32.mrb[51].mxu0  ;;  %v1562_v6 = vsub.f32 80.0, %v5371_v0  ;;  %v3807_v1 = vld [vmem:[%s3949_s16 + $0x20] sm:$0xff]  ;;  %v5418_v14 = vpop.f32.mrb[52].mxu1 }
 0x171   : > { %v2863_v47 = vsel %vm1254_vm0, %v2829_v40, 0.0  ;;  %v1754_v13 = vsub.f32 100.0, %v1690_v26  ;;  %v1691_v32 = vmul.f32 10.0, %v5396_v52  ;;  %v2768_v43 = vsub.f32 %v3807_v1, %v2736_v50  ;;  %v5429_v42 = vpop.f32.mrb[53].mxu1  ;;  %v6323_v50 = vld [vmem:[#allocation14_spill] sm:$0xff] }
 0x172   : > { %2864 = vadd.xlane.f32.xlu1 %v2863_v47  ;;  %2207 = vadd.xlane.f32.xlu0 %v5268_v36  ;;  %v2063_v53 = vsel %vm1871_vm2, %v6317_v27, %v1999_v35  ;;  %v6318_v28 = vsub.f32 100.0, %v5336_v7  ;;  %v6320_v47 = vsub.f32 80.0, %v5345_v16  ;;  %v2681_v19 = vmul.f32 0.6931472, %v3743_v60  ;;  %v5436_v7 = vpop.xlane.xlu0 %2615  ;;  %v6325_v60 = vld [vmem:[#allocation22_spill] sm:$0xff]  ;;  %v6333_v16 = vld [vmem:[#allocation20_spill] sm:$0xff] }
 0x173   : > { %3750 = vlog2.f32 %v2604_v63  ;;  %vm1936_vm3 = vcmp.gt.f32.partialorder %v5378_v10, 0.5  ;;  %v5431_v26 = vmax.f32 %v1753_v61, 0.0  ;;  %v3745_v49 = vpop.eup %3744  ;;  %v2737_v35 = vadd.f32 %v2679_v23, %v6323_v50  ;;  %v5434_v1 = vpop.xlane.xlu1 %2612  ;;  %v6326_v63 = vld [vmem:[#allocation28_spill] sm:$0xff] }
 0x174   : > { %v5422_v40 = vmax.f32 %v6318_v28, 0.0  ;;  %v5426_v36 = vmax.f32 %v6320_v47, 0.0  ;;  %v2866_v27 = vsel %vm1254_vm0, %v2830_v57, 0.0  ;;  %v6324_v28 = vunpack.c.h.bf16 %v6314_v59  ;;  %v5444_v10 = vpop.f32.mrb[52].mxu0  ;;  %v5446_v61 = vpop.f32.mrb[54].mxu1 }
 0x175   : > { %6322 = vst [vmem:[#allocation48_spill] sm:$0xff] %v5431_v26  ;;  %v2000_v0 = vsel %vm1936_vm3, %v6326_v63, %v6325_v60  ;;  %v5448_v23 = vmax.f32 %v1754_v13, 0.0  ;;  %v5450_v50 = vmax.f32 %v1562_v6, 0.0  ;;  %v1755_v57 = vsub.f32 100.0, %v1691_v32  ;;  %v6329_v26 = vld [vmem:[#allocation7_spill] sm:$0xff]  ;;  %v5461_v13 = vpop.f32.mrb[53].mxu0 }
 0x176   : > { %6319 = vst [vmem:[#allocation44_spill] sm:$0xff] %v5422_v40  ;;  %6321 = vst [vmem:[#allocation45_spill] sm:$0xff] %v5426_v36  ;;  %v2831_v47 = vmul.f32 %v6324_v28, %v2767_v17  ;;  %2867 = vadd.xlane.f32.xlu1 %v2866_v27  ;;  %2210 = vadd.xlane.f32.xlu0 %v5293_v54  ;;  %v1563_v36 = vsub.f32 80.0, %v5396_v52  ;;  %v6330_v59 = vunpack.c.l.bf16 %v6329_v26  ;;  %v2137_v27 = vsel %vm2089_vm5, %v5368_v56, 0.0  ;;  %v5463_v6 = vpop.f32.mrb[55].mxu1  ;;  %v3747_v28 = vpop.eup %3746  ;;  %v6331_v32 = vld [vmem:[#allocation17_spill] sm:$0xff] }
 0x177   : > { %6327 = vst [vmem:[#allocation53_spill] sm:$0xff] %v5448_v23  ;;  %6328 = vst [vmem:[#allocation56_spill] sm:$0xff] %v5450_v50  ;;  %v2138_v54 = vsel %vm2090_vm6, %v5383_v21, 0.0  ;;  %vm1872_vm4 = vcmp.gt.f32.partialorder %v1132_v8, 0.5  ;;  %v2738_v60 = vadd.f32 %v2681_v19, %v6331_v32  ;;  %v2683_v63 = vmul.f32 0.6931472, %v3745_v49  ;;  %v5470_v56 = vpop.xlane.xlu1 %2618  ;;  %v5472_v50 = vpop.xlane.xlu0 %2621 }
 0x178   : > { %v2832_v17 = vmul.f32 %v6330_v59, %v2768_v43  ;;  %v6332_v52 = vld [vmem:[#allocation23_spill] sm:$0xff]  ;;  %vm1937_vm7 = vcmp.gt.f32.partialorder %v5386_v58, 0.5  ;;  %v5468_v59 = vpop.f32.mrb[54].mxu0  ;;  %v2869_v21 = vsel %vm1254_vm0, %v2831_v47, 0.0  ;;  %v3808_v8 = vld [vmem:[%s3949_s16 + $0x28] sm:$0xff]  ;;  %v5479_v19 = vld [vmem:[%s3982_s27 + $0x30] sm:$0xff]   ;;  %3752 = vlog2.f32 %v2607_v18 }
 0x179   : > { %v2064_v43 = vsel %vm1872_vm4, %v6332_v52, %v2000_v0  ;;  %v2769_v23 = vsub.f32 %v3808_v8, %v2737_v35  ;;  %v2001_v40 = vsel %vm1937_vm7, %v5039_v4, %v6333_v16  ;;  %v2139_v58 = vsel %vm2089_vm5, %v2063_v53, 0.0  ;;  %v5485_v52 = vpop.f32.mrb[55].mxu0  ;;  %v5495_v18 = vpop.f32.mrb[56].mxu1  ;;  %v5498_v32 = vld [vmem:[%s4228_s19 + $0x1e8] sm:$0xff]  ;;  %v3810_v8 = vld [vmem:[%s3949_s16 + $0x30] sm:$0xff] }
 0x17a   : > { %2870 = vadd.xlane.f32.xlu1 %v2869_v21  ;;  %2213 = vadd.xlane.f32.xlu0 %v5305_v41  ;;  %v5487_v49 = vmax.f32 %v1755_v57, 0.0  ;;  %v5489_v35 = vmax.f32 %v1563_v36, 0.0  ;;  %v2685_v47 = vmul.f32 0.6931472, %v3747_v28  ;;  %v2872_v4 = vsel %vm1254_vm0, %v2832_v17, 0.0  ;;  %6336 = vst [vmem:[#allocation57_spill] sm:$0xff] %v5498_v32  ;;  %v3749_v41 = vpop.eup %3748 }
 0x17b   : > { %v5492_v16 = vadd.f32 %v2138_v54, %v2137_v27  ;;  %vm1873_vm8 = vcmp.gt.f32.partialorder %v5405_v38, 0.5  ;;  %v6337_v21 = vld [vmem:[#allocation18_spill] sm:$0xff]  ;;  %v2770_v0 = vsub.f32 %v3810_v8, %v2738_v60  ;;  %vm1938_vm9 = vcmp.gt.f32.partialorder %v5392_v20, 0.5  ;;  %v5504_v36 = vpop.f32.mrb[57].mxu1  ;;  %v5506_v17 = vpop.xlane.xlu1 %2624  ;;  %v6340_v20 = vld [vmem:[#allocation39_spill] sm:$0xff]  ;;  %v6342_v8 = vld [vmem:[#allocation12_spill] sm:$0xff] }
 0x17c   : > { %6334 = vst [vmem:[#allocation58_spill] sm:$0xff] %v5487_v49  ;;  %6335 = vst [vmem:[#allocation50_spill] sm:$0xff] %v5489_v35  ;;  %v2739_v53 = vadd.f32 %v2683_v63, %v6337_v21  ;;  %v2065_v57 = vsel %vm1873_vm8, %v5043_v45, %v2001_v40  ;;  %v5508_v27 = vpop.xlane.xlu0 %2627  ;;  %v6339_v38 = vunpack.c.h.bf16 %v6329_v26  ;;  %v2140_v28 = vsel %vm2090_vm6, %v2064_v43, 0.0  ;;  %v5520_v63 = vpop.f32.mrb[56].mxu0 }
 0x17d   : > { %6338 = vst [vmem:[#allocation59_spill] sm:$0xff] %v5508_v27  ;;  %v2002_v60 = vsel %vm1938_vm9, %v5045_v46, %v4991_v31  ;;  %vm1874_vm10 = vcmp.gt.f32.partialorder %v5412_v48, 0.5  ;;  %v3751_v45 = vpop.eup %3750  ;;  %3754 = vlog2.f32 %v5407_v25  ;;  %v5522_v26 = vpop.f32.mrb[58].mxu1  ;;  %v5526_v43 = vmul.f32 10.0, %v5498_v32  ;;  %v5529_v31 = vld [vmem:[%s4228_s19 + $0x1f0] sm:$0xff]  ;;  %v6341_v46 = vld [vmem:[#allocation24_spill] sm:$0xff] }
 0x17e   : > { %v2833_v54 = vmul.f32 %v6339_v38, %v2769_v23  ;;  %2873 = vadd.xlane.f32.xlu1 %v2872_v4  ;;  %2216 = vadd.xlane.f32.xlu0 %v5332_v5  ;;  %v2066_v40 = vsel %vm1874_vm10, %v6340_v20, %v2002_v60  ;;  %v1564_v23 = vsub.f32 80.0, %v5498_v32  ;;  %v2740_v48 = vadd.f32 %v2685_v47, %v6341_v46  ;;  %v5533_v4 = vpop.f32.mrb[57].mxu0  ;;  %v5535_v5 = vpop.f32.mrb[59].mxu1  ;;  %v3811_v20 = vld [vmem:[%s3949_s16 + $0x38] sm:$0xff] }
 0x17f   : > { %v2687_v25 = vmul.f32 0.6931472, %v3749_v41  ;;  %vm1939_vm11 = vcmp.gt.f32.partialorder %v5418_v14, 0.5  ;;  %v1565_v21 = vsub.f32 80.0, %v5529_v31  ;;  %v6343_v38 = vunpack.c.l.bf16 %v6342_v8  ;;  %v6344_v32 = vld [vmem:[#allocation27_spill] sm:$0xff]  ;;  %v5545_v47 = vpop.f32.mrb[58].mxu0 }
 0x180   : > { %v2771_v35 = vsub.f32 %v3811_v20, %v2739_v53  ;;  %v2003_v49 = vsel %vm1939_vm11, %v5226_v3, %v6344_v32  ;;  %v5543_v27 = vadd.f32 %v2140_v28, %v2139_v58  ;;  %v2875_v14 = vsel %vm1254_vm0, %v2833_v54, 0.0  ;;  %v5555_v58 = vpop.f32.mrb[59].mxu0  ;;  %v3812_v20 = vld [vmem:[%s3949_s16 + $0x40] sm:$0xff] }
 0x181   : > { %v2834_v60 = vmul.f32 %v6343_v38, %v2770_v0  ;;  %vm1875_vm12 = vcmp.gt.f32.partialorder %v5444_v10, 0.5  ;;  %vm1940_vm13 = vcmp.gt.f32.partialorder %v5429_v42, 0.5  ;;  %vm1876_vm14 = vcmp.gt.f32.partialorder %v5461_v13, 0.5  ;;  %v5551_v0 = vpop.xlane.xlu0 %2633  ;;  %v6345_v10 = vld [vmem:[#allocation25_spill] sm:$0xff] }
 0x182   : > { %v2689_v41 = vmul.f32 0.6931472, %v3751_v45  ;;  %2876 = vadd.xlane.f32.xlu1 %v2875_v14  ;;  %2219 = vadd.xlane.f32.xlu0 %v5349_v12  ;;  %v2067_v3 = vsel %vm1875_vm12, %v5254_v33, %v2003_v49  ;;  %v1756_v32 = vsub.f32 100.0, %v5526_v43  ;;  %v5559_v53 = vmul.f32 10.0, %v5529_v31  ;;  %v5568_v45 = vpop.f32.mrb[60].mxu1  ;;  %v3753_v33 = vpop.eup %3752  ;;  %v6358_v43 = vld [vmem:[#allocation43_spill] sm:$0xff] }
 0x183   : > { %v2741_v42 = vadd.f32 %v2687_v25, %v6345_v10  ;;  %v2141_v54 = vsel %vm2089_vm5, %v2065_v57, 0.0  ;;  %v2142_v28 = vsel %vm2090_vm6, %v2066_v40, 0.0  ;;  %v2004_v12 = vsel %vm1940_vm13, %v5259_v11, %v5059_v55  ;;  %v5570_v49 = vpop.xlane.xlu1 %2630  ;;  %v5579_v40 = vpop.f32.mrb[61].mxu1 }
 0x184   : > { %v6346_v46 = vunpack.c.h.bf16 %v6342_v8  ;;  %v2772_v14 = vsub.f32 %v3812_v20, %v2740_v48  ;;  %v2068_v57 = vsel %vm1876_vm14, %v5263_v51, %v2004_v12  ;;  %vm1941_vm15 = vcmp.gt.f32.partialorder %v5446_v61, 0.5  ;;  %v5592_v61 = vpop.f32.mrb[60].mxu0  ;;  %v6347_v48 = vld [vmem:[#allocation29_spill] sm:$0xff] }
 0x185   : > { %3756 = vlog2.f32 %v5434_v1  ;;  %v2878_v55 = vsel %vm1254_vm0, %v2834_v60, 0.0  ;;  %v2005_v11 = vsel %vm1941_vm15, %v5299_v34, %v5231_v9  ;;  %v5589_v51 = vadd.f32 %v2142_v28, %v2141_v54  ;;  %v5594_v1 = vpop.f32.mrb[62].mxu1  ;;  %v5600_v8 = vpop.f32.mrb[61].mxu0 }
 0x186   : > { %v2835_v38 = vmul.f32 %v6346_v46, %v2771_v35  ;;  %v5585_v35 = vmax.f32 %v1564_v23, 0.0  ;;  %3758 = vlog2.f32 %v5436_v7  ;;  %2879 = vadd.xlane.f32.xlu1 %v2878_v55  ;;  %2222 = vadd.xlane.f32.xlu0 %v5403_v30  ;;  %vm1877_vm2 = vcmp.gt.f32.partialorder %v5468_v59, 0.5  ;;  %v3813_v23 = vld [vmem:[%s3949_s16 + $0x48] sm:$0xff]  ;;  %v5603_v30 = vld [vmem:[%s4228_s19 + $0x1f8] sm:$0xff]  ;;  %v5605_v60 = vpop.f32.mrb[63].mxu1  ;;  %v5607_v10 = vpop.xlane.xlu0 %2639 }
 0x187   : > { %v1757_v13 = vsub.f32 100.0, %v5559_v53  ;;  %v2742_v9 = vadd.f32 %v2689_v41, %v6347_v48  ;;  %v2691_v34 = vmul.f32 0.6931472, %v3753_v33  ;;  %v2773_v25 = vsub.f32 %v3813_v23, %v2741_v42  ;;  %v3755_v59 = vpop.eup %3754  ;;  %v5614_v41 = vpop.f32.mrb[62].mxu0  ;;  %v6354_v23 = vld [vmem:[#allocation40_spill] sm:$0xff] }
 0x188   : > { %v2069_v7 = vsel %vm1877_vm2, %v5295_v24, %v2005_v11  ;;  %v2881_v54 = vsel %vm1254_vm0, %v2835_v38, 0.0  ;;  %v6348_v28 = vunpack.c.l.bf16 %v5034_v2  ;;  %vm1942_vm3 = vcmp.gt.f32.partialorder %v5463_v6, 0.5  ;;  %v5624_v46 = vpop.xlane.xlu1 %2636  ;;  %v5631_v38 = vpop.f32.mrb[63].mxu0  ;;  %v6352_v11 = vld [vmem:[#allocation34_spill] sm:$0xff] }
 0x189   : > { %vm1878_vm4 = vcmp.gt.f32.partialorder %v5485_v52, 0.5  ;;  %v2143_v24 = vsel %vm2089_vm5, %v2067_v3, 0.0  ;;  %v2144_v42 = vsel %vm2090_vm6, %v2068_v57, 0.0  ;;  %v2006_v33 = vsel %vm1942_vm3, %v5307_v37, %v5249_v39  ;;  %v6351_v57 = vld [vmem:[#allocation35_spill] sm:$0xff] }
 0x18a   : > { %v2836_v12 = vmul.f32 %v6348_v28, %v2772_v14  ;;  %vm1943_vm7 = vcmp.gt.f32.partialorder %v5495_v18, 0.5  ;;  %3760 = vlog2.f32 %v5470_v56  ;;  %2882 = vadd.xlane.f32.xlu1 %v2881_v54  ;;  %2225 = vadd.xlane.f32.xlu0 %v5492_v16  ;;  %v2070_v6 = vsel %vm1878_vm4, %v5301_v62, %v2006_v33  ;;  %v3814_v18 = vld [vmem:[%s3949_s16 + $0x50] sm:$0xff]  ;;  %v6355_v28 = vld [vmem:[#allocation32_spill] sm:$0xff] }
 0x18b   : > { %v2007_v52 = vsel %vm1943_vm7, %v5328_v44, %v5275_v22  ;;  %v1694_v3 = vmul.f32 10.0, %v5603_v30  ;;  %v2693_v20 = vmul.f32 0.6931472, %v3755_v59  ;;  %3762 = vlog2.f32 %v5472_v50  ;;  %v6350_v22 = vld [vmem:[#allocation30_spill] sm:$0xff]  ;;  %v6353_v50 = vld [vmem:[#allocation44_spill] sm:$0xff] }
 0x18c   : > { %v6349_v39 = vunpack.c.h.bf16 %v5034_v2  ;;  %v1566_v56 = vsub.f32 80.0, %v5603_v30  ;;  %v2774_v14 = vsub.f32 %v3814_v18, %v2742_v9  ;;  %v2233_v16 = vadd.f32 %v2144_v42, %v2143_v24  ;;  %v5645_v2 = vpop.xlane.xlu0 %2645  ;;  %v5662_v24 = vpop.xlane.xlu1 %2642  ;;  %v6356_v42 = vld [vmem:[#allocation31_spill] sm:$0xff] }
 0x18d   : > { %vm1879_vm8 = vcmp.gt.f32.partialorder %v5520_v63, 0.5  ;;  %vm1944_vm9 = vcmp.gt.f32.partialorder %v5504_v36, 0.5  ;;  %v2743_v62 = vadd.f32 %v2691_v34, %v6350_v22  ;;  %v2884_v44 = vsel %vm1254_vm0, %v2836_v12, 0.0 }
 0x18e   : > { %v2837_v37 = vmul.f32 %v6349_v39, %v2773_v25  ;;  %v2071_v55 = vsel %vm1879_vm8, %v6351_v57, %v2007_v52  ;;  %v2008_v48 = vsel %vm1944_vm9, %v6353_v50, %v6352_v11  ;;  %2885 = vadd.xlane.f32.xlu1 %v2884_v44  ;;  %2228 = vadd.xlane.f32.xlu0 %v5543_v27  ;;  %v2145_v9 = vsel %vm2089_vm5, %v2069_v7, 0.0  ;;  %v6364_v50 = vld [vmem:[#allocation56_spill] sm:$0xff] }
 0x18f   : > { %v2146_v36 = vsel %vm2090_vm6, %v2070_v6, 0.0  ;;  %vm1880_vm10 = vcmp.gt.f32.partialorder %v5533_v4, 0.5  ;;  %v1758_v63 = vsub.f32 100.0, %v1694_v3  ;;  %v3757_v34 = vpop.eup %3756  ;;  %v1820_v59 = vmax.f32 %v1756_v32, 0.0  ;;  %v6359_v32 = vld [vmem:[#allocation48_spill] sm:$0xff]  ;;  %v3815_v3 = vld [vmem:[%s3949_s16 + $0x58] sm:$0xff] }
 0x190   : > { %v2072_v25 = vsel %vm1880_vm10, %v6354_v23, %v2008_v48  ;;  %v2809_v54 = vunpack.c.h.bf16 %v5479_v19  ;;  %v5659_v27 = vmax.f32 %v1565_v21, 0.0  ;;  %v3759_v7 = vpop.eup %3758  ;;  %v2744_v12 = vadd.f32 %v2693_v20, %v6355_v28  ;;  %v6360_v21 = vld [vmem:[#allocation45_spill] sm:$0xff]  ;;  %v3816_v48 = vld [vmem:[%s3949_s16 + $0x60] sm:$0xff]  ;;  %v5703_v28 = vld [vmem:[%s3982_s27 + $0x38] sm:$0xff]  }
 0x191   : > { %v2887_v4 = vsel %vm1254_vm0, %v2837_v37, 0.0  ;;  %v6357_v33 = vunpack.c.l.bf16 %v6356_v42  ;;  %vm1945_vm11 = vcmp.gt.f32.partialorder %v5522_v26, 0.5  ;;  %v2775_v39 = vsub.f32 %v3815_v3, %v2743_v62  ;;  %v6366_v23 = vld [vmem:[#allocation49_spill] sm:$0xff] }
 0x192   : > { %v2009_v52 = vsel %vm1945_vm11, %v6359_v32, %v6358_v43  ;;  %v2236_v18 = vadd.f32 %v2146_v36, %v2145_v9  ;;  %vm1881_vm12 = vcmp.gt.f32.partialorder %v5545_v47, 0.5  ;;  %2888 = vadd.xlane.f32.xlu1 %v2887_v4  ;;  %2231 = vadd.xlane.f32.xlu0 %v5589_v51  ;;  %v1821_v37 = vmax.f32 %v1757_v13, 0.0  ;;  %v5684_v51 = vpop.xlane.xlu0 %2651  ;;  %v6361_v13 = vld [vmem:[#allocation36_spill] sm:$0xff] }
 0x193   : > { %v2838_v6 = vmul.f32 %v6357_v33, %v2774_v14  ;;  %v2073_v20 = vsel %vm1881_vm12, %v6360_v21, %v2009_v52  ;;  %v5676_v22 = vmax.f32 %v1758_v63, 0.0  ;;  %v5678_v26 = vmax.f32 %v1566_v56, 0.0  ;;  %v6362_v56 = vld [vmem:[#allocation53_spill] sm:$0xff]  ;;  %v6365_v63 = vld [vmem:[#allocation59_spill] sm:$0xff]  ;;  %v6370_v52 = vld [vmem:[#allocation50_spill] sm:$0xff] }
 0x194   : > { %v2695_v14 = vmul.f32 0.6931472, %v3757_v34  ;;  %3764 = vlog2.f32 %v5506_v17  ;;  %v2147_v62 = vsel %vm2089_vm5, %v2071_v55, 0.0  ;;  %vm1946_vm13 = vcmp.gt.f32.partialorder %v5535_v5, 0.5  ;;  %v3761_v47 = vpop.eup %3760  ;;  %v5698_v34 = vpop.xlane.xlu1 %2648 }
 0x195   : > { %v2890_v44 = vsel %vm1254_vm0, %v2838_v6, 0.0  ;;  %v2148_v53 = vsel %vm2090_vm6, %v2072_v25, 0.0  ;;  %v2010_v57 = vsel %vm1946_vm13, %v6362_v56, %v6361_v13  ;;  %vm1882_vm14 = vcmp.gt.f32.partialorder %v5555_v58, 0.5  ;;  %v3763_v17 = vpop.eup %3762  ;;  %v6367_v25 = vld [vmem:[#allocation58_spill] sm:$0xff] }
 0x196   : > { %v6363_v11 = vunpack.c.h.bf16 %v6356_v42  ;;  %v2074_v5 = vsel %vm1882_vm14, %v6364_v50, %v2010_v57  ;;  %vm1947_vm15 = vcmp.gt.f32.partialorder %v5568_v45, 0.5  ;;  %v2776_v9 = vsub.f32 %v3816_v48, %v2744_v12  ;;  %2891 = vadd.xlane.f32.xlu1 %v2890_v44  ;;  %2234 = vadd.xlane.f32.xlu0 %v2233_v16  ;;  %v6368_v42 = vld [vmem:[#allocation33_spill] sm:$0xff]  ;;  %v3820_v50 = vld [vmem:[%s3949_s16 + $0x78] sm:$0xff] }
 0x197   : > { %v2697_v36 = vmul.f32 0.6931472, %v3759_v7  ;;  %3766 = vlog2.f32 %v6365_v63  ;;  %v2011_v58 = vsel %vm1947_vm15, %v6367_v25, %v6366_v23  ;;  %v2810_v4 = vunpack.c.l.bf16 %v5703_v28  ;;  %v6375_v23 = vld [vmem:[#allocation42_spill] sm:$0xff] }
 0x198   : > { %v2839_v55 = vmul.f32 %v6363_v11, %v2775_v39  ;;  %v2745_v33 = vadd.f32 %v2695_v14, %v6368_v42  ;;  %v2699_v6 = vmul.f32 0.6931472, %v3761_v47  ;;  %v6369_v45 = vunpack.c.l.bf16 %v5479_v19  ;;  %v6371_v39 = vld [vmem:[#allocation57_spill] sm:$0xff]  ;;  %v2251_v42 = vld [vmem:[#allocation2] sm:$0xff] }
 0x199   : > { %v2239_v7 = vadd.f32 %v2148_v53, %v2147_v62  ;;  %v2149_v43 = vsel %vm2089_vm5, %v2073_v20, 0.0  ;;  %vm1883_vm2 = vcmp.gt.f32.partialorder %v5592_v61, 0.5  ;;  %vm1948_vm3 = vcmp.gt.f32.partialorder %v5579_v40, 0.5  ;;  %v6372_v14 = vld [vmem:[#allocation37_spill] sm:$0xff]  ;;  %v5721_v61 = vpop.xlane.xlu0 %2657 }
 0x19a   : > { %v2840_v12 = vmul.f32 %v6369_v45, %v2776_v9  ;;  %vm1884_vm4 = vcmp.gt.f32.partialorder %v5600_v8, 0.5  ;;  %v2893_v16 = vsel %vm1254_vm0, %v2839_v55, 0.0  ;;  %v2150_v32 = vsel %vm2090_vm6, %v2074_v5, 0.0  ;;  %2237 = vadd.xlane.f32.xlu0 %v2236_v18  ;;  %v6373_v8 = vld [vmem:[#allocation38_spill] sm:$0xff]  ;;  %v3818_v53 = vld [vmem:[%s3949_s16 + $0x68] sm:$0xff]  ;;  %v3822_v45 = vld [vmem:[%s3949_s16 + $0x80] sm:$0xff] }
 0x19b   : > { %v2075_v3 = vsel %vm1883_vm2, %v6370_v52, %v2011_v58  ;;  %v2012_v21 = vsel %vm1948_vm3, %v1820_v59, %v6371_v39  ;;  %v2746_v62 = vadd.f32 %v2697_v36, %v6372_v14  ;;  %v2701_v47 = vmul.f32 0.6931472, %v3763_v17  ;;  %2894 = vadd.xlane.f32.xlu1 %v2893_v16  ;;  %v5728_v59 = vpop.xlane.xlu1 %2654  ;;  %v736_v36 = vld [vmem:[%s5754_s26] sm:$0xff]  ;;  %v738_v52 = vld [vmem:[%s5754_s26 + $0x10] sm:$0xff] }
 0x19c   : > { %3768 = vlog2.f32 %v5570_v49  ;;  %v2076_v40 = vsel %vm1884_vm4, %v5585_v35, %v2012_v21  ;;  %v2747_v20 = vadd.f32 %v2699_v6, %v6373_v8  ;;  %v2896_v44 = vsel %vm1254_vm0, %v2840_v12, 0.0  ;;  %v3821_v58 = vld [vmem:[%s3982_s27 + $0x40] sm:$0xff]   ;;  %v6376_v39 = vld [vmem:[#allocation46_spill] sm:$0xff] }
 0x19d   : > { %vm1949_vm7 = vcmp.gt.f32.partialorder %v5594_v1, 0.5  ;;  %v2777_v13 = vsub.f32 %v3818_v53, %v2745_v33  ;;  %v2151_v56 = vsel %vm2089_vm5, %v2075_v3, 0.0  ;;  %v2242_v57 = vadd.f32 %v2150_v32, %v2149_v43 }
 0x19e   : > { %v2013_v49 = vsel %vm1949_vm7, %v1821_v37, %v5529_v31  ;;  %vm1885_vm8 = vcmp.gt.f32.partialorder %v5614_v41, 0.5  ;;  %v3765_v35 = vpop.eup %3764  ;;  %v2152_v18 = vsel %vm2090_vm6, %v2076_v40, 0.0  ;;  %vm1950_vm9 = vcmp.gt.f32.partialorder %v5605_v60, 0.5  ;;  %2240 = vadd.xlane.f32.xlu0 %v2239_v7 }
 0x19f   : > { %v2841_v1 = vmul.f32 %v2809_v54, %v2777_v13  ;;  %v2077_v17 = vsel %vm1885_vm8, %v5659_v27, %v2013_v49  ;;  %2897 = vadd.xlane.f32.xlu1 %v2896_v44  ;;  %v2014_v41 = vsel %vm1950_vm9, %v5676_v22, %v5603_v30  ;;  %vm1886_vm10 = vcmp.gt.f32.partialorder %v5631_v38, 0.5  ;;  %v3819_v54 = vld [vmem:[%s3949_s16 + $0x70] sm:$0xff]  ;;  %v6374_v30 = vld [vmem:[#allocation41_spill] sm:$0xff]  ;;  %v5757_v38 = vpop.xlane.xlu0 %2663  ;;  %v5763_v9 = vpop.xlane.xlu1 %2660  ;;  %v6377_v44 = vld [vmem:[#allocation47_spill] sm:$0xff] }
 0x1a0   : > { %v2153_v31 = vsel %vm2089_vm5, %v2077_v17, 0.0  ;;  %3770 = vlog2.f32 %v5551_v0  ;;  %v2078_v19 = vsel %vm1886_vm10, %v5678_v26, %v2014_v41  ;;  %v2778_v37 = vsub.f32 %v3819_v54, %v2746_v62  ;;  %v3825_v41 = vld [vmem:[%s3949_s16 + $0x90] sm:$0xff] }
 0x1a1   : > { %v2811_v27 = vunpack.c.h.bf16 %v5703_v28  ;;  %v3767_v15 = vpop.eup %3766  ;;  %v2748_v60 = vadd.f32 %v2701_v47, %v6374_v30  ;;  %v2703_v22 = vmul.f32 0.6931472, %v3765_v35  ;;  %v2154_v0 = vsel %vm2090_vm6, %v2078_v19, 0.0  ;;  %v3823_v47 = vld [vmem:[%s3949_s16 + $0x88] sm:$0xff] }
 0x1a2   : > { %v2245_v26 = vadd.f32 %v2152_v18, %v2151_v56  ;;  %v2899_v11 = vsel %vm1254_vm0, %v2841_v1, 0.0  ;;  %v2842_v55 = vmul.f32 %v2810_v4, %v2778_v37  ;;  %v2779_v5 = vsub.f32 %v3820_v50, %v2747_v20  ;;  %2243 = vadd.xlane.f32.xlu0 %v2242_v57  ;;  %v3824_v56 = vld [vmem:[%s3982_s27 + $0x48] sm:$0xff]   ;;  %v739_v57 = vld [vmem:[%s5754_s26 + $0x18] sm:$0xff]  ;;  %v740_v50 = vld [vmem:[%s5754_s26 + $0x20] sm:$0xff] }
 0x1a3   : > { %v2248_v48 = vadd.f32 %v2154_v0, %v2153_v31  ;;  %2900 = vadd.xlane.f32.xlu1 %v2899_v11  ;;  %3772 = vlog2.f32 %v5624_v46  ;;  %v2749_v29 = vadd.f32 %v2703_v22, %v6375_v23  ;;  %v2705_v25 = vmul.f32 0.6931472, %v3767_v15  ;;  %v2157_v4 = vpop.xlane.xlu0 %2156  ;;  %v5772_v16 = vpop.xlane.xlu1 %2666  ;;  %v737_v35 = vld [vmem:[%s5754_s26 + $0x8] sm:$0xff] }
 0x1a4   : > { %v2812_v28 = vunpack.c.l.bf16 %v3821_v58  ;;  %v2902_v33 = vsel %vm1254_vm0, %v2842_v55, 0.0  ;;  %v2843_v6 = vmul.f32 %v2811_v27, %v2779_v5  ;;  %v2780_v12 = vsub.f32 %v3822_v45, %v2748_v60  ;;  %v2252_v27 = vld [vmem:[#allocation2 + $0x8] sm:$0xff]  ;;  %v6378_v60 = vld [vmem:[#allocation51_spill] sm:$0xff] }
 0x1a5   : > { %v2283_v7 = vmul.f32 %v2157_v4, %v736_v36  ;;  %3774 = vlog2.f32 %v5607_v10  ;;  %v2813_v32 = vunpack.c.h.bf16 %v3821_v58  ;;  %v2750_v21 = vadd.f32 %v2705_v25, %v6376_v39  ;;  %v2253_v10 = vld [vmem:[#allocation2 + $0x10] sm:$0xff]  ;;  %v6379_v58 = vld [vmem:[#allocation52_spill] sm:$0xff] }
 0x1a6   : > { %v3769_v63 = vpop.eup %3768  ;;  %2246 = vadd.xlane.f32.xlu0 %v2245_v26  ;;  %v2905_v14 = vsel %vm1254_vm0, %v2843_v6, 0.0  ;;  %v2844_v62 = vmul.f32 %v2812_v28, %v2780_v12  ;;  %v2781_v40 = vsub.f32 %v3823_v47, %v2749_v29  ;;  %3776 = vlog2.f32 %v5662_v24  ;;  %v2254_v24 = vld [vmem:[#allocation2 + $0x18] sm:$0xff]  ;;  %v3827_v4 = vld [vmem:[%s3982_s27 + $0x50] sm:$0xff]   ;;  %v741_v6 = vld [vmem:[%s5754_s26 + $0x28] sm:$0xff] }
 0x1a7   : > { %2903 = vadd.xlane.f32.xlu1 %v2902_v33  ;;  %v2315_v46 = vadd.f32 %v2283_v7, %v2251_v42  ;;  %v2707_v43 = vmul.f32 0.6931472, %v3769_v63  ;;  %v2163_v8 = vpop.xlane.xlu0 %2162  ;;  %v2814_v49 = vunpack.c.l.bf16 %v3824_v56  ;;  %v2160_v18 = vpop.xlane.xlu1 %2159  ;;  %v2782_v19 = vsub.f32 %v3825_v41, %v2750_v21  ;;  %v3826_v26 = vld [vmem:[%s3949_s16 + $0x98] sm:$0xff]  ;;  %v6380_v39 = vld [vmem:[#allocation54_spill] sm:$0xff] }
 0x1a8   : > { %v2285_v20 = vmul.f32 %v2163_v8, %v738_v52  ;;  %v2908_v17 = vsel %vm1254_vm0, %v2844_v62, 0.0  ;;  %v2845_v31 = vmul.f32 %v2813_v32, %v2781_v40  ;;  %3778 = vlog2.f32 %v5645_v2  ;;  %v2255_v2 = vld [vmem:[#allocation2 + $0x20] sm:$0xff]  ;;  %v2256_v32 = vld [vmem:[#allocation2 + $0x28] sm:$0xff]  ;;  %v742_v47 = vld [vmem:[%s5754_s26 + $0x30] sm:$0xff] }
 0x1a9   : > { %2348 = vst.msk [vmem:[#allocation2] sm:$0xff] %vm575_vm1, %v2315_v46  ;;  %v2751_v53 = vadd.f32 %v2707_v43, %v6377_v44  ;;  %v2284_v30 = vmul.f32 %v2160_v18, %v737_v35  ;;  %v2815_v55 = vunpack.c.h.bf16 %v3824_v56  ;;  %v2846_v36 = vmul.f32 %v2814_v49, %v2782_v19  ;;  %v3828_v46 = vld [vmem:[%s3949_s16 + $0xa0] sm:$0xff]  ;;  %v6381_v49 = vld [vmem:[#allocation55_spill] sm:$0xff] }
 0x1aa   : > { %v3771_v3 = vpop.eup %3770  ;;  %2249 = vadd.xlane.f32.xlu0 %v2248_v48  ;;  %v2317_v54 = vadd.f32 %v2285_v20, %v2253_v10  ;;  %v2911_v48 = vsel %vm1254_vm0, %v2845_v31, 0.0  ;;  %3780 = vlog2.f32 %v5698_v34  ;;  %v2816_v33 = vunpack.c.l.bf16 %v3827_v4  ;;  %v3829_v20 = vld [vmem:[%s3949_s16 + $0xa8] sm:$0xff]  ;;  %v3830_v18 = vld [vmem:[%s3982_s27 + $0x58] sm:$0xff]  }
 0x1ab   : > { %2906 = vadd.xlane.f32.xlu1 %v2905_v14  ;;  %v2709_v13 = vmul.f32 0.6931472, %v3771_v3  ;;  %v2166_v37 = vpop.xlane.xlu0 %2165  ;;  %v2783_v11 = vsub.f32 %v3826_v26, %v2751_v53  ;;  %v2316_v23 = vadd.f32 %v2284_v30, %v2252_v27  ;;  %v2914_v12 = vsel %vm1254_vm0, %v2846_v36, 0.0  ;;  %v6382_v30 = vld [vmem:[#allocation62_spill] sm:$0xff]  ;;  %v744_v26 = vld [vmem:[%s5754_s26 + $0x40] sm:$0xff] }
 0x1ac   : > { %2350 = vst.msk [vmem:[#allocation2 + $0x10] sm:$0xff] %vm575_vm1, %v2317_v54  ;;  %v2286_v15 = vmul.f32 %v2166_v37, %v739_v57  ;;  %3782 = vlog2.f32 %v5684_v51  ;;  %v2817_v62 = vunpack.c.h.bf16 %v3827_v4  ;;  %v2257_v51 = vld [vmem:[#allocation2 + $0x30] sm:$0xff] }
 0x1ad   : > { %v3773_v1 = vpop.eup %3772  ;;  %v2752_v22 = vadd.f32 %v2709_v13, %v6378_v60  ;;  %2349 = vst.msk [vmem:[#allocation2 + $0x8] sm:$0xff] %vm575_vm1, %v2316_v23  ;;  %v2847_v7 = vmul.f32 %v2815_v55, %v2783_v11  ;;  %3784 = vlog2.f32 %v5728_v59  ;;  %v3831_v54 = vld [vmem:[%s3949_s16 + $0xb0] sm:$0xff]  ;;  %v2258_v59 = vld [vmem:[#allocation2 + $0x38] sm:$0xff] }
 0x1ae   : > { %v2711_v0 = vmul.f32 0.6931472, %v3773_v1  ;;  %v2318_v63 = vadd.f32 %v2286_v15, %v2254_v24  ;;  %v2818_v1 = vunpack.c.l.bf16 %v3830_v18  ;;  %3786 = vlog2.f32 %v5721_v61  ;;  %v2259_v61 = vld [vmem:[#allocation2 + $0x40] sm:$0xff] }
 0x1af   : > { %2909 = vadd.xlane.f32.xlu1 %v2908_v17  ;;  %v3775_v5 = vpop.eup %3774  ;;  %v2169_v29 = vpop.xlane.xlu0 %2168  ;;  %v2784_v43 = vsub.f32 %v3828_v46, %v2752_v22  ;;  %v2917_v10 = vsel %vm1254_vm0, %v2847_v7, 0.0  ;;  %v743_v17 = vld [vmem:[%s5754_s26 + $0x38] sm:$0xff]  ;;  %3788 = vlog2.f32 %v5763_v9  ;;  %v2260_v9 = vld [vmem:[#allocation2 + $0x48] sm:$0xff] }
 0x1b0   : > { %2351 = vst.msk [vmem:[#allocation2 + $0x18] sm:$0xff] %vm575_vm1, %v2318_v63  ;;  %v2287_v25 = vmul.f32 %v2169_v29, %v740_v50  ;;  %v2753_v28 = vadd.f32 %v2711_v0, %v6379_v58  ;;  %v2713_v42 = vmul.f32 0.6931472, %v3775_v5  ;;  %v3777_v45 = vpop.eup %3776  ;;  %v2819_v0 = vunpack.c.h.bf16 %v3830_v18  ;;  %v3832_v5 = vld [vmem:[%s3949_s16 + $0xb8] sm:$0xff]  ;;  %v3833_v58 = vld [vmem:[%s3982_s27 + $0x60] sm:$0xff]  }
 0x1b1   : > { %v2715_v14 = vmul.f32 0.6931472, %v3777_v45  ;;  %v2848_v8 = vmul.f32 %v2816_v33, %v2784_v43  ;;  %v3834_v45 = vld [vmem:[%s3949_s16 + $0xc0] sm:$0xff]  ;;  %3790 = vlog2.f32 %v5757_v38  ;;  %v2261_v38 = vld [vmem:[#allocation2 + $0x50] sm:$0xff] }
 0x1b2   : > { %v2319_v34 = vadd.f32 %v2287_v25, %v2255_v2  ;;  %v2754_v21 = vadd.f32 %v2713_v42, %v6380_v39  ;;  %v3779_v40 = vpop.eup %3778  ;;  %v2785_v44 = vsub.f32 %v3829_v20, %v2753_v28  ;;  %v6383_v2 = vld [vmem:[#allocation63_spill] sm:$0xff]  ;;  %v2820_v28 = vunpack.c.l.bf16 %v3833_v58  ;;  %v745_v42 = vld [vmem:[%s5754_s26 + $0x48] sm:$0xff]  ;;  %v746_v39 = vld [vmem:[%s5754_s26 + $0x50] sm:$0xff] }
 0x1b3   : > { %2912 = vadd.xlane.f32.xlu1 %v2911_v48  ;;  %v2172_v52 = vpop.xlane.xlu0 %2171  ;;  %v2755_v57 = vadd.f32 %v2715_v14, %v6381_v49  ;;  %v2717_v35 = vmul.f32 0.6931472, %v3779_v40  ;;  %v2920_v41 = vsel %vm1254_vm0, %v2848_v8, 0.0  ;;  %3792 = vlog2.f32 %v5772_v16  ;;  %v3087_v20 = vld [vmem:[#allocation2] sm:$0xff]  ;;  %v3836_v49 = vld [vmem:[%s3982_s27 + $0x68] sm:$0xff]  }
 0x1b4   : > { %2352 = vst.msk [vmem:[#allocation2 + $0x20] sm:$0xff] %vm575_vm1, %v2319_v34  ;;  %v2288_v3 = vmul.f32 %v2172_v52, %v741_v6  ;;  %v3781_v31 = vpop.eup %3780  ;;  %v2849_v19 = vmul.f32 %v2817_v62, %v2785_v44  ;;  %v2786_v24 = vsub.f32 %v3831_v54, %v2754_v21  ;;  %v6384_v34 = vld [vmem:[#allocation65_spill] sm:$0xff]  ;;  %v2262_v54 = vld [vmem:[#allocation2 + $0x58] sm:$0xff] }
 0x1b5   : > { %v2756_v60 = vadd.f32 %v2717_v35, %v6382_v30  ;;  %v2719_v22 = vmul.f32 0.6931472, %v3781_v31  ;;  %v2787_v48 = vsub.f32 %v3832_v5, %v2755_v57  ;;  %v2822_v57 = vunpack.c.l.bf16 %v3836_v49  ;;  %v747_v35 = vld [vmem:[%s5754_s26 + $0x58] sm:$0xff]  ;;  %v3837_v31 = vld [vmem:[%s3949_s16 + $0xd0] sm:$0xff] }
 0x1b6   : > { %v2320_v53 = vadd.f32 %v2288_v3, %v2256_v32  ;;  %v3783_v11 = vpop.eup %3782  ;;  %v2923_v55 = vsel %vm1254_vm0, %v2849_v19, 0.0  ;;  %v2850_v50 = vmul.f32 %v2818_v1, %v2786_v24  ;;  %v2821_v3 = vunpack.c.h.bf16 %v3833_v58 }
 0x1b7   : > { %2915 = vadd.xlane.f32.xlu1 %v2914_v12  ;;  %v2175_v13 = vpop.xlane.xlu0 %2174  ;;  %v2757_v29 = vadd.f32 %v2719_v22, %v6383_v2  ;;  %v2721_v25 = vmul.f32 0.6931472, %v3783_v11  ;;  %v3785_v4 = vpop.eup %3784  ;;  %v2851_v6 = vmul.f32 %v2819_v0, %v2787_v48  ;;  %v2788_v12 = vsub.f32 %v3834_v45, %v2756_v60  ;;  %v3838_v22 = vld [vmem:[%s3949_s16 + $0xd8] sm:$0xff]  ;;  %v748_v11 = vld [vmem:[%s5754_s26 + $0x60] sm:$0xff] }
 0x1b8   : > { %2353 = vst.msk [vmem:[#allocation2 + $0x28] sm:$0xff] %vm575_vm1, %v2320_v53  ;;  %v2289_v56 = vmul.f32 %v2175_v13, %v742_v47  ;;  %v2926_v33 = vsel %vm1254_vm0, %v2850_v50, 0.0  ;;  %v2723_v52 = vmul.f32 0.6931472, %v3785_v4  ;;  %v3787_v21 = vpop.eup %3786  ;;  %v3835_v47 = vld [vmem:[%s3949_s16 + $0xc8] sm:$0xff]  ;;  %v3119_v19 = vsel %vm575_vm1, %v3087_v20, 0.0 }
 0x1b9   : > { %v2758_v32 = vadd.f32 %v2721_v25, %v6384_v34  ;;  %v2929_v14 = vsel %vm1254_vm0, %v2851_v6, 0.0  ;;  %v2852_v62 = vmul.f32 %v2820_v28, %v2788_v12  ;;  %v2789_v40 = vsub.f32 %v3835_v47, %v2757_v29  ;;  %v3088_v53 = vld [vmem:[#allocation2 + $0x8] sm:$0xff]  ;;  %v3789_v18 = vpop.eup %3788  ;;  %v3090_v2 = vld [vmem:[#allocation2 + $0x18] sm:$0xff]  ;;  %v3839_v4 = vld [vmem:[%s3982_s27 + $0x70] sm:$0xff]  }
 0x1ba   : > { %v2321_v37 = vadd.f32 %v2289_v56, %v2257_v51  ;;  %v6385_v51 = vld [vmem:[#allocation66_spill] sm:$0xff]  ;;  %v2725_v56 = vmul.f32 0.6931472, %v3787_v21  ;;  %v2727_v60 = vmul.f32 0.6931472, %v3789_v18  ;;  %v6387_v25 = vld [vmem:[#allocation71_spill] sm:$0xff] }
 0x1bb   : > { %2918 = vadd.xlane.f32.xlu1 %v2917_v10  ;;  %v2178_v27 = vpop.xlane.xlu0 %2177  ;;  %v2759_v13 = vadd.f32 %v2723_v52, %v6385_v51  ;;  %v2932_v1 = vsel %vm1254_vm0, %v2852_v62, 0.0  ;;  %v749_v6 = vld [vmem:[%s5754_s26 + $0x68] sm:$0xff]  ;;  %v3124_v34 = vsel %vm575_vm1, %v3090_v2, 0.0 }
 0x1bc   : > { %2354 = vst.msk [vmem:[#allocation2 + $0x30] sm:$0xff] %vm575_vm1, %v2321_v37  ;;  %v2290_v15 = vmul.f32 %v2178_v27, %v743_v17  ;;  %v2853_v17 = vmul.f32 %v2821_v3, %v2789_v40  ;;  %v3120_v37 = vsel %vm575_vm1, %v3088_v53, 0.0  ;;  %v2761_v58 = vadd.f32 %v2727_v60, %v6387_v25  ;;  %v3091_v3 = vld [vmem:[#allocation2 + $0x20] sm:$0xff]  ;;  %v6388_v21 = vld [vmem:[#allocation81_spill] sm:$0xff] }
 0x1bd   : > { %v2791_v0 = vsub.f32 %v3838_v22, %v2759_v13  ;;  %v3841_v47 = vld [vmem:[%s3949_s16 + $0xe8] sm:$0xff]  ;;  %v3126_v51 = vsel %vm575_vm1, %v3091_v3, 0.0  ;;  %v2265_v13 = vld [vmem:[#allocation2 + $0x70] sm:$0xff]  ;;  %v3844_v22 = vld [vmem:[%s3949_s16 + $0xf8] sm:$0xff] }
 0x1be   : > { %v2322_v36 = vadd.f32 %v2290_v15, %v2258_v59  ;;  %v3089_v59 = vld [vmem:[#allocation2 + $0x10] sm:$0xff]  ;;  %v2935_v50 = vsel %vm1254_vm0, %v2853_v17, 0.0  ;;  %v2793_v40 = vsub.f32 %v3841_v47, %v2761_v58  ;;  %v2988_v47 = vld [vmem:[#allocation3] sm:$0xff] }
 0x1bf   : > { %2921 = vadd.xlane.f32.xlu1 %v2920_v41  ;;  %v2181_v63 = vpop.xlane.xlu0 %2180  ;;  %v2790_v41 = vsub.f32 %v3837_v31, %v2758_v32  ;;  %v6386_v15 = vld [vmem:[#allocation70_spill] sm:$0xff]  ;;  %v2264_v32 = vld [vmem:[#allocation2 + $0x68] sm:$0xff]  ;;  %v3843_v31 = vld [vmem:[%s3982_s27 + $0x78] sm:$0xff]   ;;  %s566_s27 = scalar_lea.vmem %s6022_s8, %s6395_s30 }
 0x1c0   : > { %2355 = vst.msk [vmem:[#allocation2 + $0x38] sm:$0xff] %vm575_vm1, %v2322_v36  ;;  %v2291_v23 = vmul.f32 %v2181_v63, %v744_v26  ;;  %v2760_v30 = vadd.f32 %v2725_v56, %v6386_v15  ;;  %v2823_v26 = vunpack.c.h.bf16 %v3836_v49  ;;  %v3121_v36 = vadd.f32 %v3120_v37, %v3119_v19  ;;  %v2263_v63 = vld [vmem:[#allocation2 + $0x60] sm:$0xff]  ;;  %v3092_v49 = vld [vmem:[#allocation2 + $0x28] sm:$0xff] }
 0x1c1   : > { %v2854_v5 = vmul.f32 %v2822_v57, %v2790_v41  ;;  %v2826_v41 = vunpack.c.l.bf16 %v3843_v31 }
 0x1c2   : > { %v2323_v7 = vadd.f32 %v2291_v23, %v2259_v61  ;;  %v3122_v61 = vsel %vm575_vm1, %v3089_v59, 0.0  ;;  %v3128_v59 = vsel %vm575_vm1, %v3092_v49, 0.0 }
 0x1c3   : > { %2924 = vadd.xlane.f32.xlu1 %v2923_v55  ;;  %v2184_v46 = vpop.xlane.xlu0 %2183  ;;  %v3791_v55 = vpop.eup %3790  ;;  %v2938_v12 = vsel %vm1254_vm0, %v2854_v5, 0.0 }
 0x1c4   : > { %2356 = vst.msk [vmem:[#allocation2 + $0x40] sm:$0xff] %vm575_vm1, %v2323_v7  ;;  %v2292_v43 = vmul.f32 %v2184_v46, %v745_v42  ;;  %v2729_v28 = vmul.f32 0.6931472, %v3791_v55  ;;  %v2855_v42 = vmul.f32 %v2823_v26, %v2791_v0  ;;  %v3793_v45 = vpop.eup %3792  ;;  %v3840_v7 = vld [vmem:[%s3949_s16 + $0xe0] sm:$0xff]  ;;  %v2827_v26 = vunpack.c.h.bf16 %v3843_v31 }
 0x1c5   : > { %v2731_v62 = vmul.f32 0.6931472, %v3793_v45 }
 0x1c6   : > { %v2324_v10 = vadd.f32 %v2292_v43, %v2260_v9  ;;  %v2792_v9 = vsub.f32 %v3840_v7, %v2760_v30  ;;  %v3123_v43 = vadd.f32 %v3122_v61, %v3121_v36  ;;  %v3093_v30 = vld [vmem:[#allocation2 + $0x30] sm:$0xff]  ;;  %v2267_v61 = vld [vmem:[#allocation2 + $0x80] sm:$0xff] }
 0x1c7   : > { %2927 = vadd.xlane.f32.xlu1 %v2926_v33  ;;  %v2187_v8 = vpop.xlane.xlu0 %2186  ;;  %v2824_v33 = vunpack.c.l.bf16 %v3839_v4  ;;  %v3130_v36 = vsel %vm575_vm1, %v3093_v30, 0.0  ;;  %v755_v30 = vld [vmem:[%s5754_s26 + $0x98] sm:$0xff] }
 0x1c8   : > { %2357 = vst.msk [vmem:[#allocation2 + $0x48] sm:$0xff] %vm575_vm1, %v2324_v10  ;;  %v2293_v44 = vmul.f32 %v2187_v8, %v746_v39  ;;  %v2825_v10 = vunpack.c.h.bf16 %v3839_v4  ;;  %v2941_v8 = vsel %vm1254_vm0, %v2855_v42, 0.0  ;;  %v3125_v53 = vadd.f32 %v3124_v34, %v3123_v43 }
 0x1c9   : > { %v2856_v20 = vmul.f32 %v2824_v33, %v2792_v9 }
 0x1ca   : > { %v2325_v16 = vadd.f32 %v2293_v44, %v2261_v38  ;;  %v750_v38 = vld [vmem:[%s5754_s26 + $0x70] sm:$0xff]  ;;  %v3127_v37 = vadd.f32 %v3126_v51, %v3125_v53  ;;  %v2989_v51 = vld [vmem:[#allocation3 + $0x8] sm:$0xff] }
 0x1cb   : > { %2930 = vadd.xlane.f32.xlu1 %v2929_v14  ;;  %v2190_v24 = vpop.xlane.xlu0 %2189  ;;  %v2762_v14 = vadd.f32 %v2729_v28, %v6388_v21  ;;  %v2944_v19 = vsel %vm1254_vm0, %v2856_v20, 0.0  ;;  %v3095_v4 = vld [vmem:[#allocation2 + $0x40] sm:$0xff] }
 0x1cc   : > { %2358 = vst.msk [vmem:[#allocation2 + $0x50] sm:$0xff] %vm575_vm1, %v2325_v16  ;;  %v2294_v27 = vmul.f32 %v2190_v24, %v747_v35  ;;  %v6389_v35 = vld [vmem:[#allocation82_spill] sm:$0xff]  ;;  %v751_v16 = vld [vmem:[%s5754_s26 + $0x78] sm:$0xff]  ;;  %v3134_v45 = vsel %vm575_vm1, %v3095_v4, 0.0 }
 0x1cd   : > { %v2763_v18 = vadd.f32 %v2731_v62, %v6389_v35 }
 0x1ce   : > { %v2326_v48 = vadd.f32 %v2294_v27, %v2262_v54  ;;  %v2857_v54 = vmul.f32 %v2825_v10, %v2793_v40  ;;  %v2266_v27 = vld [vmem:[#allocation2 + $0x78] sm:$0xff] }
 0x1cf   : > { %2933 = vadd.xlane.f32.xlu1 %v2932_v1  ;;  %v2193_v23 = vpop.xlane.xlu0 %2192  ;;  %v3842_v1 = vld [vmem:[%s3949_s16 + $0xf0] sm:$0xff]  ;;  %v2795_v0 = vsub.f32 %v3844_v22, %v2763_v18 }
 0x1d0   : > { %2359 = vst.msk [vmem:[#allocation2 + $0x58] sm:$0xff] %vm575_vm1, %v2326_v48  ;;  %v2295_v29 = vmul.f32 %v2193_v23, %v748_v11  ;;  %v2794_v17 = vsub.f32 %v3842_v1, %v2762_v14  ;;  %v752_v11 = vld [vmem:[%s5754_s26 + $0x80] sm:$0xff]  ;;  %v2947_v55 = vsel %vm1254_vm0, %v2857_v54, 0.0  ;;  %v3129_v48 = vadd.f32 %v3128_v59, %v3127_v37  ;;  %v3094_v23 = vld [vmem:[#allocation2 + $0x38] sm:$0xff]  ;;  %v754_v1 = vld [vmem:[%s5754_s26 + $0x90] sm:$0xff] }
 0x1d1   : > { %v2859_v25 = vmul.f32 %v2827_v26, %v2795_v0  ;;  %v3132_v42 = vsel %vm575_vm1, %v3094_v23, 0.0 }
 0x1d2   : > { %v2327_v46 = vadd.f32 %v2295_v29, %v2263_v63  ;;  %v3131_v58 = vadd.f32 %v3130_v36, %v3129_v48 }
 0x1d3   : > { %2936 = vadd.xlane.f32.xlu1 %v2935_v50  ;;  %v2196_v52 = vpop.xlane.xlu0 %2195  ;;  %v2858_v50 = vmul.f32 %v2826_v41, %v2794_v17  ;;  %v2953_v33 = vsel %vm1254_vm0, %v2859_v25, 0.0 }
 0x1d4   : > { %2360 = vst.msk [vmem:[#allocation2 + $0x60] sm:$0xff] %vm575_vm1, %v2327_v46  ;;  %v2296_v39 = vmul.f32 %v2196_v52, %v749_v6  ;;  %v3133_v6 = vadd.f32 %v3132_v42, %v3131_v58  ;;  %v3097_v46 = vld [vmem:[#allocation2 + $0x50] sm:$0xff]  ;;  %v2992_v58 = vld [vmem:[#allocation3 + $0x20] sm:$0xff] }
 0x1d5   : > { %v2950_v29 = vsel %vm1254_vm0, %v2858_v50, 0.0  ;;  %v3138_v34 = vsel %vm575_vm1, %v3097_v46, 0.0  ;;  %v2270_v50 = vld [vmem:[#allocation2 + $0x98] sm:$0xff]  ;;  %v2271_v42 = vld [vmem:[#allocation2 + $0xa0] sm:$0xff]  ;;  %vm3188_vm0 = vcmask 0  }
 0x1d6   : > { %v2328_v44 = vadd.f32 %v2296_v39, %v2264_v32  ;;  %v3135_v7 = vadd.f32 %v3134_v45, %v3133_v6 }
 0x1d7   : > { %2939 = vadd.xlane.f32.xlu1 %v2938_v12  ;;  %v2199_v56 = vpop.xlane.xlu0 %2198  ;;  %v3096_v12 = vld [vmem:[#allocation2 + $0x48] sm:$0xff]  ;;  %v3098_v32 = vld [vmem:[#allocation2 + $0x58] sm:$0xff] }
 0x1d8   : > { %2361 = vst.msk [vmem:[#allocation2 + $0x68] sm:$0xff] %vm575_vm1, %v2328_v44  ;;  %v2297_v57 = vmul.f32 %v2199_v56, %v750_v38  ;;  %v3136_v9 = vsel %vm575_vm1, %v3096_v12, 0.0  ;;  %v3140_v3 = vsel %vm575_vm1, %v3098_v32, 0.0  ;;  %v2268_v56 = vld [vmem:[#allocation2 + $0x88] sm:$0xff] }
 0x1d9   : > { %v3137_v43 = vadd.f32 %v3136_v9, %v3135_v7  ;;  %v757_v12 = vld [vmem:[%s5754_s26 + $0xa8] sm:$0xff] }
 0x1da   : > { %v2329_v24 = vadd.f32 %v2297_v57, %v2265_v13 }
 0x1db   : > { %2942 = vadd.xlane.f32.xlu1 %v2941_v8  ;;  %v2202_v15 = vpop.xlane.xlu0 %2201  ;;  %v3139_v52 = vadd.f32 %v3138_v34, %v3137_v43  ;;  %v3099_v39 = vld [vmem:[#allocation2 + $0x60] sm:$0xff]  ;;  %v753_v8 = vld [vmem:[%s5754_s26 + $0x88] sm:$0xff] }
 0x1dc   : > { %2362 = vst.msk [vmem:[#allocation2 + $0x70] sm:$0xff] %vm575_vm1, %v2329_v24  ;;  %v2298_v60 = vmul.f32 %v2202_v15, %v751_v16  ;;  %v3142_v14 = vsel %vm575_vm1, %v3099_v39, 0.0  ;;  %v2269_v24 = vld [vmem:[#allocation2 + $0x90] sm:$0xff]  ;;  %v2993_v34 = vld [vmem:[#allocation3 + $0x28] sm:$0xff] }
 0x1dd   : > { %v3141_v21 = vadd.f32 %v3140_v3, %v3139_v52  ;;  %v2272_v52 = vld [vmem:[#allocation2 + $0xa8] sm:$0xff] }
 0x1de   : > { %v2330_v5 = vadd.f32 %v2298_v60, %v2266_v27 }
 0x1df   : > { %2945 = vadd.xlane.f32.xlu1 %v2944_v19  ;;  %v3100_v62 = vld [vmem:[#allocation2 + $0x68] sm:$0xff]  ;;  %v3143_v38 = vadd.f32 %v3142_v14, %v3141_v21  ;;  %v2990_v19 = vld [vmem:[#allocation3 + $0x10] sm:$0xff] }
 0x1e0   : > { %2363 = vst.msk [vmem:[#allocation2 + $0x78] sm:$0xff] %vm575_vm1, %v2330_v5  ;;  %v3144_v20 = vsel %vm575_vm1, %v3100_v62, 0.0  ;;  %v758_v62 = vld [vmem:[%s5754_s26 + $0xb0] sm:$0xff] }
 0x1e1   : > { %v3145_v18 = vadd.f32 %v3144_v20, %v3143_v38 }
 0x1e3   : > { %2948 = vadd.xlane.f32.xlu1 %v2947_v55  ;;  %v2205_v63 = vpop.xlane.xlu0 %2204  ;;  %v3101_v53 = vld [vmem:[#allocation2 + $0x70] sm:$0xff] }
 0x1e4   : > { %v2299_v2 = vmul.f32 %v2205_v63, %v752_v11  ;;  %v3146_v17 = vsel %vm575_vm1, %v3101_v53, 0.0  ;;  %v2991_v11 = vld [vmem:[#allocation3 + $0x18] sm:$0xff]  ;;  %v756_v63 = vld [vmem:[%s5754_s26 + $0xa0] sm:$0xff] }
 0x1e5   : > { %v3147_v15 = vadd.f32 %v3146_v17, %v3145_v18  ;;  %v2995_v17 = vld [vmem:[#allocation3 + $0x38] sm:$0xff] }
 0x1e6   : > { %v2331_v28 = vadd.f32 %v2299_v2, %v2267_v61 }
 0x1e7   : > { %2951 = vadd.xlane.f32.xlu1 %v2950_v29  ;;  %v3102_v16 = vld [vmem:[#allocation2 + $0x78] sm:$0xff] }
 0x1e8   : > { %2364 = vst.msk [vmem:[#allocation2 + $0x80] sm:$0xff] %vm575_vm1, %v2331_v28  ;;  %v3148_v60 = vsel %vm575_vm1, %v3102_v16, 0.0 }
 0x1e9   : > { %v3149_v61 = vadd.f32 %v3148_v60, %v3147_v15  ;;  %v2996_v60 = vld [vmem:[#allocation3 + $0x40] sm:$0xff] }
 0x1eb   : > { %2954 = vadd.xlane.f32.xlu1 %v2953_v33 }
 0x1ef   : > { %v3103_v26 = vld [vmem:[#allocation2 + $0x80] sm:$0xff] }
 0x1f0   : > { %v3150_v23 = vsel %vm575_vm1, %v3103_v26, 0.0 }
 0x1f1   : > { %v3151_v45 = vadd.f32 %v3150_v23, %v3149_v61  ;;  %v2997_v23 = vld [vmem:[#allocation3 + $0x48] sm:$0xff] }
 0x1fb   : > { %v2862_v40 = vpop.xlane.xlu0 %2861 }
 0x1fc   : > { %v2956_v10 = vsub.f32 0.0, %v2862_v40 }
 0x1fe   : > { %v3020_v44 = vadd.f32 %v2988_v47, %v2956_v10 }
 0x1ff   : > { %v2865_v13 = vpop.xlane.xlu1 %2864  ;;  %v2208_v49 = vpop.xlane.xlu0 %2207 }
 0x200   : > { %3052 = vst.msk [vmem:[#allocation3] sm:$0xff] %vm575_vm1, %v3020_v44  ;;  %v2957_v57 = vsub.f32 0.0, %v2865_v13  ;;  %v2300_v35 = vmul.f32 %v2208_v49, %v753_v8  ;;  %v2994_v8 = vld [vmem:[#allocation3 + $0x30] sm:$0xff]  ;;  %v759_v49 = vld [vmem:[%s5754_s26 + $0xb8] sm:$0xff] }
 0x201   : > { %v2273_v44 = vld [vmem:[#allocation2 + $0xb0] sm:$0xff] }
 0x202   : > { %v3021_v31 = vadd.f32 %v2989_v51, %v2957_v57  ;;  %v2332_v41 = vadd.f32 %v2300_v35, %v2268_v56 }
 0x203   : > { %v2868_v54 = vpop.xlane.xlu1 %2867  ;;  %v2211_v37 = vpop.xlane.xlu0 %2210 }
 0x204   : > { %3053 = vst.msk [vmem:[#allocation3 + $0x8] sm:$0xff] %vm575_vm1, %v3021_v31  ;;  %2365 = vst.msk [vmem:[#allocation2 + $0x88] sm:$0xff] %vm575_vm1, %v2332_v41  ;;  %v2958_v59 = vsub.f32 0.0, %v2868_v54  ;;  %v2301_v27 = vmul.f32 %v2211_v37, %v754_v1  ;;  %v2274_v41 = vld [vmem:[#allocation2 + $0xb8] sm:$0xff]  ;;  %v760_v37 = vld [vmem:[%s5754_s26 + $0xc0] sm:$0xff] }
 0x206   : > { %v3022_v22 = vadd.f32 %v2990_v19, %v2958_v59  ;;  %v2333_v0 = vadd.f32 %v2301_v27, %v2269_v24 }
 0x207   : > { %v2871_v55 = vpop.xlane.xlu1 %2870  ;;  %v2214_v5 = vpop.xlane.xlu0 %2213 }
 0x208   : > { %3054 = vst.msk [vmem:[#allocation3 + $0x10] sm:$0xff] %vm575_vm1, %v3022_v22  ;;  %2366 = vst.msk [vmem:[#allocation2 + $0x90] sm:$0xff] %vm575_vm1, %v2333_v0  ;;  %v2959_v48 = vsub.f32 0.0, %v2871_v55  ;;  %v2302_v36 = vmul.f32 %v2214_v5, %v755_v30  ;;  %v2275_v0 = vld [vmem:[#allocation2 + $0xc0] sm:$0xff]  ;;  %v761_v5 = vld [vmem:[%s5754_s26 + $0xc8] sm:$0xff] }
 0x20a   : > { %v3023_v2 = vadd.f32 %v2991_v11, %v2959_v48  ;;  %v2334_v29 = vadd.f32 %v2302_v36, %v2270_v50 }
 0x20b   : > { %v3104_v25 = vld [vmem:[#allocation2 + $0x88] sm:$0xff]  ;;  %v2874_v28 = vpop.xlane.xlu1 %2873  ;;  %v2217_v4 = vpop.xlane.xlu0 %2216 }
 0x20c   : > { %3055 = vst.msk [vmem:[#allocation3 + $0x18] sm:$0xff] %vm575_vm1, %v3023_v2  ;;  %2367 = vst.msk [vmem:[#allocation2 + $0x98] sm:$0xff] %vm575_vm1, %v2334_v29  ;;  %v2960_v33 = vsub.f32 0.0, %v2874_v28  ;;  %v2303_v6 = vmul.f32 %v2217_v4, %v756_v63  ;;  %v3152_v7 = vsel %vm575_vm1, %v3104_v25, 0.0  ;;  %v2276_v29 = vld [vmem:[#allocation2 + $0xc8] sm:$0xff]  ;;  %v762_v4 = vld [vmem:[%s5754_s26 + $0xd0] sm:$0xff] }
 0x20d   : > { %v3153_v14 = vadd.f32 %v3152_v7, %v3151_v45  ;;  %v2998_v7 = vld [vmem:[#allocation3 + $0x50] sm:$0xff] }
 0x20e   : > { %v3024_v9 = vadd.f32 %v2992_v58, %v2960_v33  ;;  %v2335_v46 = vadd.f32 %v2303_v6, %v2271_v42 }
 0x20f   : > { %v3105_v43 = vld [vmem:[#allocation2 + $0x90] sm:$0xff]  ;;  %v2877_v32 = vpop.xlane.xlu1 %2876  ;;  %v2220_v3 = vpop.xlane.xlu0 %2219 }
 0x210   : > { %3056 = vst.msk [vmem:[#allocation3 + $0x20] sm:$0xff] %vm575_vm1, %v3024_v9  ;;  %2368 = vst.msk [vmem:[#allocation2 + $0xa0] sm:$0xff] %vm575_vm1, %v2335_v46  ;;  %v2961_v39 = vsub.f32 0.0, %v2877_v32  ;;  %v2304_v21 = vmul.f32 %v2220_v3, %v757_v12  ;;  %v3154_v47 = vsel %vm575_vm1, %v3105_v43, 0.0  ;;  %v2277_v46 = vld [vmem:[#allocation2 + $0xd0] sm:$0xff]  ;;  %v763_v3 = vld [vmem:[%s5754_s26 + $0xd8] sm:$0xff] }
 0x211   : > { %v3155_v56 = vadd.f32 %v3154_v47, %v3153_v14  ;;  %v2999_v47 = vld [vmem:[#allocation3 + $0x58] sm:$0xff] }
 0x212   : > { %v3025_v40 = vadd.f32 %v2993_v34, %v2961_v39  ;;  %v2336_v10 = vadd.f32 %v2304_v21, %v2272_v52 }
 0x213   : > { %v3106_v38 = vld [vmem:[#allocation2 + $0x98] sm:$0xff]  ;;  %v2880_v20 = vpop.xlane.xlu1 %2879  ;;  %v2223_v53 = vpop.xlane.xlu0 %2222 }
 0x214   : > { %3057 = vst.msk [vmem:[#allocation3 + $0x28] sm:$0xff] %vm575_vm1, %v3025_v40  ;;  %2369 = vst.msk [vmem:[#allocation2 + $0xa8] sm:$0xff] %vm575_vm1, %v2336_v10  ;;  %v2962_v51 = vsub.f32 0.0, %v2880_v20  ;;  %v2305_v13 = vmul.f32 %v2223_v53, %v758_v62  ;;  %v3156_v57 = vsel %vm575_vm1, %v3106_v38, 0.0  ;;  %v2278_v10 = vld [vmem:[#allocation2 + $0xd8] sm:$0xff]  ;;  %v764_v53 = vld [vmem:[%s5754_s26 + $0xe0] sm:$0xff] }
 0x215   : > { %v3157_v24 = vadd.f32 %v3156_v57, %v3155_v56  ;;  %v3000_v57 = vld [vmem:[#allocation3 + $0x60] sm:$0xff] }
 0x216   : > { %v3026_v35 = vadd.f32 %v2994_v8, %v2962_v51  ;;  %v2337_v18 = vadd.f32 %v2305_v13, %v2273_v44 }
 0x217   : > { %v3107_v1 = vld [vmem:[#allocation2 + $0xa0] sm:$0xff]  ;;  %v2883_v31 = vpop.xlane.xlu1 %2882  ;;  %v2226_v16 = vpop.xlane.xlu0 %2225 }
 0x218   : > { %3058 = vst.msk [vmem:[#allocation3 + $0x30] sm:$0xff] %vm575_vm1, %v3026_v35  ;;  %2370 = vst.msk [vmem:[#allocation2 + $0xb0] sm:$0xff] %vm575_vm1, %v2337_v18  ;;  %v2963_v19 = vsub.f32 0.0, %v2883_v31  ;;  %v2306_v54 = vmul.f32 %v2226_v16, %v759_v49  ;;  %v3158_v59 = vsel %vm575_vm1, %v3107_v1, 0.0  ;;  %v2279_v18 = vld [vmem:[#allocation2 + $0xe0] sm:$0xff]  ;;  %v765_v16 = vld [vmem:[%s5754_s26 + $0xe8] sm:$0xff] }
 0x219   : > { %v3159_v50 = vadd.f32 %v3158_v59, %v3157_v24  ;;  %v3001_v59 = vld [vmem:[#allocation3 + $0x68] sm:$0xff] }
 0x21a   : > { %v3027_v27 = vadd.f32 %v2995_v17, %v2963_v19  ;;  %v2338_v15 = vadd.f32 %v2306_v54, %v2274_v41 }
 0x21b   : > { %v3108_v30 = vld [vmem:[#allocation2 + $0xa8] sm:$0xff]  ;;  %v2886_v22 = vpop.xlane.xlu1 %2885  ;;  %v2229_v26 = vpop.xlane.xlu0 %2228 }
 0x21c   : > { %3059 = vst.msk [vmem:[#allocation3 + $0x38] sm:$0xff] %vm575_vm1, %v3027_v27  ;;  %2371 = vst.msk [vmem:[#allocation2 + $0xb8] sm:$0xff] %vm575_vm1, %v2338_v15  ;;  %v2964_v11 = vsub.f32 0.0, %v2886_v22  ;;  %v2307_v55 = vmul.f32 %v2229_v26, %v760_v37  ;;  %v3160_v48 = vsel %vm575_vm1, %v3108_v30, 0.0  ;;  %v2280_v15 = vld [vmem:[#allocation2 + $0xe8] sm:$0xff]  ;;  %v766_v26 = vld [vmem:[%s5754_s26 + $0xf0] sm:$0xff] }
 0x21d   : > { %v3161_v42 = vadd.f32 %v3160_v48, %v3159_v50  ;;  %v3002_v48 = vld [vmem:[#allocation3 + $0x70] sm:$0xff] }
 0x21e   : > { %v3028_v36 = vadd.f32 %v2996_v60, %v2964_v11  ;;  %v2339_v61 = vadd.f32 %v2307_v55, %v2275_v0 }
 0x21f   : > { %v3109_v63 = vld [vmem:[#allocation2 + $0xb0] sm:$0xff]  ;;  %v2889_v2 = vpop.xlane.xlu1 %2888  ;;  %v2232_v25 = vpop.xlane.xlu0 %2231 }
 0x220   : > { %3060 = vst.msk [vmem:[#allocation3 + $0x40] sm:$0xff] %vm575_vm1, %v3028_v36  ;;  %2372 = vst.msk [vmem:[#allocation2 + $0xc0] sm:$0xff] %vm575_vm1, %v2339_v61  ;;  %v2965_v58 = vsub.f32 0.0, %v2889_v2  ;;  %v2308_v28 = vmul.f32 %v2232_v25, %v761_v5  ;;  %v3162_v33 = vsel %vm575_vm1, %v3109_v63, 0.0  ;;  %v2281_v61 = vld [vmem:[#allocation2 + $0xf0] sm:$0xff]  ;;  %v767_v25 = vld [vmem:[%s5754_s26 + $0xf8] sm:$0xff] }
 0x221   : > { %v3163_v52 = vadd.f32 %v3162_v33, %v3161_v42  ;;  %v3003_v33 = vld [vmem:[#allocation3 + $0x78] sm:$0xff] }
 0x222   : > { %v3029_v6 = vadd.f32 %v2997_v23, %v2965_v58  ;;  %v2340_v45 = vadd.f32 %v2308_v28, %v2276_v29 }
 0x223   : > { %v3110_v12 = vld [vmem:[#allocation2 + $0xb8] sm:$0xff]  ;;  %v2892_v9 = vpop.xlane.xlu1 %2891  ;;  %v2235_v43 = vpop.xlane.xlu0 %2234 }
 0x224   : > { %3061 = vst.msk [vmem:[#allocation3 + $0x48] sm:$0xff] %vm575_vm1, %v3029_v6  ;;  %2373 = vst.msk [vmem:[#allocation2 + $0xc8] sm:$0xff] %vm575_vm1, %v2340_v45  ;;  %v2966_v34 = vsub.f32 0.0, %v2892_v9  ;;  %v2309_v32 = vmul.f32 %v2235_v43, %v762_v4  ;;  %v3164_v39 = vsel %vm575_vm1, %v3110_v12, 0.0  ;;  %v2282_v45 = vld [vmem:[#allocation2 + $0xf8] sm:$0xff] }
 0x225   : > { %v3165_v44 = vadd.f32 %v3164_v39, %v3163_v52 }
 0x226   : > { %v3030_v21 = vadd.f32 %v2998_v7, %v2966_v34  ;;  %v2341_v14 = vadd.f32 %v2309_v32, %v2277_v46 }
 0x227   : > { %v3111_v62 = vld [vmem:[#allocation2 + $0xc0] sm:$0xff]  ;;  %v2238_v38 = vpop.xlane.xlu0 %2237 }
 0x228   : > { %v2895_v40 = vpop.xlane.xlu1 %2894  ;;  %3062 = vst.msk [vmem:[#allocation3 + $0x50] sm:$0xff] %vm575_vm1, %v3030_v21  ;;  %2374 = vst.msk [vmem:[#allocation2 + $0xd0] sm:$0xff] %vm575_vm1, %v2341_v14  ;;  %v2310_v20 = vmul.f32 %v2238_v38, %v763_v3  ;;  %v3166_v51 = vsel %vm575_vm1, %v3111_v62, 0.0  ;;  %v3004_v3 = vld [vmem:[#allocation3 + $0x80] sm:$0xff] }
 0x229   : > { %v2967_v8 = vsub.f32 0.0, %v2895_v40  ;;  %v3167_v41 = vadd.f32 %v3166_v51, %v3165_v44  ;;  %v3191_v51 = vld [vmem:[#allocation3 + $0x8] sm:$0xff] }
 0x22a   : > { %v2342_v56 = vadd.f32 %v2310_v20, %v2278_v10  ;;  %v3005_v10 = vld [vmem:[#allocation3 + $0x88] sm:$0xff] }
 0x22b   : > { %v3031_v13 = vadd.f32 %v2999_v47, %v2967_v8  ;;  %v3112_v49 = vld [vmem:[#allocation2 + $0xc8] sm:$0xff]  ;;  %v2241_v1 = vpop.xlane.xlu0 %2240 }
 0x22c   : > { %v2898_v35 = vpop.xlane.xlu1 %2897  ;;  %2375 = vst.msk [vmem:[#allocation2 + $0xd8] sm:$0xff] %vm575_vm1, %v2342_v56  ;;  %v2311_v31 = vmul.f32 %v2241_v1, %v764_v53  ;;  %v3168_v19 = vsel %vm575_vm1, %v3112_v49, 0.0  ;;  %v3006_v49 = vld [vmem:[#allocation3 + $0x90] sm:$0xff]  ;;  %v3190_v1 = vld [vmem:[#allocation3] sm:$0xff] }
 0x22d   : > { %3063 = vst.msk [vmem:[#allocation3 + $0x58] sm:$0xff] %vm575_vm1, %v3031_v13  ;;  %v2968_v17 = vsub.f32 0.0, %v2898_v35  ;;  %v3169_v0 = vadd.f32 %v3168_v19, %v3167_v41  ;;  %v3223_v41 = vsel %vm575_vm1, %v3191_v51, 0.0  ;;  %v3193_v19 = vld [vmem:[#allocation3 + $0x18] sm:$0xff] }
 0x22e   : > { %v2343_v24 = vadd.f32 %v2311_v31, %v2279_v18 }
 0x22f   : > { %v3032_v54 = vadd.f32 %v3000_v57, %v2968_v17  ;;  %v3113_v37 = vld [vmem:[#allocation2 + $0xd0] sm:$0xff]  ;;  %v2244_v30 = vpop.xlane.xlu0 %2243 }
 0x230   : > { %v2901_v27 = vpop.xlane.xlu1 %2900  ;;  %2376 = vst.msk [vmem:[#allocation2 + $0xe0] sm:$0xff] %vm575_vm1, %v2343_v24  ;;  %v2312_v22 = vmul.f32 %v2244_v30, %v765_v16  ;;  %v3170_v11 = vsel %vm575_vm1, %v3113_v37, 0.0  ;;  %v3192_v17 = vld [vmem:[#allocation3 + $0x10] sm:$0xff]  ;;  %v3007_v24 = vld [vmem:[#allocation3 + $0x98] sm:$0xff] }
 0x231   : > { %3064 = vst.msk [vmem:[#allocation3 + $0x60] sm:$0xff] %vm575_vm1, %v3032_v54  ;;  %v2969_v60 = vsub.f32 0.0, %v2901_v27  ;;  %v3171_v29 = vadd.f32 %v3170_v11, %v3169_v0  ;;  %v3225_v27 = vsel %vm575_vm1, %v3192_v17, 0.0  ;;  %v3227_v0 = vsel %vm575_vm1, %v3193_v19, 0.0 }
 0x232   : > { %v2344_v50 = vadd.f32 %v2312_v22, %v2280_v15 }
 0x233   : > { %v3033_v55 = vadd.f32 %v3001_v59, %v2969_v60  ;;  %v3114_v5 = vld [vmem:[#allocation2 + $0xd8] sm:$0xff]  ;;  %v2247_v63 = vpop.xlane.xlu0 %2246  ;;  %v3222_v59 = vsel %vm575_vm1, %v3190_v1, 0.0  ;;  %v3194_v60 = vld [vmem:[#allocation3 + $0x20] sm:$0xff] }
 0x234   : > { %v2904_v36 = vpop.xlane.xlu1 %2903  ;;  %2377 = vst.msk [vmem:[#allocation2 + $0xe8] sm:$0xff] %vm575_vm1, %v2344_v50  ;;  %v2313_v2 = vmul.f32 %v2247_v63, %v766_v26  ;;  %v3172_v58 = vsel %vm575_vm1, %v3114_v5, 0.0  ;;  %v3224_v30 = vadd.f32 %v3223_v41, %v3222_v59  ;;  %v3008_v5 = vld [vmem:[#allocation3 + $0xa0] sm:$0xff]  ;;  %v3013_v59 = vld [vmem:[#allocation3 + $0xc8] sm:$0xff] }
 0x235   : > { %3065 = vst.msk [vmem:[#allocation3 + $0x68] sm:$0xff] %vm575_vm1, %v3033_v55  ;;  %v2970_v23 = vsub.f32 0.0, %v2904_v36  ;;  %v3173_v46 = vadd.f32 %v3172_v58, %v3171_v29  ;;  %v3195_v55 = vld [vmem:[#allocation3 + $0x28] sm:$0xff]  ;;  %v3229_v36 = vsel %vm575_vm1, %v3194_v60, 0.0 }
 0x236   : > { %v2345_v42 = vadd.f32 %v2313_v2, %v2281_v61  ;;  %v3226_v11 = vadd.f32 %v3225_v27, %v3224_v30  ;;  %v3231_v29 = vsel %vm575_vm1, %v3195_v55, 0.0 }
 0x237   : > { %v3034_v28 = vadd.f32 %v3002_v48, %v2970_v23  ;;  %v3115_v4 = vld [vmem:[#allocation2 + $0xe0] sm:$0xff]  ;;  %v2250_v12 = vpop.xlane.xlu0 %2249  ;;  %v3196_v23 = vld [vmem:[#allocation3 + $0x30] sm:$0xff] }
 0x238   : > { %v2907_v6 = vpop.xlane.xlu1 %2906  ;;  %2378 = vst.msk [vmem:[#allocation2 + $0xf0] sm:$0xff] %vm575_vm1, %v2345_v42  ;;  %v2314_v9 = vmul.f32 %v2250_v12, %v767_v25  ;;  %v3174_v43 = vsel %vm575_vm1, %v3115_v4, 0.0  ;;  %v3228_v63 = vadd.f32 %v3227_v0, %v3226_v11  ;;  %v3009_v4 = vld [vmem:[#allocation3 + $0xa8] sm:$0xff] }
 0x239   : > { %3066 = vst.msk [vmem:[#allocation3 + $0x70] sm:$0xff] %vm575_vm1, %v3034_v28  ;;  %v2971_v7 = vsub.f32 0.0, %v2907_v6  ;;  %v3175_v14 = vadd.f32 %v3174_v43, %v3173_v46  ;;  %v3197_v28 = vld [vmem:[#allocation3 + $0x38] sm:$0xff]  ;;  %v3233_v6 = vsel %vm575_vm1, %v3196_v23, 0.0 }
 0x23a   : > { %v2346_v32 = vadd.f32 %v2314_v9, %v2282_v45  ;;  %v3230_v58 = vadd.f32 %v3229_v36, %v3228_v63  ;;  %v3235_v46 = vsel %vm575_vm1, %v3197_v28, 0.0 }
 0x23b   : > { %v3035_v34 = vadd.f32 %v3003_v33, %v2971_v7  ;;  %v3116_v52 = vld [vmem:[#allocation2 + $0xe8] sm:$0xff]  ;;  %v3198_v7 = vld [vmem:[#allocation3 + $0x40] sm:$0xff] }
 0x23c   : > { %v2910_v39 = vpop.xlane.xlu1 %2909  ;;  %2379 = vst.msk [vmem:[#allocation2 + $0xf8] sm:$0xff] %vm575_vm1, %v2346_v32  ;;  %v3176_v62 = vsel %vm575_vm1, %v3116_v52, 0.0  ;;  %v3232_v12 = vadd.f32 %v3231_v29, %v3230_v58  ;;  %v3199_v32 = vld [vmem:[#allocation3 + $0x48] sm:$0xff]  ;;  %v3010_v52 = vld [vmem:[#allocation3 + $0xb0] sm:$0xff]  ;;  %v3015_v58 = vld [vmem:[#allocation3 + $0xd8] sm:$0xff] }
 0x23d   : > { %3067 = vst.msk [vmem:[#allocation3 + $0x78] sm:$0xff] %vm575_vm1, %v3035_v34  ;;  %v2972_v21 = vsub.f32 0.0, %v2910_v39  ;;  %v3177_v44 = vadd.f32 %v3176_v62, %v3175_v14  ;;  %v3237_v39 = vsel %vm575_vm1, %v3198_v7, 0.0  ;;  %v3200_v62 = vld [vmem:[#allocation3 + $0x50] sm:$0xff] }
 0x23e   : > { %v3234_v34 = vadd.f32 %v3233_v6, %v3232_v12 }
 0x23f   : > { %v3036_v47 = vadd.f32 %v3004_v3, %v2972_v21  ;;  %v3117_v40 = vld [vmem:[#allocation2 + $0xf0] sm:$0xff] }
 0x240   : > { %v2913_v38 = vpop.xlane.xlu1 %2912  ;;  %v3178_v8 = vsel %vm575_vm1, %v3117_v40, 0.0  ;;  %v3236_v14 = vadd.f32 %v3235_v46, %v3234_v34  ;;  %v3016_v46 = vld [vmem:[#allocation3 + $0xe0] sm:$0xff] }
 0x241   : > { %3068 = vst.msk [vmem:[#allocation3 + $0x80] sm:$0xff] %vm575_vm1, %v3036_v47  ;;  %v2973_v20 = vsub.f32 0.0, %v2913_v38  ;;  %v3179_v13 = vadd.f32 %v3178_v8, %v3177_v44  ;;  %v3239_v47 = vsel %vm575_vm1, %v3199_v32, 0.0  ;;  %v3201_v38 = vld [vmem:[#allocation3 + $0x58] sm:$0xff]  ;;  %v3241_v44 = vsel %vm575_vm1, %v3200_v62, 0.0 }
 0x242   : > { %v3011_v8 = vld [vmem:[#allocation3 + $0xb8] sm:$0xff] }
 0x243   : > { %v3037_v53 = vadd.f32 %v3005_v10, %v2973_v20  ;;  %v3118_v56 = vld [vmem:[#allocation2 + $0xf8] sm:$0xff]  ;;  %v3238_v10 = vadd.f32 %v3237_v39, %v3236_v14 }
 0x244   : > { %v2916_v57 = vpop.xlane.xlu1 %2915  ;;  %v3180_v35 = vsel %vm575_vm1, %v3118_v56, 0.0  ;;  %v3243_v56 = vsel %vm575_vm1, %v3201_v38, 0.0 }
 0x245   : > { %3069 = vst.msk [vmem:[#allocation3 + $0x88] sm:$0xff] %vm575_vm1, %v3037_v53  ;;  %v2974_v18 = vsub.f32 0.0, %v2916_v57  ;;  %v3181_v31 = vadd.f32 %v3180_v35, %v3179_v13  ;;  %v3240_v51 = vadd.f32 %v3239_v47, %v3238_v10  ;;  %v3202_v13 = vld [vmem:[#allocation3 + $0x60] sm:$0xff]  ;;  %v3203_v35 = vld [vmem:[#allocation3 + $0x68] sm:$0xff] }
 0x246   : > { %v3245_v17 = vsel %vm575_vm1, %v3202_v13, 0.0  ;;  %v3247_v19 = vsel %vm575_vm1, %v3203_v35, 0.0  ;;  %v3017_v47 = vld [vmem:[#allocation3 + $0xe8] sm:$0xff] }
 0x247   : > { %v3038_v16 = vadd.f32 %v3006_v49, %v2974_v18  ;;  %v3182_v54 = vrot.slane %v3181_v31, 4  ;;  %v3242_v57 = vadd.f32 %v3241_v44, %v3240_v51  ;;  %v3012_v18 = vld [vmem:[#allocation3 + $0xc0] sm:$0xff] }
 0x248   : > { %v2919_v37 = vpop.xlane.xlu1 %2918 }
 0x249   : > { %3070 = vst.msk [vmem:[#allocation3 + $0x90] sm:$0xff] %vm575_vm1, %v3038_v16  ;;  %v2975_v15 = vsub.f32 0.0, %v2919_v37  ;;  %v3183_v22 = vadd.f32 %v3182_v54, %v3181_v31  ;;  %v3244_v41 = vadd.f32 %v3243_v56, %v3242_v57  ;;  %v3204_v16 = vld [vmem:[#allocation3 + $0x70] sm:$0xff]  ;;  %v3205_v37 = vld [vmem:[#allocation3 + $0x78] sm:$0xff] }
 0x24a   : > { %v3251_v0 = vsel %vm575_vm1, %v3205_v37, 0.0  ;;  %v3018_v56 = vld [vmem:[#allocation3 + $0xf0] sm:$0xff] }
 0x24b   : > { %v3039_v26 = vadd.f32 %v3007_v24, %v2975_v15  ;;  %v3184_v50 = vrot.slane %v3183_v22, 2  ;;  %v3246_v24 = vadd.f32 %v3245_v17, %v3244_v41  ;;  %v3249_v15 = vsel %vm575_vm1, %v3204_v16, 0.0 }
 0x24c   : > { %v2922_v48 = vpop.xlane.xlu1 %2921  ;;  %v3207_v55 = vld [vmem:[#allocation3 + $0x88] sm:$0xff] }
 0x24d   : > { %3071 = vst.msk [vmem:[#allocation3 + $0x98] sm:$0xff] %vm575_vm1, %v3039_v26  ;;  %v2976_v61 = vsub.f32 0.0, %v2922_v48  ;;  %v3185_v2 = vadd.f32 %v3184_v50, %v3183_v22  ;;  %v3248_v60 = vadd.f32 %v3247_v19, %v3246_v24  ;;  %v3206_v22 = vld [vmem:[#allocation3 + $0x80] sm:$0xff]  ;;  %v3014_v50 = vld [vmem:[#allocation3 + $0xd0] sm:$0xff]  ;;  %v3255_v23 = vsel %vm575_vm1, %v3207_v55, 0.0  ;;  %v3019_v19 = vld [vmem:[#allocation3 + $0xf8] sm:$0xff] }
 0x24e   : > { %v3253_v48 = vsel %vm575_vm1, %v3206_v22, 0.0 }
 0x24f   : > { %v3040_v25 = vadd.f32 %v3008_v5, %v2976_v61  ;;  %v3186_v42 = vrot.slane %v3185_v2, 1  ;;  %v3250_v11 = vadd.f32 %v3249_v15, %v3248_v60 }
 0x250   : > { %v2925_v33 = vpop.xlane.xlu1 %2924  ;;  %v3208_v63 = vld [vmem:[#allocation3 + $0x90] sm:$0xff] }
 0x251   : > { %3072 = vst.msk [vmem:[#allocation3 + $0xa0] sm:$0xff] %vm575_vm1, %v3040_v25  ;;  %v2977_v45 = vsub.f32 0.0, %v2925_v33  ;;  %v3187_v9 = vadd.f32 %v3186_v42, %v3185_v2  ;;  %v3252_v61 = vadd.f32 %v3251_v0, %v3250_v11  ;;  %v3257_v42 = vsel %vm575_vm1, %v3208_v63, 0.0 }
 0x253   : > { %v3041_v43 = vadd.f32 %v3009_v4, %v2977_v45  ;;  %3189 = vst.msk [vmem:[%s566_s27] sm:$0x1] %vm3188_vm0, %v3187_v9  ;;  %v3254_v29 = vadd.f32 %v3253_v48, %v3252_v61 }
 0x254   : > { %v2928_v3 = vpop.xlane.xlu1 %2927  ;;  %v3209_v25 = vld [vmem:[#allocation3 + $0x98] sm:$0xff] }
 0x255   : > { %3073 = vst.msk [vmem:[#allocation3 + $0xa8] sm:$0xff] %vm575_vm1, %v3041_v43  ;;  %v2978_v21 = vsub.f32 0.0, %v2928_v3  ;;  %v3256_v33 = vadd.f32 %v3255_v23, %v3254_v29  ;;  %v3259_v45 = vsel %vm575_vm1, %v3209_v25, 0.0 }
 0x257   : > { %v3042_v40 = vadd.f32 %v3010_v52, %v2978_v21  ;;  %v3258_v7 = vadd.f32 %v3257_v42, %v3256_v33 }
 0x258   : > { %v2931_v20 = vpop.xlane.xlu1 %2930  ;;  %v3210_v6 = vld [vmem:[#allocation3 + $0xa0] sm:$0xff] }
 0x259   : > { %3074 = vst.msk [vmem:[#allocation3 + $0xb0] sm:$0xff] %vm575_vm1, %v3042_v40  ;;  %v2979_v53 = vsub.f32 0.0, %v2931_v20  ;;  %v3261_v34 = vsel %vm575_vm1, %v3210_v6, 0.0  ;;  %v3260_v52 = vadd.f32 %v3259_v45, %v3258_v7 }
 0x25b   : > { %v3043_v49 = vadd.f32 %v3011_v8, %v2979_v53  ;;  %v3262_v14 = vadd.f32 %v3261_v34, %v3260_v52 }
 0x25c   : > { %v2934_v1 = vpop.xlane.xlu1 %2933  ;;  %v3211_v9 = vld [vmem:[#allocation3 + $0xa8] sm:$0xff] }
 0x25d   : > { %3075 = vst.msk [vmem:[#allocation3 + $0xb8] sm:$0xff] %vm575_vm1, %v3043_v49  ;;  %v2980_v31 = vsub.f32 0.0, %v2934_v1  ;;  %v3263_v39 = vsel %vm575_vm1, %v3211_v9, 0.0 }
 0x25e   : > { %v3264_v8 = vadd.f32 %v3263_v39, %v3262_v14 }
 0x25f   : > { %v3044_v54 = vadd.f32 %v3012_v18, %v2980_v31 }
 0x260   : > { %v2937_v27 = vpop.xlane.xlu1 %2936  ;;  %v3212_v3 = vld [vmem:[#allocation3 + $0xb0] sm:$0xff] }
 0x261   : > { %3076 = vst.msk [vmem:[#allocation3 + $0xc0] sm:$0xff] %vm575_vm1, %v3044_v54  ;;  %v2981_v30 = vsub.f32 0.0, %v2937_v27  ;;  %v3265_v10 = vsel %vm575_vm1, %v3212_v3, 0.0 }
 0x262   : > { %v3266_v51 = vadd.f32 %v3265_v10, %v3264_v8 }
 0x263   : > { %v3045_v26 = vadd.f32 %v3013_v59, %v2981_v30 }
 0x264   : > { %v2940_v5 = vpop.xlane.xlu1 %2939  ;;  %v3213_v62 = vld [vmem:[#allocation3 + $0xb8] sm:$0xff] }
 0x265   : > { %3077 = vst.msk [vmem:[#allocation3 + $0xc8] sm:$0xff] %vm575_vm1, %v3045_v26  ;;  %v2982_v36 = vsub.f32 0.0, %v2940_v5  ;;  %v3267_v44 = vsel %vm575_vm1, %v3213_v62, 0.0 }
 0x266   : > { %v3268_v18 = vadd.f32 %v3267_v44, %v3266_v51 }
 0x267   : > { %v3046_v2 = vadd.f32 %v3014_v50, %v2982_v36 }
 0x268   : > { %v2943_v28 = vpop.xlane.xlu1 %2942  ;;  %v3214_v20 = vld [vmem:[#allocation3 + $0xc0] sm:$0xff] }
 0x269   : > { %3078 = vst.msk [vmem:[#allocation3 + $0xd0] sm:$0xff] %vm575_vm1, %v3046_v2  ;;  %v2983_v4 = vsub.f32 0.0, %v2943_v28  ;;  %v3269_v57 = vsel %vm575_vm1, %v3214_v20, 0.0 }
 0x26a   : > { %v3270_v41 = vadd.f32 %v3269_v57, %v3268_v18 }
 0x26b   : > { %v3047_v12 = vadd.f32 %v3015_v58, %v2983_v4 }
 0x26c   : > { %v2946_v43 = vpop.xlane.xlu1 %2945  ;;  %v3215_v13 = vld [vmem:[#allocation3 + $0xc8] sm:$0xff] }
 0x26d   : > { %3079 = vst.msk [vmem:[#allocation3 + $0xd8] sm:$0xff] %vm575_vm1, %v3047_v12  ;;  %v2984_v32 = vsub.f32 0.0, %v2946_v43  ;;  %v3271_v17 = vsel %vm575_vm1, %v3215_v13, 0.0 }
 0x26e   : > { %v3272_v59 = vadd.f32 %v3271_v17, %v3270_v41 }
 0x26f   : > { %v3048_v21 = vadd.f32 %v3016_v46, %v2984_v32 }
 0x270   : > { %v2949_v40 = vpop.xlane.xlu1 %2948  ;;  %v3216_v1 = vld [vmem:[#allocation3 + $0xd0] sm:$0xff] }
 0x271   : > { %3080 = vst.msk [vmem:[#allocation3 + $0xe0] sm:$0xff] %vm575_vm1, %v3048_v21  ;;  %v2985_v38 = vsub.f32 0.0, %v2949_v40  ;;  %v3273_v24 = vsel %vm575_vm1, %v3216_v1, 0.0 }
 0x272   : > { %v3274_v60 = vadd.f32 %v3273_v24, %v3272_v59 }
 0x273   : > { %v3049_v53 = vadd.f32 %v3017_v47, %v2985_v38 }
 0x274   : > { %v2952_v49 = vpop.xlane.xlu1 %2951  ;;  %v3217_v16 = vld [vmem:[#allocation3 + $0xd8] sm:$0xff] }
 0x275   : > { %3081 = vst.msk [vmem:[#allocation3 + $0xe8] sm:$0xff] %vm575_vm1, %v3049_v53  ;;  %v2986_v35 = vsub.f32 0.0, %v2952_v49  ;;  %v3275_v15 = vsel %vm575_vm1, %v3217_v16, 0.0 }
 0x276   : > { %v3276_v26 = vadd.f32 %v3275_v15, %v3274_v60 }
 0x277   : > { %v3050_v31 = vadd.f32 %v3018_v56, %v2986_v35 }
 0x278   : > { %v2955_v54 = vpop.xlane.xlu1 %2954  ;;  %v3218_v27 = vld [vmem:[#allocation3 + $0xe0] sm:$0xff] }
 0x279   : > { %3082 = vst.msk [vmem:[#allocation3 + $0xf0] sm:$0xff] %vm575_vm1, %v3050_v31  ;;  %v2987_v37 = vsub.f32 0.0, %v2955_v54  ;;  %v3277_v0 = vsel %vm575_vm1, %v3218_v27, 0.0 }
 0x27a   : > { %v3278_v55 = vadd.f32 %v3277_v0, %v3276_v26 }
 0x27b   : > { %v3051_v30 = vadd.f32 %v3019_v19, %v2987_v37 }
 0x27c   : > { %v3219_v22 = vld [vmem:[#allocation3 + $0xe8] sm:$0xff] }
 0x27d   : > { %3083 = vst.msk [vmem:[#allocation3 + $0xf8] sm:$0xff] %vm575_vm1, %v3051_v30  ;;  %v3279_v11 = vsel %vm575_vm1, %v3219_v22, 0.0 }
 0x27e   : > { %v3280_v48 = vadd.f32 %v3279_v11, %v3278_v55 }
 0x280   : > { %v3220_v50 = vld [vmem:[#allocation3 + $0xf0] sm:$0xff] }
 0x281   : > { %v3281_v5 = vsel %vm575_vm1, %v3220_v50, 0.0 }
 0x282   : > { %v3282_v36 = vadd.f32 %v3281_v5, %v3280_v48 }
 0x284   : > { %v3221_v61 = vld [vmem:[#allocation3 + $0xf8] sm:$0xff] }
 0x285   : > { %v3283_v63 = vsel %vm575_vm1, %v3221_v61, 0.0 }
 0x286   : > { %v3284_v23 = vadd.f32 %v3283_v63, %v3282_v36 }
 0x288   : > { %v3285_v2 = vrot.slane %v3284_v23, 4 }
 0x28a   : > { %v3286_v29 = vadd.f32 %v3285_v2, %v3284_v23 }
 0x28c   : > { %v3287_v25 = vrot.slane %v3286_v29, 2 }
 0x28e   : > { %v3288_v58 = vadd.f32 %v3287_v25, %v3286_v29 }
 0x290   : > { %v3289_v28 = vrot.slane %v3288_v58, 1 }
 0x292   : > { %v3290_v42 = vadd.f32 %v3289_v28, %v3288_v58 }
 0x294   : > { %3291 = vst.msk [vmem:[%s569_s14] sm:$0x1] %vm3188_vm0, %v3290_v42 }
 0x295 PF: > { %s20_s11 = sadd.s32 1, %s3867_s11   ;;  %s6390_s30 = smov %s3863_s10 }
 0x296   : > { %p17_p5 = scmp.ge.s32.totalorder %s20_s11, 4   ;;  %s6391_s10 = smov %s6393_s12 }
 0x298   :  { %19 = sbr.rel (!%p17_p5) target bundleno = 2 (0x2), region = 123 }

</bundles_post_ra>
